<compile_context>
chip_gen: v5e
topology: v5e:2x2
jax: 0.10.0
libtpu: 0.0.40
codegen_flags: <defaults>
</compile_context>

<pallas_src>
import functools

import jax
import jax.numpy as jnp
from jax.experimental import pallas as pl
from jax.experimental.pallas import tpu as pltpu

# Explicit scoped-VMEM budget; safe on v5e/v6e (128 MiB phys) and v7x (64 MiB).
VMEM_LIMIT = 32 * 1024 * 1024

LIF_DECAY = 0.5   # tau = 2.0
LIF_VTH = 1.0


# ----------------------------------------------------------------------------
# helpers
# ----------------------------------------------------------------------------
def _pick_tile(dim, target, mult):
    """Largest tile <= target that divides dim and is a multiple of mult,
    else the full dim (full-dim blocks are always legal)."""
    if dim <= target:
        return dim
    t = (target // mult) * mult
    while t >= mult:
        if dim % t == 0:
            return t
        t -= mult
    return dim


def im2col(x_nhwc, k, stride, pad):
    """x: [B, H, W, C] -> ([B*Ho*Wo, k*k*C], Ho, Wo); patch order (kh, kw, c).
    TODO(synk): patch extraction is still materialized by XLA in HBM; an
    in-kernel (kh,kw) reduction axis would avoid the 9x activation blow-up."""
    B, H, W, C = x_nhwc.shape
    xp = jnp.pad(x_nhwc, ((0, 0), (pad, pad), (pad, pad), (0, 0)))
    Ho = (H + 2 * pad - k) // stride + 1
    Wo = (W + 2 * pad - k) // stride + 1
    cols = []
    for kh in range(k):
        for kw in range(k):
            cols.append(xp[:, kh:kh + stride * Ho:stride,
                           kw:kw + stride * Wo:stride, :])
    p = jnp.stack(cols, axis=3)            # [B, Ho, Wo, k*k, C]
    return p.reshape(B * Ho * Wo, k * k * C), Ho, Wo


def fold_conv_bn(w_oihw, b_o, gamma, beta, mean, var, eps=1e-5):
    """Fold eval-mode BN into conv; return matmul weight [k*k*Cin, Cout] + bias."""
    scale = gamma / jnp.sqrt(var + eps)
    w = w_oihw * scale[:, None, None, None]
    b = (b_o - mean) * scale + beta
    # (kh, kw, cin, cout) flatten matches im2col patch order (kh, kw, cin)
    w_mat = jnp.transpose(w, (2, 3, 1, 0)).reshape(-1, w.shape[0])
    return w_mat, b


# ----------------------------------------------------------------------------
# Pallas kernels
# ----------------------------------------------------------------------------
def _mm_bias_kernel(a_ref, b_ref, bias_ref, o_ref, acc_ref):
    @pl.when(pl.program_id(2) == 0)
    def _():
        acc_ref[...] = jnp.zeros_like(acc_ref)

    acc_ref[...] += jnp.dot(a_ref[...], b_ref[...],
                            preferred_element_type=jnp.float32)

    @pl.when(pl.program_id(2) == pl.num_programs(2) - 1)
    def _():
        o_ref[...] = (acc_ref[...] + bias_ref[...]).astype(o_ref.dtype)


def matmul_bias(a, b, bias, *, out_dtype=jnp.float32,
                tm_target=1024, tn_target=1024, tk_target=1024):
    """C = A @ B + bias. bf16 MXU inputs, f32 accumulator."""
    M, K = a.shape
    K2, N = b.shape
    assert K == K2
    tm = _pick_tile(M, tm_target, 8)
    tn = _pick_tile(N, tn_target, 128)
    tk = _pick_tile(K, tk_target, 128)
    grid = (M // tm, N // tn, K // tk)
    bias2 = bias.reshape(1, N).astype(jnp.float32)
    return pl.pallas_call(
        _mm_bias_kernel,
        out_shape=jax.ShapeDtypeStruct((M, N), out_dtype),
        grid_spec=pltpu.PrefetchScalarGridSpec(
            num_scalar_prefetch=0,
            grid=grid,
            in_specs=[
                pl.BlockSpec((tm, tk), lambda i, j, k: (i, k)),
                pl.BlockSpec((tk, tn), lambda i, j, k: (k, j)),
                pl.BlockSpec((1, tn), lambda i, j, k: (0, j)),
            ],
            out_specs=pl.BlockSpec((tm, tn), lambda i, j, k: (i, j)),
            scratch_shapes=[pltpu.VMEM((tm, tn), jnp.float32)],
        ),
        compiler_params=pltpu.CompilerParams(
            dimension_semantics=("parallel", "parallel", "arbitrary"),
            vmem_limit_bytes=VMEM_LIMIT),
    )(a, b, bias2)


def _mm_bias_lif_kernel(a_ref, b_ref, bias_ref, o_ref, acc_ref, *,
                        n_rows, decay, v_th):
    """Matmul + bias whose epilogue applies the LIF recurrence over time.
    Rows are time-major: rows [t*n_rows, (t+1)*n_rows) belong to timestep t.
    Requires the full M (= T * n_rows) to be resident in one output tile."""
    @pl.when(pl.program_id(2) == 0)
    def _():
        acc_ref[...] = jnp.zeros_like(acc_ref)

    acc_ref[...] += jnp.dot(a_ref[...], b_ref[...],
                            preferred_element_type=jnp.float32)

    @pl.when(pl.program_id(2) == pl.num_programs(2) - 1)
    def _():
        z = acc_ref[...] + bias_ref[...]
        n_steps = o_ref.shape[0] // n_rows          # static T
        u = jnp.zeros((n_rows, z.shape[1]), jnp.float32)
        for t in range(n_steps):                    # static, unrolled (T small)
            u = u * decay + z[t * n_rows:(t + 1) * n_rows, :]
            s = (u >= v_th).astype(jnp.float32)
            o_ref[t * n_rows:(t + 1) * n_rows, :] = s.astype(o_ref.dtype)
            u = u * (1.0 - s)                       # hard reset


def matmul_bias_lif(a, b, bias, *, n_rows, decay=LIF_DECAY, v_th=LIF_VTH,
                    tk_target=1024):
    """(A @ B + bias) followed by a fused LIF over the time-major row blocks.
    Returns bf16 spikes."""
    M, K = a.shape
    K2, N = b.shape
    assert K == K2 and M % n_rows == 0
    tk = _pick_tile(K, tk_target, 128)
    bias2 = bias.reshape(1, N).astype(jnp.float32)
    kern = functools.partial(_mm_bias_lif_kernel,
                             n_rows=n_rows, decay=decay, v_th=v_th)
    # NOTE(v7x): splitting the output (j) axis across both TensorCores would
    # require padding 800 -> 1024 columns (+28% FC1 weight bytes on v5e/v6e);
    # kept unsplit here to minimize the dominant HBM weight stream.
    return pl.pallas_call(
        kern,
        out_shape=jax.ShapeDtypeStruct((M, N), jnp.bfloat16),
        grid_spec=pltpu.PrefetchScalarGridSpec(
            num_scalar_prefetch=0,
            grid=(1, 1, K // tk),
            in_specs=[
                pl.BlockSpec((M, tk), lambda i, j, k: (0, k)),
                pl.BlockSpec((tk, N), lambda i, j, k: (k, 0)),
                pl.BlockSpec((1, N), lambda i, j, k: (0, 0)),
            ],
            out_specs=pl.BlockSpec((M, N), lambda i, j, k: (0, 0)),
            scratch_shapes=[pltpu.VMEM((M, N), jnp.float32)],
        ),
        compiler_params=pltpu.CompilerParams(
            dimension_semantics=("parallel", "parallel", "arbitrary"),
            vmem_limit_bytes=VMEM_LIMIT),
    )(a, b, bias2)


def _lif_kernel(x_ref, s_ref, *, decay, v_th):
    # x_ref: (T_in, rows, 128) f32, s_ref: (T_out, rows, 128) bf16.
    # T_in == 1 replays the same drive every step (DirectEncoder + a
    # time-invariant layer, without materializing the repeat).
    t_in = x_ref.shape[0]
    t_out = s_ref.shape[0]
    u = jnp.zeros(s_ref.shape[1:], jnp.float32)
    for t in range(t_out):                          # static, unrolled (T small)
        x = x_ref[t if t_in > 1 else 0].astype(jnp.float32)
        u = u * decay + x
        s = (u >= v_th).astype(jnp.float32)
        s_ref[t] = s.astype(s_ref.dtype)
        u = u * (1.0 - s)                           # hard reset


def lif(x_3d, t_out, *, decay=LIF_DECAY, v_th=LIF_VTH, rows_target=2048):
    """x: [T_in, rows, 128] membrane drive -> [t_out, rows, 128] bf16 spikes."""
    t_in, R, L = x_3d.shape
    assert L == 128 and t_in in (1, t_out)
    rows = _pick_tile(R, rows_target, 8)
    grid = (R // rows,)
    return pl.pallas_call(
        functools.partial(_lif_kernel, decay=decay, v_th=v_th),
        out_shape=jax.ShapeDtypeStruct((t_out, R, 128), jnp.bfloat16),
        grid_spec=pltpu.PrefetchScalarGridSpec(
            num_scalar_prefetch=0,
            grid=grid,
            in_specs=[pl.BlockSpec((t_in, rows, 128), lambda i: (0, i, 0))],
            out_specs=pl.BlockSpec((t_out, rows, 128), lambda i: (0, i, 0)),
        ),
        compiler_params=pltpu.CompilerParams(
            dimension_semantics=("parallel",),
            vmem_limit_bytes=VMEM_LIMIT),
    )(x_3d)


# ----------------------------------------------------------------------------
# MNISTNet forward
# ----------------------------------------------------------------------------
def mnist_net_forward(x_nchw, params, *, T):
    N, Cin, H, W = x_nchw.shape
    x = jnp.transpose(x_nchw, (0, 2, 3, 1)).astype(jnp.bfloat16)      # NHWC bf16

    # Conv2d(1,32,3,1,1)+BN (folded): the conv is time-invariant and the
    # DirectEncoder drive is identical each step, so compute it ONCE per
    # sample; the LIF kernel replays the drive T times.
    p1, Ho1, Wo1 = im2col(x, 3, 1, 1)                                  # [N*784, 9]
    y1 = matmul_bias(p1, params["w1"], params["b1"])                   # [N*784, 32] f32
    s1 = lif(y1.reshape(1, -1, 128), T)                                # [T, N*196, 128]
    s1 = s1.reshape(T * N, Ho1, Wo1, 32)                               # time-major NHWC

    # Conv2d(32,32,3,2,1)+BN (folded) -> LIF
    p2, Ho2, Wo2 = im2col(s1, 3, 2, 1)                                 # [T*N*196, 288]
    y2 = matmul_bias(p2, params["w2"], params["b2"])                   # [T*N*196, 32] f32
    s2 = lif(y2.reshape(T, -1, 128), T)                                # [T, N*49, 128]

    # flatten: rows stay (t, n); features stay (h, w, c) — fc1_w rows were
    # pre-permuted from PyTorch's (c, h, w) flatten order, so no transpose.
    flat = s2.reshape(T * N, Ho2 * Wo2 * 32)                           # [T*N, 6272] bf16

    # Linear(6272, 800) with the LIF fused into the matmul epilogue.
    s3 = matmul_bias_lif(flat, params["fc1_w"], params["fc1_b"], n_rows=N)

    # Linear(800, 10) — output padded to 128 lanes inside the kernel, sliced here.
    logits = matmul_bias(s3, params["fc2_w"], params["fc2_b"])[:, :10]  # [T*N, 10]
    return jnp.transpose(logits.reshape(T, N, 10), (1, 0, 2))           # [N, T, 10]


def init_params(key):
    ks = jax.random.split(key, 8)

    def uinit(k, shape, fan_in):
        bound = 1.0 / (fan_in ** 0.5)
        return jax.random.uniform(k, shape, jnp.float32, -bound, bound)

    # Conv2d(1, 32, 3, 1, 1) / Conv2d(32, 32, 3, 2, 1)
    cw1 = uinit(ks[0], (32, 1, 3, 3), 1 * 9)
    cb1 = uinit(ks[1], (32,), 1 * 9)
    cw2 = uinit(ks[2], (32, 32, 3, 3), 32 * 9)
    cb2 = uinit(ks[3], (32,), 32 * 9)
    # BatchNorm2d(32) default init, eval mode: gamma=1, beta=0, mean=0, var=1
    ones = jnp.ones((32,), jnp.float32)
    zeros = jnp.zeros((32,), jnp.float32)
    w1, b1 = fold_conv_bn(cw1, cb1, ones, zeros, zeros, ones)
    w2, b2 = fold_conv_bn(cw2, cb2, ones, zeros, zeros, ones)

    # Linear(32*14*14, 800): rows initialised in PyTorch's (c, h, w) flatten
    # order, then permuted to (h, w, c) so the NHWC activation flattens
    # without a transpose (equivalent network function).
    fc1_w = uinit(ks[4], (32 * 14 * 14, 800), 32 * 14 * 14)
    fc1_b = uinit(ks[5], (800,), 32 * 14 * 14)
    chw = jnp.arange(32 * 14 * 14).reshape(32, 14, 14)
    perm = jnp.transpose(chw, (1, 2, 0)).reshape(-1)    # pos (h,w,c) -> chw index
    fc1_w = fc1_w[perm]

    # Linear(800, 10): output padded to 128 lanes (zero cols), sliced after.
    fc2_w = jnp.pad(uinit(ks[6], (800, 10), 800), ((0, 0), (0, 118)))
    fc2_b = jnp.pad(uinit(ks[7], (10,), 800), (0, 118))

    # Pre-cast matmul weights to bf16 once (biases stay f32, added post-MXU).
    bf16 = jnp.bfloat16
    return dict(w1=w1.astype(bf16), b1=b1,
                w2=w2.astype(bf16), b2=b2,
                fc1_w=fc1_w.astype(bf16), fc1_b=fc1_b,
                fc2_w=fc2_w.astype(bf16), fc2_b=fc2_b)


if __name__ == "__main__":
    T = 2
    key = jax.random.PRNGKey(0)
    kx, kp = jax.random.split(key)
    # MNIST-shaped input (28x28 is required by the hardcoded 32*14*14 Linear).
    x = jax.random.normal(kx, (2, 1, 28, 28), jnp.float32)
    params = init_params(kp)

    fwd = jax.jit(functools.partial(mnist_net_forward, T=T))
    out = fwd(x, params)
    jax.block_until_ready(out)
    assert out.shape == (2, T, 10) and out.dtype == jnp.float32
    print("KERNEL_OK")
</pallas_src>

<mosaic_0001>
module attributes {stable_mosaic.version = 11 : i64} {
  func.func @_mm_bias_kernel(%arg0: i32, %arg1: i32, %arg2: i32, %arg3: memref<784x9xbf16, #tpu.memory_space<vmem>>, %arg4: memref<9x32xbf16, #tpu.memory_space<vmem>>, %arg5: memref<1x32xf32, #tpu.memory_space<vmem>>, %arg6: memref<784x32xf32, #tpu.memory_space<vmem>>, %arg7: memref<784x32xf32, #tpu.memory_space<vmem>>) attributes {dimension_semantics = [#tpu.dimension_semantics<parallel>, #tpu.dimension_semantics<parallel>, #tpu.dimension_semantics<arbitrary>], iteration_bounds = array<i64: 2, 1, 1>, scalar_prefetch = 0 : i64, scratch_operands = 1 : i64, tpu.core_type = #tpu.core_type<tc>, window_params = [{transform_indices = @transform_0, window_bounds = array<i64: 784, 9>}, {transform_indices = @transform_1, window_bounds = array<i64: 9, 32>}, {transform_indices = @transform_2, window_bounds = array<i64: 1, 32>}, {transform_indices = @transform_3, window_bounds = array<i64: 784, 32>}]} {
    %c0_i32 = arith.constant 0 : i32
    %0 = arith.cmpi eq, %arg2, %c0_i32 : i32
    %1 = arith.extui %0 : i1 to i32
    %c0_i32_0 = arith.constant 0 : i32
    %2 = arith.cmpi ne, %1, %c0_i32_0 : i32
    scf.if %2 {
      %cst_10 = arith.constant 0.000000e+00 : f32
      %12 = vector.broadcast %cst_10 : f32 to vector<784x32xf32>
      %c0_11 = arith.constant 0 : index
      %c0_12 = arith.constant 0 : index
      %13 = vector.load %arg7[%c0_11, %c0_12] : memref<784x32xf32, #tpu.memory_space<vmem>>, vector<784x32xf32>
      tpu.vector_store %arg7[%c0_11, %c0_12], %12 {strides = array<i32>} : memref<784x32xf32, #tpu.memory_space<vmem>>, vector<784x32xf32>,
    } else {
    }
    %c0 = arith.constant 0 : index
    %c0_1 = arith.constant 0 : index
    %3 = vector.load %arg7[%c0, %c0_1] : memref<784x32xf32, #tpu.memory_space<vmem>>, vector<784x32xf32>
    %c0_2 = arith.constant 0 : index
    %c0_3 = arith.constant 0 : index
    %4 = vector.load %arg3[%c0_2, %c0_3] : memref<784x9xbf16, #tpu.memory_space<vmem>>, vector<784x9xbf16>
    %c0_4 = arith.constant 0 : index
    %c0_5 = arith.constant 0 : index
    %5 = vector.load %arg4[%c0_4, %c0_5] : memref<9x32xbf16, #tpu.memory_space<vmem>>, vector<9x32xbf16>
    %cst = arith.constant dense<0.000000e+00> : vector<784x32xf32>
    %6 = tpu.matmul %4, %5, %cst {dimension_numbers = #tpu.dot_dimension_numbers<[1], [0], [0], [1], [0, 0, 1, 1], [], []>} : vector<784x9xbf16>, vector<9x32xbf16>, vector<784x32xf32> -> vector<784x32xf32>
    %7 = arith.addf %3, %6 : vector<784x32xf32>
    %c0_6 = arith.constant 0 : index
    %c0_7 = arith.constant 0 : index
    %8 = vector.load %arg7[%c0_6, %c0_7] : memref<784x32xf32, #tpu.memory_space<vmem>>, vector<784x32xf32>
    tpu.vector_store %arg7[%c0_6, %c0_7], %7 {strides = array<i32>} : memref<784x32xf32, #tpu.memory_space<vmem>>, vector<784x32xf32>,
    %c0_i32_8 = arith.constant 0 : i32
    %9 = arith.cmpi eq, %arg2, %c0_i32_8 : i32
    %10 = arith.extui %9 : i1 to i32
    %c0_i32_9 = arith.constant 0 : i32
    %11 = arith.cmpi ne, %10, %c0_i32_9 : i32
    scf.if %11 {
      %c0_10 = arith.constant 0 : index
      %c0_11 = arith.constant 0 : index
      %12 = vector.load %arg7[%c0_10, %c0_11] : memref<784x32xf32, #tpu.memory_space<vmem>>, vector<784x32xf32>
      %c0_12 = arith.constant 0 : index
      %c0_13 = arith.constant 0 : index
      %13 = vector.load %arg5[%c0_12, %c0_13] : memref<1x32xf32, #tpu.memory_space<vmem>>, vector<1x32xf32>
      %14 = vector.broadcast %13 : vector<1x32xf32> to vector<784x32xf32>
      %15 = arith.addf %12, %14 : vector<784x32xf32>
      %c0_14 = arith.constant 0 : index
      %c0_15 = arith.constant 0 : index
      %16 = vector.load %arg6[%c0_14, %c0_15] : memref<784x32xf32, #tpu.memory_space<vmem>>, vector<784x32xf32>
      tpu.vector_store %arg6[%c0_14, %c0_15], %15 {strides = array<i32>} : memref<784x32xf32, #tpu.memory_space<vmem>>, vector<784x32xf32>,
    } else {
    }
    return
  }
  func.func @transform_0(%arg0: i32, %arg1: i32, %arg2: i32) -> (i32, i32) {
    %c0_i32 = arith.constant 0 : i32
    return %arg0, %arg2 : i32, i32
  }
  func.func @transform_1(%arg0: i32, %arg1: i32, %arg2: i32) -> (i32, i32) {
    %c0_i32 = arith.constant 0 : i32
    return %arg2, %arg1 : i32, i32
  }
  func.func @transform_2(%arg0: i32, %arg1: i32, %arg2: i32) -> (i32, i32) {
    %c0_i32 = arith.constant 0 : i32
    %c0_i32_0 = arith.constant 0 : i32
    return %c0_i32, %arg1 : i32, i32
  }
  func.func @transform_3(%arg0: i32, %arg1: i32, %arg2: i32) -> (i32, i32) {
    %c0_i32 = arith.constant 0 : i32
    return %arg0, %arg1 : i32, i32
  }
}

module attributes {stable_mosaic.version = 11 : i64} {
  func.func @_lif_kernel(%arg0: i32, %arg1: memref<1x392x128xf32, #tpu.memory_space<vmem>>, %arg2: memref<2x392x128xbf16, #tpu.memory_space<vmem>>) attributes {dimension_semantics = [#tpu.dimension_semantics<parallel>], iteration_bounds = array<i64: 1>, scalar_prefetch = 0 : i64, scratch_operands = 0 : i64, tpu.core_type = #tpu.core_type<tc>, window_params = [{transform_indices = @transform_0, window_bounds = array<i64: 1, 392, 128>}, {transform_indices = @transform_1, window_bounds = array<i64: 2, 392, 128>}]} {
    %cst = arith.constant 0.000000e+00 : f32
    %0 = vector.broadcast %cst : f32 to vector<392x128xf32>
    %c0 = arith.constant 0 : index
    %c0_0 = arith.constant 0 : index
    %c0_1 = arith.constant 0 : index
    %1 = vector.load %arg1[%c0, %c0_0, %c0_1] : memref<1x392x128xf32, #tpu.memory_space<vmem>>, vector<1x392x128xf32>
    %2 = vector.shape_cast %1 : vector<1x392x128xf32> to vector<392x128xf32>
    %cst_2 = arith.constant 5.000000e-01 : f32
    %3 = vector.broadcast %cst_2 : f32 to vector<392x128xf32>
    %4 = arith.mulf %0, %3 : vector<392x128xf32>
    %5 = arith.addf %4, %2 : vector<392x128xf32>
    %cst_3 = arith.constant 1.000000e+00 : f32
    %6 = vector.broadcast %cst_3 : f32 to vector<392x128xf32>
    %7 = arith.cmpf oge, %5, %6 : vector<392x128xf32>
    %8 = arith.extui %7 : vector<392x128xi1> to vector<392x128xi32>
    %9 = arith.sitofp %8 : vector<392x128xi32> to vector<392x128xf32>
    %10 = arith.truncf %9 : vector<392x128xf32> to vector<392x128xbf16>
    %c0_4 = arith.constant 0 : index
    %c0_5 = arith.constant 0 : index
    %c0_6 = arith.constant 0 : index
    %11 = vector.load %arg2[%c0_4, %c0_5, %c0_6] : memref<2x392x128xbf16, #tpu.memory_space<vmem>>, vector<1x392x128xbf16>
    %12 = vector.shape_cast %11 : vector<1x392x128xbf16> to vector<392x128xbf16>
    %13 = vector.shape_cast %10 : vector<392x128xbf16> to vector<1x392x128xbf16>
    tpu.vector_store %arg2[%c0_4, %c0_5, %c0_6], %13 {strides = array<i32>} : memref<2x392x128xbf16, #tpu.memory_space<vmem>>, vector<1x392x128xbf16>,
    %cst_7 = arith.constant 1.000000e+00 : f32
    %14 = vector.broadcast %cst_7 : f32 to vector<392x128xf32>
    %15 = arith.subf %14, %9 : vector<392x128xf32>
    %16 = arith.mulf %5, %15 : vector<392x128xf32>
    %c0_8 = arith.constant 0 : index
    %c0_9 = arith.constant 0 : index
    %c0_10 = arith.constant 0 : index
    %17 = vector.load %arg1[%c0_8, %c0_9, %c0_10] : memref<1x392x128xf32, #tpu.memory_space<vmem>>, vector<1x392x128xf32>
    %18 = vector.shape_cast %17 : vector<1x392x128xf32> to vector<392x128xf32>
    %cst_11 = arith.constant 5.000000e-01 : f32
    %19 = vector.broadcast %cst_11 : f32 to vector<392x128xf32>
    %20 = arith.mulf %16, %19 : vector<392x128xf32>
    %21 = arith.addf %20, %18 : vector<392x128xf32>
    %cst_12 = arith.constant 1.000000e+00 : f32
    %22 = vector.broadcast %cst_12 : f32 to vector<392x128xf32>
    %23 = arith.cmpf oge, %21, %22 : vector<392x128xf32>
    %24 = arith.extui %23 : vector<392x128xi1> to vector<392x128xi32>
    %25 = arith.sitofp %24 : vector<392x128xi32> to vector<392x128xf32>
    %26 = arith.truncf %25 : vector<392x128xf32> to vector<392x128xbf16>
    %c1 = arith.constant 1 : index
    %c0_13 = arith.constant 0 : index
    %c0_14 = arith.constant 0 : index
    %27 = vector.load %arg2[%c1, %c0_13, %c0_14] : memref<2x392x128xbf16, #tpu.memory_space<vmem>>, vector<1x392x128xbf16>
    %28 = vector.shape_cast %27 : vector<1x392x128xbf16> to vector<392x128xbf16>
    %29 = vector.shape_cast %26 : vector<392x128xbf16> to vector<1x392x128xbf16>
    tpu.vector_store %arg2[%c1, %c0_13, %c0_14], %29 {strides = array<i32>} : memref<2x392x128xbf16, #tpu.memory_space<vmem>>, vector<1x392x128xbf16>,
    return
  }
  func.func @transform_0(%arg0: i32) -> (i32, i32, i32) {
    %c0_i32 = arith.constant 0 : i32
    %c0_i32_0 = arith.constant 0 : i32
    %c0_i32_1 = arith.constant 0 : i32
    return %c0_i32, %arg0, %c0_i32_0 : i32, i32, i32
  }
  func.func @transform_1(%arg0: i32) -> (i32, i32, i32) {
    %c0_i32 = arith.constant 0 : i32
    %c0_i32_0 = arith.constant 0 : i32
    %c0_i32_1 = arith.constant 0 : i32
    return %c0_i32, %arg0, %c0_i32_0 : i32, i32, i32
  }
}

module attributes {stable_mosaic.version = 11 : i64} {
  func.func @_mm_bias_kernel(%arg0: i32, %arg1: i32, %arg2: i32, %arg3: memref<784x288xbf16, #tpu.memory_space<vmem>>, %arg4: memref<288x32xbf16, #tpu.memory_space<vmem>>, %arg5: memref<1x32xf32, #tpu.memory_space<vmem>>, %arg6: memref<784x32xf32, #tpu.memory_space<vmem>>, %arg7: memref<784x32xf32, #tpu.memory_space<vmem>>) attributes {dimension_semantics = [#tpu.dimension_semantics<parallel>, #tpu.dimension_semantics<parallel>, #tpu.dimension_semantics<arbitrary>], iteration_bounds = array<i64: 1, 1, 1>, scalar_prefetch = 0 : i64, scratch_operands = 1 : i64, tpu.core_type = #tpu.core_type<tc>, window_params = [{transform_indices = @transform_0, window_bounds = array<i64: 784, 288>}, {transform_indices = @transform_1, window_bounds = array<i64: 288, 32>}, {transform_indices = @transform_2, window_bounds = array<i64: 1, 32>}, {transform_indices = @transform_3, window_bounds = array<i64: 784, 32>}]} {
    %c0_i32 = arith.constant 0 : i32
    %0 = arith.cmpi eq, %arg2, %c0_i32 : i32
    %1 = arith.extui %0 : i1 to i32
    %c0_i32_0 = arith.constant 0 : i32
    %2 = arith.cmpi ne, %1, %c0_i32_0 : i32
    scf.if %2 {
      %cst_10 = arith.constant 0.000000e+00 : f32
      %12 = vector.broadcast %cst_10 : f32 to vector<784x32xf32>
      %c0_11 = arith.constant 0 : index
      %c0_12 = arith.constant 0 : index
      %13 = vector.load %arg7[%c0_11, %c0_12] : memref<784x32xf32, #tpu.memory_space<vmem>>, vector<784x32xf32>
      tpu.vector_store %arg7[%c0_11, %c0_12], %12 {strides = array<i32>} : memref<784x32xf32, #tpu.memory_space<vmem>>, vector<784x32xf32>,
    } else {
    }
    %c0 = arith.constant 0 : index
    %c0_1 = arith.constant 0 : index
    %3 = vector.load %arg7[%c0, %c0_1] : memref<784x32xf32, #tpu.memory_space<vmem>>, vector<784x32xf32>
    %c0_2 = arith.constant 0 : index
    %c0_3 = arith.constant 0 : index
    %4 = vector.load %arg3[%c0_2, %c0_3] : memref<784x288xbf16, #tpu.memory_space<vmem>>, vector<784x288xbf16>
    %c0_4 = arith.constant 0 : index
    %c0_5 = arith.constant 0 : index
    %5 = vector.load %arg4[%c0_4, %c0_5] : memref<288x32xbf16, #tpu.memory_space<vmem>>, vector<288x32xbf16>
    %cst = arith.constant dense<0.000000e+00> : vector<784x32xf32>
    %6 = tpu.matmul %4, %5, %cst {dimension_numbers = #tpu.dot_dimension_numbers<[1], [0], [0], [1], [0, 0, 1, 1], [], []>} : vector<784x288xbf16>, vector<288x32xbf16>, vector<784x32xf32> -> vector<784x32xf32>
    %7 = arith.addf %3, %6 : vector<784x32xf32>
    %c0_6 = arith.constant 0 : index
    %c0_7 = arith.constant 0 : index
    %8 = vector.load %arg7[%c0_6, %c0_7] : memref<784x32xf32, #tpu.memory_space<vmem>>, vector<784x32xf32>
    tpu.vector_store %arg7[%c0_6, %c0_7], %7 {strides = array<i32>} : memref<784x32xf32, #tpu.memory_space<vmem>>, vector<784x32xf32>,
    %c0_i32_8 = arith.constant 0 : i32
    %9 = arith.cmpi eq, %arg2, %c0_i32_8 : i32
    %10 = arith.extui %9 : i1 to i32
    %c0_i32_9 = arith.constant 0 : i32
    %11 = arith.cmpi ne, %10, %c0_i32_9 : i32
    scf.if %11 {
      %c0_10 = arith.constant 0 : index
      %c0_11 = arith.constant 0 : index
      %12 = vector.load %arg7[%c0_10, %c0_11] : memref<784x32xf32, #tpu.memory_space<vmem>>, vector<784x32xf32>
      %c0_12 = arith.constant 0 : index
      %c0_13 = arith.constant 0 : index
      %13 = vector.load %arg5[%c0_12, %c0_13] : memref<1x32xf32, #tpu.memory_space<vmem>>, vector<1x32xf32>
      %14 = vector.broadcast %13 : vector<1x32xf32> to vector<784x32xf32>
      %15 = arith.addf %12, %14 : vector<784x32xf32>
      %c0_14 = arith.constant 0 : index
      %c0_15 = arith.constant 0 : index
      %16 = vector.load %arg6[%c0_14, %c0_15] : memref<784x32xf32, #tpu.memory_space<vmem>>, vector<784x32xf32>
      tpu.vector_store %arg6[%c0_14, %c0_15], %15 {strides = array<i32>} : memref<784x32xf32, #tpu.memory_space<vmem>>, vector<784x32xf32>,
    } else {
    }
    return
  }
  func.func @transform_0(%arg0: i32, %arg1: i32, %arg2: i32) -> (i32, i32) {
    %c0_i32 = arith.constant 0 : i32
    return %arg0, %arg2 : i32, i32
  }
  func.func @transform_1(%arg0: i32, %arg1: i32, %arg2: i32) -> (i32, i32) {
    %c0_i32 = arith.constant 0 : i32
    return %arg2, %arg1 : i32, i32
  }
  func.func @transform_2(%arg0: i32, %arg1: i32, %arg2: i32) -> (i32, i32) {
    %c0_i32 = arith.constant 0 : i32
    %c0_i32_0 = arith.constant 0 : i32
    return %c0_i32, %arg1 : i32, i32
  }
  func.func @transform_3(%arg0: i32, %arg1: i32, %arg2: i32) -> (i32, i32) {
    %c0_i32 = arith.constant 0 : i32
    return %arg0, %arg1 : i32, i32
  }
}

module attributes {stable_mosaic.version = 11 : i64} {
  func.func @_lif_kernel(%arg0: i32, %arg1: memref<2x98x128xf32, #tpu.memory_space<vmem>>, %arg2: memref<2x98x128xbf16, #tpu.memory_space<vmem>>) attributes {dimension_semantics = [#tpu.dimension_semantics<parallel>], iteration_bounds = array<i64: 1>, scalar_prefetch = 0 : i64, scratch_operands = 0 : i64, tpu.core_type = #tpu.core_type<tc>, window_params = [{transform_indices = @transform_0, window_bounds = array<i64: 2, 98, 128>}, {transform_indices = @transform_1, window_bounds = array<i64: 2, 98, 128>}]} {
    %cst = arith.constant 0.000000e+00 : f32
    %0 = vector.broadcast %cst : f32 to vector<98x128xf32>
    %c0 = arith.constant 0 : index
    %c0_0 = arith.constant 0 : index
    %c0_1 = arith.constant 0 : index
    %1 = vector.load %arg1[%c0, %c0_0, %c0_1] : memref<2x98x128xf32, #tpu.memory_space<vmem>>, vector<1x98x128xf32>
    %2 = vector.shape_cast %1 : vector<1x98x128xf32> to vector<98x128xf32>
    %cst_2 = arith.constant 5.000000e-01 : f32
    %3 = vector.broadcast %cst_2 : f32 to vector<98x128xf32>
    %4 = arith.mulf %0, %3 : vector<98x128xf32>
    %5 = arith.addf %4, %2 : vector<98x128xf32>
    %cst_3 = arith.constant 1.000000e+00 : f32
    %6 = vector.broadcast %cst_3 : f32 to vector<98x128xf32>
    %7 = arith.cmpf oge, %5, %6 : vector<98x128xf32>
    %8 = arith.extui %7 : vector<98x128xi1> to vector<98x128xi32>
    %9 = arith.sitofp %8 : vector<98x128xi32> to vector<98x128xf32>
    %10 = arith.truncf %9 : vector<98x128xf32> to vector<98x128xbf16>
    %c0_4 = arith.constant 0 : index
    %c0_5 = arith.constant 0 : index
    %c0_6 = arith.constant 0 : index
    %11 = vector.load %arg2[%c0_4, %c0_5, %c0_6] : memref<2x98x128xbf16, #tpu.memory_space<vmem>>, vector<1x98x128xbf16>
    %12 = vector.shape_cast %11 : vector<1x98x128xbf16> to vector<98x128xbf16>
    %13 = vector.shape_cast %10 : vector<98x128xbf16> to vector<1x98x128xbf16>
    tpu.vector_store %arg2[%c0_4, %c0_5, %c0_6], %13 {strides = array<i32>} : memref<2x98x128xbf16, #tpu.memory_space<vmem>>, vector<1x98x128xbf16>,
    %cst_7 = arith.constant 1.000000e+00 : f32
    %14 = vector.broadcast %cst_7 : f32 to vector<98x128xf32>
    %15 = arith.subf %14, %9 : vector<98x128xf32>
    %16 = arith.mulf %5, %15 : vector<98x128xf32>
    %c1 = arith.constant 1 : index
    %c0_8 = arith.constant 0 : index
    %c0_9 = arith.constant 0 : index
    %17 = vector.load %arg1[%c1, %c0_8, %c0_9] : memref<2x98x128xf32, #tpu.memory_space<vmem>>, vector<1x98x128xf32>
    %18 = vector.shape_cast %17 : vector<1x98x128xf32> to vector<98x128xf32>
    %cst_10 = arith.constant 5.000000e-01 : f32
    %19 = vector.broadcast %cst_10 : f32 to vector<98x128xf32>
    %20 = arith.mulf %16, %19 : vector<98x128xf32>
    %21 = arith.addf %20, %18 : vector<98x128xf32>
    %cst_11 = arith.constant 1.000000e+00 : f32
    %22 = vector.broadcast %cst_11 : f32 to vector<98x128xf32>
    %23 = arith.cmpf oge, %21, %22 : vector<98x128xf32>
    %24 = arith.extui %23 : vector<98x128xi1> to vector<98x128xi32>
    %25 = arith.sitofp %24 : vector<98x128xi32> to vector<98x128xf32>
    %26 = arith.truncf %25 : vector<98x128xf32> to vector<98x128xbf16>
    %c1_12 = arith.constant 1 : index
    %c0_13 = arith.constant 0 : index
    %c0_14 = arith.constant 0 : index
    %27 = vector.load %arg2[%c1_12, %c0_13, %c0_14] : memref<2x98x128xbf16, #tpu.memory_space<vmem>>, vector<1x98x128xbf16>
    %28 = vector.shape_cast %27 : vector<1x98x128xbf16> to vector<98x128xbf16>
    %29 = vector.shape_cast %26 : vector<98x128xbf16> to vector<1x98x128xbf16>
    tpu.vector_store %arg2[%c1_12, %c0_13, %c0_14], %29 {strides = array<i32>} : memref<2x98x128xbf16, #tpu.memory_space<vmem>>, vector<1x98x128xbf16>,
    return
  }
  func.func @transform_0(%arg0: i32) -> (i32, i32, i32) {
    %c0_i32 = arith.constant 0 : i32
    %c0_i32_0 = arith.constant 0 : i32
    %c0_i32_1 = arith.constant 0 : i32
    return %c0_i32, %arg0, %c0_i32_0 : i32, i32, i32
  }
  func.func @transform_1(%arg0: i32) -> (i32, i32, i32) {
    %c0_i32 = arith.constant 0 : i32
    %c0_i32_0 = arith.constant 0 : i32
    %c0_i32_1 = arith.constant 0 : i32
    return %c0_i32, %arg0, %c0_i32_0 : i32, i32, i32
  }
}

module attributes {stable_mosaic.version = 11 : i64} {
  func.func @_mm_bias_lif_kernel(%arg0: i32, %arg1: i32, %arg2: i32, %arg3: memref<4x896xbf16, #tpu.memory_space<vmem>>, %arg4: memref<896x800xbf16, #tpu.memory_space<vmem>>, %arg5: memref<1x800xf32, #tpu.memory_space<vmem>>, %arg6: memref<4x800xbf16, #tpu.memory_space<vmem>>, %arg7: memref<4x800xf32, #tpu.memory_space<vmem>>) attributes {dimension_semantics = [#tpu.dimension_semantics<parallel>, #tpu.dimension_semantics<parallel>, #tpu.dimension_semantics<arbitrary>], iteration_bounds = array<i64: 1, 1, 7>, scalar_prefetch = 0 : i64, scratch_operands = 1 : i64, tpu.core_type = #tpu.core_type<tc>, window_params = [{transform_indices = @transform_0, window_bounds = array<i64: 4, 896>}, {transform_indices = @transform_1, window_bounds = array<i64: 896, 800>}, {pipeline_mode = #tpu.pipeline_mode<synchronous>, transform_indices = @transform_2, window_bounds = array<i64: 1, 800>}, {pipeline_mode = #tpu.pipeline_mode<synchronous>, transform_indices = @transform_3, window_bounds = array<i64: 4, 800>}]} {
    %c0_i32 = arith.constant 0 : i32
    %0 = arith.cmpi eq, %arg2, %c0_i32 : i32
    %1 = arith.extui %0 : i1 to i32
    %c0_i32_0 = arith.constant 0 : i32
    %2 = arith.cmpi ne, %1, %c0_i32_0 : i32
    scf.if %2 {
      %cst_9 = arith.constant 0.000000e+00 : f32
      %12 = vector.broadcast %cst_9 : f32 to vector<4x800xf32>
      %c0_10 = arith.constant 0 : index
      %c0_11 = arith.constant 0 : index
      %13 = vector.load %arg7[%c0_10, %c0_11] : memref<4x800xf32, #tpu.memory_space<vmem>>, vector<4x800xf32>
      tpu.vector_store %arg7[%c0_10, %c0_11], %12 {strides = array<i32>} : memref<4x800xf32, #tpu.memory_space<vmem>>, vector<4x800xf32>,
    } else {
    }
    %c0 = arith.constant 0 : index
    %c0_1 = arith.constant 0 : index
    %3 = vector.load %arg7[%c0, %c0_1] : memref<4x800xf32, #tpu.memory_space<vmem>>, vector<4x800xf32>
    %c0_2 = arith.constant 0 : index
    %c0_3 = arith.constant 0 : index
    %4 = vector.load %arg3[%c0_2, %c0_3] : memref<4x896xbf16, #tpu.memory_space<vmem>>, vector<4x896xbf16>
    %c0_4 = arith.constant 0 : index
    %c0_5 = arith.constant 0 : index
    %5 = vector.load %arg4[%c0_4, %c0_5] : memref<896x800xbf16, #tpu.memory_space<vmem>>, vector<896x800xbf16>
    %cst = arith.constant dense<0.000000e+00> : vector<4x800xf32>
    %6 = tpu.matmul %4, %5, %cst {dimension_numbers = #tpu.dot_dimension_numbers<[1], [0], [0], [1], [0, 0, 1, 1], [], []>} : vector<4x896xbf16>, vector<896x800xbf16>, vector<4x800xf32> -> vector<4x800xf32>
    %7 = arith.addf %3, %6 : vector<4x800xf32>
    %c0_6 = arith.constant 0 : index
    %c0_7 = arith.constant 0 : index
    %8 = vector.load %arg7[%c0_6, %c0_7] : memref<4x800xf32, #tpu.memory_space<vmem>>, vector<4x800xf32>
    tpu.vector_store %arg7[%c0_6, %c0_7], %7 {strides = array<i32>} : memref<4x800xf32, #tpu.memory_space<vmem>>, vector<4x800xf32>,
    %c6_i32 = arith.constant 6 : i32
    %9 = arith.cmpi eq, %arg2, %c6_i32 : i32
    %10 = arith.extui %9 : i1 to i32
    %c0_i32_8 = arith.constant 0 : i32
    %11 = arith.cmpi ne, %10, %c0_i32_8 : i32
    scf.if %11 {
      %c0_9 = arith.constant 0 : index
      %c0_10 = arith.constant 0 : index
      %12 = vector.load %arg7[%c0_9, %c0_10] : memref<4x800xf32, #tpu.memory_space<vmem>>, vector<4x800xf32>
      %c0_11 = arith.constant 0 : index
      %c0_12 = arith.constant 0 : index
      %13 = vector.load %arg5[%c0_11, %c0_12] : memref<1x800xf32, #tpu.memory_space<vmem>>, vector<1x800xf32>
      %14 = vector.broadcast %13 : vector<1x800xf32> to vector<4x800xf32>
      %15 = arith.addf %12, %14 : vector<4x800xf32>
      %cst_13 = arith.constant 0.000000e+00 : f32
      %16 = vector.broadcast %cst_13 : f32 to vector<2x800xf32>
      %cst_14 = arith.constant 5.000000e-01 : f32
      %17 = vector.broadcast %cst_14 : f32 to vector<2x800xf32>
      %18 = arith.mulf %16, %17 : vector<2x800xf32>
      %19 = vector.extract_strided_slice %15 {offsets = [0, 0], sizes = [2, 800], strides = [1, 1]} : vector<4x800xf32> to vector<2x800xf32>
      %20 = arith.addf %18, %19 : vector<2x800xf32>
      %cst_15 = arith.constant 1.000000e+00 : f32
      %21 = vector.broadcast %cst_15 : f32 to vector<2x800xf32>
      %22 = arith.cmpf oge, %20, %21 : vector<2x800xf32>
      %23 = arith.extui %22 : vector<2x800xi1> to vector<2x800xi32>
      %24 = arith.sitofp %23 : vector<2x800xi32> to vector<2x800xf32>
      %25 = arith.truncf %24 : vector<2x800xf32> to vector<2x800xbf16>
      %c0_16 = arith.constant 0 : index
      %c0_17 = arith.constant 0 : index
      %26 = vector.load %arg6[%c0_16, %c0_17] : memref<4x800xbf16, #tpu.memory_space<vmem>>, vector<2x800xbf16>
      tpu.vector_store %arg6[%c0_16, %c0_17], %25 {strides = array<i32>} : memref<4x800xbf16, #tpu.memory_space<vmem>>, vector<2x800xbf16>,
      %cst_18 = arith.constant 1.000000e+00 : f32
      %27 = vector.broadcast %cst_18 : f32 to vector<2x800xf32>
      %28 = arith.subf %27, %24 : vector<2x800xf32>
      %29 = arith.mulf %20, %28 : vector<2x800xf32>
      %cst_19 = arith.constant 5.000000e-01 : f32
      %30 = vector.broadcast %cst_19 : f32 to vector<2x800xf32>
      %31 = arith.mulf %29, %30 : vector<2x800xf32>
      %32 = vector.extract_strided_slice %15 {offsets = [2, 0], sizes = [2, 800], strides = [1, 1]} : vector<4x800xf32> to vector<2x800xf32>
      %33 = arith.addf %31, %32 : vector<2x800xf32>
      %cst_20 = arith.constant 1.000000e+00 : f32
      %34 = vector.broadcast %cst_20 : f32 to vector<2x800xf32>
      %35 = arith.cmpf oge, %33, %34 : vector<2x800xf32>
      %36 = arith.extui %35 : vector<2x800xi1> to vector<2x800xi32>
      %37 = arith.sitofp %36 : vector<2x800xi32> to vector<2x800xf32>
      %38 = arith.truncf %37 : vector<2x800xf32> to vector<2x800xbf16>
      %c2 = arith.constant 2 : index
      %c0_21 = arith.constant 0 : index
      %39 = vector.load %arg6[%c2, %c0_21] : memref<4x800xbf16, #tpu.memory_space<vmem>>, vector<2x800xbf16>
      tpu.vector_store %arg6[%c2, %c0_21], %38 {strides = array<i32>} : memref<4x800xbf16, #tpu.memory_space<vmem>>, vector<2x800xbf16>,
    } else {
    }
    return
  }
  func.func @transform_0(%arg0: i32, %arg1: i32, %arg2: i32) -> (i32, i32) {
    %c0_i32 = arith.constant 0 : i32
    %c0_i32_0 = arith.constant 0 : i32
    return %c0_i32, %arg2 : i32, i32
  }
  func.func @transform_1(%arg0: i32, %arg1: i32, %arg2: i32) -> (i32, i32) {
    %c0_i32 = arith.constant 0 : i32
    %c0_i32_0 = arith.constant 0 : i32
    return %arg2, %c0_i32 : i32, i32
  }
  func.func @transform_2(%arg0: i32, %arg1: i32, %arg2: i32) -> (i32, i32) {
    %c0_i32 = arith.constant 0 : i32
    %c0_i32_0 = arith.constant 0 : i32
    %c0_i32_1 = arith.constant 0 : i32
    return %c0_i32, %c0_i32_0 : i32, i32
  }
  func.func @transform_3(%arg0: i32, %arg1: i32, %arg2: i32) -> (i32, i32) {
    %c0_i32 = arith.constant 0 : i32
    %c0_i32_0 = arith.constant 0 : i32
    %c0_i32_1 = arith.constant 0 : i32
    return %c0_i32, %c0_i32_0 : i32, i32
  }
}

module attributes {stable_mosaic.version = 11 : i64} {
  func.func @_mm_bias_kernel(%arg0: i32, %arg1: i32, %arg2: i32, %arg3: memref<4x800xbf16, #tpu.memory_space<vmem>>, %arg4: memref<800x128xbf16, #tpu.memory_space<vmem>>, %arg5: memref<1x128xf32, #tpu.memory_space<vmem>>, %arg6: memref<4x128xf32, #tpu.memory_space<vmem>>, %arg7: memref<4x128xf32, #tpu.memory_space<vmem>>) attributes {dimension_semantics = [#tpu.dimension_semantics<parallel>, #tpu.dimension_semantics<parallel>, #tpu.dimension_semantics<arbitrary>], iteration_bounds = array<i64: 1, 1, 1>, scalar_prefetch = 0 : i64, scratch_operands = 1 : i64, tpu.core_type = #tpu.core_type<tc>, window_params = [{transform_indices = @transform_0, window_bounds = array<i64: 4, 800>}, {transform_indices = @transform_1, window_bounds = array<i64: 800, 128>}, {transform_indices = @transform_2, window_bounds = array<i64: 1, 128>}, {transform_indices = @transform_3, window_bounds = array<i64: 4, 128>}]} {
    %c0_i32 = arith.constant 0 : i32
    %0 = arith.cmpi eq, %arg2, %c0_i32 : i32
    %1 = arith.extui %0 : i1 to i32
    %c0_i32_0 = arith.constant 0 : i32
    %2 = arith.cmpi ne, %1, %c0_i32_0 : i32
    scf.if %2 {
      %cst_10 = arith.constant 0.000000e+00 : f32
      %12 = vector.broadcast %cst_10 : f32 to vector<4x128xf32>
      %c0_11 = arith.constant 0 : index
      %c0_12 = arith.constant 0 : index
      %13 = vector.load %arg7[%c0_11, %c0_12] : memref<4x128xf32, #tpu.memory_space<vmem>>, vector<4x128xf32>
      tpu.vector_store %arg7[%c0_11, %c0_12], %12 {strides = array<i32>} : memref<4x128xf32, #tpu.memory_space<vmem>>, vector<4x128xf32>,
    } else {
    }
    %c0 = arith.constant 0 : index
    %c0_1 = arith.constant 0 : index
    %3 = vector.load %arg7[%c0, %c0_1] : memref<4x128xf32, #tpu.memory_space<vmem>>, vector<4x128xf32>
    %c0_2 = arith.constant 0 : index
    %c0_3 = arith.constant 0 : index
    %4 = vector.load %arg3[%c0_2, %c0_3] : memref<4x800xbf16, #tpu.memory_space<vmem>>, vector<4x800xbf16>
    %c0_4 = arith.constant 0 : index
    %c0_5 = arith.constant 0 : index
    %5 = vector.load %arg4[%c0_4, %c0_5] : memref<800x128xbf16, #tpu.memory_space<vmem>>, vector<800x128xbf16>
    %cst = arith.constant dense<0.000000e+00> : vector<4x128xf32>
    %6 = tpu.matmul %4, %5, %cst {dimension_numbers = #tpu.dot_dimension_numbers<[1], [0], [0], [1], [0, 0, 1, 1], [], []>} : vector<4x800xbf16>, vector<800x128xbf16>, vector<4x128xf32> -> vector<4x128xf32>
    %7 = arith.addf %3, %6 : vector<4x128xf32>
    %c0_6 = arith.constant 0 : index
    %c0_7 = arith.constant 0 : index
    %8 = vector.load %arg7[%c0_6, %c0_7] : memref<4x128xf32, #tpu.memory_space<vmem>>, vector<4x128xf32>
    tpu.vector_store %arg7[%c0_6, %c0_7], %7 {strides = array<i32>} : memref<4x128xf32, #tpu.memory_space<vmem>>, vector<4x128xf32>,
    %c0_i32_8 = arith.constant 0 : i32
    %9 = arith.cmpi eq, %arg2, %c0_i32_8 : i32
    %10 = arith.extui %9 : i1 to i32
    %c0_i32_9 = arith.constant 0 : i32
    %11 = arith.cmpi ne, %10, %c0_i32_9 : i32
    scf.if %11 {
      %c0_10 = arith.constant 0 : index
      %c0_11 = arith.constant 0 : index
      %12 = vector.load %arg7[%c0_10, %c0_11] : memref<4x128xf32, #tpu.memory_space<vmem>>, vector<4x128xf32>
      %c0_12 = arith.constant 0 : index
      %c0_13 = arith.constant 0 : index
      %13 = vector.load %arg5[%c0_12, %c0_13] : memref<1x128xf32, #tpu.memory_space<vmem>>, vector<1x128xf32>
      %14 = vector.broadcast %13 : vector<1x128xf32> to vector<4x128xf32>
      %15 = arith.addf %12, %14 : vector<4x128xf32>
      %c0_14 = arith.constant 0 : index
      %c0_15 = arith.constant 0 : index
      %16 = vector.load %arg6[%c0_14, %c0_15] : memref<4x128xf32, #tpu.memory_space<vmem>>, vector<4x128xf32>
      tpu.vector_store %arg6[%c0_14, %c0_15], %15 {strides = array<i32>} : memref<4x128xf32, #tpu.memory_space<vmem>>, vector<4x128xf32>,
    } else {
    }
    return
  }
  func.func @transform_0(%arg0: i32, %arg1: i32, %arg2: i32) -> (i32, i32) {
    %c0_i32 = arith.constant 0 : i32
    return %arg0, %arg2 : i32, i32
  }
  func.func @transform_1(%arg0: i32, %arg1: i32, %arg2: i32) -> (i32, i32) {
    %c0_i32 = arith.constant 0 : i32
    return %arg2, %arg1 : i32, i32
  }
  func.func @transform_2(%arg0: i32, %arg1: i32, %arg2: i32) -> (i32, i32) {
    %c0_i32 = arith.constant 0 : i32
    %c0_i32_0 = arith.constant 0 : i32
    return %c0_i32, %arg1 : i32, i32
  }
  func.func @transform_3(%arg0: i32, %arg1: i32, %arg2: i32) -> (i32, i32) {
    %c0_i32 = arith.constant 0 : i32
    return %arg0, %arg1 : i32, i32
  }
}

</mosaic_0001>

<bundles_post_ra>
// kernel: mnist_net_forward.7
= control target key start
LH: loop header
LB: loop body
LE: loop exit
PB: predicated region body
PF: predicated region fallthrough
CT: control target
= control target key end

     0   :  { %v1991_v5 = vmov 0.0   ;;  %s1983_s0 = inlined_call_operand.vmem [shape: f32[1,392,128], index: 0, kind: input, shape index: {}]   ;;  %s1984_s1 = inlined_call_operand.vmem [shape: bf16[2,392,128], index: 1, kind: output, shape index: {}]  }
   0x1   :  { %v1199_v0 = vld [vmem:[%s1983_s0] sm:$0xff]  ;;  %v1204_v1 = vld [vmem:[%s1983_s0 + $0x8] sm:$0xff]  ;;  %v1209_v2 = vld [vmem:[%s1983_s0 + $0x10] sm:$0xff] }
   0x2   :  { %vm106_vm0 = vcmp.ge.f32.partialorder %v1199_v0, 1.0  ;;  %vm107_vm1 = vcmp.ge.f32.partialorder %v1204_v1, 1.0  ;;  %v1216_v3 = vld [vmem:[%s1983_s0 + $0x18] sm:$0xff]  ;;  %vm108_vm2 = vcmp.ge.f32.partialorder %v1209_v2, 1.0  ;;  %v1222_v4 = vld [vmem:[%s1983_s0 + $0x20] sm:$0xff]  ;;  %v1231_v9 = vld [vmem:[%s1983_s0 + $0x28] sm:$0xff] }
   0x3   :  { %v846_v6 = vsel %vm106_vm0, 1.0, %v1991_v5  ;;  %v847_v7 = vsel %vm107_vm1, 1.0, %v1991_v5  ;;  %vm109_vm3 = vcmp.ge.f32.partialorder %v1216_v3, 1.0  ;;  %v848_v8 = vsel %vm108_vm2, 1.0, %v1991_v5  ;;  %v1238_v17 = vld [vmem:[%s1983_s0 + $0x30] sm:$0xff]  ;;  %v1243_v18 = vld [vmem:[%s1983_s0 + $0x38] sm:$0xff] }
   0x4   :  { %v994_v10 = vpack.c.bf16 %v847_v7, %v846_v6  ;;  %v351_v11 = vsub.f32 1.0, %v846_v6  ;;  %v352_v12 = vsub.f32 1.0, %v847_v7  ;;  %v849_v13 = vsel %vm109_vm3, 1.0, %v1991_v5  ;;  %v1259_v22 = vld [vmem:[%s1983_s0 + $0x40] sm:$0xff]  ;;  %v1276_v29 = vld [vmem:[%s1983_s0 + $0x48] sm:$0xff]  ;;  %v1281_v30 = vld [vmem:[%s1983_s0 + $0x50] sm:$0xff] }
   0x5   :  { %v997_v14 = vpack.c.bf16 %v849_v13, %v848_v8  ;;  %v353_v15 = vsub.f32 1.0, %v848_v8  ;;  %v354_v16 = vsub.f32 1.0, %v849_v13  ;;  %vm110_vm4 = vcmp.ge.f32.partialorder %v1222_v4, 1.0  ;;  %v1286_v31 = vld [vmem:[%s1983_s0 + $0x58] sm:$0xff]  ;;  %v1317_v44 = vld [vmem:[%s1983_s0 + $0x60] sm:$0xff]  ;;  %v1322_v45 = vld [vmem:[%s1983_s0 + $0x68] sm:$0xff] }
   0x6   :  { %995 = vst [vmem:[%s1984_s1] sm:$0xff] %v994_v10   ;;  %v1249_v19 = vmul.f32 %v351_v11, %v1199_v0  ;;  %v1252_v20 = vmul.f32 %v352_v12, %v1204_v1  ;;  %vm111_vm5 = vcmp.ge.f32.partialorder %v1231_v9, 1.0  ;;  %v850_v21 = vsel %vm110_vm4, 1.0, %v1991_v5  ;;  %v1327_v46 = vld [vmem:[%s1983_s0 + $0x70] sm:$0xff]  ;;  %v1337_v55 = vld [vmem:[%s1983_s0 + $0x78] sm:$0xff]  ;;  %v1351_v57 = vld [vmem:[%s1983_s0 + $0x80] sm:$0xff] }
   0x7   :  { %1137 = vst [vmem:[%s1984_s1 + $0x8] sm:$0xff] %v997_v14   ;;  %v1265_v23 = vmul.f32 %v353_v15, %v1209_v2  ;;  %v1268_v24 = vmul.f32 %v354_v16, %v1216_v3  ;;  %v851_v25 = vsel %vm111_vm5, 1.0, %v1991_v5  ;;  %v355_v26 = vsub.f32 1.0, %v850_v21  ;;  %v1356_v58 = vld [vmem:[%s1983_s0 + $0x88] sm:$0xff]  ;;  %v1373_v8 = vld [vmem:[%s1983_s0 + $0x90] sm:$0xff]  ;;  %v1391_v16 = vld [vmem:[%s1983_s0 + $0x98] sm:$0xff] }
   0x8   :  { %v1000_v27 = vpack.c.bf16 %v851_v25, %v850_v21  ;;  %v356_v28 = vsub.f32 1.0, %v851_v25  ;;  %vm112_vm6 = vcmp.ge.f32.partialorder %v1238_v17, 1.0  ;;  %vm113_vm7 = vcmp.ge.f32.partialorder %v1243_v18, 1.0  ;;  %v1396_v21 = vld [vmem:[%s1983_s0 + $0xa0] sm:$0xff] }
   0x9   :  { %v1289_v32 = vmul.f32 %v355_v26, %v1222_v4  ;;  %v852_v33 = vsel %vm112_vm6, 1.0, %v1991_v5  ;;  %v853_v34 = vsel %vm113_vm7, 1.0, %v1991_v5  ;;  %vm114_vm8 = vcmp.ge.f32.partialorder %v1259_v22, 1.0 }
   0xa   :  { %1138 = vst [vmem:[%s1984_s1 + $0x10] sm:$0xff] %v1000_v27   ;;  %v1298_v35 = vmul.f32 %v356_v28, %v1231_v9  ;;  %v1003_v36 = vpack.c.bf16 %v853_v34, %v852_v33  ;;  %v357_v37 = vsub.f32 1.0, %v852_v33  ;;  %v358_v38 = vsub.f32 1.0, %v853_v34 }
   0xb   :  { %vm115_vm9 = vcmp.ge.f32.partialorder %v1276_v29, 1.0  ;;  %v854_v39 = vsel %vm114_vm8, 1.0, %v1991_v5  ;;  %vm116_vm10 = vcmp.ge.f32.partialorder %v1281_v30, 1.0  ;;  %vm117_vm11 = vcmp.ge.f32.partialorder %v1286_v31, 1.0 }
   0xc   :  { %1139 = vst [vmem:[%s1984_s1 + $0x18] sm:$0xff] %v1003_v36   ;;  %v1308_v40 = vmul.f32 %v357_v37, %v1238_v17  ;;  %v1311_v41 = vmul.f32 %v358_v38, %v1243_v18  ;;  %v855_v42 = vsel %vm115_vm9, 1.0, %v1991_v5  ;;  %v359_v43 = vsub.f32 1.0, %v854_v39  ;;  %v1410_v37 = vld [vmem:[%s1983_s0 + $0xa8] sm:$0xff] }
   0xd   :  { %v1006_v47 = vpack.c.bf16 %v855_v42, %v854_v39  ;;  %v360_v48 = vsub.f32 1.0, %v855_v42  ;;  %v856_v49 = vsel %vm116_vm10, 1.0, %v1991_v5  ;;  %v857_v50 = vsel %vm117_vm11, 1.0, %v1991_v5  ;;  %2010 = vst [vmem:[#allocation2_spill] sm:$0xff] %v1410_v37  ;;  %v1421_v42 = vld [vmem:[%s1983_s0 + $0xb0] sm:$0xff] }
   0xe   :  { %v1332_v51 = vmul.f32 %v359_v43, %v1259_v22  ;;  %v1009_v52 = vpack.c.bf16 %v857_v50, %v856_v49  ;;  %v361_v53 = vsub.f32 1.0, %v856_v49  ;;  %v362_v54 = vsub.f32 1.0, %v857_v50  ;;  %2011 = vst [vmem:[#allocation3_spill] sm:$0xff] %v1421_v42  ;;  %v1436_v50 = vld [vmem:[%s1983_s0 + $0xb8] sm:$0xff] }
   0xf   :  { %1140 = vst [vmem:[%s1984_s1 + $0x20] sm:$0xff] %v1006_v47   ;;  %v1343_v56 = vmul.f32 %v360_v48, %v1276_v29  ;;  %vm118_vm12 = vcmp.ge.f32.partialorder %v1317_v44, 1.0  ;;  %vm119_vm13 = vcmp.ge.f32.partialorder %v1322_v45, 1.0  ;;  %vm120_vm14 = vcmp.ge.f32.partialorder %v1327_v46, 1.0 }
  0x10   :  { %1141 = vst [vmem:[%s1984_s1 + $0x28] sm:$0xff] %v1009_v52   ;;  %v1362_v59 = vmul.f32 %v361_v53, %v1281_v30  ;;  %v1365_v60 = vmul.f32 %v362_v54, %v1286_v31  ;;  %v858_v61 = vsel %vm118_vm12, 1.0, %v1991_v5  ;;  %v859_v62 = vsel %vm119_vm13, 1.0, %v1991_v5 }
  0x11   :  { %v1012_v63 = vpack.c.bf16 %v859_v62, %v858_v61  ;;  %v363_v6 = vsub.f32 1.0, %v858_v61  ;;  %v364_v7 = vsub.f32 1.0, %v859_v62  ;;  %vm121_vm15 = vcmp.ge.f32.partialorder %v1337_v55, 1.0  ;;  %2012 = vst [vmem:[#allocation4_spill] sm:$0xff] %v1436_v50  ;;  %v1443_v61 = vld [vmem:[%s1983_s0 + $0xc0] sm:$0xff] }
  0x12   :  { %v860_v10 = vsel %vm120_vm14, 1.0, %v1991_v5  ;;  %v861_v11 = vsel %vm121_vm15, 1.0, %v1991_v5  ;;  %vm122_vm0 = vcmp.ge.f32.partialorder %v1351_v57, 1.0  ;;  %vm123_vm1 = vcmp.ge.f32.partialorder %v1356_v58, 1.0  ;;  %2013 = vst [vmem:[#allocation5_spill] sm:$0xff] %v1443_v61 }
  0x13   :  { %1142 = vst [vmem:[%s1984_s1 + $0x30] sm:$0xff] %v1012_v63   ;;  %v1383_v12 = vmul.f32 %v363_v6, %v1317_v44  ;;  %v1386_v13 = vmul.f32 %v364_v7, %v1322_v45  ;;  %v1015_v14 = vpack.c.bf16 %v861_v11, %v860_v10  ;;  %v365_v15 = vsub.f32 1.0, %v860_v10 }
  0x14   :  { %v366_v25 = vsub.f32 1.0, %v861_v11  ;;  %v862_v26 = vsel %vm122_vm0, 1.0, %v1991_v5  ;;  %v863_v27 = vsel %vm123_vm1, 1.0, %v1991_v5  ;;  %vm124_vm2 = vcmp.ge.f32.partialorder %v1373_v8, 1.0 }
  0x15   :  { %1143 = vst [vmem:[%s1984_s1 + $0x38] sm:$0xff] %v1015_v14   ;;  %v1405_v28 = vmul.f32 %v365_v15, %v1327_v46  ;;  %v1018_v33 = vpack.c.bf16 %v863_v27, %v862_v26  ;;  %v367_v34 = vsub.f32 1.0, %v862_v26  ;;  %v368_v36 = vsub.f32 1.0, %v863_v27  ;;  %v1460_v14 = vld [vmem:[%s1983_s0 + $0xc8] sm:$0xff]  ;;  %v1465_v15 = vld [vmem:[%s1983_s0 + $0xd0] sm:$0xff] }
  0x16   :  { %v1413_v38 = vmul.f32 %v366_v25, %v1337_v55  ;;  %vm125_vm3 = vcmp.ge.f32.partialorder %v1391_v16, 1.0  ;;  %v864_v39 = vsel %vm124_vm2, 1.0, %v1991_v5  ;;  %vm126_vm4 = vcmp.ge.f32.partialorder %v1396_v21, 1.0  ;;  %2014 = vst [vmem:[#allocation6_spill] sm:$0xff] %v1460_v14  ;;  %v1470_v25 = vld [vmem:[%s1983_s0 + $0xd8] sm:$0xff] }
  0x17   :  { %1144 = vst [vmem:[%s1984_s1 + $0x40] sm:$0xff] %v1018_v33   ;;  %v1427_v43 = vmul.f32 %v367_v34, %v1351_v57  ;;  %v1430_v47 = vmul.f32 %v368_v36, %v1356_v58  ;;  %v865_v48 = vsel %vm125_vm3, 1.0, %v1991_v5  ;;  %v369_v49 = vsub.f32 1.0, %v864_v39 }
  0x18   :  { %v1021_v52 = vpack.c.bf16 %v865_v48, %v864_v39  ;;  %v370_v53 = vsub.f32 1.0, %v865_v48  ;;  %vm127_vm5 = vcmp.ge.f32.partialorder %v1410_v37, 1.0  ;;  %v866_v54 = vsel %vm126_vm4, 1.0, %v1991_v5  ;;  %2015 = vst [vmem:[#allocation7_spill] sm:$0xff] %v1465_v15 }
  0x19   :  { %v1446_v62 = vmul.f32 %v369_v49, %v1373_v8  ;;  %v867_v63 = vsel %vm127_vm5, 1.0, %v1991_v5  ;;  %v371_v6 = vsub.f32 1.0, %v866_v54  ;;  %vm128_vm6 = vcmp.ge.f32.partialorder %v1421_v42, 1.0  ;;  %2016 = vst [vmem:[#allocation8_spill] sm:$0xff] %v1470_v25 }
  0x1a   :  { %1145 = vst [vmem:[%s1984_s1 + $0x48] sm:$0xff] %v1021_v52   ;;  %v1454_v7 = vmul.f32 %v370_v53, %v1391_v16  ;;  %v1024_v10 = vpack.c.bf16 %v867_v63, %v866_v54  ;;  %v372_v11 = vsub.f32 1.0, %v867_v63  ;;  %vm129_vm7 = vcmp.ge.f32.partialorder %v1436_v50, 1.0 }
  0x1b   :  { %v1473_v26 = vmul.f32 %v371_v6, %v1396_v21  ;;  %v868_v27 = vsel %vm128_vm6, 1.0, %v1991_v5  ;;  %v869_v33 = vsel %vm129_vm7, 1.0, %v1991_v5  ;;  %vm130_vm8 = vcmp.ge.f32.partialorder %v1443_v61, 1.0  ;;  %v1501_v6 = vld [vmem:[%s1983_s0 + $0xe0] sm:$0xff] }
  0x1c   :  { %1146 = vst [vmem:[%s1984_s1 + $0x50] sm:$0xff] %v1024_v10   ;;  %v1482_v34 = vmul.f32 %v372_v11, %v1410_v37  ;;  %v1027_v36 = vpack.c.bf16 %v869_v33, %v868_v27  ;;  %v373_v39 = vsub.f32 1.0, %v868_v27  ;;  %v374_v48 = vsub.f32 1.0, %v869_v33  ;;  %v1506_v10 = vld [vmem:[%s1983_s0 + $0xe8] sm:$0xff]  ;;  %v1511_v11 = vld [vmem:[%s1983_s0 + $0xf0] sm:$0xff]  ;;  %v1521_v37 = vld [vmem:[%s1983_s0 + $0xf8] sm:$0xff] }
  0x1d   :  { %vm131_vm9 = vcmp.ge.f32.partialorder %v1460_v14, 1.0  ;;  %v870_v49 = vsel %vm130_vm8, 1.0, %v1991_v5  ;;  %vm132_vm10 = vcmp.ge.f32.partialorder %v1465_v15, 1.0  ;;  %vm133_vm11 = vcmp.ge.f32.partialorder %v1470_v25, 1.0  ;;  %2018 = vst [vmem:[#allocation10_spill] sm:$0xff] %v1501_v6 }
  0x1e   :  { %1147 = vst [vmem:[%s1984_s1 + $0x58] sm:$0xff] %v1027_v36   ;;  %v1492_v52 = vmul.f32 %v373_v39, %v1421_v42  ;;  %v1495_v53 = vmul.f32 %v374_v48, %v1436_v50  ;;  %v871_v54 = vsel %vm131_vm9, 1.0, %v1991_v5  ;;  %v375_v63 = vsub.f32 1.0, %v870_v49 }
  0x1f   :  { %2019 = vst [vmem:[#allocation11_spill] sm:$0xff] %v1506_v10  ;;  %v1030_v27 = vpack.c.bf16 %v871_v54, %v870_v49  ;;  %v376_v33 = vsub.f32 1.0, %v871_v54  ;;  %v872_v36 = vsel %vm132_vm10, 1.0, %v1991_v5  ;;  %v873_v39 = vsel %vm133_vm11, 1.0, %v1991_v5  ;;  %v1535_v54 = vld [vmem:[%s1983_s0 + $0x100] sm:$0xff] }
  0x20   :  { %2017 = vst [vmem:[#allocation9_spill] sm:$0xff] %v1495_v53  ;;  %v1516_v48 = vmul.f32 %v375_v63, %v1443_v61  ;;  %v1033_v50 = vpack.c.bf16 %v873_v39, %v872_v36  ;;  %v377_v53 = vsub.f32 1.0, %v872_v36  ;;  %v378_v42 = vsub.f32 1.0, %v873_v39  ;;  %v1540_v63 = vld [vmem:[%s1983_s0 + $0x108] sm:$0xff] }
  0x21   :  { %2020 = vst [vmem:[#allocation12_spill] sm:$0xff] %v1511_v11  ;;  %v1527_v49 = vmul.f32 %v376_v33, %v1460_v14  ;;  %vm134_vm12 = vcmp.ge.f32.partialorder %v1501_v6, 1.0  ;;  %vm135_vm13 = vcmp.ge.f32.partialorder %v1506_v10, 1.0  ;;  %vm136_vm14 = vcmp.ge.f32.partialorder %v1511_v11, 1.0 }
  0x22   :  { %2021 = vst [vmem:[#allocation13_spill] sm:$0xff] %v1516_v48  ;;  %v1549_v33 = vmul.f32 %v378_v42, %v1470_v25  ;;  %v874_v36 = vsel %vm134_vm12, 1.0, %v1991_v5  ;;  %v875_v39 = vsel %vm135_vm13, 1.0, %v1991_v5  ;;  %vm137_vm15 = vcmp.ge.f32.partialorder %v1521_v37, 1.0  ;;  %v1557_v48 = vld [vmem:[%s1983_s0 + $0x110] sm:$0xff] }
  0x23   :  { %2022 = vst [vmem:[#allocation14_spill] sm:$0xff] %v1521_v37  ;;  %v1036_v14 = vpack.c.bf16 %v875_v39, %v874_v36  ;;  %v379_v61 = vsub.f32 1.0, %v874_v36  ;;  %vm138_vm0 = vcmp.ge.f32.partialorder %v1535_v54, 1.0  ;;  %vm139_vm1 = vcmp.ge.f32.partialorder %v1540_v63, 1.0 }
  0x24   :  { %1148 = vst [vmem:[%s1984_s1 + $0x60] sm:$0xff] %v1030_v27   ;;  %v1546_v27 = vmul.f32 %v377_v53, %v1465_v15  ;;  %v877_v53 = vsel %vm137_vm15, 1.0, %v1991_v5  ;;  %v1580_v15 = vld [vmem:[%s1983_s0 + $0x120] sm:$0xff]  ;;  %vm140_vm2 = vcmp.ge.f32.partialorder %v1557_v48, 1.0 }
  0x25   :  { %2023 = vst [vmem:[#allocation15_spill] sm:$0xff] %v1527_v49  ;;  %v380_v49 = vsub.f32 1.0, %v875_v39  ;;  %v1567_v42 = vmul.f32 %v379_v61, %v1501_v6  ;;  %vm142_vm4 = vcmp.ge.f32.partialorder %v1580_v15, 1.0 }
  0x26   :  { %2024 = vst [vmem:[#allocation16_spill] sm:$0xff] %v1535_v54 }
  0x27   :  { %2025 = vst [vmem:[#allocation17_spill] sm:$0xff] %v1540_v63  ;;  %v1570_v36 = vmul.f32 %v380_v49, %v1506_v10 }
  0x28   :  { %1149 = vst [vmem:[%s1984_s1 + $0x68] sm:$0xff] %v1033_v50   ;;  %v876_v50 = vsel %vm136_vm14, 1.0, %v1991_v5  ;;  %v1575_v5 = vld [vmem:[%s1983_s0 + $0x118] sm:$0xff] }
  0x29   :  { %2026 = vst [vmem:[#allocation18_spill] sm:$0xff] %v1546_v27  ;;  %v1039_v39 = vpack.c.bf16 %v877_v53, %v876_v50  ;;  %v381_v25 = vsub.f32 1.0, %v876_v50  ;;  %vm141_vm3 = vcmp.ge.f32.partialorder %v1575_v5, 1.0 }
  0x2a   :  { %2027 = vst [vmem:[#allocation19_spill] sm:$0xff] %v1549_v33  ;;  %v382_v33 = vsub.f32 1.0, %v877_v53  ;;  %v1594_v53 = vld [vmem:[%s1983_s0 + $0x128] sm:$0xff] }
  0x2b   :  { %2028 = vst [vmem:[#allocation20_spill] sm:$0xff] %v1557_v48  ;;  %v1589_v49 = vmul.f32 %v381_v25, %v1511_v11  ;;  %v1605_v25 = vld [vmem:[%s1983_s0 + $0x130] sm:$0xff]  ;;  %vm143_vm5 = vcmp.ge.f32.partialorder %v1594_v53, 1.0 }
  0x2c   :  { %1150 = vst [vmem:[%s1984_s1 + $0x70] sm:$0xff] %v1036_v14   ;;  %v2033_v14 = vmov 0.0   ;;  %vm144_vm6 = vcmp.ge.f32.partialorder %v1605_v25, 1.0 }
  0x2d   :  { %2029 = vst [vmem:[#allocation21_spill] sm:$0xff] %v1567_v42  ;;  %v878_v27 = vsel %vm138_vm0, 1.0, %v2033_v14  ;;  %v879_v61 = vsel %vm139_vm1, 1.0, %v2033_v14  ;;  %v880_v42 = vsel %vm140_vm2, 1.0, %v2033_v14 }
  0x2e   :  { %2030 = vst [vmem:[#allocation22_spill] sm:$0xff] %v1570_v36  ;;  %v1042_v50 = vpack.c.bf16 %v879_v61, %v878_v27  ;;  %v383_v10 = vsub.f32 1.0, %v878_v27  ;;  %v384_v6 = vsub.f32 1.0, %v879_v61  ;;  %v1597_v36 = vmul.f32 %v382_v33, %v1521_v37  ;;  %v1620_v37 = vld [vmem:[%s1983_s0 + $0x138] sm:$0xff] }
  0x2f   :  { %2031 = vst [vmem:[#allocation23_spill] sm:$0xff] %v1575_v5  ;;  %v385_v61 = vsub.f32 1.0, %v880_v42  ;;  %vm145_vm7 = vcmp.ge.f32.partialorder %v1620_v37, 1.0 }
  0x30   :  { %2032 = vst [vmem:[#allocation24_spill] sm:$0xff] %v1580_v15  ;;  %v1611_v27 = vmul.f32 %v383_v10, %v1535_v54  ;;  %v1614_v33 = vmul.f32 %v384_v6, %v1540_v63  ;;  %v1627_v10 = vld [vmem:[%s1983_s0 + $0x140] sm:$0xff]  ;;  %v883_v63 = vsel %vm143_vm5, 1.0, %v2033_v14 }
  0x31   :  { %1151 = vst [vmem:[%s1984_s1 + $0x78] sm:$0xff] %v1039_v39   ;;  %v881_v39 = vsel %vm141_vm3, 1.0, %v2033_v14  ;;  %v1630_v6 = vmul.f32 %v385_v61, %v1557_v48  ;;  %v1644_v61 = vld [vmem:[%s1983_s0 + $0x148] sm:$0xff]  ;;  %v1649_v48 = vld [vmem:[%s1983_s0 + $0x150] sm:$0xff]  ;;  %vm146_vm8 = vcmp.ge.f32.partialorder %v1627_v10, 1.0 }
  0x32   :  { %2034 = vst [vmem:[#allocation25_spill] sm:$0xff] %v1589_v49  ;;  %v1045_v11 = vpack.c.bf16 %v881_v39, %v880_v42  ;;  %vm147_vm9 = vcmp.ge.f32.partialorder %v1644_v61, 1.0  ;;  %vm148_vm10 = vcmp.ge.f32.partialorder %v1649_v48, 1.0  ;;  %v1705_v49 = vld [vmem:[%s1983_s0 + $0x178] sm:$0xff] }
  0x33   :  { %2035 = vst [vmem:[#allocation26_spill] sm:$0xff] %v1594_v53  ;;  %vm153_vm15 = vcmp.ge.f32.partialorder %v1705_v49, 1.0 }
  0x34   :  { %2036 = vst [vmem:[#allocation27_spill] sm:$0xff] %v1597_v36  ;;  %v386_v36 = vsub.f32 1.0, %v881_v39 }
  0x35   :  { %2037 = vst [vmem:[#allocation28_spill] sm:$0xff] %v1605_v25 }
  0x36   :  { %1152 = vst [vmem:[%s1984_s1 + $0x80] sm:$0xff] %v1042_v50   ;;  %v882_v50 = vsel %vm142_vm4, 1.0, %v2033_v14  ;;  %v1638_v42 = vmul.f32 %v386_v36, %v1575_v5 }
  0x37   :  { %2038 = vst [vmem:[#allocation29_spill] sm:$0xff] %v1611_v27  ;;  %v387_v54 = vsub.f32 1.0, %v882_v50  ;;  %v1048_v39 = vpack.c.bf16 %v883_v63, %v882_v50  ;;  %v885_v50 = vsel %vm145_vm7, 1.0, %v2033_v14 }
  0x38   :  { %2039 = vst [vmem:[#allocation30_spill] sm:$0xff] %v1614_v33  ;;  %v388_v33 = vsub.f32 1.0, %v883_v63  ;;  %v884_v63 = vsel %vm144_vm6, 1.0, %v2033_v14  ;;  %v390_v27 = vsub.f32 1.0, %v885_v50 }
  0x39   :  { %2040 = vst [vmem:[#allocation31_spill] sm:$0xff] %v1620_v37  ;;  %v1657_v36 = vmul.f32 %v387_v54, %v1580_v15  ;;  %v886_v54 = vsel %vm146_vm8, 1.0, %v2033_v14 }
  0x3a   :  { %2041 = vst [vmem:[#allocation32_spill] sm:$0xff] %v1627_v10  ;;  %v1666_v5 = vmul.f32 %v388_v33, %v1594_v53  ;;  %v1679_v33 = vmul.f32 %v390_v27, %v1620_v37  ;;  %v1685_v53 = vld [vmem:[%s1983_s0 + $0x160] sm:$0xff]  ;;  %v888_v37 = vsel %vm148_vm10, 1.0, %v2033_v14 }
  0x3b   :  { %2042 = vst [vmem:[#allocation33_spill] sm:$0xff] %v1630_v6  ;;  %v389_v6 = vsub.f32 1.0, %v884_v63  ;;  %v393_v15 = vsub.f32 1.0, %v888_v37  ;;  %vm150_vm12 = vcmp.ge.f32.partialorder %v1685_v53, 1.0 }
  0x3c   :  { %1153 = vst [vmem:[%s1984_s1 + $0x88] sm:$0xff] %v1045_v11   ;;  %v1654_v11 = vld [vmem:[%s1983_s0 + $0x158] sm:$0xff] }
  0x3d   :  { %2043 = vst [vmem:[#allocation34_spill] sm:$0xff] %v1638_v42  ;;  %v1051_v42 = vpack.c.bf16 %v885_v50, %v884_v63  ;;  %vm149_vm11 = vcmp.ge.f32.partialorder %v1654_v11, 1.0  ;;  %v887_v63 = vsel %vm147_vm9, 1.0, %v2033_v14  ;;  %v391_v50 = vsub.f32 1.0, %v886_v54 }
  0x3e   :  { %2044 = vst [vmem:[#allocation35_spill] sm:$0xff] %v1644_v61  ;;  %v1054_v27 = vpack.c.bf16 %v887_v63, %v886_v54 }
  0x3f   :  { %2045 = vst [vmem:[#allocation36_spill] sm:$0xff] %v1649_v48 }
  0x40   :  { %2046 = vst [vmem:[#allocation37_spill] sm:$0xff] %v1654_v11 }
  0x41   :  { %2047 = vst [vmem:[#allocation38_spill] sm:$0xff] %v1657_v36 }
  0x42   :  { %1154 = vst [vmem:[%s1984_s1 + $0x90] sm:$0xff] %v1048_v39   ;;  %v1676_v39 = vmul.f32 %v389_v6, %v1605_v25  ;;  %v1695_v6 = vld [vmem:[%s1983_s0 + $0x170] sm:$0xff]  ;;  %v889_v25 = vsel %vm149_vm11, 1.0, %v2033_v14 }
  0x43   :  { %2048 = vst [vmem:[#allocation39_spill] sm:$0xff] %v1666_v5  ;;  %v1690_v5 = vld [vmem:[%s1983_s0 + $0x168] sm:$0xff]  ;;  %v394_v36 = vsub.f32 1.0, %v889_v25  ;;  %vm152_vm14 = vcmp.ge.f32.partialorder %v1695_v6, 1.0 }
  0x44   :  { %1155 = vst [vmem:[%s1984_s1 + $0x98] sm:$0xff] %v1051_v42   ;;  %v392_v42 = vsub.f32 1.0, %v887_v63  ;;  %vm151_vm13 = vcmp.ge.f32.partialorder %v1690_v5, 1.0 }
  0x45   :  { %2049 = vst [vmem:[#allocation40_spill] sm:$0xff] %v1676_v39  ;;  %v1057_v39 = vpack.c.bf16 %v889_v25, %v888_v37  ;;  %v1719_v37 = vld [vmem:[%s1983_s0 + $0x180] sm:$0xff]  ;;  %v1725_v25 = vmul.f32 %v393_v15, %v1649_v48  ;;  %v1728_v63 = vmul.f32 %v394_v36, %v1654_v11  ;;  %v498_v15 = vmul.f32 0.5, %v1249_v19 }
  0x46   :  { %2050 = vst [vmem:[#allocation41_spill] sm:$0xff] %v1679_v33  ;;  %v1700_v33 = vmul.f32 %v391_v50, %v1627_v10  ;;  %v1711_v54 = vmul.f32 %v392_v42, %v1644_v61  ;;  %v890_v50 = vsel %vm150_vm12, 1.0, %v2033_v14  ;;  %vm154_vm0 = vcmp.ge.f32.partialorder %v1719_v37, 1.0 }
  0x47   :  { %1156 = vst [vmem:[%s1984_s1 + $0xa0] sm:$0xff] %v1054_v27   ;;  %v891_v27 = vsel %vm151_vm13, 1.0, %v2033_v14  ;;  %v395_v61 = vsub.f32 1.0, %v890_v50  ;;  %v894_v48 = vsel %vm154_vm0, 1.0, %v2033_v14 }
  0x48   :  { %2051 = vst [vmem:[#allocation42_spill] sm:$0xff] %v1700_v33  ;;  %v1060_v42 = vpack.c.bf16 %v891_v27, %v890_v50  ;;  %v396_v10 = vsub.f32 1.0, %v891_v27  ;;  %v893_v33 = vsel %vm153_vm15, 1.0, %v2033_v14 }
  0x49   :  { %2052 = vst [vmem:[#allocation43_spill] sm:$0xff] %v1711_v54  ;;  %v892_v54 = vsel %vm152_vm14, 1.0, %v2033_v14  ;;  %v1741_v36 = vmul.f32 %v395_v61, %v1685_v53  ;;  %v398_v11 = vsub.f32 1.0, %v893_v33  ;;  %v301_v61 = vpack.c.bf16 %v894_v48, %v894_v48 }
  0x4a   :  { %1157 = vst [vmem:[%s1984_s1 + $0xa8] sm:$0xff] %v1057_v39   ;;  %v1744_v39 = vmul.f32 %v396_v10, %v1690_v5  ;;  %v1063_v50 = vpack.c.bf16 %v893_v33, %v892_v54  ;;  %v397_v27 = vsub.f32 1.0, %v892_v54  ;;  %v500_v10 = vmul.f32 0.5, %v1265_v23 }
  0x4b   :  { %2053 = vst [vmem:[#allocation44_spill] sm:$0xff] %v1725_v25  ;;  %v499_v25 = vmul.f32 0.5, %v1252_v20  ;;  %v1757_v54 = vmul.f32 %v398_v11, %v1705_v49  ;;  %v502_v23 = vmul.f32 0.5, %v1289_v32 }
  0x4c   :  { %2054 = vst [vmem:[#allocation45_spill] sm:$0xff] %v1728_v63  ;;  %v547_v63 = vadd.f32 %v498_v15, %v1199_v0  ;;  %v1753_v19 = vmul.f32 %v397_v27, %v1695_v6  ;;  %v501_v0 = vmul.f32 0.5, %v1268_v24 }
  0x4d   :  { %1158 = vst [vmem:[%s1984_s1 + $0xb0] sm:$0xff] %v1060_v42   ;;  %v399_v42 = vsub.f32 1.0, %v894_v48  ;;  %v548_v33 = vadd.f32 %v499_v25, %v1204_v1  ;;  %v549_v48 = vadd.f32 %v500_v10, %v1209_v2  ;;  %v503_v1 = vmul.f32 0.5, %v1298_v35 }
  0x4e   :  { %1159 = vst [vmem:[%s1984_s1 + $0xb8] sm:$0xff] %v1063_v50   ;;  %vm596_vm1 = vcmp.ge.f32.partialorder %v547_v63, 1.0  ;;  %v550_v63 = vadd.f32 %v501_v0, %v1216_v3  ;;  %v551_v25 = vadd.f32 %v502_v23, %v1222_v4  ;;  %v504_v50 = vmul.f32 0.5, %v1308_v40 }
  0x4f   :  { %350 = vst [vmem:[%s1984_s1 + $0xc0] sm:$0xf] %v301_v61  ;;  %v1765_v20 = vmul.f32 %v399_v42, %v1719_v37  ;;  %v895_v15 = vsel %vm596_vm1, 1.0, %v2033_v14  ;;  %vm597_vm2 = vcmp.ge.f32.partialorder %v548_v33, 1.0  ;;  %vm598_vm3 = vcmp.ge.f32.partialorder %v549_v48, 1.0 }
  0x50   :  { %v743_v11 = vpack.c.bf16 %v895_v15, %v895_v15  ;;  %v896_v24 = vsel %vm597_vm2, 1.0, %v2033_v14  ;;  %v897_v2 = vsel %vm598_vm3, 1.0, %v2033_v14  ;;  %vm599_vm4 = vcmp.ge.f32.partialorder %v550_v63, 1.0 }
  0x51   :  { %v552_v32 = vadd.f32 %v503_v1, %v1231_v9  ;;  %v505_v3 = vmul.f32 0.5, %v1311_v41  ;;  %v1066_v27 = vpack.c.bf16 %v897_v2, %v896_v24  ;;  %vm600_vm5 = vcmp.ge.f32.partialorder %v551_v25, 1.0 }
  0x52   :  { %944 = vst [vmem:[%s1984_s1 + $0xc4] sm:$0xf] %v743_v11  ;;  %v898_v35 = vsel %vm599_vm4, 1.0, %v2033_v14  ;;  %v553_v61 = vadd.f32 %v504_v50, %v1238_v17  ;;  %v899_v4 = vsel %vm600_vm5, 1.0, %v2033_v14  ;;  %v506_v40 = vmul.f32 0.5, %v1332_v51 }
  0x53   :  { %vm601_vm6 = vcmp.ge.f32.partialorder %v552_v32, 1.0  ;;  %v554_v42 = vadd.f32 %v505_v3, %v1243_v18  ;;  %1160 = vst [vmem:[%s1984_s1 + $0xc8] sm:$0xff] %v1066_v27   ;;  %v1069_v9 = vpack.c.bf16 %v899_v4, %v898_v35  ;;  %v507_v10 = vmul.f32 0.5, %v1343_v56 }
  0x54   :  { %vm602_vm7 = vcmp.ge.f32.partialorder %v553_v61, 1.0  ;;  %v900_v41 = vsel %vm601_vm6, 1.0, %v2033_v14  ;;  %v555_v17 = vadd.f32 %v506_v40, %v1259_v22  ;;  %v508_v0 = vmul.f32 0.5, %v1362_v59  ;;  %v2055_v40 = vld [vmem:[#allocation2_spill] sm:$0xff] }
  0x55   :  { %v901_v33 = vsel %vm602_vm7, 1.0, %v2033_v14  ;;  %vm603_vm8 = vcmp.ge.f32.partialorder %v554_v42, 1.0  ;;  %1161 = vst [vmem:[%s1984_s1 + $0xd0] sm:$0xff] %v1069_v9   ;;  %v556_v15 = vadd.f32 %v507_v10, %v1276_v29  ;;  %v509_v48 = vmul.f32 0.5, %v1365_v60 }
  0x56   :  { %v1072_v18 = vpack.c.bf16 %v901_v33, %v900_v41  ;;  %v902_v51 = vsel %vm603_vm8, 1.0, %v2033_v14  ;;  %vm604_vm9 = vcmp.ge.f32.partialorder %v555_v17, 1.0  ;;  %v557_v56 = vadd.f32 %v508_v0, %v1281_v30  ;;  %v2057_v33 = vld [vmem:[#allocation9_spill] sm:$0xff] }
  0x57   :  { %v510_v23 = vmul.f32 0.5, %v1383_v12  ;;  %v511_v22 = vmul.f32 0.5, %v1386_v13  ;;  %v903_v59 = vsel %vm604_vm9, 1.0, %v2033_v14  ;;  %vm605_vm10 = vcmp.ge.f32.partialorder %v556_v15, 1.0  ;;  %v2058_v0 = vld [vmem:[#allocation13_spill] sm:$0xff]  ;;  %v2059_v15 = vld [vmem:[#allocation15_spill] sm:$0xff] }
  0x58   :  { %1162 = vst [vmem:[%s1984_s1 + $0xd8] sm:$0xff] %v1072_v18   ;;  %v558_v11 = vadd.f32 %v509_v48, %v1286_v31  ;;  %v512_v29 = vmul.f32 0.5, %v1405_v28  ;;  %v1075_v63 = vpack.c.bf16 %v903_v59, %v902_v51  ;;  %vm606_vm11 = vcmp.ge.f32.partialorder %v557_v56, 1.0  ;;  %v2060_v56 = vld [vmem:[#allocation18_spill] sm:$0xff]  ;;  %v2061_v59 = vld [vmem:[#allocation4_spill] sm:$0xff] }
  0x59   :  { %v904_v60 = vsel %vm605_vm10, 1.0, %v2033_v14  ;;  %v559_v30 = vadd.f32 %v510_v23, %v1317_v44  ;;  %v905_v12 = vsel %vm606_vm11, 1.0, %v2033_v14  ;;  %v560_v13 = vadd.f32 %v511_v22, %v1322_v45 }
  0x5a   :  { %vm607_vm12 = vcmp.ge.f32.partialorder %v558_v11, 1.0  ;;  %v561_v1 = vadd.f32 %v512_v29, %v1327_v46  ;;  %1163 = vst [vmem:[%s1984_s1 + $0xe0] sm:$0xff] %v1075_v63   ;;  %v1078_v31 = vpack.c.bf16 %v905_v12, %v904_v60  ;;  %v513_v24 = vmul.f32 0.5, %v1413_v38  ;;  %v2062_v29 = vld [vmem:[#allocation5_spill] sm:$0xff]  ;;  %v2063_v60 = vld [vmem:[#allocation19_spill] sm:$0xff] }
  0x5b   :  { %vm608_vm13 = vcmp.ge.f32.partialorder %v559_v30, 1.0  ;;  %v906_v28 = vsel %vm607_vm12, 1.0, %v2033_v14  ;;  %vm609_vm14 = vcmp.ge.f32.partialorder %v560_v13, 1.0  ;;  %v514_v44 = vmul.f32 0.5, %v1427_v43  ;;  %v2064_v13 = vld [vmem:[#allocation6_spill] sm:$0xff] }
  0x5c   :  { %v907_v25 = vsel %vm608_vm13, 1.0, %v2033_v14  ;;  %vm610_vm15 = vcmp.ge.f32.partialorder %v561_v1, 1.0  ;;  %1164 = vst [vmem:[%s1984_s1 + $0xe8] sm:$0xff] %v1078_v31   ;;  %v908_v46 = vsel %vm609_vm14, 1.0, %v2033_v14  ;;  %v562_v2 = vadd.f32 %v513_v24, %v1337_v55  ;;  %v2065_v31 = vld [vmem:[#allocation7_spill] sm:$0xff]  ;;  %v2066_v24 = vld [vmem:[#allocation21_spill] sm:$0xff] }
  0x5d   :  { %v1081_v45 = vpack.c.bf16 %v907_v25, %v906_v28  ;;  %v909_v50 = vsel %vm610_vm15, 1.0, %v2033_v14  ;;  %v563_v38 = vadd.f32 %v514_v44, %v1351_v57  ;;  %v515_v3 = vmul.f32 0.5, %v1430_v47  ;;  %v2067_v44 = vld [vmem:[#allocation8_spill] sm:$0xff] }
  0x5e   :  { %v1084_v32 = vpack.c.bf16 %v909_v50, %v908_v46  ;;  %v516_v27 = vmul.f32 0.5, %v1446_v62  ;;  %vm611_vm0 = vcmp.ge.f32.partialorder %v562_v2, 1.0  ;;  %v517_v43 = vmul.f32 0.5, %v1454_v7  ;;  %v2068_v46 = vld [vmem:[#allocation22_spill] sm:$0xff] }
  0x5f   :  { %1165 = vst [vmem:[%s1984_s1 + $0xf0] sm:$0xff] %v1081_v45   ;;  %v518_v35 = vmul.f32 0.5, %v1473_v26  ;;  %v519_v61 = vmul.f32 0.5, %v1482_v34  ;;  %vm612_vm1 = vcmp.ge.f32.partialorder %v563_v38, 1.0  ;;  %v910_v55 = vsel %vm611_vm0, 1.0, %v2033_v14 }
  0x60   :  { %1166 = vst [vmem:[%s1984_s1 + $0xf8] sm:$0xff] %v1084_v32   ;;  %v564_v57 = vadd.f32 %v515_v3, %v1356_v58  ;;  %v565_v47 = vadd.f32 %v516_v27, %v1373_v8  ;;  %v911_v62 = vsel %vm612_vm1, 1.0, %v2033_v14  ;;  %v566_v4 = vadd.f32 %v517_v43, %v1391_v16  ;;  %v2069_v43 = vld [vmem:[#allocation10_spill] sm:$0xff] }
  0x61   :  { %v567_v7 = vadd.f32 %v518_v35, %v1396_v21  ;;  %v520_v26 = vmul.f32 0.5, %v1492_v52  ;;  %v1087_v34 = vpack.c.bf16 %v911_v62, %v910_v55  ;;  %v568_v42 = vadd.f32 %v519_v61, %v2055_v40  ;;  %v2056_v21 = vld [vmem:[#allocation3_spill] sm:$0xff]  ;;  %v2070_v55 = vld [vmem:[#allocation25_spill] sm:$0xff] }
  0x62   :  { %vm613_vm2 = vcmp.ge.f32.partialorder %v564_v57, 1.0  ;;  %vm614_vm3 = vcmp.ge.f32.partialorder %v565_v47, 1.0  ;;  %vm615_vm4 = vcmp.ge.f32.partialorder %v566_v4, 1.0  ;;  %v521_v17 = vmul.f32 0.5, %v2057_v33  ;;  %v2071_v47 = vld [vmem:[#allocation11_spill] sm:$0xff]  ;;  %v2077_v33 = vld [vmem:[#allocation16_spill] sm:$0xff] }
  0x63   :  { %v912_v9 = vsel %vm613_vm2, 1.0, %v2033_v14  ;;  %v913_v41 = vsel %vm614_vm3, 1.0, %v2033_v14  ;;  %vm616_vm5 = vcmp.ge.f32.partialorder %v567_v7, 1.0  ;;  %1167 = vst [vmem:[%s1984_s1 + $0x100] sm:$0xff] %v1087_v34   ;;  %v914_v8 = vsel %vm615_vm4, 1.0, %v2033_v14  ;;  %v2072_v7 = vld [vmem:[#allocation27_spill] sm:$0xff] }
  0x64   :  { %v1090_v58 = vpack.c.bf16 %v913_v41, %v912_v9  ;;  %v915_v16 = vsel %vm616_vm5, 1.0, %v2033_v14  ;;  %v569_v52 = vadd.f32 %v520_v26, %v2056_v21  ;;  %vm617_vm6 = vcmp.ge.f32.partialorder %v568_v42, 1.0  ;;  %v2073_v34 = vld [vmem:[#allocation29_spill] sm:$0xff]  ;;  %v2074_v9 = vld [vmem:[#allocation12_spill] sm:$0xff] }
  0x65   :  { %v1093_v10 = vpack.c.bf16 %v915_v16, %v914_v8  ;;  %v522_v18 = vmul.f32 0.5, %v2058_v0  ;;  %v916_v51 = vsel %vm617_vm6, 1.0, %v2033_v14  ;;  %v523_v48 = vmul.f32 0.5, %v2059_v15  ;;  %v2078_v0 = vld [vmem:[#allocation33_spill] sm:$0xff] }
  0x66   :  { %1168 = vst [vmem:[%s1984_s1 + $0x108] sm:$0xff] %v1090_v58   ;;  %vm618_vm7 = vcmp.ge.f32.partialorder %v569_v52, 1.0  ;;  %v524_v23 = vmul.f32 0.5, %v2060_v56  ;;  %v570_v11 = vadd.f32 %v521_v17, %v2061_v59  ;;  %v525_v30 = vmul.f32 0.5, %v2063_v60  ;;  %v2075_v58 = vld [vmem:[#allocation30_spill] sm:$0xff]  ;;  %v2082_v60 = vld [vmem:[#allocation20_spill] sm:$0xff] }
  0x67   :  { %1169 = vst [vmem:[%s1984_s1 + $0x110] sm:$0xff] %v1093_v10   ;;  %v917_v22 = vsel %vm618_vm7, 1.0, %v2033_v14  ;;  %v571_v63 = vadd.f32 %v522_v18, %v2062_v29  ;;  %v572_v1 = vadd.f32 %v523_v48, %v2064_v13  ;;  %v526_v25 = vmul.f32 0.5, %v2066_v24  ;;  %v2076_v52 = vld [vmem:[#allocation14_spill] sm:$0xff]  ;;  %v2083_v13 = vld [vmem:[#allocation23_spill] sm:$0xff] }
  0x68   :  { %v1096_v12 = vpack.c.bf16 %v917_v22, %v916_v51  ;;  %v573_v28 = vadd.f32 %v524_v23, %v2065_v31  ;;  %vm619_vm8 = vcmp.ge.f32.partialorder %v570_v11, 1.0  ;;  %v574_v45 = vadd.f32 %v525_v30, %v2067_v44  ;;  %v2079_v51 = vld [vmem:[#allocation17_spill] sm:$0xff]  ;;  %v2080_v48 = vld [vmem:[#allocation34_spill] sm:$0xff]  ;;  %v2084_v31 = vld [vmem:[#allocation24_spill] sm:$0xff] }
  0x69   :  { %vm620_vm9 = vcmp.ge.f32.partialorder %v571_v63, 1.0  ;;  %v527_v50 = vmul.f32 0.5, %v2068_v46  ;;  %v918_v2 = vsel %vm619_vm8, 1.0, %v2033_v14  ;;  %vm621_vm10 = vcmp.ge.f32.partialorder %v572_v1, 1.0  ;;  %v2081_v22 = vld [vmem:[#allocation38_spill] sm:$0xff] }
  0x6a   :  { %1170 = vst [vmem:[%s1984_s1 + $0x118] sm:$0xff] %v1096_v12   ;;  %v919_v32 = vsel %vm620_vm9, 1.0, %v2033_v14  ;;  %vm622_vm11 = vcmp.ge.f32.partialorder %v573_v28, 1.0  ;;  %v920_v3 = vsel %vm621_vm10, 1.0, %v2033_v14  ;;  %v575_v35 = vadd.f32 %v526_v25, %v2069_v43  ;;  %v2085_v25 = vld [vmem:[#allocation39_spill] sm:$0xff]  ;;  %v2088_v43 = vld [vmem:[#allocation26_spill] sm:$0xff] }
  0x6b   :  { %v1099_v38 = vpack.c.bf16 %v919_v32, %v918_v2  ;;  %v921_v27 = vsel %vm622_vm11, 1.0, %v2033_v14  ;;  %vm623_vm12 = vcmp.ge.f32.partialorder %v574_v45, 1.0  ;;  %v528_v57 = vmul.f32 0.5, %v2070_v55  ;;  %v2086_v45 = vld [vmem:[#allocation40_spill] sm:$0xff]  ;;  %v2087_v2 = vld [vmem:[#allocation41_spill] sm:$0xff] }
  0x6c   :  { %v1102_v61 = vpack.c.bf16 %v921_v27, %v920_v3  ;;  %v576_v62 = vadd.f32 %v527_v50, %v2071_v47  ;;  %vm624_vm13 = vcmp.ge.f32.partialorder %v575_v35, 1.0  ;;  %v922_v4 = vsel %vm623_vm12, 1.0, %v2033_v14  ;;  %v2089_v55 = vld [vmem:[#allocation28_spill] sm:$0xff]  ;;  %v2090_v47 = vld [vmem:[#allocation42_spill] sm:$0xff] }
  0x6d   :  { %1171 = vst [vmem:[%s1984_s1 + $0x120] sm:$0xff] %v1099_v38   ;;  %v529_v26 = vmul.f32 0.5, %v2072_v7  ;;  %v530_v40 = vmul.f32 0.5, %v2073_v34  ;;  %v923_v42 = vsel %vm624_vm13, 1.0, %v2033_v14  ;;  %v577_v41 = vadd.f32 %v528_v57, %v2074_v9  ;;  %v2094_v9 = vld [vmem:[#allocation45_spill] sm:$0xff] }
  0x6e   :  { %1172 = vst [vmem:[%s1984_s1 + $0x128] sm:$0xff] %v1102_v61   ;;  %vm625_vm14 = vcmp.ge.f32.partialorder %v576_v62, 1.0  ;;  %v531_v8 = vmul.f32 0.5, %v2075_v58  ;;  %v1105_v16 = vpack.c.bf16 %v923_v42, %v922_v4  ;;  %v532_v18 = vmul.f32 0.5, %v2078_v0  ;;  %v2091_v4 = vld [vmem:[#allocation31_spill] sm:$0xff] }
  0x6f   :  { %v924_v21 = vsel %vm625_vm14, 1.0, %v2033_v14  ;;  %v578_v10 = vadd.f32 %v529_v26, %v2076_v52  ;;  %v579_v17 = vadd.f32 %v530_v40, %v2077_v33  ;;  %vm626_vm15 = vcmp.ge.f32.partialorder %v577_v41, 1.0  ;;  %v2092_v26 = vld [vmem:[#allocation43_spill] sm:$0xff]  ;;  %v2093_v40 = vld [vmem:[#allocation44_spill] sm:$0xff] }
  0x70   :  { %v580_v15 = vadd.f32 %v531_v8, %v2079_v51  ;;  %v533_v56 = vmul.f32 0.5, %v2080_v48  ;;  %1173 = vst [vmem:[%s1984_s1 + $0x130] sm:$0xff] %v1105_v16   ;;  %v925_v23 = vsel %vm626_vm15, 1.0, %v2033_v14  ;;  %v534_v59 = vmul.f32 0.5, %v2081_v22  ;;  %v2095_v8 = vld [vmem:[#allocation32_spill] sm:$0xff] }
  0x71   :  { %vm627_vm0 = vcmp.ge.f32.partialorder %v578_v10, 1.0  ;;  %vm628_vm1 = vcmp.ge.f32.partialorder %v579_v17, 1.0  ;;  %v1108_v11 = vpack.c.bf16 %v925_v23, %v924_v21  ;;  %v581_v30 = vadd.f32 %v532_v18, %v2082_v60  ;;  %v2096_v10 = vld [vmem:[#allocation35_spill] sm:$0xff]  ;;  %v2097_v17 = vld [vmem:[#allocation36_spill] sm:$0xff] }
  0x72   :  { %v926_v29 = vsel %vm627_vm0, 1.0, %v2033_v14  ;;  %v927_v63 = vsel %vm628_vm1, 1.0, %v2033_v14  ;;  %vm629_vm2 = vcmp.ge.f32.partialorder %v580_v15, 1.0  ;;  %v582_v1 = vadd.f32 %v533_v56, %v2083_v13  ;;  %v2098_v15 = vld [vmem:[#allocation37_spill] sm:$0xff] }
  0x73   :  { %v1111_v12 = vpack.c.bf16 %v927_v63, %v926_v29  ;;  %v583_v28 = vadd.f32 %v534_v59, %v2084_v31  ;;  %1174 = vst [vmem:[%s1984_s1 + $0x138] sm:$0xff] %v1108_v11   ;;  %vm630_vm3 = vcmp.ge.f32.partialorder %v581_v30, 1.0  ;;  %v928_v24 = vsel %vm629_vm2, 1.0, %v2033_v14 }
  0x74   :  { %v535_v44 = vmul.f32 0.5, %v2085_v25  ;;  %v536_v46 = vmul.f32 0.5, %v2086_v45  ;;  %v929_v50 = vsel %vm630_vm3, 1.0, %v2033_v14  ;;  %vm631_vm4 = vcmp.ge.f32.partialorder %v582_v1, 1.0 }
  0x75   :  { %1175 = vst [vmem:[%s1984_s1 + $0x140] sm:$0xff] %v1111_v12   ;;  %vm632_vm5 = vcmp.ge.f32.partialorder %v583_v28, 1.0  ;;  %v537_v32 = vmul.f32 0.5, %v2087_v2  ;;  %v1114_v38 = vpack.c.bf16 %v929_v50, %v928_v24  ;;  %v930_v3 = vsel %vm631_vm4, 1.0, %v2033_v14 }
  0x76   :  { %v931_v27 = vsel %vm632_vm5, 1.0, %v2033_v14  ;;  %v584_v35 = vadd.f32 %v535_v44, %v2088_v43  ;;  %v585_v57 = vadd.f32 %v536_v46, %v2089_v55  ;;  %v538_v62 = vmul.f32 0.5, %v2090_v47 }
  0x77   :  { %v1117_v61 = vpack.c.bf16 %v931_v27, %v930_v3  ;;  %v586_v7 = vadd.f32 %v537_v32, %v2091_v4  ;;  %1176 = vst [vmem:[%s1984_s1 + $0x148] sm:$0xff] %v1114_v38   ;;  %v539_v34 = vmul.f32 0.5, %v2092_v26  ;;  %v540_v42 = vmul.f32 0.5, %v2093_v40 }
  0x78   :  { %vm633_vm6 = vcmp.ge.f32.partialorder %v584_v35, 1.0  ;;  %v541_v41 = vmul.f32 0.5, %v2094_v9  ;;  %vm634_vm7 = vcmp.ge.f32.partialorder %v585_v57, 1.0  ;;  %v587_v16 = vadd.f32 %v538_v62, %v2095_v8 }
  0x79   :  { %1177 = vst [vmem:[%s1984_s1 + $0x150] sm:$0xff] %v1117_v61   ;;  %v932_v58 = vsel %vm633_vm6, 1.0, %v2033_v14  ;;  %vm635_vm8 = vcmp.ge.f32.partialorder %v586_v7, 1.0  ;;  %v933_v21 = vsel %vm634_vm7, 1.0, %v2033_v14  ;;  %v588_v33 = vadd.f32 %v539_v34, %v2096_v10 }
  0x7a   :  { %v934_v52 = vsel %vm635_vm8, 1.0, %v2033_v14  ;;  %v589_v0 = vadd.f32 %v540_v42, %v2097_v17  ;;  %v1120_v18 = vpack.c.bf16 %v933_v21, %v932_v58  ;;  %vm636_vm9 = vcmp.ge.f32.partialorder %v587_v16, 1.0 }
  0x7b   :  { %v542_v51 = vmul.f32 0.5, %v1741_v36  ;;  %v590_v48 = vadd.f32 %v541_v41, %v2098_v15  ;;  %v935_v56 = vsel %vm636_vm9, 1.0, %v2033_v14  ;;  %vm637_vm10 = vcmp.ge.f32.partialorder %v588_v33, 1.0 }
  0x7c   :  { %vm638_vm11 = vcmp.ge.f32.partialorder %v589_v0, 1.0  ;;  %v543_v23 = vmul.f32 0.5, %v1744_v39  ;;  %1178 = vst [vmem:[%s1984_s1 + $0x158] sm:$0xff] %v1120_v18   ;;  %v1123_v22 = vpack.c.bf16 %v935_v56, %v934_v52  ;;  %v936_v59 = vsel %vm637_vm10, 1.0, %v2033_v14 }
  0x7d   :  { %v937_v11 = vsel %vm638_vm11, 1.0, %v2033_v14  ;;  %v591_v29 = vadd.f32 %v542_v51, %v1685_v53  ;;  %vm639_vm12 = vcmp.ge.f32.partialorder %v590_v48, 1.0  ;;  %v544_v63 = vmul.f32 0.5, %v1753_v19 }
  0x7e   :  { %v1126_v36 = vpack.c.bf16 %v937_v11, %v936_v59  ;;  %v592_v60 = vadd.f32 %v543_v23, %v1690_v5  ;;  %1179 = vst [vmem:[%s1984_s1 + $0x160] sm:$0xff] %v1123_v22   ;;  %v938_v39 = vsel %vm639_vm12, 1.0, %v2033_v14  ;;  %v545_v30 = vmul.f32 0.5, %v1757_v54 }
  0x7f   :  { %vm640_vm13 = vcmp.ge.f32.partialorder %v591_v29, 1.0  ;;  %v546_v12 = vmul.f32 0.5, %v1765_v20  ;;  %v593_v19 = vadd.f32 %v544_v63, %v1695_v6 }
  0x80   :  { %1180 = vst [vmem:[%s1984_s1 + $0x168] sm:$0xff] %v1126_v36   ;;  %v939_v53 = vsel %vm640_vm13, 1.0, %v2033_v14  ;;  %vm641_vm14 = vcmp.ge.f32.partialorder %v592_v60, 1.0  ;;  %v594_v1 = vadd.f32 %v545_v30, %v1705_v49 }
  0x81   :  { %v1129_v5 = vpack.c.bf16 %v939_v53, %v938_v39  ;;  %v940_v13 = vsel %vm641_vm14, 1.0, %v2033_v14  ;;  %v595_v31 = vadd.f32 %v546_v12, %v1719_v37  ;;  %vm642_vm15 = vcmp.ge.f32.partialorder %v593_v19, 1.0 }
  0x82   :  { %v941_v54 = vsel %vm642_vm15, 1.0, %v2033_v14  ;;  %vm643_vm0 = vcmp.ge.f32.partialorder %v594_v1, 1.0 }
  0x83   :  { %1181 = vst [vmem:[%s1984_s1 + $0x170] sm:$0xff] %v1129_v5   ;;  %vm644_vm1 = vcmp.ge.f32.partialorder %v595_v31, 1.0  ;;  %v1132_v20 = vpack.c.bf16 %v941_v54, %v940_v13  ;;  %v942_v6 = vsel %vm643_vm0, 1.0, %v2033_v14 }
  0x84   :  { %v943_v28 = vsel %vm644_vm1, 1.0, %v2033_v14 }
  0x85   :  { %v1135_v24 = vpack.c.bf16 %v943_v28, %v942_v6  ;;  %1182 = vst [vmem:[%s1984_s1 + $0x178] sm:$0xff] %v1132_v20  }
  0x87   :  { %1183 = vst [vmem:[%s1984_s1 + $0x180] sm:$0xff] %v1135_v24  }

// kernel: mnist_net_forward.6
= control target key start
LH: loop header
LB: loop body
LE: loop exit
PB: predicated region body
PF: predicated region fallthrough
CT: control target
= control target key end

     0   :  { %8 = vsyncpa [#allocation4], 0  ;;  %s3220_s0 = inlined_call_operand.vmem [shape: bf16[1568,9], index: 0, kind: input, shape index: {}]   ;;  %s3221_s1 = inlined_call_operand.hbm [shape: bf16[9,32], index: 1, kind: input, shape index: {}]   ;;  %s3222_s2 = inlined_call_operand.hbm [shape: f32[1,32], index: 2, kind: input, shape index: {}]   ;;  %s3223_s3 = inlined_call_operand.vmem [shape: f32[1568,32], index: 3, kind: output, shape index: {}]  }
   0x1   :  { %9 = vsyncpa [#allocation6], 0  ;;  %s2313_s12 = smov 0   ;;  %s2315_s13 = smov 0  }
   0x2   :  { %s2317_s14 = smov 0  }
   0x3 LB: > { %s1829_s15 = sadd.s32 4294967295, %s2285_s14   ;;  %s34_s16 = sadd.s32 1, %s2281_s13  ;;  %s2285_s14 = sphi %s2317_s14, %s15_s14   ;;  %s2281_s13 = sphi %s2315_s13, %s3227_s13   ;;  %s2277_s12 = sphi %s2313_s12, %s3226_s12  }
   0x4   : > { %p36_p0 = scmp.ge.s32.totalorder %s34_s16, 2  ;;  %p1831_p1 = scmp.ge.s32.totalorder %s2285_s14, 1 }
   0x5   : > { %p149_p2 = scmp.lt.s32.totalorder %s2285_s14, 3  ;;  %p2338_p4 = scmp.eq.s32.totalorder %s1829_s15, 0 }
   0x6   : > { %s3229_s16 = smov (%p36_p0, %s34_s16), 0  ;;  %s164_s21 = sshll.u32 %s3221_s1, 4  ;;  %s165_s21 = int_to_ptr.hbm [resolvable:$true] %s164_s21 }
   0x7   : > { %p2334_p3 = pnand %p1831_p1, %p149_p2  ;;  %s2287_s22 = smov [#allocation3]  }
   0x8   : > { %s166_s23 = sshll.u32 %s2287_s22, 4  ;;  %s180_s26 = sshll.u32 %s3222_s2, 4  ;;  %s167_s23 = int_to_ptr.vmem [resolvable:$true] %s166_s23  ;;  %s181_s26 = int_to_ptr.hbm [resolvable:$true] %s180_s26 }
   0x9   : > { %p2152_p5 = pneg %p2334_p3  ;;  %s2288_s27 = smov 64  }
   0xa   : > { %s2289_s28 = smov 4   ;;  %s2290_s29 = smov [#allocation5]  }
   0xb   : > { %p2153_p6 = pnand %p2338_p4, %p2152_p5  ;;  %s182_s30 = sshll.u32 %s2290_s29, 4  ;;  %s183_s30 = int_to_ptr.vmem [resolvable:$true] %s182_s30 }
   0xc   : > { %207 = sbr.rel (%p2334_p3) target bundleno = 375 (0x177), region = 32 }
   0xd   : > { %2155 = dma.hbm_to_vmem [thread:$0]  (!%p2153_p6), %s165_s21, 128, %s167_s23, [#allocation4], %s2288_s27, %s2288_s27, %s2289_s28  }
   0xe   : > { %2158 = dma.hbm_to_vmem [thread:$0]  (!%p2153_p6), %s181_s26, 16, %s183_s30, [#allocation6]  }
  0x11   : > { %2268 = dma.done.wait (%p2338_p4), [#allocation4], 128  }
  0x12   : > { %2270 = vsyncadd (%p2338_p4), [#allocation4], 4294967168 }
  0x13   : > { %2272 = dma.done.wait (%p2338_p4), [#allocation6], 16  }
  0x14   : > { %2274 = vsyncadd (%p2338_p4), [#allocation6], 4294967280  ;;  %vm962_vm0 = vcmask 1043456   ;;  %s243_s4 = smul.u32 98, %s2277_s12  ;;  %vm963_vm1 = vcmask 1044480   ;;  %v2291_v0 = vmov 65535  }
  0x15   : > { %v964_v1 = vsel %vm962_vm0, 4294967295, %v2291_v0  ;;  %v2038_v3 = vld [vmem:[#allocation3] sm:$0xf]  ;;  %v2140_v4 = vld [vmem:[#allocation3] sm:$0x10]  ;;  %vm814_vm2 = vcmask 72704  }
  0x16   : > { %p244_p7 = scmp.lt.s32.totalorder %s243_s4, 195  ;;  %v965_v2 = vsel %vm963_vm1, %v964_v1, 0  ;;  %v2039_v5 = vor.u32 %v2140_v4, %v2038_v3  ;;  %vm267_vm3 = vcmask 261120   ;;  %v2292_v31 = vmov 0.0   ;;  %v2531_v41 = vld [vmem:[#allocation5] ss:$0 sm:$0xff] }
  0x17   : > { %268 = vst.msk [vmem:[#allocation2] sm:$0xff] %vm267_vm3, %v2292_v31 }
  0x18   : > { %s3231_s4 = smov (!%p244_p7, %s243_s4), 195  ;;  %v967_v6 = vand.u32 %v2039_v5, %v965_v2  ;;  %269 = vst.msk [vmem:[#allocation2 + $0x8] sm:$0xff] %vm267_vm3, %v2292_v31 }
  0x19   : > { %s1838_s5 = sshll.u32 %s3231_s4, 2  ;;  %270 = vst.msk [vmem:[#allocation2 + $0x10] sm:$0xff] %vm267_vm3, %v2292_v31  ;;  %s1839_s9 = sshll.u32 %s3231_s4, 3 }
  0x1a   : > { %s2369_s8 = scalar_lea.vmem %s3220_s0, %s1838_s5  ;;  %976 = vmatpush.bf16.msra.mxu0 %v967_v6  ;;  %2141 = vmatpush.bf16.msra.mxu1 %v967_v6  ;;  %271 = vst.msk [vmem:[#allocation2 + $0x18] sm:$0xff] %vm267_vm3, %v2292_v31  ;;  %s2542_s12 = scalar_lea.vmem %s3223_s3, %s1839_s9 }
  0x1b   : > { %v2091_v7 = vld [vmem:[%s2369_s8] sm:$0xff]  ;;  %v2104_v8 = vld [vmem:[%s2369_s8 + $0x68] sm:$0xff]  ;;  %v2117_v9 = vld [vmem:[%s2369_s8 + $0xd0] sm:$0xff]  ;;  %2142 = vmatpush.bf16.msra.mxu2 %v967_v6  ;;  %2143 = vmatpush.bf16.msra.mxu3 %v967_v6  ;;  %272 = vst.msk [vmem:[#allocation2 + $0x20] sm:$0xff] %vm267_vm3, %v2292_v31 }
  0x1c   : > { %v2130_v10 = vld [vmem:[%s2369_s8 + $0x138] sm:$0xff]  ;;  %v2092_v11 = vld [vmem:[%s2369_s8 + $0x8] sm:$0xff]  ;;  %v2105_v12 = vld [vmem:[%s2369_s8 + $0x70] sm:$0xff]  ;;  %273 = vst.msk [vmem:[#allocation2 + $0x28] sm:$0xff] %vm267_vm3, %v2292_v31 }
  0x1d   : > { %2040 = vmatmul.msk.bf16.vlgmr.msra.gmra.mxu0 %vm814_vm2, %v2091_v7  ;;  %2053 = vmatmul.msk.bf16.vlgmr.msra.gmra.mxu1 %vm814_vm2, %v2104_v8  ;;  %v2118_v13 = vld [vmem:[%s2369_s8 + $0xd8] sm:$0xff]  ;;  %v2131_v14 = vld [vmem:[%s2369_s8 + $0x140] sm:$0xff]  ;;  %v2093_v15 = vld [vmem:[%s2369_s8 + $0x10] sm:$0xff]  ;;  %274 = vst.msk [vmem:[#allocation2 + $0x30] sm:$0xff] %vm267_vm3, %v2292_v31 }
  0x1e   : > { %2066 = vmatmul.msk.bf16.vlgmr.msra.gmra.mxu2 %vm814_vm2, %v2117_v9  ;;  %2079 = vmatmul.msk.bf16.vlgmr.msra.gmra.mxu3 %vm814_vm2, %v2130_v10  ;;  %v2106_v16 = vld [vmem:[%s2369_s8 + $0x78] sm:$0xff]  ;;  %v2119_v17 = vld [vmem:[%s2369_s8 + $0xe0] sm:$0xff]  ;;  %v2132_v18 = vld [vmem:[%s2369_s8 + $0x148] sm:$0xff]  ;;  %275 = vst.msk [vmem:[#allocation2 + $0x38] sm:$0xff] %vm267_vm3, %v2292_v31 }
  0x1f   : > { %v2094_v19 = vld [vmem:[%s2369_s8 + $0x18] sm:$0xff]  ;;  %v2107_v20 = vld [vmem:[%s2369_s8 + $0x80] sm:$0xff]  ;;  %v2120_v21 = vld [vmem:[%s2369_s8 + $0xe8] sm:$0xff]  ;;  %276 = vst.msk [vmem:[#allocation2 + $0x40] sm:$0xff] %vm267_vm3, %v2292_v31 }
  0x20   : > { %v2133_v22 = vld [vmem:[%s2369_s8 + $0x150] sm:$0xff]  ;;  %v2095_v23 = vld [vmem:[%s2369_s8 + $0x20] sm:$0xff]  ;;  %v2108_v24 = vld [vmem:[%s2369_s8 + $0x88] sm:$0xff]  ;;  %277 = vst.msk [vmem:[#allocation2 + $0x48] sm:$0xff] %vm267_vm3, %v2292_v31 }
  0x21   : > { %v2121_v25 = vld [vmem:[%s2369_s8 + $0xf0] sm:$0xff]  ;;  %v2134_v26 = vld [vmem:[%s2369_s8 + $0x158] sm:$0xff]  ;;  %v2096_v27 = vld [vmem:[%s2369_s8 + $0x28] sm:$0xff]  ;;  %278 = vst.msk [vmem:[#allocation2 + $0x50] sm:$0xff] %vm267_vm3, %v2292_v31 }
  0x22   : > { %v2109_v28 = vld [vmem:[%s2369_s8 + $0x90] sm:$0xff]  ;;  %v2122_v29 = vld [vmem:[%s2369_s8 + $0xf8] sm:$0xff]  ;;  %v2135_v30 = vld [vmem:[%s2369_s8 + $0x160] sm:$0xff]  ;;  %279 = vst.msk [vmem:[#allocation2 + $0x58] sm:$0xff] %vm267_vm3, %v2292_v31 }
  0x23   : > { %v2097_v32 = vld [vmem:[%s2369_s8 + $0x30] sm:$0xff]  ;;  %v2110_v33 = vld [vmem:[%s2369_s8 + $0x98] sm:$0xff]  ;;  %v2123_v34 = vld [vmem:[%s2369_s8 + $0x100] sm:$0xff]  ;;  %280 = vst.msk [vmem:[#allocation2 + $0x60] sm:$0xff] %vm267_vm3, %v2292_v31 }
  0x24   : > { %281 = vst.msk [vmem:[#allocation2 + $0x68] sm:$0xff] %vm267_vm3, %v2292_v31  ;;  %v2098_v35 = vld [vmem:[%s2369_s8 + $0x38] sm:$0xff]  ;;  %v2111_v36 = vld [vmem:[%s2369_s8 + $0xa0] sm:$0xff]  ;;  %v2124_v37 = vld [vmem:[%s2369_s8 + $0x108] sm:$0xff] }
  0x25   : > { %282 = vst.msk [vmem:[#allocation2 + $0x70] sm:$0xff] %vm267_vm3, %v2292_v31  ;;  %v366_v38 = vld [vmem:[#allocation2] sm:$0xff]  ;;  %v2112_v46 = vld [vmem:[%s2369_s8 + $0xa8] sm:$0xff]  ;;  %v2125_v47 = vld [vmem:[%s2369_s8 + $0x110] sm:$0xff] }
  0x26   : > { %283 = vst.msk [vmem:[#allocation2 + $0x78] sm:$0xff] %vm267_vm3, %v2292_v31  ;;  %v2099_v45 = vld [vmem:[%s2369_s8 + $0x40] sm:$0xff]  ;;  %v2136_v51 = vld [vmem:[%s2369_s8 + $0x168] sm:$0xff]  ;;  %v2113_v56 = vld [vmem:[%s2369_s8 + $0xb0] sm:$0xff] }
  0x27   : > { %284 = vst.msk [vmem:[#allocation2 + $0x80] sm:$0xff] %vm267_vm3, %v2292_v31  ;;  %v2100_v55 = vld [vmem:[%s2369_s8 + $0x48] sm:$0xff]  ;;  %v2126_v57 = vld [vmem:[%s2369_s8 + $0x118] sm:$0xff]  ;;  %v2137_v61 = vld [vmem:[%s2369_s8 + $0x170] sm:$0xff] }
  0x28   : > { %285 = vst.msk [vmem:[#allocation2 + $0x88] sm:$0xff] %vm267_vm3, %v2292_v31  ;;  %v2101_v2 = vld [vmem:[%s2369_s8 + $0x50] sm:$0xff]  ;;  %v2114_v3 = vld [vmem:[%s2369_s8 + $0xb8] sm:$0xff]  ;;  %v2127_v4 = vld [vmem:[%s2369_s8 + $0x120] sm:$0xff] }
  0x29   : > { %286 = vst.msk [vmem:[#allocation2 + $0x90] sm:$0xff] %vm267_vm3, %v2292_v31  ;;  %v367_v6 = vld [vmem:[#allocation2 + $0x8] sm:$0xff] }
  0x2a   : > { %287 = vst.msk [vmem:[#allocation2 + $0x98] sm:$0xff] %vm267_vm3, %v2292_v31 }
  0x2b   : > { %288 = vst.msk [vmem:[#allocation2 + $0xa0] sm:$0xff] %vm267_vm3, %v2292_v31 }
  0x2c   : > { %289 = vst.msk [vmem:[#allocation2 + $0xa8] sm:$0xff] %vm267_vm3, %v2292_v31 }
  0x2d   : > { %2041 = vmatmul.msk.bf16.gmra.mxu0 %vm814_vm2, %v2092_v11  ;;  %2054 = vmatmul.msk.bf16.gmra.mxu1 %vm814_vm2, %v2105_v12  ;;  %290 = vst.msk [vmem:[#allocation2 + $0xb0] sm:$0xff] %vm267_vm3, %v2292_v31  ;;  %v368_v12 = vld [vmem:[#allocation2 + $0x10] sm:$0xff] }
  0x2e   : > { %2067 = vmatmul.msk.bf16.gmra.mxu2 %vm814_vm2, %v2118_v13  ;;  %2080 = vmatmul.msk.bf16.gmra.mxu3 %vm814_vm2, %v2131_v14  ;;  %291 = vst.msk [vmem:[#allocation2 + $0xb8] sm:$0xff] %vm267_vm3, %v2292_v31 }
  0x2f   : > { %292 = vst.msk [vmem:[#allocation2 + $0xc0] sm:$0xff] %vm267_vm3, %v2292_v31 }
  0x30   : > { %293 = vst.msk [vmem:[#allocation2 + $0xc8] sm:$0xff] %vm267_vm3, %v2292_v31 }
  0x31   : > { %294 = vst.msk [vmem:[#allocation2 + $0xd0] sm:$0xff] %vm267_vm3, %v2292_v31 }
  0x32   : > { %295 = vst.msk [vmem:[#allocation2 + $0xd8] sm:$0xff] %vm267_vm3, %v2292_v31 }
  0x33   : > { %296 = vst.msk [vmem:[#allocation2 + $0xe0] sm:$0xff] %vm267_vm3, %v2292_v31 }
  0x34   : > { %297 = vst.msk [vmem:[#allocation2 + $0xe8] sm:$0xff] %vm267_vm3, %v2292_v31 }
  0x35   : > { %298 = vst.msk [vmem:[#allocation2 + $0xf0] sm:$0xff] %vm267_vm3, %v2292_v31 }
  0x36   : > { %299 = vst.msk [vmem:[#allocation2 + $0xf8] sm:$0xff] %vm267_vm3, %v2292_v31 }
  0x37   : > { %300 = vst.msk [vmem:[#allocation2 + $0x100] sm:$0xff] %vm267_vm3, %v2292_v31 }
  0x38   : > { %301 = vst.msk [vmem:[#allocation2 + $0x108] sm:$0xff] %vm267_vm3, %v2292_v31  ;;  %v392_v63 = vld [vmem:[#allocation2 + $0xd0] sm:$0xff] }
  0x39   : > { %302 = vst.msk [vmem:[#allocation2 + $0x110] sm:$0xff] %vm267_vm3, %v2292_v31  ;;  %v393_v8 = vld [vmem:[#allocation2 + $0xd8] sm:$0xff] }
  0x3a   : > { %303 = vst.msk [vmem:[#allocation2 + $0x118] sm:$0xff] %vm267_vm3, %v2292_v31 }
  0x3b   : > { %304 = vst.msk [vmem:[#allocation2 + $0x120] sm:$0xff] %vm267_vm3, %v2292_v31 }
  0x3c   : > { %305 = vst.msk [vmem:[#allocation2 + $0x128] sm:$0xff] %vm267_vm3, %v2292_v31 }
  0x3d   : > { %2042 = vmatmul.msk.bf16.gmra.mxu0 %vm814_vm2, %v2093_v15  ;;  %2055 = vmatmul.msk.bf16.gmra.mxu1 %vm814_vm2, %v2106_v16  ;;  %306 = vst.msk [vmem:[#allocation2 + $0x130] sm:$0xff] %vm267_vm3, %v2292_v31  ;;  %v394_v15 = vld [vmem:[#allocation2 + $0xe0] sm:$0xff] }
  0x3e   : > { %2068 = vmatmul.msk.bf16.gmra.mxu2 %vm814_vm2, %v2119_v17  ;;  %2081 = vmatmul.msk.bf16.gmra.mxu3 %vm814_vm2, %v2132_v18  ;;  %307 = vst.msk [vmem:[#allocation2 + $0x138] sm:$0xff] %vm267_vm3, %v2292_v31 }
  0x3f   : > { %308 = vst.msk [vmem:[#allocation2 + $0x140] sm:$0xff] %vm267_vm3, %v2292_v31 }
  0x40   : > { %309 = vst.msk [vmem:[#allocation2 + $0x148] sm:$0xff] %vm267_vm3, %v2292_v31 }
  0x41   : > { %310 = vst.msk [vmem:[#allocation2 + $0x150] sm:$0xff] %vm267_vm3, %v2292_v31 }
  0x42   : > { %311 = vst.msk [vmem:[#allocation2 + $0x158] sm:$0xff] %vm267_vm3, %v2292_v31 }
  0x43   : > { %312 = vst.msk [vmem:[#allocation2 + $0x160] sm:$0xff] %vm267_vm3, %v2292_v31 }
  0x44   : > { %313 = vst.msk [vmem:[#allocation2 + $0x168] sm:$0xff] %vm267_vm3, %v2292_v31 }
  0x45   : > { %314 = vst.msk [vmem:[#allocation2 + $0x170] sm:$0xff] %vm267_vm3, %v2292_v31 }
  0x46   : > { %315 = vst.msk [vmem:[#allocation2 + $0x178] sm:$0xff] %vm267_vm3, %v2292_v31 }
  0x47   : > { %316 = vst.msk [vmem:[#allocation2 + $0x180] sm:$0xff] %vm267_vm3, %v2292_v31 }
  0x48   : > { %317 = vst.msk [vmem:[#allocation2 + $0x188] sm:$0xff] %vm267_vm3, %v2292_v31 }
  0x49   : > { %318 = vst.msk [vmem:[#allocation2 + $0x190] sm:$0xff] %vm267_vm3, %v2292_v31 }
  0x4a   : > { %319 = vst.msk [vmem:[#allocation2 + $0x198] sm:$0xff] %vm267_vm3, %v2292_v31 }
  0x4b   : > { %320 = vst.msk [vmem:[#allocation2 + $0x1a0] sm:$0xff] %vm267_vm3, %v2292_v31 }
  0x4c   : > { %321 = vst.msk [vmem:[#allocation2 + $0x1a8] sm:$0xff] %vm267_vm3, %v2292_v31 }
  0x4d   : > { %2043 = vmatmul.msk.bf16.gmra.mxu0 %vm814_vm2, %v2094_v19  ;;  %2056 = vmatmul.msk.bf16.gmra.mxu1 %vm814_vm2, %v2107_v20  ;;  %322 = vst.msk [vmem:[#allocation2 + $0x1b0] sm:$0xff] %vm267_vm3, %v2292_v31 }
  0x4e   : > { %2069 = vmatmul.msk.bf16.gmra.mxu2 %vm814_vm2, %v2120_v21  ;;  %2082 = vmatmul.msk.bf16.gmra.mxu3 %vm814_vm2, %v2133_v22  ;;  %323 = vst.msk [vmem:[#allocation2 + $0x1b8] sm:$0xff] %vm267_vm3, %v2292_v31  ;;  %v369_v21 = vld [vmem:[#allocation2 + $0x18] sm:$0xff] }
  0x4f   : > { %324 = vst.msk [vmem:[#allocation2 + $0x1c0] sm:$0xff] %vm267_vm3, %v2292_v31  ;;  %v2138_v22 = vld [vmem:[%s2369_s8 + $0x178] sm:$0xff] }
  0x50   : > { %325 = vst.msk [vmem:[#allocation2 + $0x1c8] sm:$0xff] %vm267_vm3, %v2292_v31 }
  0x51   : > { %326 = vst.msk [vmem:[#allocation2 + $0x1d0] sm:$0xff] %vm267_vm3, %v2292_v31 }
  0x52   : > { %327 = vst.msk [vmem:[#allocation2 + $0x1d8] sm:$0xff] %vm267_vm3, %v2292_v31  ;;  %v418_v5 = vld [vmem:[#allocation2 + $0x1a0] sm:$0xff] }
  0x53   : > { %328 = vst.msk [vmem:[#allocation2 + $0x1e0] sm:$0xff] %vm267_vm3, %v2292_v31  ;;  %v419_v10 = vld [vmem:[#allocation2 + $0x1a8] sm:$0xff] }
  0x54   : > { %329 = vst.msk [vmem:[#allocation2 + $0x1e8] sm:$0xff] %vm267_vm3, %v2292_v31  ;;  %v420_v17 = vld [vmem:[#allocation2 + $0x1b0] sm:$0xff] }
  0x55   : > { %330 = vst.msk [vmem:[#allocation2 + $0x1f0] sm:$0xff] %vm267_vm3, %v2292_v31 }
  0x56   : > { %331 = vst.msk [vmem:[#allocation2 + $0x1f8] sm:$0xff] %vm267_vm3, %v2292_v31 }
  0x57   : > { %332 = vst.msk [vmem:[#allocation2 + $0x200] sm:$0xff] %vm267_vm3, %v2292_v31 }
  0x58   : > { %333 = vst.msk [vmem:[#allocation2 + $0x208] sm:$0xff] %vm267_vm3, %v2292_v31 }
  0x59   : > { %334 = vst.msk [vmem:[#allocation2 + $0x210] sm:$0xff] %vm267_vm3, %v2292_v31 }
  0x5a   : > { %335 = vst.msk [vmem:[#allocation2 + $0x218] sm:$0xff] %vm267_vm3, %v2292_v31 }
  0x5b   : > { %336 = vst.msk [vmem:[#allocation2 + $0x220] sm:$0xff] %vm267_vm3, %v2292_v31 }
  0x5c   : > { %337 = vst.msk [vmem:[#allocation2 + $0x228] sm:$0xff] %vm267_vm3, %v2292_v31 }
  0x5d   : > { %2044 = vmatmul.msk.bf16.gmra.mxu0 %vm814_vm2, %v2095_v23  ;;  %2057 = vmatmul.msk.bf16.gmra.mxu1 %vm814_vm2, %v2108_v24  ;;  %338 = vst.msk [vmem:[#allocation2 + $0x230] sm:$0xff] %vm267_vm3, %v2292_v31  ;;  %v395_v24 = vld [vmem:[#allocation2 + $0xe8] sm:$0xff] }
  0x5e   : > { %2070 = vmatmul.msk.bf16.gmra.mxu2 %vm814_vm2, %v2121_v25  ;;  %2083 = vmatmul.msk.bf16.gmra.mxu3 %vm814_vm2, %v2134_v26  ;;  %339 = vst.msk [vmem:[#allocation2 + $0x238] sm:$0xff] %vm267_vm3, %v2292_v31 }
  0x5f   : > { %340 = vst.msk [vmem:[#allocation2 + $0x240] sm:$0xff] %vm267_vm3, %v2292_v31 }
  0x60   : > { %341 = vst.msk [vmem:[#allocation2 + $0x248] sm:$0xff] %vm267_vm3, %v2292_v31 }
  0x61   : > { %342 = vst.msk [vmem:[#allocation2 + $0x250] sm:$0xff] %vm267_vm3, %v2292_v31 }
  0x62   : > { %343 = vst.msk [vmem:[#allocation2 + $0x258] sm:$0xff] %vm267_vm3, %v2292_v31 }
  0x63   : > { %344 = vst.msk [vmem:[#allocation2 + $0x260] sm:$0xff] %vm267_vm3, %v2292_v31 }
  0x64   : > { %345 = vst.msk [vmem:[#allocation2 + $0x268] sm:$0xff] %vm267_vm3, %v2292_v31 }
  0x65   : > { %346 = vst.msk [vmem:[#allocation2 + $0x270] sm:$0xff] %vm267_vm3, %v2292_v31 }
  0x66   : > { %347 = vst.msk [vmem:[#allocation2 + $0x278] sm:$0xff] %vm267_vm3, %v2292_v31 }
  0x67   : > { %348 = vst.msk [vmem:[#allocation2 + $0x280] sm:$0xff] %vm267_vm3, %v2292_v31 }
  0x68   : > { %349 = vst.msk [vmem:[#allocation2 + $0x288] sm:$0xff] %vm267_vm3, %v2292_v31 }
  0x69   : > { %350 = vst.msk [vmem:[#allocation2 + $0x290] sm:$0xff] %vm267_vm3, %v2292_v31 }
  0x6a   : > { %351 = vst.msk [vmem:[#allocation2 + $0x298] sm:$0xff] %vm267_vm3, %v2292_v31 }
  0x6b   : > { %352 = vst.msk [vmem:[#allocation2 + $0x2a0] sm:$0xff] %vm267_vm3, %v2292_v31 }
  0x6c   : > { %353 = vst.msk [vmem:[#allocation2 + $0x2a8] sm:$0xff] %vm267_vm3, %v2292_v31 }
  0x6d   : > { %2045 = vmatmul.msk.bf16.gmra.mxu0 %vm814_vm2, %v2096_v27  ;;  %2058 = vmatmul.msk.bf16.gmra.mxu1 %vm814_vm2, %v2109_v28  ;;  %354 = vst.msk [vmem:[#allocation2 + $0x2b0] sm:$0xff] %vm267_vm3, %v2292_v31 }
  0x6e   : > { %2071 = vmatmul.msk.bf16.gmra.mxu2 %vm814_vm2, %v2122_v29  ;;  %2084 = vmatmul.msk.bf16.gmra.mxu3 %vm814_vm2, %v2135_v30  ;;  %355 = vst.msk [vmem:[#allocation2 + $0x2b8] sm:$0xff] %vm267_vm3, %v2292_v31 }
  0x6f   : > { %356 = vst.msk [vmem:[#allocation2 + $0x2c0] sm:$0xff] %vm267_vm3, %v2292_v31 }
  0x70   : > { %357 = vst.msk [vmem:[#allocation2 + $0x2c8] sm:$0xff] %vm267_vm3, %v2292_v31 }
  0x71   : > { %358 = vst.msk [vmem:[#allocation2 + $0x2d0] sm:$0xff] %vm267_vm3, %v2292_v31 }
  0x72   : > { %359 = vst.msk [vmem:[#allocation2 + $0x2d8] sm:$0xff] %vm267_vm3, %v2292_v31 }
  0x73   : > { %360 = vst.msk [vmem:[#allocation2 + $0x2e0] sm:$0xff] %vm267_vm3, %v2292_v31 }
  0x74   : > { %361 = vst.msk [vmem:[#allocation2 + $0x2e8] sm:$0xff] %vm267_vm3, %v2292_v31 }
  0x75   : > { %362 = vst.msk [vmem:[#allocation2 + $0x2f0] sm:$0xff] %vm267_vm3, %v2292_v31 }
  0x76   : > { %363 = vst.msk [vmem:[#allocation2 + $0x2f8] sm:$0xff] %vm267_vm3, %v2292_v31 }
  0x77   : > { %364 = vst.msk [vmem:[#allocation2 + $0x300] sm:$0xff] %vm267_vm3, %v2292_v31 }
  0x78   : > { %365 = vst.msk [vmem:[#allocation2 + $0x308] sm:$0xff] %vm267_vm3, %v2292_v31  ;;  %v2102_v31 = vld [vmem:[%s2369_s8 + $0x58] sm:$0xff] }
  0x7d   : > { %2046 = vmatmul.msk.bf16.gmra.mxu0 %vm814_vm2, %v2097_v32  ;;  %2059 = vmatmul.msk.bf16.gmra.mxu1 %vm814_vm2, %v2110_v33  ;;  %v2115_v32 = vld [vmem:[%s2369_s8 + $0xc0] sm:$0xff] }
  0x7e   : > { %2072 = vmatmul.msk.bf16.gmra.mxu2 %vm814_vm2, %v2123_v34  ;;  %2085 = vmatmul.msk.bf16.gmra.mxu3 %vm814_vm2, %v2136_v51 }
  0x8d   : > { %2047 = vmatmul.msk.bf16.gmra.mxu0 %vm814_vm2, %v2098_v35  ;;  %2060 = vmatmul.msk.bf16.gmra.mxu1 %vm814_vm2, %v2111_v36 }
  0x8e   : > { %2073 = vmatmul.msk.bf16.gmra.mxu2 %vm814_vm2, %v2124_v37  ;;  %2086 = vmatmul.msk.bf16.gmra.mxu3 %vm814_vm2, %v2137_v61  ;;  %v2128_v37 = vld [vmem:[%s2369_s8 + $0x128] sm:$0xff]  ;;  %v422_v61 = vld [vmem:[#allocation2 + $0x1c0] sm:$0xff] }
  0x9a   : > { %v978_v39 = vpop.f32.mrf.mxu0  ;;  %v2557_v44 = vpop.f32.mrf.mxu1 }
  0x9b   : > { %v1223_v40 = vadd.f32 %v978_v39, %v366_v38  ;;  %v1249_v7 = vadd.f32 %v2557_v44, %v392_v63 }
  0x9d   : > { %1322 = vst.msk [vmem:[#allocation2] sm:$0xff] %vm267_vm3, %v1223_v40  ;;  %2048 = vmatmul.msk.bf16.gmra.mxu0 %vm814_vm2, %v2099_v45  ;;  %2061 = vmatmul.msk.bf16.gmra.mxu1 %vm814_vm2, %v2112_v46 }
  0x9e   : > { %2074 = vmatmul.msk.bf16.gmra.mxu2 %vm814_vm2, %v2125_v47  ;;  %1348 = vst.msk [vmem:[#allocation2 + $0xd0] sm:$0xff] %vm267_vm3, %v1249_v7  ;;  %2087 = vmatmul.msk.bf16.gmra.mxu3 %vm814_vm2, %v2138_v22  ;;  %v2116_v22 = vld [vmem:[%s2369_s8 + $0xc8] sm:$0xff] }
  0xa1   : > { %v2579_v48 = vpop.f32.mrf.mxu2  ;;  %v2698_v27 = vpop.f32.mrf.mxu3 }
  0xa2   : > { %v2587_v49 = vpop.f32.mrf.mxu0  ;;  %v2589_v50 = vpop.f32.mrf.mxu1  ;;  %v1275_v9 = vadd.f32 %v2579_v48, %v418_v5  ;;  %v371_v5 = vld [vmem:[#allocation2 + $0x28] sm:$0xff] }
  0xa3   : > { %v1224_v11 = vadd.f32 %v2587_v49, %v367_v6  ;;  %v1250_v14 = vadd.f32 %v2589_v50, %v393_v8  ;;  %v421_v49 = vld [vmem:[#allocation2 + $0x1b8] sm:$0xff]  ;;  %v2139_v6 = vld [vmem:[%s2369_s8 + $0x180] sm:$0xff] }
  0xa4   : > { %v1423_v42 = vld [vmem:[#allocation2] sm:$0xff]  ;;  %1374 = vst.msk [vmem:[#allocation2 + $0x1a0] sm:$0xff] %vm267_vm3, %v1275_v9  ;;  %v397_v8 = vld [vmem:[#allocation2 + $0xf8] sm:$0xff]  ;;  %v423_v9 = vld [vmem:[#allocation2 + $0x1c8] sm:$0xff] }
  0xa5   : > { %v1525_v43 = vadd.f32 %v2531_v41, %v1423_v42  ;;  %1323 = vst.msk [vmem:[#allocation2 + $0x8] sm:$0xff] %vm267_vm3, %v1224_v11  ;;  %v1449_v30 = vld [vmem:[#allocation2 + $0xd0] sm:$0xff] }
  0xa6   : > { %1349 = vst.msk [vmem:[#allocation2 + $0xd8] sm:$0xff] %vm267_vm3, %v1250_v14  ;;  %v1551_v33 = vadd.f32 %v2531_v41, %v1449_v30  ;;  %v444_v11 = vld [vmem:[#allocation2 + $0x270] sm:$0xff] }
  0xa7   : > { %1623 = vst.msk [vmem:[%s2542_s12] sm:$0xff] %vm267_vm3, %v1525_v43 }
  0xa8   : > { %1649 = vst.msk [vmem:[%s2542_s12 + $0xd0] sm:$0xff] %vm267_vm3, %v1551_v33 }
  0xa9   : > { %v1110_v52 = vpop.f32.mrf.mxu2 }
  0xaa   : > { %v2609_v53 = vpop.f32.mrf.mxu0  ;;  %v2611_v54 = vpop.f32.mrf.mxu1  ;;  %v1276_v16 = vadd.f32 %v1110_v52, %v419_v10  ;;  %v370_v52 = vld [vmem:[#allocation2 + $0x20] sm:$0xff] }
  0xab   : > { %v1225_v20 = vadd.f32 %v2609_v53, %v368_v12  ;;  %v1251_v23 = vadd.f32 %v2611_v54, %v394_v15  ;;  %v1475_v34 = vld [vmem:[#allocation2 + $0x1a0] sm:$0xff]  ;;  %v2736_v54 = vpop.f32.mrf.mxu3 }
  0xac   : > { %1375 = vst.msk [vmem:[#allocation2 + $0x1a8] sm:$0xff] %vm267_vm3, %v1276_v16  ;;  %v1577_v38 = vadd.f32 %v2531_v41, %v1475_v34  ;;  %v1424_v39 = vld [vmem:[#allocation2 + $0x8] sm:$0xff]  ;;  %v1301_v16 = vadd.f32 %v2698_v27, %v444_v11 }
  0xad   : > { %2049 = vmatmul.msk.bf16.gmra.mxu0 %vm814_vm2, %v2100_v55  ;;  %2062 = vmatmul.msk.bf16.gmra.mxu1 %vm814_vm2, %v2113_v56  ;;  %1324 = vst.msk [vmem:[#allocation2 + $0x10] sm:$0xff] %vm267_vm3, %v1225_v20  ;;  %v1526_v40 = vadd.f32 %v2531_v41, %v1424_v39  ;;  %v1450_v42 = vld [vmem:[#allocation2 + $0xd8] sm:$0xff] }
  0xae   : > { %2075 = vmatmul.msk.bf16.gmra.mxu2 %vm814_vm2, %v2126_v57  ;;  %1350 = vst.msk [vmem:[#allocation2 + $0xe0] sm:$0xff] %vm267_vm3, %v1251_v23  ;;  %v1552_v43 = vadd.f32 %v2531_v41, %v1450_v42  ;;  %v396_v57 = vld [vmem:[#allocation2 + $0xf0] sm:$0xff]  ;;  %2088 = vmatmul.msk.bf16.gmra.mxu3 %vm814_vm2, %v2139_v6 }
  0xaf   : > { %1675 = vst.msk [vmem:[%s2542_s12 + $0x1a0] sm:$0xff] %vm267_vm3, %v1577_v38  ;;  %v2129_v23 = vld [vmem:[%s2369_s8 + $0x130] sm:$0xff] }
  0xb0   : > { %1624 = vst.msk [vmem:[%s2542_s12 + $0x8] sm:$0xff] %vm267_vm3, %v1526_v40  ;;  %v424_v42 = vld [vmem:[#allocation2 + $0x1d0] sm:$0xff] }
  0xb1   : > { %v1113_v58 = vpop.f32.mrf.mxu2  ;;  %1650 = vst.msk [vmem:[%s2542_s12 + $0xd8] sm:$0xff] %vm267_vm3, %v1552_v43 }
  0xb2   : > { %v985_v59 = vpop.f32.mrf.mxu0  ;;  %v1050_v60 = vpop.f32.mrf.mxu1  ;;  %v1277_v25 = vadd.f32 %v1113_v58, %v420_v17  ;;  %1400 = vst.msk [vmem:[#allocation2 + $0x270] sm:$0xff] %vm267_vm3, %v1301_v16 }
  0xb3   : > { %v1226_v26 = vadd.f32 %v985_v59, %v369_v21  ;;  %v1252_v28 = vadd.f32 %v1050_v60, %v395_v24  ;;  %v1476_v44 = vld [vmem:[#allocation2 + $0x1a8] sm:$0xff]  ;;  %v2769_v15 = vpop.f32.mrf.mxu3  ;;  %v2103_v21 = vld [vmem:[%s2369_s8 + $0x60] sm:$0xff] }
  0xb4   : > { %1376 = vst.msk [vmem:[#allocation2 + $0x1b0] sm:$0xff] %vm267_vm3, %v1277_v25  ;;  %v1578_v45 = vadd.f32 %v2531_v41, %v1476_v44  ;;  %v1425_v46 = vld [vmem:[#allocation2 + $0x10] sm:$0xff] }
  0xb5   : > { %1325 = vst.msk [vmem:[#allocation2 + $0x18] sm:$0xff] %vm267_vm3, %v1226_v26  ;;  %v1527_v47 = vadd.f32 %v2531_v41, %v1425_v46  ;;  %v1451_v48 = vld [vmem:[#allocation2 + $0xe0] sm:$0xff] }
  0xb6   : > { %1351 = vst.msk [vmem:[#allocation2 + $0xe8] sm:$0xff] %vm267_vm3, %v1252_v28  ;;  %v1553_v50 = vadd.f32 %v2531_v41, %v1451_v48  ;;  %v373_v48 = vld [vmem:[#allocation2 + $0x38] sm:$0xff] }
  0xb7   : > { %1676 = vst.msk [vmem:[%s2542_s12 + $0x1a8] sm:$0xff] %vm267_vm3, %v1578_v45  ;;  %v445_v45 = vld [vmem:[#allocation2 + $0x278] sm:$0xff] }
  0xb8   : > { %1625 = vst.msk [vmem:[%s2542_s12 + $0x10] sm:$0xff] %vm267_vm3, %v1527_v47 }
  0xb9   : > { %v2649_v62 = vpop.f32.mrf.mxu2  ;;  %1651 = vst.msk [vmem:[%s2542_s12 + $0xe0] sm:$0xff] %vm267_vm3, %v1553_v50  ;;  %v1501_v44 = vld [vmem:[#allocation2 + $0x270] sm:$0xff] }
  0xba   : > { %v2655_v0 = vpop.f32.mrf.mxu0  ;;  %v2657_v1 = vpop.f32.mrf.mxu1  ;;  %v1278_v60 = vadd.f32 %v2649_v62, %v421_v49  ;;  %v1603_v46 = vadd.f32 %v2531_v41, %v1501_v44 }
  0xbb   : > { %v1477_v51 = vld [vmem:[#allocation2 + $0x1b0] sm:$0xff]  ;;  %v1253_v7 = vadd.f32 %v2657_v1, %v396_v57  ;;  %v425_v57 = vld [vmem:[#allocation2 + $0x1d8] sm:$0xff] }
  0xbc   : > { %v1579_v55 = vadd.f32 %v2531_v41, %v1477_v51  ;;  %v1426_v56 = vld [vmem:[#allocation2 + $0x18] sm:$0xff]  ;;  %1377 = vst.msk [vmem:[#allocation2 + $0x1b8] sm:$0xff] %vm267_vm3, %v1278_v60  ;;  %v372_v1 = vld [vmem:[#allocation2 + $0x30] sm:$0xff] }
  0xbd   : > { %2050 = vmatmul.msk.bf16.gmra.mxu0 %vm814_vm2, %v2101_v2  ;;  %2063 = vmatmul.msk.bf16.gmra.mxu1 %vm814_vm2, %v2114_v3  ;;  %v1528_v58 = vadd.f32 %v2531_v41, %v1426_v56  ;;  %v1452_v59 = vld [vmem:[#allocation2 + $0xe8] sm:$0xff]  ;;  %1352 = vst.msk [vmem:[#allocation2 + $0xf0] sm:$0xff] %vm267_vm3, %v1253_v7  ;;  %v1302_v56 = vadd.f32 %v2736_v54, %v445_v45  ;;  %v400_v54 = vld [vmem:[#allocation2 + $0x110] sm:$0xff]  ;;  %v426_v7 = vld [vmem:[#allocation2 + $0x1e0] sm:$0xff] }
  0xbe   : > { %2076 = vmatmul.msk.bf16.gmra.mxu2 %vm814_vm2, %v2127_v4  ;;  %1677 = vst.msk [vmem:[%s2542_s12 + $0x1b0] sm:$0xff] %vm267_vm3, %v1579_v55  ;;  %v1554_v3 = vadd.f32 %v2531_v41, %v1452_v59  ;;  %v1227_v4 = vadd.f32 %v2655_v0, %v370_v52  ;;  %v399_v52 = vld [vmem:[#allocation2 + $0x108] sm:$0xff]  ;;  %v446_v59 = vld [vmem:[#allocation2 + $0x280] sm:$0xff] }
  0xbf   : > { %1626 = vst.msk [vmem:[%s2542_s12 + $0x18] sm:$0xff] %vm267_vm3, %v1528_v58 }
  0xc0   : > { %1652 = vst.msk [vmem:[%s2542_s12 + $0xe8] sm:$0xff] %vm267_vm3, %v1554_v3  ;;  %v374_v3 = vld [vmem:[#allocation2 + $0x40] sm:$0xff] }
  0xc1   : > { %v2680_v13 = vpop.f32.mrf.mxu2  ;;  %1326 = vst.msk [vmem:[#allocation2 + $0x20] sm:$0xff] %vm267_vm3, %v1227_v4 }
  0xc2   : > { %v2686_v18 = vpop.f32.mrf.mxu0  ;;  %v2688_v19 = vpop.f32.mrf.mxu1  ;;  %v1279_v62 = vadd.f32 %v2680_v13, %v422_v61  ;;  %v398_v13 = vld [vmem:[#allocation2 + $0x100] sm:$0xff]  ;;  %1701 = vst.msk [vmem:[%s2542_s12 + $0x270] sm:$0xff] %vm267_vm3, %v1603_v46  ;;  %v376_v46 = vld [vmem:[#allocation2 + $0x50] sm:$0xff] }
  0xc3   : > { %v1228_v10 = vadd.f32 %v2686_v18, %v371_v5  ;;  %v1254_v0 = vadd.f32 %v2688_v19, %v397_v8  ;;  %v1478_v24 = vld [vmem:[#allocation2 + $0x1b8] sm:$0xff]  ;;  %1401 = vst.msk [vmem:[#allocation2 + $0x278] sm:$0xff] %vm267_vm3, %v1302_v56  ;;  %v403_v56 = vld [vmem:[#allocation2 + $0x128] sm:$0xff] }
  0xc4   : > { %1378 = vst.msk [vmem:[#allocation2 + $0x1c0] sm:$0xff] %vm267_vm3, %v1279_v62  ;;  %v1580_v25 = vadd.f32 %v2531_v41, %v1478_v24  ;;  %v1453_v28 = vld [vmem:[#allocation2 + $0xf0] sm:$0xff] }
  0xc5   : > { %1327 = vst.msk [vmem:[#allocation2 + $0x28] sm:$0xff] %vm267_vm3, %v1228_v10 }
  0xc6   : > { %1353 = vst.msk [vmem:[#allocation2 + $0xf8] sm:$0xff] %vm267_vm3, %v1254_v0 }
  0xc7   : > { %1678 = vst.msk [vmem:[%s2542_s12 + $0x1b8] sm:$0xff] %vm267_vm3, %v1580_v25 }
  0xc8   : > { %v1427_v26 = vld [vmem:[#allocation2 + $0x20] sm:$0xff] }
  0xc9   : > { %v2702_v29 = vpop.f32.mrf.mxu2  ;;  %v1529_v27 = vadd.f32 %v2531_v41, %v1427_v26  ;;  %v375_v26 = vld [vmem:[#allocation2 + $0x48] sm:$0xff] }
  0xca   : > { %v2709_v35 = vpop.f32.mrf.mxu0  ;;  %v2711_v36 = vpop.f32.mrf.mxu1  ;;  %v1280_v12 = vadd.f32 %v2702_v29, %v423_v9  ;;  %v1555_v29 = vadd.f32 %v2531_v41, %v1453_v28 }
  0xcb   : > { %v1229_v17 = vadd.f32 %v2709_v35, %v372_v1  ;;  %v1255_v20 = vadd.f32 %v2711_v36, %v398_v13  ;;  %v1479_v30 = vld [vmem:[#allocation2 + $0x1c0] sm:$0xff]  ;;  %1627 = vst.msk [vmem:[%s2542_s12 + $0x20] sm:$0xff] %vm267_vm3, %v1529_v27  ;;  %v1502_v13 = vld [vmem:[#allocation2 + $0x278] sm:$0xff] }
  0xcc   : > { %1379 = vst.msk [vmem:[#allocation2 + $0x1c8] sm:$0xff] %vm267_vm3, %v1280_v12  ;;  %v1581_v33 = vadd.f32 %v2531_v41, %v1479_v30  ;;  %v1428_v34 = vld [vmem:[#allocation2 + $0x28] sm:$0xff]  ;;  %v1604_v16 = vadd.f32 %v2531_v41, %v1502_v13 }
  0xcd   : > { %2051 = vmatmul.msk.bf16.gmra.mxu0 %vm814_vm2, %v2102_v31  ;;  %2064 = vmatmul.msk.bf16.gmra.mxu1 %vm814_vm2, %v2115_v32  ;;  %1328 = vst.msk [vmem:[#allocation2 + $0x30] sm:$0xff] %vm267_vm3, %v1229_v17  ;;  %v1180_v32 = vpop.f32.mrf.mxu3  ;;  %v1530_v35 = vadd.f32 %v2531_v41, %v1428_v34  ;;  %v1454_v36 = vld [vmem:[#allocation2 + $0xf8] sm:$0xff]  ;;  %v427_v34 = vld [vmem:[#allocation2 + $0x1e8] sm:$0xff] }
  0xce   : > { %2077 = vmatmul.msk.bf16.gmra.mxu2 %vm814_vm2, %v2128_v37  ;;  %1354 = vst.msk [vmem:[#allocation2 + $0x100] sm:$0xff] %vm267_vm3, %v1255_v20  ;;  %v1556_v39 = vadd.f32 %v2531_v41, %v1454_v36 }
  0xcf   : > { %1653 = vst.msk [vmem:[%s2542_s12 + $0xf0] sm:$0xff] %vm267_vm3, %v1555_v29  ;;  %v401_v29 = vld [vmem:[#allocation2 + $0x118] sm:$0xff] }
  0xd0   : > { %1679 = vst.msk [vmem:[%s2542_s12 + $0x1c0] sm:$0xff] %vm267_vm3, %v1581_v33 }
  0xd1   : > { %v2734_v53 = vpop.f32.mrf.mxu2  ;;  %1628 = vst.msk [vmem:[%s2542_s12 + $0x28] sm:$0xff] %vm267_vm3, %v1530_v35 }
  0xd2   : > { %v2745_v63 = vpop.f32.mrf.mxu0  ;;  %v2747_v2 = vpop.f32.mrf.mxu1  ;;  %1654 = vst.msk [vmem:[%s2542_s12 + $0xf8] sm:$0xff] %vm267_vm3, %v1556_v39  ;;  %v1281_v51 = vadd.f32 %v2734_v53, %v424_v42 }
  0xd3   : > { %v1480_v40 = vld [vmem:[#allocation2 + $0x1c8] sm:$0xff]  ;;  %v1230_v58 = vadd.f32 %v2745_v63, %v373_v48  ;;  %v1256_v53 = vadd.f32 %v2747_v2, %v399_v52  ;;  %v1303_v63 = vadd.f32 %v2769_v15, %v446_v59  ;;  %1702 = vst.msk [vmem:[%s2542_s12 + $0x278] sm:$0xff] %vm267_vm3, %v1604_v16  ;;  %v402_v48 = vld [vmem:[#allocation2 + $0x120] sm:$0xff]  ;;  %v377_v52 = vld [vmem:[#allocation2 + $0x58] sm:$0xff] }
  0xd4   : > { %v1582_v43 = vadd.f32 %v2531_v41, %v1480_v40  ;;  %v1429_v47 = vld [vmem:[#allocation2 + $0x30] sm:$0xff]  ;;  %1380 = vst.msk [vmem:[#allocation2 + $0x1d0] sm:$0xff] %vm267_vm3, %v1281_v51  ;;  %v447_v2 = vld [vmem:[#allocation2 + $0x288] sm:$0xff]  ;;  %v449_v51 = vld [vmem:[#allocation2 + $0x298] sm:$0xff] }
  0xd5   : > { %v1531_v49 = vadd.f32 %v2531_v41, %v1429_v47  ;;  %v1455_v50 = vld [vmem:[#allocation2 + $0x100] sm:$0xff]  ;;  %v2828_v61 = vpop.f32.mrf.mxu3  ;;  %1329 = vst.msk [vmem:[#allocation2 + $0x38] sm:$0xff] %vm267_vm3, %v1230_v58  ;;  %v1304_v10 = vadd.f32 %v1180_v32, %v447_v2  ;;  %v448_v40 = vld [vmem:[#allocation2 + $0x290] sm:$0xff] }
  0xd6   : > { %1680 = vst.msk [vmem:[%s2542_s12 + $0x1c8] sm:$0xff] %vm267_vm3, %v1582_v43  ;;  %v1557_v55 = vadd.f32 %v2531_v41, %v1455_v50 }
  0xd7   : > { %1629 = vst.msk [vmem:[%s2542_s12 + $0x30] sm:$0xff] %vm267_vm3, %v1531_v49  ;;  %v428_v49 = vld [vmem:[#allocation2 + $0x1f0] sm:$0xff] }
  0xd8   : > { %1655 = vst.msk [vmem:[%s2542_s12 + $0x100] sm:$0xff] %vm267_vm3, %v1557_v55 }
  0xd9   : > { %v2767_v14 = vpop.f32.mrf.mxu2  ;;  %1355 = vst.msk [vmem:[#allocation2 + $0x108] sm:$0xff] %vm267_vm3, %v1256_v53 }
  0xda   : > { %v2775_v18 = vpop.f32.mrf.mxu0  ;;  %v2777_v19 = vpop.f32.mrf.mxu1  ;;  %v1282_v4 = vadd.f32 %v2767_v14, %v425_v57  ;;  %1402 = vst.msk [vmem:[#allocation2 + $0x280] sm:$0xff] %vm267_vm3, %v1303_v63 }
  0xdb   : > { %v1231_v8 = vadd.f32 %v2775_v18, %v374_v3  ;;  %v1257_v62 = vadd.f32 %v2777_v19, %v400_v54  ;;  %v1481_v1 = vld [vmem:[#allocation2 + $0x1d0] sm:$0xff]  ;;  %1403 = vst.msk [vmem:[#allocation2 + $0x288] sm:$0xff] %vm267_vm3, %v1304_v10 }
  0xdc   : > { %1381 = vst.msk [vmem:[#allocation2 + $0x1d8] sm:$0xff] %vm267_vm3, %v1282_v4  ;;  %v1583_v12 = vadd.f32 %v2531_v41, %v1481_v1  ;;  %v1430_v17 = vld [vmem:[#allocation2 + $0x38] sm:$0xff] }
  0xdd   : > { %2052 = vmatmul.msk.bf16.gmra.mxu0 %vm814_vm2, %v2103_v21  ;;  %2065 = vmatmul.msk.bf16.gmra.mxu1 %vm814_vm2, %v2116_v22  ;;  %1330 = vst.msk [vmem:[#allocation2 + $0x40] sm:$0xff] %vm267_vm3, %v1231_v8  ;;  %v2848_v0 = vpop.f32.mrf.mxu3  ;;  %v1532_v18 = vadd.f32 %v2531_v41, %v1430_v17 }
  0xde   : > { %2078 = vmatmul.msk.bf16.gmra.mxu2 %vm814_vm2, %v2129_v23  ;;  %1356 = vst.msk [vmem:[#allocation2 + $0x110] sm:$0xff] %vm267_vm3, %v1257_v62  ;;  %v1306_v59 = vadd.f32 %v2848_v0, %v449_v51 }
  0xdf   : > { %1681 = vst.msk [vmem:[%s2542_s12 + $0x1d0] sm:$0xff] %vm267_vm3, %v1583_v12 }
  0xe0   : > { %v1456_v19 = vld [vmem:[#allocation2 + $0x108] sm:$0xff]  ;;  %1630 = vst.msk [vmem:[%s2542_s12 + $0x38] sm:$0xff] %vm267_vm3, %v1532_v18  ;;  %v450_v18 = vld [vmem:[#allocation2 + $0x2a0] sm:$0xff] }
  0xe1   : > { %v1128_v31 = vpop.f32.mrf.mxu2  ;;  %v1558_v20 = vadd.f32 %v2531_v41, %v1456_v19  ;;  %v1503_v23 = vld [vmem:[#allocation2 + $0x280] sm:$0xff]  ;;  %1405 = vst.msk [vmem:[#allocation2 + $0x298] sm:$0xff] %vm267_vm3, %v1306_v59 }
  0xe2   : > { %v2802_v37 = vpop.f32.mrf.mxu0  ;;  %v2804_v38 = vpop.f32.mrf.mxu1  ;;  %v1283_v9 = vadd.f32 %v1128_v31, %v426_v7  ;;  %v1605_v24 = vadd.f32 %v2531_v41, %v1503_v23  ;;  %v1504_v36 = vld [vmem:[#allocation2 + $0x288] sm:$0xff] }
  0xe3   : > { %v1482_v21 = vld [vmem:[#allocation2 + $0x1d8] sm:$0xff]  ;;  %1656 = vst.msk [vmem:[%s2542_s12 + $0x108] sm:$0xff] %vm267_vm3, %v1558_v20  ;;  %v1232_v39 = vadd.f32 %v2802_v37, %v375_v26  ;;  %v1606_v44 = vadd.f32 %v2531_v41, %v1504_v36  ;;  %v1258_v45 = vadd.f32 %v2804_v38, %v401_v29  ;;  %v1305_v37 = vadd.f32 %v2828_v61, %v448_v40 }
  0xe4   : > { %1382 = vst.msk [vmem:[#allocation2 + $0x1e0] sm:$0xff] %vm267_vm3, %v1283_v9  ;;  %v1584_v22 = vadd.f32 %v2531_v41, %v1482_v21  ;;  %v1431_v25 = vld [vmem:[#allocation2 + $0x40] sm:$0xff] }
  0xe5   : > { %v1533_v27 = vadd.f32 %v2531_v41, %v1431_v25  ;;  %v1457_v28 = vld [vmem:[#allocation2 + $0x110] sm:$0xff]  ;;  %v2872_v31 = vpop.f32.mrf.mxu3  ;;  %1703 = vst.msk [vmem:[%s2542_s12 + $0x280] sm:$0xff] %vm267_vm3, %v1605_v24  ;;  %v378_v21 = vld [vmem:[#allocation2 + $0x60] sm:$0xff] }
  0xe6   : > { %1682 = vst.msk [vmem:[%s2542_s12 + $0x1d8] sm:$0xff] %vm267_vm3, %v1584_v22  ;;  %v1559_v32 = vadd.f32 %v2531_v41, %v1457_v28  ;;  %v404_v25 = vld [vmem:[#allocation2 + $0x130] sm:$0xff]  ;;  %v430_v28 = vld [vmem:[#allocation2 + $0x200] sm:$0xff] }
  0xe7   : > { %1631 = vst.msk [vmem:[%s2542_s12 + $0x40] sm:$0xff] %vm267_vm3, %v1533_v27  ;;  %v1307_v27 = vadd.f32 %v2872_v31, %v450_v18 }
  0xe8   : > { %1657 = vst.msk [vmem:[%s2542_s12 + $0x110] sm:$0xff] %vm267_vm3, %v1559_v32  ;;  %v1506_v17 = vld [vmem:[#allocation2 + $0x298] sm:$0xff]  ;;  %v451_v32 = vld [vmem:[#allocation2 + $0x2a8] sm:$0xff] }
  0xe9   : > { %v2826_v60 = vpop.f32.mrf.mxu2  ;;  %1704 = vst.msk [vmem:[%s2542_s12 + $0x288] sm:$0xff] %vm267_vm3, %v1606_v44  ;;  %v1608_v19 = vadd.f32 %v2531_v41, %v1506_v17  ;;  %v431_v44 = vld [vmem:[#allocation2 + $0x208] sm:$0xff]  ;;  %v381_v17 = vld [vmem:[#allocation2 + $0x78] sm:$0xff] }
  0xea   : > { %v2835_v5 = vpop.f32.mrf.mxu0  ;;  %v2837_v6 = vpop.f32.mrf.mxu1  ;;  %v1284_v47 = vadd.f32 %v2826_v60, %v427_v34  ;;  %1331 = vst.msk [vmem:[#allocation2 + $0x48] sm:$0xff] %vm267_vm3, %v1232_v39  ;;  %v405_v39 = vld [vmem:[#allocation2 + $0x138] sm:$0xff] }
  0xeb   : > { %v1483_v33 = vld [vmem:[#allocation2 + $0x1e0] sm:$0xff]  ;;  %v1233_v50 = vadd.f32 %v2835_v5, %v376_v46  ;;  %1357 = vst.msk [vmem:[#allocation2 + $0x118] sm:$0xff] %vm267_vm3, %v1258_v45  ;;  %v1259_v38 = vadd.f32 %v2837_v6, %v402_v48  ;;  %v452_v46 = vld [vmem:[#allocation2 + $0x2b0] sm:$0xff] }
  0xec   : > { %v1585_v35 = vadd.f32 %v2531_v41, %v1483_v33  ;;  %1383 = vst.msk [vmem:[#allocation2 + $0x1e8] sm:$0xff] %vm267_vm3, %v1284_v47 }
  0xed   : > { %v2900_v58 = vpop.f32.mrf.mxu3  ;;  %1404 = vst.msk [vmem:[#allocation2 + $0x290] sm:$0xff] %vm267_vm3, %v1305_v37 }
  0xee   : > { %1683 = vst.msk [vmem:[%s2542_s12 + $0x1e0] sm:$0xff] %vm267_vm3, %v1585_v35  ;;  %v379_v35 = vld [vmem:[#allocation2 + $0x68] sm:$0xff] }
  0xef   : > { %1332 = vst.msk [vmem:[#allocation2 + $0x50] sm:$0xff] %vm267_vm3, %v1233_v50 }
  0xf0   : > { %1358 = vst.msk [vmem:[#allocation2 + $0x120] sm:$0xff] %vm267_vm3, %v1259_v38 }
  0xf1   : > { %v1133_v11 = vpop.f32.mrf.mxu2  ;;  %v1432_v4 = vld [vmem:[#allocation2 + $0x48] sm:$0xff]  ;;  %1706 = vst.msk [vmem:[%s2542_s12 + $0x298] sm:$0xff] %vm267_vm3, %v1608_v19 }
  0xf2   : > { %v1005_v14 = vpop.f32.mrf.mxu0  ;;  %v1070_v15 = vpop.f32.mrf.mxu1  ;;  %v1285_v55 = vadd.f32 %v1133_v11, %v428_v49  ;;  %v1534_v54 = vadd.f32 %v2531_v41, %v1432_v4  ;;  %v1458_v5 = vld [vmem:[#allocation2 + $0x118] sm:$0xff]  ;;  %1406 = vst.msk [vmem:[#allocation2 + $0x2a0] sm:$0xff] %vm267_vm3, %v1307_v27  ;;  %v408_v27 = vld [vmem:[#allocation2 + $0x150] sm:$0xff] }
  0xf3   : > { %v1234_v60 = vadd.f32 %v1005_v14, %v377_v52  ;;  %v1260_v3 = vadd.f32 %v1070_v15, %v403_v56  ;;  %v1560_v6 = vadd.f32 %v2531_v41, %v1458_v5  ;;  %v1484_v63 = vld [vmem:[#allocation2 + $0x1e8] sm:$0xff]  ;;  %v429_v15 = vld [vmem:[#allocation2 + $0x1f8] sm:$0xff]  ;;  %v380_v5 = vld [vmem:[#allocation2 + $0x70] sm:$0xff] }
  0xf4   : > { %1384 = vst.msk [vmem:[#allocation2 + $0x1f0] sm:$0xff] %vm267_vm3, %v1285_v55  ;;  %v1586_v7 = vadd.f32 %v2531_v41, %v1484_v63  ;;  %v1505_v8 = vld [vmem:[#allocation2 + $0x290] sm:$0xff] }
  0xf5   : > { %1333 = vst.msk [vmem:[#allocation2 + $0x58] sm:$0xff] %vm267_vm3, %v1234_v60  ;;  %v1193_v62 = vpop.f32.mrf.mxu3  ;;  %v1607_v9 = vadd.f32 %v2531_v41, %v1505_v8 }
  0xf6   : > { %1359 = vst.msk [vmem:[#allocation2 + $0x128] sm:$0xff] %vm267_vm3, %v1260_v3  ;;  %v1433_v10 = vld [vmem:[#allocation2 + $0x50] sm:$0xff]  ;;  %v1309_v48 = vadd.f32 %v1193_v62, %v452_v46 }
  0xf7   : > { %1632 = vst.msk [vmem:[%s2542_s12 + $0x48] sm:$0xff] %vm267_vm3, %v1534_v54  ;;  %v1535_v11 = vadd.f32 %v2531_v41, %v1433_v10  ;;  %v1459_v0 = vld [vmem:[#allocation2 + $0x120] sm:$0xff]  ;;  %v432_v10 = vld [vmem:[#allocation2 + $0x210] sm:$0xff] }
  0xf8   : > { %1658 = vst.msk [vmem:[%s2542_s12 + $0x118] sm:$0xff] %vm267_vm3, %v1560_v6  ;;  %v1561_v13 = vadd.f32 %v2531_v41, %v1459_v0 }
  0xf9   : > { %v2870_v30 = vpop.f32.mrf.mxu2  ;;  %1684 = vst.msk [vmem:[%s2542_s12 + $0x1e8] sm:$0xff] %vm267_vm3, %v1586_v7  ;;  %v1507_v38 = vld [vmem:[#allocation2 + $0x2a0] sm:$0xff] }
  0xfa   : > { %v2881_v42 = vpop.f32.mrf.mxu0  ;;  %v2883_v43 = vpop.f32.mrf.mxu1  ;;  %1705 = vst.msk [vmem:[%s2542_s12 + $0x290] sm:$0xff] %vm267_vm3, %v1607_v9  ;;  %v1286_v24 = vadd.f32 %v2870_v30, %v429_v15  ;;  %v1609_v56 = vadd.f32 %v2531_v41, %v1507_v38  ;;  %v406_v7 = vld [vmem:[#allocation2 + $0x140] sm:$0xff] }
  0xfb   : > { %v1485_v14 = vld [vmem:[#allocation2 + $0x1f0] sm:$0xff]  ;;  %1633 = vst.msk [vmem:[%s2542_s12 + $0x50] sm:$0xff] %vm267_vm3, %v1535_v11  ;;  %v1235_v29 = vadd.f32 %v2881_v42, %v378_v21  ;;  %v1261_v30 = vadd.f32 %v2883_v43, %v404_v25  ;;  %v1308_v42 = vadd.f32 %v2900_v58, %v451_v32  ;;  %v382_v25 = vld [vmem:[#allocation2 + $0x80] sm:$0xff] }
  0xfc   : > { %v1587_v16 = vadd.f32 %v2531_v41, %v1485_v14  ;;  %1659 = vst.msk [vmem:[%s2542_s12 + $0x120] sm:$0xff] %vm267_vm3, %v1561_v13  ;;  %v1434_v20 = vld [vmem:[#allocation2 + $0x58] sm:$0xff] }
  0xfd   : > { %v1536_v22 = vadd.f32 %v2531_v41, %v1434_v20  ;;  %v1460_v23 = vld [vmem:[#allocation2 + $0x128] sm:$0xff]  ;;  %v2951_v34 = vpop.f32.mrf.mxu3  ;;  %1385 = vst.msk [vmem:[#allocation2 + $0x1f8] sm:$0xff] %vm267_vm3, %v1286_v24  ;;  %v453_v14 = vld [vmem:[#allocation2 + $0x2b8] sm:$0xff] }
  0xfe   : > { %1685 = vst.msk [vmem:[%s2542_s12 + $0x1f0] sm:$0xff] %vm267_vm3, %v1587_v16  ;;  %v1562_v26 = vadd.f32 %v2531_v41, %v1460_v23  ;;  %v407_v20 = vld [vmem:[#allocation2 + $0x148] sm:$0xff] }
  0xff   : > { %1634 = vst.msk [vmem:[%s2542_s12 + $0x58] sm:$0xff] %vm267_vm3, %v1536_v22  ;;  %v433_v22 = vld [vmem:[#allocation2 + $0x218] sm:$0xff] }
 0x100   : > { %1660 = vst.msk [vmem:[%s2542_s12 + $0x128] sm:$0xff] %vm267_vm3, %v1562_v26 }
 0x101   : > { %v1138_v57 = vpop.f32.mrf.mxu2  ;;  %1334 = vst.msk [vmem:[#allocation2 + $0x60] sm:$0xff] %vm267_vm3, %v1235_v29 }
 0x102   : > { %v2905_v61 = vpop.f32.mrf.mxu0  ;;  %v2907_v53 = vpop.f32.mrf.mxu1  ;;  %v1287_v36 = vadd.f32 %v1138_v57, %v430_v28  ;;  %1360 = vst.msk [vmem:[#allocation2 + $0x130] sm:$0xff] %vm267_vm3, %v1261_v30 }
 0x103   : > { %v1236_v45 = vadd.f32 %v2905_v61, %v379_v35  ;;  %v1262_v43 = vadd.f32 %v2907_v53, %v405_v39  ;;  %1407 = vst.msk [vmem:[#allocation2 + $0x2a8] sm:$0xff] %vm267_vm3, %v1308_v42 }
 0x104   : > { %1386 = vst.msk [vmem:[#allocation2 + $0x200] sm:$0xff] %vm267_vm3, %v1287_v36  ;;  %v1486_v50 = vld [vmem:[#allocation2 + $0x1f8] sm:$0xff] }
 0x105   : > { %1335 = vst.msk [vmem:[#allocation2 + $0x68] sm:$0xff] %vm267_vm3, %v1236_v45  ;;  %v1198_v49 = vpop.f32.mrf.mxu3  ;;  %v1588_v51 = vadd.f32 %v2531_v41, %v1486_v50 }
 0x106   : > { %1361 = vst.msk [vmem:[#allocation2 + $0x138] sm:$0xff] %vm267_vm3, %v1262_v43 }
 0x107   : > { %1408 = vst.msk [vmem:[#allocation2 + $0x2b0] sm:$0xff] %vm267_vm3, %v1309_v48 }
 0x108   : > { %v1435_v57 = vld [vmem:[#allocation2 + $0x60] sm:$0xff]  ;;  %1686 = vst.msk [vmem:[%s2542_s12 + $0x1f8] sm:$0xff] %vm267_vm3, %v1588_v51 }
 0x109   : > { %v1140_v2 = vpop.f32.mrf.mxu2  ;;  %v1537_v58 = vadd.f32 %v2531_v41, %v1435_v57  ;;  %v1461_v59 = vld [vmem:[#allocation2 + $0x130] sm:$0xff]  ;;  %1707 = vst.msk [vmem:[%s2542_s12 + $0x2a0] sm:$0xff] %vm267_vm3, %v1609_v56  ;;  %v434_v51 = vld [vmem:[#allocation2 + $0x220] sm:$0xff]  ;;  %v3046_v57 = vld [vmem:[#allocation5] ss:$0 sm:$0xff] }
 0x10a   : > { %v2925_v1 = vpop.f32.mrf.mxu0  ;;  %v2927_v12 = vpop.f32.mrf.mxu1  ;;  %v1288_v47 = vadd.f32 %v1140_v2, %v431_v44  ;;  %v1563_v60 = vadd.f32 %v2531_v41, %v1461_v59  ;;  %v1508_v3 = vld [vmem:[#allocation2 + $0x2a8] sm:$0xff] }
 0x10b   : > { %v1487_v61 = vld [vmem:[#allocation2 + $0x200] sm:$0xff]  ;;  %1635 = vst.msk [vmem:[%s2542_s12 + $0x60] sm:$0xff] %vm267_vm3, %v1537_v58  ;;  %v1610_v4 = vadd.f32 %v2531_v41, %v1508_v3  ;;  %v1237_v13 = vadd.f32 %v2925_v1, %v380_v5  ;;  %v1263_v16 = vadd.f32 %v2927_v12, %v406_v7  ;;  %v1310_v1 = vadd.f32 %v2951_v34, %v453_v14  ;;  %v409_v3 = vld [vmem:[#allocation2 + $0x158] sm:$0xff]  ;;  %v435_v5 = vld [vmem:[#allocation2 + $0x228] sm:$0xff] }
 0x10c   : > { %1387 = vst.msk [vmem:[#allocation2 + $0x208] sm:$0xff] %vm267_vm3, %v1288_v47  ;;  %v1589_v53 = vadd.f32 %v2531_v41, %v1487_v61  ;;  %v1436_v54 = vld [vmem:[#allocation2 + $0x68] sm:$0xff]  ;;  %v454_v12 = vld [vmem:[#allocation2 + $0x2c0] sm:$0xff]  ;;  %v456_v7 = vld [vmem:[#allocation2 + $0x2d0] sm:$0xff] }
 0x10d   : > { %1661 = vst.msk [vmem:[%s2542_s12 + $0x130] sm:$0xff] %vm267_vm3, %v1563_v60  ;;  %v1538_v6 = vadd.f32 %v2531_v41, %v1436_v54  ;;  %v1462_v63 = vld [vmem:[#allocation2 + $0x138] sm:$0xff]  ;;  %v2992_v2 = vpop.f32.mrf.mxu3  ;;  %v1311_v29 = vadd.f32 %v1198_v49, %v454_v12  ;;  %v383_v60 = vld [vmem:[#allocation2 + $0x88] sm:$0xff] }
 0x10e   : > { %1687 = vst.msk [vmem:[%s2542_s12 + $0x200] sm:$0xff] %vm267_vm3, %v1589_v53  ;;  %v1564_v62 = vadd.f32 %v2531_v41, %v1462_v63  ;;  %v1509_v0 = vld [vmem:[#allocation2 + $0x2b0] sm:$0xff] }
 0x10f   : > { %1708 = vst.msk [vmem:[%s2542_s12 + $0x2a8] sm:$0xff] %vm267_vm3, %v1610_v4  ;;  %v1611_v15 = vadd.f32 %v2531_v41, %v1509_v0  ;;  %v410_v0 = vld [vmem:[#allocation2 + $0x160] sm:$0xff] }
 0x110   : > { %1636 = vst.msk [vmem:[%s2542_s12 + $0x68] sm:$0xff] %vm267_vm3, %v1538_v6 }
 0x111   : > { %v2949_v33 = vpop.f32.mrf.mxu2  ;;  %1662 = vst.msk [vmem:[%s2542_s12 + $0x138] sm:$0xff] %vm267_vm3, %v1564_v62 }
 0x112   : > { %v2957_v31 = vpop.f32.mrf.mxu0  ;;  %v2959_v40 = vpop.f32.mrf.mxu1  ;;  %v1289_v19 = vadd.f32 %v2949_v33, %v432_v10  ;;  %1709 = vst.msk [vmem:[%s2542_s12 + $0x2b0] sm:$0xff] %vm267_vm3, %v1611_v15  ;;  %v457_v15 = vld [vmem:[#allocation2 + $0x2d8] sm:$0xff] }
 0x113   : > { %v1488_v9 = vld [vmem:[#allocation2 + $0x208] sm:$0xff]  ;;  %1336 = vst.msk [vmem:[#allocation2 + $0x70] sm:$0xff] %vm267_vm3, %v1237_v13  ;;  %v1238_v23 = vadd.f32 %v2957_v31, %v381_v17  ;;  %v1264_v24 = vadd.f32 %v2959_v40, %v407_v20  ;;  %v436_v13 = vld [vmem:[#allocation2 + $0x230] sm:$0xff] }
 0x114   : > { %v1590_v11 = vadd.f32 %v2531_v41, %v1488_v9  ;;  %1362 = vst.msk [vmem:[#allocation2 + $0x140] sm:$0xff] %vm267_vm3, %v1263_v16 }
 0x115   : > { %1388 = vst.msk [vmem:[#allocation2 + $0x210] sm:$0xff] %vm267_vm3, %v1289_v19  ;;  %v1203_v33 = vpop.f32.mrf.mxu3 }
 0x116   : > { %1688 = vst.msk [vmem:[%s2542_s12 + $0x208] sm:$0xff] %vm267_vm3, %v1590_v11 }
 0x117   : > { %1409 = vst.msk [vmem:[#allocation2 + $0x2b8] sm:$0xff] %vm267_vm3, %v1310_v1 }
 0x118   : > { %1337 = vst.msk [vmem:[#allocation2 + $0x78] sm:$0xff] %vm267_vm3, %v1238_v23 }
 0x119   : > { %v1145_v37 = vpop.f32.mrf.mxu2  ;;  %1363 = vst.msk [vmem:[#allocation2 + $0x148] sm:$0xff] %vm267_vm3, %v1264_v24 }
 0x11a   : > { %v1018_v52 = vpop.f32.mrf.mxu0  ;;  %v1083_v55 = vpop.f32.mrf.mxu1  ;;  %v1290_v26 = vadd.f32 %v1145_v37, %v433_v22  ;;  %v1437_v30 = vld [vmem:[#allocation2 + $0x70] sm:$0xff]  ;;  %1410 = vst.msk [vmem:[#allocation2 + $0x2c0] sm:$0xff] %vm267_vm3, %v1311_v29 }
 0x11b   : > { %v1239_v32 = vadd.f32 %v1018_v52, %v382_v25  ;;  %v1265_v34 = vadd.f32 %v1083_v55, %v408_v27  ;;  %v1539_v36 = vadd.f32 %v2531_v41, %v1437_v30  ;;  %v1463_v39 = vld [vmem:[#allocation2 + $0x140] sm:$0xff]  ;;  %v455_v55 = vld [vmem:[#allocation2 + $0x2c8] sm:$0xff] }
 0x11c   : > { %1389 = vst.msk [vmem:[#allocation2 + $0x218] sm:$0xff] %vm267_vm3, %v1290_v26  ;;  %v1565_v40 = vadd.f32 %v2531_v41, %v1463_v39  ;;  %v1489_v42 = vld [vmem:[#allocation2 + $0x210] sm:$0xff]  ;;  %v1312_v54 = vadd.f32 %v2992_v2, %v455_v55  ;;  %v1313_v2 = vadd.f32 %v1203_v33, %v456_v7 }
 0x11d   : > { %1338 = vst.msk [vmem:[#allocation2 + $0x80] sm:$0xff] %vm267_vm3, %v1239_v32  ;;  %v1591_v44 = vadd.f32 %v2531_v41, %v1489_v42  ;;  %v1205_v56 = vpop.f32.mrf.mxu3 }
 0x11e   : > { %1364 = vst.msk [vmem:[#allocation2 + $0x150] sm:$0xff] %vm267_vm3, %v1265_v34  ;;  %v1510_v45 = vld [vmem:[#allocation2 + $0x2b8] sm:$0xff]  ;;  %v1314_v19 = vadd.f32 %v1205_v56, %v457_v15 }
 0x11f   : > { %1637 = vst.msk [vmem:[%s2542_s12 + $0x70] sm:$0xff] %vm267_vm3, %v1539_v36  ;;  %v1612_v46 = vadd.f32 %v2531_v41, %v1510_v45  ;;  %v1438_v43 = vld [vmem:[#allocation2 + $0x78] sm:$0xff] }
 0x120   : > { %1663 = vst.msk [vmem:[%s2542_s12 + $0x140] sm:$0xff] %vm267_vm3, %v1565_v40  ;;  %v1540_v48 = vadd.f32 %v2531_v41, %v1438_v43  ;;  %v1464_v37 = vld [vmem:[#allocation2 + $0x148] sm:$0xff]  ;;  %v437_v45 = vld [vmem:[#allocation2 + $0x238] sm:$0xff] }
 0x121   : > { %v2990_v8 = vpop.f32.mrf.mxu2  ;;  %1689 = vst.msk [vmem:[%s2542_s12 + $0x210] sm:$0xff] %vm267_vm3, %v1591_v44  ;;  %v1566_v49 = vadd.f32 %v2531_v41, %v1464_v37  ;;  %v1511_v52 = vld [vmem:[#allocation2 + $0x2c0] sm:$0xff] }
 0x122   : > { %v3005_v18 = vpop.f32.mrf.mxu0  ;;  %v3010_v21 = vpop.f32.mrf.mxu1  ;;  %1710 = vst.msk [vmem:[%s2542_s12 + $0x2b8] sm:$0xff] %vm267_vm3, %v1612_v46  ;;  %v1613_v58 = vadd.f32 %v3046_v57, %v1511_v52  ;;  %v412_v52 = vld [vmem:[#allocation2 + $0x170] sm:$0xff] }
 0x123   : > { %v1490_v50 = vld [vmem:[#allocation2 + $0x218] sm:$0xff]  ;;  %1638 = vst.msk [vmem:[%s2542_s12 + $0x78] sm:$0xff] %vm267_vm3, %v1540_v48  ;;  %v1240_v63 = vadd.f32 %v3005_v18, %v383_v60  ;;  %v1266_v9 = vadd.f32 %v3010_v21, %v409_v3  ;;  %v458_v48 = vld [vmem:[#allocation2 + $0x2e0] sm:$0xff] }
 0x124   : > { %v1592_v38 = vadd.f32 %v2531_v41, %v1490_v50  ;;  %1664 = vst.msk [vmem:[%s2542_s12 + $0x148] sm:$0xff] %vm267_vm3, %v1566_v49  ;;  %v1439_v59 = vld [vmem:[#allocation2 + $0x80] sm:$0xff]  ;;  %v1291_v41 = vadd.f32 %v2990_v8, %v434_v51  ;;  %v384_v8 = vld [vmem:[#allocation2 + $0x90] sm:$0xff] }
 0x125   : > { %v1541_v61 = vadd.f32 %v3046_v57, %v1439_v59  ;;  %v1465_v53 = vld [vmem:[#allocation2 + $0x150] sm:$0xff]  ;;  %1711 = vst.msk [vmem:[%s2542_s12 + $0x2c0] sm:$0xff] %vm267_vm3, %v1613_v58  ;;  %v1208_v18 = vpop.f32.mrf.mxu3  ;;  %v386_v50 = vld [vmem:[#allocation2 + $0xa0] sm:$0xff] }
 0x126   : > { %1690 = vst.msk [vmem:[%s2542_s12 + $0x218] sm:$0xff] %vm267_vm3, %v1592_v38  ;;  %v1567_v4 = vadd.f32 %v3046_v57, %v1465_v53  ;;  %v1315_v56 = vadd.f32 %v1208_v18, %v458_v48  ;;  %v438_v58 = vld [vmem:[#allocation2 + $0x240] sm:$0xff] }
 0x127   : > { %1639 = vst.msk [vmem:[%s2542_s12 + $0x80] sm:$0xff] %vm267_vm3, %v1541_v61  ;;  %v459_v61 = vld [vmem:[#allocation2 + $0x2e8] sm:$0xff] }
 0x128   : > { %1665 = vst.msk [vmem:[%s2542_s12 + $0x150] sm:$0xff] %vm267_vm3, %v1567_v4  ;;  %v413_v4 = vld [vmem:[#allocation2 + $0x178] sm:$0xff] }
 0x129   : > { %v1150_v28 = vpop.f32.mrf.mxu2  ;;  %1390 = vst.msk [vmem:[#allocation2 + $0x220] sm:$0xff] %vm267_vm3, %v1291_v41  ;;  %v387_v41 = vld [vmem:[#allocation2 + $0xa8] sm:$0xff] }
 0x12a   : > { %v1023_v35 = vpop.f32.mrf.mxu0  ;;  %v1088_v31 = vpop.f32.mrf.mxu1  ;;  %v1292_v11 = vadd.f32 %v1150_v28, %v435_v5  ;;  %1411 = vst.msk [vmem:[#allocation2 + $0x2c8] sm:$0xff] %vm267_vm3, %v1312_v54 }
 0x12b   : > { %1339 = vst.msk [vmem:[#allocation2 + $0x88] sm:$0xff] %vm267_vm3, %v1240_v63  ;;  %v1241_v14 = vadd.f32 %v1023_v35, %v384_v8  ;;  %v1267_v16 = vadd.f32 %v1088_v31, %v410_v0  ;;  %v385_v35 = vld [vmem:[#allocation2 + $0x98] sm:$0xff]  ;;  %v411_v31 = vld [vmem:[#allocation2 + $0x168] sm:$0xff] }
 0x12c   : > { %1365 = vst.msk [vmem:[#allocation2 + $0x158] sm:$0xff] %vm267_vm3, %v1266_v9 }
 0x12d   : > { %1391 = vst.msk [vmem:[#allocation2 + $0x228] sm:$0xff] %vm267_vm3, %v1292_v11  ;;  %v1210_v40 = vpop.f32.mrf.mxu3 }
 0x12e   : > { %1412 = vst.msk [vmem:[#allocation2 + $0x2d0] sm:$0xff] %vm267_vm3, %v1313_v2  ;;  %v1316_v54 = vadd.f32 %v1210_v40, %v459_v61 }
 0x12f   : > { %1340 = vst.msk [vmem:[#allocation2 + $0x90] sm:$0xff] %vm267_vm3, %v1241_v14 }
 0x130   : > { %v1491_v20 = vld [vmem:[#allocation2 + $0x220] sm:$0xff]  ;;  %1366 = vst.msk [vmem:[#allocation2 + $0x160] sm:$0xff] %vm267_vm3, %v1267_v16 }
 0x131   : > { %v1153_v47 = vpop.f32.mrf.mxu2  ;;  %v1593_v1 = vadd.f32 %v3046_v57, %v1491_v20  ;;  %v1512_v22 = vld [vmem:[#allocation2 + $0x2c8] sm:$0xff]  ;;  %1413 = vst.msk [vmem:[#allocation2 + $0x2d8] sm:$0xff] %vm267_vm3, %v1314_v19 }
 0x132   : > { %v1025_v6 = vpop.f32.mrf.mxu0  ;;  %v1090_v62 = vpop.f32.mrf.mxu1  ;;  %v1293_v17 = vadd.f32 %v1153_v47, %v436_v13  ;;  %v1614_v12 = vadd.f32 %v3046_v57, %v1512_v22  ;;  %v1440_v24 = vld [vmem:[#allocation2 + $0x88] sm:$0xff]  ;;  %1414 = vst.msk [vmem:[#allocation2 + $0x2e0] sm:$0xff] %vm267_vm3, %v1315_v56 }
 0x133   : > { %1691 = vst.msk [vmem:[%s2542_s12 + $0x220] sm:$0xff] %vm267_vm3, %v1593_v1  ;;  %v1542_v26 = vadd.f32 %v3046_v57, %v1440_v24  ;;  %v1466_v27 = vld [vmem:[#allocation2 + $0x158] sm:$0xff]  ;;  %v1242_v47 = vadd.f32 %v1025_v6, %v385_v35  ;;  %v1268_v49 = vadd.f32 %v1090_v62, %v411_v31 }
 0x134   : > { %1392 = vst.msk [vmem:[#allocation2 + $0x230] sm:$0xff] %vm267_vm3, %v1293_v17  ;;  %v1568_v28 = vadd.f32 %v3046_v57, %v1466_v27  ;;  %v1492_v29 = vld [vmem:[#allocation2 + $0x228] sm:$0xff] }
 0x135   : > { %1712 = vst.msk [vmem:[%s2542_s12 + $0x2c8] sm:$0xff] %vm267_vm3, %v1614_v12  ;;  %v1594_v32 = vadd.f32 %v3046_v57, %v1492_v29  ;;  %v1513_v33 = vld [vmem:[#allocation2 + $0x2d0] sm:$0xff]  ;;  %v1213_v6 = vpop.f32.mrf.mxu3 }
 0x136   : > { %1640 = vst.msk [vmem:[%s2542_s12 + $0x88] sm:$0xff] %vm267_vm3, %v1542_v26  ;;  %v1615_v34 = vadd.f32 %v3046_v57, %v1513_v33  ;;  %v1441_v30 = vld [vmem:[#allocation2 + $0x90] sm:$0xff] }
 0x137   : > { %1666 = vst.msk [vmem:[%s2542_s12 + $0x158] sm:$0xff] %vm267_vm3, %v1568_v28  ;;  %v1543_v36 = vadd.f32 %v3046_v57, %v1441_v30  ;;  %v1467_v39 = vld [vmem:[#allocation2 + $0x160] sm:$0xff]  ;;  %v388_v26 = vld [vmem:[#allocation2 + $0xb0] sm:$0xff] }
 0x138   : > { %1692 = vst.msk [vmem:[%s2542_s12 + $0x228] sm:$0xff] %vm267_vm3, %v1594_v32  ;;  %v1569_v42 = vadd.f32 %v3046_v57, %v1467_v39  ;;  %v1514_v43 = vld [vmem:[#allocation2 + $0x2d8] sm:$0xff]  ;;  %v414_v32 = vld [vmem:[#allocation2 + $0x180] sm:$0xff]  ;;  %v440_v30 = vld [vmem:[#allocation2 + $0x250] sm:$0xff] }
 0x139   : > { %v1155_v10 = vpop.f32.mrf.mxu2  ;;  %1713 = vst.msk [vmem:[%s2542_s12 + $0x2d0] sm:$0xff] %vm267_vm3, %v1615_v34  ;;  %v1616_v37 = vadd.f32 %v3046_v57, %v1514_v43  ;;  %v1515_v14 = vld [vmem:[#allocation2 + $0x2e0] sm:$0xff]  ;;  %v461_v39 = vld [vmem:[#allocation2 + $0x2f8] sm:$0xff] }
 0x13a   : > { %v1028_v21 = vpop.f32.mrf.mxu0  ;;  %v1093_v23 = vpop.f32.mrf.mxu1  ;;  %1641 = vst.msk [vmem:[%s2542_s12 + $0x90] sm:$0xff] %vm267_vm3, %v1543_v36  ;;  %v1294_v38 = vadd.f32 %v1155_v10, %v437_v45  ;;  %v1617_v15 = vadd.f32 %v3046_v57, %v1515_v14 }
 0x13b   : > { %v1493_v44 = vld [vmem:[#allocation2 + $0x230] sm:$0xff]  ;;  %1667 = vst.msk [vmem:[%s2542_s12 + $0x160] sm:$0xff] %vm267_vm3, %v1569_v42  ;;  %v1243_v60 = vadd.f32 %v1028_v21, %v386_v50  ;;  %v1269_v53 = vadd.f32 %v1093_v23, %v412_v52  ;;  %v439_v21 = vld [vmem:[#allocation2 + $0x248] sm:$0xff]  ;;  %v389_v42 = vld [vmem:[#allocation2 + $0xb8] sm:$0xff] }
 0x13c   : > { %v1595_v46 = vadd.f32 %v3046_v57, %v1493_v44  ;;  %1714 = vst.msk [vmem:[%s2542_s12 + $0x2d8] sm:$0xff] %vm267_vm3, %v1616_v37  ;;  %v460_v23 = vld [vmem:[#allocation2 + $0x2f0] sm:$0xff]  ;;  %v462_v37 = vld [vmem:[#allocation2 + $0x300] sm:$0xff] }
 0x13d   : > { %1341 = vst.msk [vmem:[#allocation2 + $0x98] sm:$0xff] %vm267_vm3, %v1242_v47  ;;  %v1215_v12 = vpop.f32.mrf.mxu3  ;;  %v1317_v34 = vadd.f32 %v1213_v6, %v460_v23  ;;  %v441_v47 = vld [vmem:[#allocation2 + $0x258] sm:$0xff] }
 0x13e   : > { %1693 = vst.msk [vmem:[%s2542_s12 + $0x230] sm:$0xff] %vm267_vm3, %v1595_v46  ;;  %v415_v46 = vld [vmem:[#allocation2 + $0x188] sm:$0xff]  ;;  %v1318_v43 = vadd.f32 %v1215_v12, %v461_v39 }
 0x13f   : > { %1367 = vst.msk [vmem:[#allocation2 + $0x168] sm:$0xff] %vm267_vm3, %v1268_v49 }
 0x140   : > { %1393 = vst.msk [vmem:[#allocation2 + $0x238] sm:$0xff] %vm267_vm3, %v1294_v38 }
 0x141   : > { %v1158_v25 = vpop.f32.mrf.mxu2  ;;  %1342 = vst.msk [vmem:[#allocation2 + $0xa0] sm:$0xff] %vm267_vm3, %v1243_v60 }
 0x142   : > { %v1030_v51 = vpop.f32.mrf.mxu0  ;;  %v1095_v55 = vpop.f32.mrf.mxu1  ;;  %v1295_v3 = vadd.f32 %v1158_v25, %v438_v58  ;;  %1368 = vst.msk [vmem:[#allocation2 + $0x170] sm:$0xff] %vm267_vm3, %v1269_v53 }
 0x143   : > { %v1244_v5 = vadd.f32 %v1030_v51, %v387_v41  ;;  %v1270_v63 = vadd.f32 %v1095_v55, %v413_v4  ;;  %1415 = vst.msk [vmem:[#allocation2 + $0x2e8] sm:$0xff] %vm267_vm3, %v1316_v54 }
 0x144   : > { %1394 = vst.msk [vmem:[#allocation2 + $0x240] sm:$0xff] %vm267_vm3, %v1295_v3  ;;  %v1442_v7 = vld [vmem:[#allocation2 + $0x98] sm:$0xff] }
 0x145   : > { %v1544_v9 = vadd.f32 %v3046_v57, %v1442_v7  ;;  %1343 = vst.msk [vmem:[#allocation2 + $0xa8] sm:$0xff] %vm267_vm3, %v1244_v5  ;;  %v1218_v51 = vpop.f32.mrf.mxu3 }
 0x146   : > { %v1468_v8 = vld [vmem:[#allocation2 + $0x168] sm:$0xff]  ;;  %1369 = vst.msk [vmem:[#allocation2 + $0x178] sm:$0xff] %vm267_vm3, %v1270_v63  ;;  %v1319_v38 = vadd.f32 %v1218_v51, %v462_v37 }
 0x147   : > { %v1570_v11 = vadd.f32 %v3046_v57, %v1468_v8  ;;  %v1494_v0 = vld [vmem:[#allocation2 + $0x238] sm:$0xff]  ;;  %1642 = vst.msk [vmem:[%s2542_s12 + $0x98] sm:$0xff] %vm267_vm3, %v1544_v9 }
 0x148   : > { %v1596_v13 = vadd.f32 %v3046_v57, %v1494_v0  ;;  %v1443_v16 = vld [vmem:[#allocation2 + $0xa0] sm:$0xff]  ;;  %1715 = vst.msk [vmem:[%s2542_s12 + $0x2e0] sm:$0xff] %vm267_vm3, %v1617_v15 }
 0x149   : > { %v1160_v59 = vpop.f32.mrf.mxu2  ;;  %1668 = vst.msk [vmem:[%s2542_s12 + $0x168] sm:$0xff] %vm267_vm3, %v1570_v11  ;;  %v1545_v17 = vadd.f32 %v3046_v57, %v1443_v16  ;;  %v1469_v18 = vld [vmem:[#allocation2 + $0x170] sm:$0xff]  ;;  %v463_v16 = vld [vmem:[#allocation2 + $0x308] sm:$0xff] }
 0x14a   : > { %v1033_v62 = vpop.f32.mrf.mxu0  ;;  %v1098_v10 = vpop.f32.mrf.mxu1  ;;  %1694 = vst.msk [vmem:[%s2542_s12 + $0x238] sm:$0xff] %vm267_vm3, %v1596_v13  ;;  %v1571_v19 = vadd.f32 %v3046_v57, %v1469_v18  ;;  %v1516_v22 = vld [vmem:[#allocation2 + $0x2e8] sm:$0xff]  ;;  %v1296_v29 = vadd.f32 %v1160_v59, %v439_v21 }
 0x14b   : > { %v1495_v20 = vld [vmem:[#allocation2 + $0x240] sm:$0xff]  ;;  %1643 = vst.msk [vmem:[%s2542_s12 + $0xa0] sm:$0xff] %vm267_vm3, %v1545_v17  ;;  %v1618_v24 = vadd.f32 %v3046_v57, %v1516_v22  ;;  %v1245_v36 = vadd.f32 %v1033_v62, %v388_v26  ;;  %v1271_v40 = vadd.f32 %v1098_v10, %v414_v32  ;;  %v416_v10 = vld [vmem:[#allocation2 + $0x190] sm:$0xff]  ;;  %v417_v22 = vld [vmem:[#allocation2 + $0x198] sm:$0xff] }
 0x14c   : > { %v1597_v1 = vadd.f32 %v3046_v57, %v1495_v20  ;;  %1669 = vst.msk [vmem:[%s2542_s12 + $0x170] sm:$0xff] %vm267_vm3, %v1571_v19  ;;  %v1444_v25 = vld [vmem:[#allocation2 + $0xa8] sm:$0xff]  ;;  %v390_v62 = vld [vmem:[#allocation2 + $0xc0] sm:$0xff] }
 0x14d   : > { %v1546_v27 = vadd.f32 %v3046_v57, %v1444_v25  ;;  %v1470_v28 = vld [vmem:[#allocation2 + $0x178] sm:$0xff]  ;;  %1716 = vst.msk [vmem:[%s2542_s12 + $0x2e8] sm:$0xff] %vm267_vm3, %v1618_v24  ;;  %v1220_v17 = vpop.f32.mrf.mxu3  ;;  %v391_v20 = vld [vmem:[#allocation2 + $0xc8] sm:$0xff] }
 0x14e   : > { %1695 = vst.msk [vmem:[%s2542_s12 + $0x240] sm:$0xff] %vm267_vm3, %v1597_v1  ;;  %v1572_v33 = vadd.f32 %v3046_v57, %v1470_v28  ;;  %v1320_v12 = vadd.f32 %v1220_v17, %v463_v16  ;;  %v443_v24 = vld [vmem:[#allocation2 + $0x268] sm:$0xff] }
 0x14f   : > { %1644 = vst.msk [vmem:[%s2542_s12 + $0xa8] sm:$0xff] %vm267_vm3, %v1546_v27 }
 0x150   : > { %1670 = vst.msk [vmem:[%s2542_s12 + $0x178] sm:$0xff] %vm267_vm3, %v1572_v33 }
 0x151   : > { %v1163_v2 = vpop.f32.mrf.mxu2  ;;  %1395 = vst.msk [vmem:[#allocation2 + $0x248] sm:$0xff] %vm267_vm3, %v1296_v29 }
 0x152   : > { %v1035_v35 = vpop.f32.mrf.mxu0  ;;  %v1100_v31 = vpop.f32.mrf.mxu1  ;;  %v1297_v45 = vadd.f32 %v1163_v2, %v440_v30  ;;  %1416 = vst.msk [vmem:[#allocation2 + $0x2f0] sm:$0xff] %vm267_vm3, %v1317_v34  ;;  %v442_v2 = vld [vmem:[#allocation2 + $0x260] sm:$0xff] }
 0x153   : > { %1344 = vst.msk [vmem:[#allocation2 + $0xb0] sm:$0xff] %vm267_vm3, %v1245_v36  ;;  %v1246_v48 = vadd.f32 %v1035_v35, %v389_v42  ;;  %v1272_v49 = vadd.f32 %v1100_v31, %v415_v46 }
 0x154   : > { %1370 = vst.msk [vmem:[#allocation2 + $0x180] sm:$0xff] %vm267_vm3, %v1271_v40 }
 0x155   : > { %1396 = vst.msk [vmem:[#allocation2 + $0x250] sm:$0xff] %vm267_vm3, %v1297_v45 }
 0x156   : > { %1417 = vst.msk [vmem:[#allocation2 + $0x2f8] sm:$0xff] %vm267_vm3, %v1318_v43 }
 0x157   : > { %1345 = vst.msk [vmem:[#allocation2 + $0xb8] sm:$0xff] %vm267_vm3, %v1246_v48 }
 0x158   : > { %v1496_v52 = vld [vmem:[#allocation2 + $0x248] sm:$0xff]  ;;  %1371 = vst.msk [vmem:[#allocation2 + $0x188] sm:$0xff] %vm267_vm3, %v1272_v49 }
 0x159   : > { %v1165_v44 = vpop.f32.mrf.mxu2  ;;  %v1598_v56 = vadd.f32 %v3046_v57, %v1496_v52  ;;  %v1517_v58 = vld [vmem:[#allocation2 + $0x2f0] sm:$0xff]  ;;  %1418 = vst.msk [vmem:[#allocation2 + $0x300] sm:$0xff] %vm267_vm3, %v1319_v38 }
 0x15a   : > { %v1298_v50 = vadd.f32 %v1165_v44, %v441_v47  ;;  %v1038_v55 = vpop.f32.mrf.mxu0  ;;  %v1103_v59 = vpop.f32.mrf.mxu1  ;;  %v1619_v60 = vadd.f32 %v3046_v57, %v1517_v58  ;;  %v1445_v61 = vld [vmem:[#allocation2 + $0xb0] sm:$0xff]  ;;  %1419 = vst.msk [vmem:[#allocation2 + $0x308] sm:$0xff] %vm267_vm3, %v1320_v12 }
 0x15b   : > { %1696 = vst.msk [vmem:[%s2542_s12 + $0x248] sm:$0xff] %vm267_vm3, %v1598_v56  ;;  %v1547_v41 = vadd.f32 %v3046_v57, %v1445_v61  ;;  %v1471_v3 = vld [vmem:[#allocation2 + $0x180] sm:$0xff]  ;;  %v1247_v15 = vadd.f32 %v1038_v55, %v390_v62  ;;  %v1273_v19 = vadd.f32 %v1103_v59, %v416_v10 }
 0x15c   : > { %1397 = vst.msk [vmem:[#allocation2 + $0x258] sm:$0xff] %vm267_vm3, %v1298_v50  ;;  %v1573_v4 = vadd.f32 %v3046_v57, %v1471_v3  ;;  %v1497_v54 = vld [vmem:[#allocation2 + $0x250] sm:$0xff] }
 0x15d   : > { %1717 = vst.msk [vmem:[%s2542_s12 + $0x2f0] sm:$0xff] %vm267_vm3, %v1619_v60  ;;  %v1599_v5 = vadd.f32 %v3046_v57, %v1497_v54  ;;  %v1518_v6 = vld [vmem:[#allocation2 + $0x2f8] sm:$0xff] }
 0x15e   : > { %1645 = vst.msk [vmem:[%s2542_s12 + $0xb0] sm:$0xff] %vm267_vm3, %v1547_v41  ;;  %v1620_v63 = vadd.f32 %v3046_v57, %v1518_v6  ;;  %v1446_v7 = vld [vmem:[#allocation2 + $0xb8] sm:$0xff] }
 0x15f   : > { %1671 = vst.msk [vmem:[%s2542_s12 + $0x180] sm:$0xff] %vm267_vm3, %v1573_v4  ;;  %v1548_v9 = vadd.f32 %v3046_v57, %v1446_v7  ;;  %v1472_v8 = vld [vmem:[#allocation2 + $0x188] sm:$0xff] }
 0x160   : > { %1697 = vst.msk [vmem:[%s2542_s12 + $0x250] sm:$0xff] %vm267_vm3, %v1599_v5  ;;  %v1574_v11 = vadd.f32 %v3046_v57, %v1472_v8  ;;  %v1519_v14 = vld [vmem:[#allocation2 + $0x300] sm:$0xff] }
 0x161   : > { %v1168_v53 = vpop.f32.mrf.mxu2  ;;  %1718 = vst.msk [vmem:[%s2542_s12 + $0x2f8] sm:$0xff] %vm267_vm3, %v1620_v63  ;;  %v1621_v18 = vadd.f32 %v3046_v57, %v1519_v14  ;;  %v1520_v36 = vld [vmem:[#allocation2 + $0x308] sm:$0xff] }
 0x162   : > { %1646 = vst.msk [vmem:[%s2542_s12 + $0xb8] sm:$0xff] %vm267_vm3, %v1548_v9  ;;  %v1040_v21 = vpop.f32.mrf.mxu0  ;;  %v1299_v1 = vadd.f32 %v1168_v53, %v442_v2  ;;  %v1105_v23 = vpop.f32.mrf.mxu1  ;;  %v1622_v39 = vadd.f32 %v3046_v57, %v1520_v36 }
 0x163   : > { %v1498_v0 = vld [vmem:[#allocation2 + $0x258] sm:$0xff]  ;;  %1672 = vst.msk [vmem:[%s2542_s12 + $0x188] sm:$0xff] %vm267_vm3, %v1574_v11  ;;  %v1248_v26 = vadd.f32 %v1040_v21, %v391_v20  ;;  %v1274_v27 = vadd.f32 %v1105_v23, %v417_v22 }
 0x164   : > { %v1600_v13 = vadd.f32 %v3046_v57, %v1498_v0  ;;  %1719 = vst.msk [vmem:[%s2542_s12 + $0x300] sm:$0xff] %vm267_vm3, %v1621_v18 }
 0x165   : > { %1346 = vst.msk [vmem:[#allocation2 + $0xc0] sm:$0xff] %vm267_vm3, %v1247_v15 }
 0x166   : > { %1698 = vst.msk [vmem:[%s2542_s12 + $0x258] sm:$0xff] %vm267_vm3, %v1600_v13 }
 0x167   : > { %1372 = vst.msk [vmem:[#allocation2 + $0x190] sm:$0xff] %vm267_vm3, %v1273_v19 }
 0x168   : > { %1398 = vst.msk [vmem:[#allocation2 + $0x260] sm:$0xff] %vm267_vm3, %v1299_v1 }
 0x169   : > { %v1170_v25 = vpop.f32.mrf.mxu2  ;;  %1347 = vst.msk [vmem:[#allocation2 + $0xc8] sm:$0xff] %vm267_vm3, %v1248_v26 }
 0x16a   : > { %v1300_v28 = vadd.f32 %v1170_v25, %v443_v24  ;;  %1373 = vst.msk [vmem:[#allocation2 + $0x198] sm:$0xff] %vm267_vm3, %v1274_v27 }
 0x16b   : > { %1720 = vst.msk [vmem:[%s2542_s12 + $0x308] sm:$0xff] %vm267_vm3, %v1622_v39 }
 0x16c   : > { %1399 = vst.msk [vmem:[#allocation2 + $0x268] sm:$0xff] %vm267_vm3, %v1300_v28  ;;  %v1447_v29 = vld [vmem:[#allocation2 + $0xc0] sm:$0xff] }
 0x16d   : > { %v1549_v32 = vadd.f32 %v3046_v57, %v1447_v29 }
 0x16e   : > { %v1473_v33 = vld [vmem:[#allocation2 + $0x190] sm:$0xff] }
 0x16f   : > { %v1575_v34 = vadd.f32 %v3046_v57, %v1473_v33  ;;  %v1499_v30 = vld [vmem:[#allocation2 + $0x260] sm:$0xff]  ;;  %1647 = vst.msk [vmem:[%s2542_s12 + $0xc0] sm:$0xff] %vm267_vm3, %v1549_v32 }
 0x170   : > { %v1601_v35 = vadd.f32 %v3046_v57, %v1499_v30  ;;  %v1448_v31 = vld [vmem:[#allocation2 + $0xc8] sm:$0xff] }
 0x171   : > { %1673 = vst.msk [vmem:[%s2542_s12 + $0x190] sm:$0xff] %vm267_vm3, %v1575_v34  ;;  %v1550_v40 = vadd.f32 %v3046_v57, %v1448_v31  ;;  %v1474_v42 = vld [vmem:[#allocation2 + $0x198] sm:$0xff] }
 0x172   : > { %1699 = vst.msk [vmem:[%s2542_s12 + $0x260] sm:$0xff] %vm267_vm3, %v1601_v35  ;;  %v1576_v44 = vadd.f32 %v3046_v57, %v1474_v42 }
 0x173   : > { %v1500_v45 = vld [vmem:[#allocation2 + $0x268] sm:$0xff]  ;;  %1648 = vst.msk [vmem:[%s2542_s12 + $0xc8] sm:$0xff] %vm267_vm3, %v1550_v40 }
 0x174   : > { %v1602_v46 = vadd.f32 %v3046_v57, %v1500_v45  ;;  %1674 = vst.msk [vmem:[%s2542_s12 + $0x198] sm:$0xff] %vm267_vm3, %v1576_v44 }
 0x176   : > { %1700 = vst.msk [vmem:[%s2542_s12 + $0x268] sm:$0xff] %vm267_vm3, %v1602_v46 }
 0x177 PF: > { %s15_s14 = sadd.s32 1, %s2285_s14   ;;  %s3226_s12 = smov %s2281_s13 }
 0x178   : > { %p12_p8 = scmp.ge.s32.totalorder %s15_s14, 4   ;;  %s3227_s13 = smov %s3229_s16 }
 0x17a   :  { %14 = sbr.rel (!%p12_p8) target bundleno = 3 (0x3), region = 81 }
 0x17f   :  { %1749 = vsyncpa [#allocation4], 1 }
 0x180   :  { %1751 = vsyncpa [#allocation4 + $0x1], 1 }
 0x181   :  { %1752 = vsyncpa [#allocation6], 1 }

// kernel: mnist_net_forward.9
= control target key start
LH: loop header
LB: loop body
LE: loop exit
PB: predicated region body
PF: predicated region fallthrough
CT: control target
= control target key end

     0   :  { %v331_v5 = vmov 0.0   ;;  %s491_s0 = inlined_call_operand.vmem [shape: f32[2,98,128], index: 0, kind: input, shape index: {}]   ;;  %s492_s1 = inlined_call_operand.vmem [shape: bf16[2,98,128], index: 1, kind: output, shape index: {}]  }
   0x1   :  { %v8_v0 = vld [vmem:[%s491_s0] sm:$0xff]  ;;  %v9_v1 = vld [vmem:[%s491_s0 + $0x8] sm:$0xff]  ;;  %v10_v2 = vld [vmem:[%s491_s0 + $0x10] sm:$0xff] }
   0x2   :  { %vm34_vm0 = vcmp.ge.f32.partialorder %v8_v0, 1.0  ;;  %vm35_vm1 = vcmp.ge.f32.partialorder %v9_v1, 1.0  ;;  %v11_v3 = vld [vmem:[%s491_s0 + $0x18] sm:$0xff]  ;;  %vm36_vm2 = vcmp.ge.f32.partialorder %v10_v2, 1.0  ;;  %v12_v4 = vld [vmem:[%s491_s0 + $0x20] sm:$0xff]  ;;  %v13_v9 = vld [vmem:[%s491_s0 + $0x28] sm:$0xff] }
   0x3   :  { %v235_v6 = vsel %vm34_vm0, 1.0, %v331_v5  ;;  %v236_v7 = vsel %vm35_vm1, 1.0, %v331_v5  ;;  %vm37_vm3 = vcmp.ge.f32.partialorder %v11_v3, 1.0  ;;  %v237_v8 = vsel %vm36_vm2, 1.0, %v331_v5  ;;  %v14_v17 = vld [vmem:[%s491_s0 + $0x30] sm:$0xff]  ;;  %v15_v18 = vld [vmem:[%s491_s0 + $0x38] sm:$0xff] }
   0x4   :  { %v288_v10 = vpack.c.bf16 %v236_v7, %v235_v6  ;;  %v99_v11 = vsub.f32 1.0, %v235_v6  ;;  %v100_v12 = vsub.f32 1.0, %v236_v7  ;;  %v238_v13 = vsel %vm37_vm3, 1.0, %v331_v5  ;;  %v16_v22 = vld [vmem:[%s491_s0 + $0x40] sm:$0xff]  ;;  %v17_v29 = vld [vmem:[%s491_s0 + $0x48] sm:$0xff]  ;;  %v18_v30 = vld [vmem:[%s491_s0 + $0x50] sm:$0xff] }
   0x5   :  { %v291_v14 = vpack.c.bf16 %v238_v13, %v237_v8  ;;  %v101_v15 = vsub.f32 1.0, %v237_v8  ;;  %v102_v16 = vsub.f32 1.0, %v238_v13  ;;  %vm38_vm4 = vcmp.ge.f32.partialorder %v12_v4, 1.0  ;;  %v19_v31 = vld [vmem:[%s491_s0 + $0x58] sm:$0xff]  ;;  %v20_v44 = vld [vmem:[%s491_s0 + $0x60] sm:$0x3] }
   0x6   :  { %289 = vst [vmem:[%s492_s1] sm:$0xff] %v288_v10   ;;  %v112_v19 = vmul.f32 %v99_v11, %v8_v0  ;;  %v113_v20 = vmul.f32 %v100_v12, %v9_v1  ;;  %vm39_vm5 = vcmp.ge.f32.partialorder %v13_v9, 1.0  ;;  %v239_v21 = vsel %vm38_vm4, 1.0, %v331_v5  ;;  %v248_v53 = vld [vmem:[%s491_s0 + $0x68] sm:$0xff]  ;;  %v249_v54 = vld [vmem:[%s491_s0 + $0x70] sm:$0xff]  ;;  %v250_v57 = vld [vmem:[%s491_s0 + $0x78] sm:$0xff] }
   0x7   :  { %320 = vst [vmem:[%s492_s1 + $0x8] sm:$0xff] %v291_v14   ;;  %v114_v23 = vmul.f32 %v101_v15, %v10_v2  ;;  %v115_v24 = vmul.f32 %v102_v16, %v11_v3  ;;  %v240_v25 = vsel %vm39_vm5, 1.0, %v331_v5  ;;  %v103_v26 = vsub.f32 1.0, %v239_v21  ;;  %v251_v3 = vld [vmem:[%s491_s0 + $0x80] sm:$0xff]  ;;  %v252_v6 = vld [vmem:[%s491_s0 + $0x88] sm:$0xff]  ;;  %v254_v12 = vld [vmem:[%s491_s0 + $0x98] sm:$0xff] }
   0x8   :  { %v294_v27 = vpack.c.bf16 %v240_v25, %v239_v21  ;;  %v104_v28 = vsub.f32 1.0, %v240_v25  ;;  %vm40_vm6 = vcmp.ge.f32.partialorder %v14_v17, 1.0  ;;  %vm41_vm7 = vcmp.ge.f32.partialorder %v15_v18, 1.0  ;;  %v255_v21 = vld [vmem:[%s491_s0 + $0xa0] sm:$0xff] }
   0x9   :  { %v116_v32 = vmul.f32 %v103_v26, %v12_v4  ;;  %v241_v33 = vsel %vm40_vm6, 1.0, %v331_v5  ;;  %v242_v34 = vsel %vm41_vm7, 1.0, %v331_v5  ;;  %vm42_vm8 = vcmp.ge.f32.partialorder %v16_v22, 1.0 }
   0xa   :  { %321 = vst [vmem:[%s492_s1 + $0x10] sm:$0xff] %v294_v27   ;;  %v117_v35 = vmul.f32 %v104_v28, %v13_v9  ;;  %v297_v36 = vpack.c.bf16 %v242_v34, %v241_v33  ;;  %v105_v37 = vsub.f32 1.0, %v241_v33  ;;  %v106_v38 = vsub.f32 1.0, %v242_v34  ;;  %v253_v9 = vld [vmem:[%s491_s0 + $0x90] sm:$0xff] }
   0xb   :  { %vm43_vm9 = vcmp.ge.f32.partialorder %v17_v29, 1.0  ;;  %v243_v39 = vsel %vm42_vm8, 1.0, %v331_v5  ;;  %vm44_vm10 = vcmp.ge.f32.partialorder %v18_v30, 1.0  ;;  %vm45_vm11 = vcmp.ge.f32.partialorder %v19_v31, 1.0 }
   0xc   :  { %322 = vst [vmem:[%s492_s1 + $0x18] sm:$0xff] %v297_v36   ;;  %v118_v40 = vmul.f32 %v105_v37, %v14_v17  ;;  %v119_v41 = vmul.f32 %v106_v38, %v15_v18  ;;  %v244_v42 = vsel %vm43_vm9, 1.0, %v331_v5  ;;  %v107_v43 = vsub.f32 1.0, %v243_v39  ;;  %v259_v37 = vld [vmem:[%s491_s0 + $0xc0] sm:$0xff] }
   0xd   :  { %v300_v45 = vpack.c.bf16 %v244_v42, %v243_v39  ;;  %v108_v46 = vsub.f32 1.0, %v244_v42  ;;  %v245_v47 = vsel %vm44_vm10, 1.0, %v331_v5  ;;  %v246_v48 = vsel %vm45_vm11, 1.0, %v331_v5 }
   0xe   :  { %v120_v49 = vmul.f32 %v107_v43, %v16_v22  ;;  %v303_v50 = vpack.c.bf16 %v246_v48, %v245_v47  ;;  %v109_v51 = vsub.f32 1.0, %v245_v47  ;;  %v110_v52 = vsub.f32 1.0, %v246_v48 }
   0xf   :  { %323 = vst [vmem:[%s492_s1 + $0x20] sm:$0xff] %v300_v45   ;;  %v121_v55 = vmul.f32 %v108_v46, %v17_v29  ;;  %vm46_vm12 = vcmp.ge.f32.partialorder %v20_v44, 1.0  ;;  %v139_v56 = vmul.f32 0.5, %v112_v19  ;;  %v140_v58 = vmul.f32 0.5, %v113_v20 }
  0x10   :  { %324 = vst [vmem:[%s492_s1 + $0x28] sm:$0xff] %v303_v50   ;;  %v122_v59 = vmul.f32 %v109_v51, %v18_v30  ;;  %v123_v60 = vmul.f32 %v110_v52, %v19_v31  ;;  %v247_v61 = vsel %vm46_vm12, 1.0, %v331_v5  ;;  %v141_v62 = vmul.f32 0.5, %v114_v23  ;;  %v257_v31 = vld [vmem:[%s491_s0 + $0xb0] sm:$0xff] }
  0x11   :  { %v85_v63 = vpack.c.bf16 %v247_v61, %v247_v61  ;;  %v111_v0 = vsub.f32 1.0, %v247_v61  ;;  %v152_v1 = vadd.f32 %v248_v53, %v139_v56  ;;  %v153_v2 = vadd.f32 %v249_v54, %v140_v58 }
  0x12   :  { %v154_v4 = vadd.f32 %v250_v57, %v141_v62  ;;  %v142_v7 = vmul.f32 0.5, %v115_v24  ;;  %v143_v8 = vmul.f32 0.5, %v116_v32  ;;  %v144_v10 = vmul.f32 0.5, %v117_v35  ;;  %v256_v24 = vld [vmem:[%s491_s0 + $0xa8] sm:$0xff]  ;;  %v258_v35 = vld [vmem:[%s491_s0 + $0xb8] sm:$0xff] }
  0x13   :  { %98 = vst [vmem:[%s492_s1 + $0x30] sm:$0x1] %v85_v63  ;;  %v124_v11 = vmul.f32 %v111_v0, %v20_v44  ;;  %vm165_vm13 = vcmp.ge.f32.partialorder %v152_v1, 1.0  ;;  %vm166_vm14 = vcmp.ge.f32.partialorder %v153_v2, 1.0  ;;  %v145_v13 = vmul.f32 0.5, %v118_v40 }
  0x14   :  { %v261_v14 = vsel %vm165_vm13, 1.0, %v331_v5  ;;  %vm167_vm15 = vcmp.ge.f32.partialorder %v154_v4, 1.0  ;;  %v262_v15 = vsel %vm166_vm14, 1.0, %v331_v5  ;;  %v155_v16 = vadd.f32 %v251_v3, %v142_v7 }
  0x15   :  { %v204_v17 = vpack.c.bf16 %v261_v14, %v261_v14  ;;  %v263_v18 = vsel %vm167_vm15, 1.0, %v331_v5  ;;  %v156_v19 = vadd.f32 %v252_v6, %v143_v8  ;;  %v157_v20 = vadd.f32 %v253_v9, %v144_v10 }
  0x16   :  { %v306_v22 = vpack.c.bf16 %v263_v18, %v262_v15  ;;  %vm168_vm0 = vcmp.ge.f32.partialorder %v155_v16, 1.0  ;;  %v158_v23 = vadd.f32 %v254_v12, %v145_v13  ;;  %v146_v25 = vmul.f32 0.5, %v119_v41  ;;  %v260_v41 = vld [vmem:[%s491_s0 + $0xc8] sm:$0x3] }
  0x17   :  { %274 = vst [vmem:[%s492_s1 + $0x34] sm:$0xf] %v204_v17  ;;  %vm169_vm1 = vcmp.ge.f32.partialorder %v156_v19, 1.0  ;;  %v264_v26 = vsel %vm168_vm0, 1.0, %v331_v5  ;;  %vm170_vm2 = vcmp.ge.f32.partialorder %v157_v20, 1.0  ;;  %v147_v27 = vmul.f32 0.5, %v120_v49 }
  0x18   :  { %325 = vst [vmem:[%s492_s1 + $0x38] sm:$0xff] %v306_v22   ;;  %v265_v28 = vsel %vm169_vm1, 1.0, %v331_v5  ;;  %vm171_vm3 = vcmp.ge.f32.partialorder %v158_v23, 1.0  ;;  %v266_v29 = vsel %vm170_vm2, 1.0, %v331_v5  ;;  %v159_v30 = vadd.f32 %v255_v21, %v146_v25 }
  0x19   :  { %v309_v32 = vpack.c.bf16 %v265_v28, %v264_v26  ;;  %v267_v33 = vsel %vm171_vm3, 1.0, %v331_v5  ;;  %v160_v34 = vadd.f32 %v256_v24, %v147_v27  ;;  %v148_v36 = vmul.f32 0.5, %v121_v55 }
  0x1a   :  { %v312_v38 = vpack.c.bf16 %v267_v33, %v266_v29  ;;  %vm172_vm4 = vcmp.ge.f32.partialorder %v159_v30, 1.0  ;;  %v149_v39 = vmul.f32 0.5, %v122_v59  ;;  %v150_v40 = vmul.f32 0.5, %v123_v60 }
  0x1b   :  { %326 = vst [vmem:[%s492_s1 + $0x40] sm:$0xff] %v309_v32   ;;  %vm173_vm5 = vcmp.ge.f32.partialorder %v160_v34, 1.0  ;;  %v268_v42 = vsel %vm172_vm4, 1.0, %v331_v5  ;;  %v161_v43 = vadd.f32 %v257_v31, %v148_v36  ;;  %v151_v44 = vmul.f32 0.5, %v124_v11 }
  0x1c   :  { %327 = vst [vmem:[%s492_s1 + $0x48] sm:$0xff] %v312_v38   ;;  %v269_v45 = vsel %vm173_vm5, 1.0, %v331_v5  ;;  %v162_v46 = vadd.f32 %v258_v35, %v149_v39  ;;  %v163_v47 = vadd.f32 %v259_v37, %v150_v40 }
  0x1d   :  { %v315_v48 = vpack.c.bf16 %v269_v45, %v268_v42  ;;  %vm174_vm6 = vcmp.ge.f32.partialorder %v161_v43, 1.0  ;;  %v164_v49 = vadd.f32 %v260_v41, %v151_v44 }
  0x1e   :  { %vm175_vm7 = vcmp.ge.f32.partialorder %v162_v46, 1.0  ;;  %v270_v50 = vsel %vm174_vm6, 1.0, %v331_v5  ;;  %vm176_vm8 = vcmp.ge.f32.partialorder %v163_v47, 1.0 }
  0x1f   :  { %328 = vst [vmem:[%s492_s1 + $0x50] sm:$0xff] %v315_v48   ;;  %v271_v51 = vsel %vm175_vm7, 1.0, %v331_v5  ;;  %v272_v52 = vsel %vm176_vm8, 1.0, %v331_v5  ;;  %vm177_vm9 = vcmp.ge.f32.partialorder %v164_v49, 1.0 }
  0x20   :  { %v318_v53 = vpack.c.bf16 %v271_v51, %v270_v50  ;;  %v215_v54 = vpack.c.bf16 %v272_v52, %v272_v52  ;;  %v273_v55 = vsel %vm177_vm9, 1.0, %v331_v5 }
  0x21   :  { %v216_v56 = vpack.c.bf16 %v273_v55, %v273_v55 }
  0x22   :  { %329 = vst [vmem:[%s492_s1 + $0x58] sm:$0xff] %v318_v53  }
  0x23   :  { %285 = vst [vmem:[%s492_s1 + $0x60] sm:$0xf] %v215_v54 }
  0x24   :  { %286 = vst [vmem:[%s492_s1 + $0x64] sm:$0x1] %v216_v56 }

// kernel: mnist_net_forward.8
= control target key start
LH: loop header
LB: loop body
LE: loop exit
PB: predicated region body
PF: predicated region fallthrough
CT: control target
= control target key end

     0   :  { %vm19_vm0 = vcmask 261120   ;;  %s5615_s1 = inlined_call_operand.vmem [shape: bf16[288,32], index: 1, kind: input, shape index: {}]   ;;  %s5616_s0 = inlined_call_operand.vmem [shape: bf16[784,288], index: 0, kind: input, shape index: {}]   ;;  %s5617_s2 = inlined_call_operand.vmem [shape: f32[1,32], index: 2, kind: input, shape index: {}]   ;;  %s5618_s3 = inlined_call_operand.vmem [shape: f32[784,32], index: 3, kind: output, shape index: {}]  }
   0x1   :  { %v3565_v0 = vld [vmem:[%s5615_s1 + $0x38] sm:$0xff]  ;;  %v3629_v2 = vld [vmem:[%s5615_s1 + $0x88] sm:$0xff]  ;;  %v3564_v3 = vld [vmem:[%s5615_s1 + $0x30] sm:$0xff] }
   0x2   :  { %v3573_v1 = vld [vmem:[%s5615_s1 + $0x78] sm:$0xff]  ;;  %1439 = vmatpush.bf16.msra.mxu0 %v3565_v0  ;;  %3576 = vmatpush.bf16.msra.mxu3 %v3565_v0  ;;  %v3572_v4 = vld [vmem:[%s5615_s1 + $0x70] sm:$0xff]  ;;  %v3641_v5 = vld [vmem:[%s5615_s1 + $0x80] sm:$0xff] }
   0x3   :  { %1693 = vmatpush.bf16.msra.mxu1 %v3573_v1  ;;  %1953 = vmatpush.bf16.msra.mxu2 %v3629_v2  ;;  %v2712_v6 = vld [vmem:[%s5616_s0 + $0x8] sm:$0xf]  ;;  %v3413_v7 = vld [vmem:[%s5616_s0 + $0x10] sm:$0xf0]  ;;  %v3562_v11 = vld [vmem:[%s5615_s1 + $0x20] sm:$0xff] }
   0x4   :  { %v2713_v8 = vor.u32 %v3413_v7, %v2712_v6  ;;  %v3563_v9 = vld [vmem:[%s5615_s1 + $0x28] sm:$0xff]  ;;  %v3570_v12 = vld [vmem:[%s5615_s1 + $0x60] sm:$0xff]  ;;  %v3561_v13 = vld [vmem:[%s5615_s1 + $0x18] sm:$0xff] }
   0x5   :  { %v3571_v10 = vld [vmem:[%s5615_s1 + $0x68] sm:$0xff]  ;;  %v3569_v14 = vld [vmem:[%s5615_s1 + $0x58] sm:$0xff]  ;;  %v3560_v15 = vld [vmem:[%s5615_s1 + $0x10] sm:$0xff] }
   0x6   :  { %1440 = vmatpush.bf16.msra.mxu0 %v3564_v3  ;;  %3577 = vmatpush.bf16.msra.mxu3 %v3564_v3  ;;  %v3568_v16 = vld [vmem:[%s5615_s1 + $0x50] sm:$0xff]  ;;  %v2724_v17 = vld [vmem:[%s5616_s0 + $0x20] sm:$0xf]  ;;  %v3416_v18 = vld [vmem:[%s5616_s0 + $0x28] sm:$0xf0] }
   0x7   :  { %1694 = vmatpush.bf16.msra.mxu1 %v3572_v4  ;;  %1954 = vmatpush.bf16.msra.mxu2 %v3641_v5  ;;  %v2725_v19 = vor.u32 %v3416_v18, %v2724_v17  ;;  %v3559_v20 = vld [vmem:[%s5615_s1 + $0x8] sm:$0xff]  ;;  %v3558_v22 = vld [vmem:[%s5615_s1] sm:$0xff]  ;;  %v3148_v26 = vld [vmem:[%s5616_s0 + $0x378] sm:$0xf] }
   0x8   :  { %v3567_v21 = vld [vmem:[%s5615_s1 + $0x48] sm:$0xff]  ;;  %v3566_v23 = vld [vmem:[%s5615_s1 + $0x40] sm:$0xff]  ;;  %v2706_v29 = vld [vmem:[%s5616_s0 + $0xc] sm:$0xf0] }
   0x9   :  { %v2704_v24 = vld [vmem:[%s5616_s0] sm:$0xf]  ;;  %v3412_v25 = vld [vmem:[%s5616_s0 + $0x8] sm:$0xf0]  ;;  %v3523_v27 = vld [vmem:[%s5616_s0 + $0x380] sm:$0xf0] }
   0xa   :  { %3362 = vmatmul.msk.bf16.vlgmr.msra.gmra.mxu2 %vm19_vm0, %v2713_v8  ;;  %1441 = vmatpush.bf16.msra.mxu0 %v3563_v9  ;;  %v3411_v28 = vld [vmem:[%s5616_s0 + $0x4] sm:$0xf]  ;;  %v2705_v30 = vor.u32 %v3412_v25, %v2704_v24  ;;  %v3149_v31 = vor.u32 %v3523_v27, %v3148_v26  ;;  %v2736_v33 = vld [vmem:[%s5616_s0 + $0x38] sm:$0xf]  ;;  %v3160_v38 = vld [vmem:[%s5616_s0 + $0x390] sm:$0xf] }
   0xb   :  { %3578 = vmatpush.bf16.msra.mxu3 %v3563_v9  ;;  %1695 = vmatpush.bf16.msra.mxu1 %v3571_v10  ;;  %v2709_v32 = vor.u32 %v3411_v28, %v2706_v29  ;;  %v3419_v34 = vld [vmem:[%s5616_s0 + $0x40] sm:$0xf0]  ;;  %v2716_v36 = vld [vmem:[%s5616_s0 + $0x18] sm:$0xf]  ;;  %v3526_v39 = vld [vmem:[%s5616_s0 + $0x398] sm:$0xf0] }
   0xc   :  { %v2737_v35 = vor.u32 %v3419_v34, %v2736_v33  ;;  %v3415_v37 = vld [vmem:[%s5616_s0 + $0x20] sm:$0xf0]  ;;  %v3414_v40 = vld [vmem:[%s5616_s0 + $0x1c] sm:$0xf]  ;;  %v2718_v41 = vld [vmem:[%s5616_s0 + $0x24] sm:$0xf0]  ;;  %v3161_v43 = vor.u32 %v3526_v39, %v3160_v38 }
   0xd   :  { %v2717_v42 = vor.u32 %v3415_v37, %v2716_v36  ;;  %v2721_v44 = vor.u32 %v3414_v40, %v2718_v41  ;;  %v2748_v45 = vld [vmem:[%s5616_s0 + $0x50] sm:$0xf]  ;;  %v3422_v46 = vld [vmem:[%s5616_s0 + $0x58] sm:$0xf0]  ;;  %v3172_v50 = vld [vmem:[%s5616_s0 + $0x3a8] sm:$0xf] }
   0xe   :  { %1442 = vmatpush.bf16.msra.mxu0 %v3562_v11  ;;  %v2749_v47 = vor.u32 %v3422_v46, %v2748_v45  ;;  %v2728_v48 = vld [vmem:[%s5616_s0 + $0x30] sm:$0xf]  ;;  %v3418_v49 = vld [vmem:[%s5616_s0 + $0x38] sm:$0xf0]  ;;  %v3529_v51 = vld [vmem:[%s5616_s0 + $0x3b0] sm:$0xf0] }
   0xf   :  { %3579 = vmatpush.bf16.msra.mxu3 %v3562_v11  ;;  %1696 = vmatpush.bf16.msra.mxu1 %v3570_v12  ;;  %v3417_v52 = vld [vmem:[%s5616_s0 + $0x34] sm:$0xf]  ;;  %v2730_v53 = vld [vmem:[%s5616_s0 + $0x3c] sm:$0xf0]  ;;  %v2729_v54 = vor.u32 %v3418_v49, %v2728_v48  ;;  %v3173_v55 = vor.u32 %v3529_v51, %v3172_v50  ;;  %v2760_v57 = vld [vmem:[%s5616_s0 + $0x68] sm:$0xf] }
  0x10   :  { %v2733_v56 = vor.u32 %v3417_v52, %v2730_v53  ;;  %v3425_v58 = vld [vmem:[%s5616_s0 + $0x70] sm:$0xf0]  ;;  %v2740_v60 = vld [vmem:[%s5616_s0 + $0x48] sm:$0xf]  ;;  %v3184_v62 = vld [vmem:[%s5616_s0 + $0x3c0] sm:$0xf] }
  0x11   :  { %v2761_v59 = vor.u32 %v3425_v58, %v2760_v57  ;;  %v3421_v61 = vld [vmem:[%s5616_s0 + $0x50] sm:$0xf0]  ;;  %v3532_v63 = vld [vmem:[%s5616_s0 + $0x3c8] sm:$0xf0]  ;;  %v2752_v8 = vld [vmem:[%s5616_s0 + $0x60] sm:$0xf] }
  0x12   :  { %1443 = vmatpush.bf16.msra.mxu0 %v3561_v13  ;;  %v3420_v0 = vld [vmem:[%s5616_s0 + $0x4c] sm:$0xf]  ;;  %v3185_v3 = vor.u32 %v3532_v63, %v3184_v62  ;;  %v3535_v11 = vld [vmem:[%s5616_s0 + $0x3e0] sm:$0xf0]  ;;  %v2784_v17 = vld [vmem:[%s5616_s0 + $0x98] sm:$0xf] }
  0x13   :  { %3580 = vmatpush.bf16.msra.mxu3 %v3561_v13  ;;  %1697 = vmatpush.bf16.msra.mxu1 %v3569_v14  ;;  %v3428_v6 = vld [vmem:[%s5616_s0 + $0x88] sm:$0xf0]  ;;  %v2754_v13 = vld [vmem:[%s5616_s0 + $0x6c] sm:$0xf0]  ;;  %v3431_v18 = vld [vmem:[%s5616_s0 + $0xa0] sm:$0xf0] }
  0x14   :  { %v3424_v9 = vld [vmem:[%s5616_s0 + $0x68] sm:$0xf0]  ;;  %v3426_v24 = vld [vmem:[%s5616_s0 + $0x7c] sm:$0xf]  ;;  %v2766_v25 = vld [vmem:[%s5616_s0 + $0x84] sm:$0xf0] }
  0x15   :  { %v2769_v28 = vor.u32 %v3426_v24, %v2766_v25  ;;  %v2796_v29 = vld [vmem:[%s5616_s0 + $0xb0] sm:$0xf]  ;;  %v3430_v33 = vld [vmem:[%s5616_s0 + $0x98] sm:$0xf0]  ;;  %v3220_v34 = vld [vmem:[%s5616_s0 + $0x408] sm:$0xf] }
  0x16   :  { %1444 = vmatpush.bf16.msra.mxu0 %v3560_v15  ;;  %v3429_v36 = vld [vmem:[%s5616_s0 + $0x94] sm:$0xf]  ;;  %v2778_v37 = vld [vmem:[%s5616_s0 + $0x9c] sm:$0xf0]  ;;  %v3599_v38 = vmov 0.0  }
  0x17   :  { %3581 = vmatpush.bf16.msra.mxu3 %v3560_v15  ;;  %1698 = vmatpush.bf16.msra.mxu1 %v3568_v16  ;;  %20 = vst.msk [vmem:[#allocation2] sm:$0xff] %vm19_vm0, %v3599_v38  ;;  %v2781_v41 = vor.u32 %v3429_v36, %v2778_v37  ;;  %v2788_v45 = vld [vmem:[%s5616_s0 + $0xa8] sm:$0xf]  ;;  %v3433_v46 = vld [vmem:[%s5616_s0 + $0xb0] sm:$0xf0] }
  0x18   :  { %21 = vst.msk [vmem:[#allocation2 + $0x8] sm:$0xff] %vm19_vm0, %v3599_v38  ;;  %v3544_v48 = vld [vmem:[%s5616_s0 + $0x428] sm:$0xf0]  ;;  %v2790_v50 = vld [vmem:[%s5616_s0 + $0xb4] sm:$0xf0]  ;;  %v2789_v51 = vor.u32 %v3433_v46, %v2788_v45 }
  0x19   :  { %22 = vst.msk [vmem:[#allocation2 + $0x10] sm:$0xff] %vm19_vm0, %v3599_v38  ;;  %v3432_v49 = vld [vmem:[%s5616_s0 + $0xac] sm:$0xf]  ;;  %v2800_v58 = vld [vmem:[%s5616_s0 + $0xc0] sm:$0xf] }
  0x1a   :  { %3363 = vmatmul.msk.bf16.gmra.mxu2 %vm19_vm0, %v2725_v19  ;;  %1445 = vmatpush.bf16.msra.mxu0 %v3559_v20  ;;  %v2785_v19 = vor.u32 %v3431_v18, %v2784_v17  ;;  %23 = vst.msk [vmem:[#allocation2 + $0x18] sm:$0xff] %vm19_vm0, %v3599_v38  ;;  %v2793_v53 = vor.u32 %v3432_v49, %v2790_v50  ;;  %v3435_v62 = vld [vmem:[%s5616_s0 + $0xc4] sm:$0xf]  ;;  %v2802_v63 = vld [vmem:[%s5616_s0 + $0xcc] sm:$0xf0] }
  0x1b   :  { %3582 = vmatpush.bf16.msra.mxu3 %v3559_v20  ;;  %1699 = vmatpush.bf16.msra.mxu1 %v3567_v21  ;;  %v2764_v20 = vld [vmem:[%s5616_s0 + $0x78] sm:$0xf]  ;;  %24 = vst.msk [vmem:[#allocation2 + $0x20] sm:$0xff] %vm19_vm0, %v3599_v38  ;;  %v3553_v45 = vld [vmem:[%s5616_s0 + $0x470] sm:$0xf0] }
  0x1c   :  { %25 = vst.msk [vmem:[#allocation2 + $0x28] sm:$0xff] %vm19_vm0, %v3599_v38  ;;  %v2832_v18 = vld [vmem:[%s5616_s0 + $0xf8] sm:$0xf]  ;;  %v2826_v49 = vld [vmem:[%s5616_s0 + $0xfc] sm:$0xf0] }
  0x1d   :  { %26 = vst.msk [vmem:[#allocation2 + $0x30] sm:$0xff] %vm19_vm0, %v3599_v38  ;;  %v2812_v25 = vld [vmem:[%s5616_s0 + $0xd8] sm:$0xf] }
  0x1e   :  { %1446 = vmatpush.bf16.msra.mxu0 %v3558_v22  ;;  %27 = vst.msk [vmem:[#allocation2 + $0x38] sm:$0xff] %vm19_vm0, %v3599_v38 }
  0x1f   :  { %3583 = vmatpush.bf16.msra.mxu3 %v3558_v22  ;;  %1700 = vmatpush.bf16.msra.mxu1 %v3566_v23  ;;  %v3208_v22 = vld [vmem:[%s5616_s0 + $0x3f0] sm:$0xf]  ;;  %28 = vst.msk [vmem:[#allocation2 + $0x40] sm:$0xff] %vm19_vm0, %v3599_v38 }
  0x20   :  { %29 = vst.msk [vmem:[#allocation2 + $0x48] sm:$0xff] %vm19_vm0, %v3599_v38 }
  0x21   :  { %1447 = vmatmul.bf16.vlgmr.msra.gmra.mxu0 %v2705_v30  ;;  %v3434_v30 = vld [vmem:[%s5616_s0 + $0xb8] sm:$0xf0]  ;;  %30 = vst.msk [vmem:[#allocation2 + $0x50] sm:$0xff] %vm19_vm0, %v3599_v38 }
  0x22   :  { %1632 = vmatmul.bf16.vlgmr.msra.gmra.mxu3 %v3149_v31  ;;  %1701 = vmatmul.bf16.vlgmr.msra.gmra.mxu1 %v2709_v32  ;;  %v2797_v31 = vor.u32 %v3434_v30, %v2796_v29  ;;  %v2776_v32 = vld [vmem:[%s5616_s0 + $0x90] sm:$0xf]  ;;  %31 = vst.msk [vmem:[#allocation2 + $0x58] sm:$0xff] %vm19_vm0, %v3599_v38  ;;  %v3550_v29 = vld [vmem:[%s5616_s0 + $0x458] sm:$0xf0] }
  0x23   :  { %3584 = vmatpush.bf16.msrb.mxu3 %v3573_v1  ;;  %v2742_v1 = vld [vmem:[%s5616_s0 + $0x54] sm:$0xf0]  ;;  %v2777_v39 = vor.u32 %v3430_v33, %v2776_v32  ;;  %32 = vst.msk [vmem:[#allocation2 + $0x60] sm:$0xff] %vm19_vm0, %v3599_v38  ;;  %v2814_v32 = vld [vmem:[%s5616_s0 + $0xe4] sm:$0xf0] }
  0x24   :  { %33 = vst.msk [vmem:[#allocation2 + $0x68] sm:$0xff] %vm19_vm0, %v3599_v38 }
  0x25   :  { %34 = vst.msk [vmem:[#allocation2 + $0x70] sm:$0xff] %vm19_vm0, %v3599_v38 }
  0x26   :  { %35 = vst.msk [vmem:[#allocation2 + $0x78] sm:$0xff] %vm19_vm0, %v3599_v38 }
  0x27   :  { %3585 = vmatpush.bf16.msrb.mxu3 %v3572_v4  ;;  %v2745_v4 = vor.u32 %v3420_v0, %v2742_v1  ;;  %36 = vst.msk [vmem:[#allocation2 + $0x80] sm:$0xff] %vm19_vm0, %v3599_v38 }
  0x28   :  { %37 = vst.msk [vmem:[#allocation2 + $0x88] sm:$0xff] %vm19_vm0, %v3599_v38 }
  0x29   :  { %38 = vst.msk [vmem:[#allocation2 + $0x90] sm:$0xff] %vm19_vm0, %v3599_v38 }
  0x2a   :  { %3364 = vmatmul.msk.bf16.gmra.mxu2 %vm19_vm0, %v2737_v35  ;;  %v3541_v35 = vld [vmem:[%s5616_s0 + $0x410] sm:$0xf0]  ;;  %39 = vst.msk [vmem:[#allocation2 + $0x98] sm:$0xff] %vm19_vm0, %v3599_v38 }
  0x2b   :  { %3586 = vmatpush.bf16.msrb.mxu3 %v3571_v10  ;;  %v3196_v10 = vld [vmem:[%s5616_s0 + $0x3d8] sm:$0xf]  ;;  %v3221_v40 = vor.u32 %v3541_v35, %v3220_v34  ;;  %40 = vst.msk [vmem:[#allocation2 + $0xa0] sm:$0xff] %vm19_vm0, %v3599_v38 }
  0x2c   :  { %v3197_v15 = vor.u32 %v3535_v11, %v3196_v10  ;;  %41 = vst.msk [vmem:[#allocation2 + $0xa8] sm:$0xff] %vm19_vm0, %v3599_v38  ;;  %v4010_v10 = vld [vmem:[%s5617_s2] ss:$0 sm:$0xff] }
  0x2d   :  { %42 = vst.msk [vmem:[#allocation2 + $0xb0] sm:$0xff] %vm19_vm0, %v3599_v38 }
  0x2e   :  { %43 = vst.msk [vmem:[#allocation2 + $0xb8] sm:$0xff] %vm19_vm0, %v3599_v38 }
  0x2f   :  { %3587 = vmatpush.bf16.msrb.mxu3 %v3570_v12  ;;  %v3423_v12 = vld [vmem:[%s5616_s0 + $0x64] sm:$0xf]  ;;  %44 = vst.msk [vmem:[#allocation2 + $0xc0] sm:$0xff] %vm19_vm0, %v3599_v38 }
  0x30   :  { %45 = vst.msk [vmem:[#allocation2 + $0xc8] sm:$0xff] %vm19_vm0, %v3599_v38 }
  0x31   :  { %1452 = vmatmul.bf16.gmra.mxu0 %v2717_v42  ;;  %v2808_v42 = vld [vmem:[%s5616_s0 + $0xc8] sm:$0xf]  ;;  %46 = vst.msk [vmem:[#allocation2 + $0xd0] sm:$0xff] %vm19_vm0, %v3599_v38 }
  0x32   :  { %1637 = vmatmul.bf16.gmra.mxu3 %v3161_v43  ;;  %1706 = vmatmul.bf16.gmra.mxu1 %v2721_v44  ;;  %v3437_v43 = vld [vmem:[%s5616_s0 + $0xd0] sm:$0xf0]  ;;  %47 = vst.msk [vmem:[#allocation2 + $0xd8] sm:$0xff] %vm19_vm0, %v3599_v38 }
  0x33   :  { %3588 = vmatpush.bf16.msrb.mxu3 %v3569_v14  ;;  %v2753_v14 = vor.u32 %v3424_v9, %v2752_v8  ;;  %v2809_v44 = vor.u32 %v3437_v43, %v2808_v42  ;;  %48 = vst.msk [vmem:[#allocation2 + $0xe0] sm:$0xff] %vm19_vm0, %v3599_v38  ;;  %v2824_v42 = vld [vmem:[%s5616_s0 + $0xf0] sm:$0xf]  ;;  %v3442_v43 = vld [vmem:[%s5616_s0 + $0xf8] sm:$0xf0] }
  0x34   :  { %49 = vst.msk [vmem:[#allocation2 + $0xe8] sm:$0xff] %vm19_vm0, %v3599_v38  ;;  %v2825_v50 = vor.u32 %v3442_v43, %v2824_v42 }
  0x35   :  { %50 = vst.msk [vmem:[#allocation2 + $0xf0] sm:$0xff] %vm19_vm0, %v3599_v38 }
  0x36   :  { %51 = vst.msk [vmem:[#allocation2 + $0xf8] sm:$0xff] %vm19_vm0, %v3599_v38 }
  0x37   :  { %3589 = vmatpush.bf16.msrb.mxu3 %v3568_v16  ;;  %v2757_v16 = vor.u32 %v3423_v12, %v2754_v13  ;;  %52 = vst.msk [vmem:[#allocation2 + $0x100] sm:$0xff] %vm19_vm0, %v3599_v38 }
  0x38   :  { %53 = vst.msk [vmem:[#allocation2 + $0x108] sm:$0xff] %vm19_vm0, %v3599_v38 }
  0x39   :  { %54 = vst.msk [vmem:[#allocation2 + $0x110] sm:$0xff] %vm19_vm0, %v3599_v38 }
  0x3a   :  { %3365 = vmatmul.msk.bf16.gmra.mxu2 %vm19_vm0, %v2749_v47  ;;  %v3232_v47 = vld [vmem:[%s5616_s0 + $0x420] sm:$0xf]  ;;  %55 = vst.msk [vmem:[#allocation2 + $0x118] sm:$0xff] %vm19_vm0, %v3599_v38 }
  0x3b   :  { %3590 = vmatpush.bf16.msrb.mxu3 %v3567_v21  ;;  %v3427_v21 = vld [vmem:[%s5616_s0 + $0x80] sm:$0xf0]  ;;  %v3233_v52 = vor.u32 %v3544_v48, %v3232_v47  ;;  %56 = vst.msk [vmem:[#allocation2 + $0x120] sm:$0xff] %vm19_vm0, %v3599_v38  ;;  %v3441_v48 = vld [vmem:[%s5616_s0 + $0xf4] sm:$0xf] }
  0x3c   :  { %v2765_v26 = vor.u32 %v3427_v21, %v2764_v20  ;;  %57 = vst.msk [vmem:[#allocation2 + $0x128] sm:$0xff] %vm19_vm0, %v3599_v38 }
  0x3d   :  { %58 = vst.msk [vmem:[#allocation2 + $0x130] sm:$0xff] %vm19_vm0, %v3599_v38 }
  0x3e   :  { %59 = vst.msk [vmem:[#allocation2 + $0x138] sm:$0xff] %vm19_vm0, %v3599_v38 }
  0x3f   :  { %3591 = vmatpush.bf16.msrb.mxu3 %v3566_v23  ;;  %v3538_v23 = vld [vmem:[%s5616_s0 + $0x3f8] sm:$0xf0]  ;;  %60 = vst.msk [vmem:[#allocation2 + $0x140] sm:$0xff] %vm19_vm0, %v3599_v38 }
  0x40   :  { %v3209_v27 = vor.u32 %v3538_v23, %v3208_v22  ;;  %61 = vst.msk [vmem:[#allocation2 + $0x148] sm:$0xff] %vm19_vm0, %v3599_v38 }
  0x41   :  { %1457 = vmatmul.bf16.gmra.mxu0 %v2729_v54  ;;  %v2820_v54 = vld [vmem:[%s5616_s0 + $0xe0] sm:$0xf]  ;;  %62 = vst.msk [vmem:[#allocation2 + $0x150] sm:$0xff] %vm19_vm0, %v3599_v38 }
  0x42   :  { %1642 = vmatmul.bf16.gmra.mxu3 %v3173_v55  ;;  %1711 = vmatmul.bf16.gmra.mxu1 %v2733_v56  ;;  %v3440_v55 = vld [vmem:[%s5616_s0 + $0xe8] sm:$0xf0]  ;;  %63 = vst.msk [vmem:[#allocation2 + $0x158] sm:$0xff] %vm19_vm0, %v3599_v38 }
  0x43   :  { %3592 = vmatpush.bf16.msra.mxu3 %v3629_v2  ;;  %v2741_v2 = vor.u32 %v3421_v61, %v2740_v60  ;;  %v2821_v56 = vor.u32 %v3440_v55, %v2820_v54  ;;  %v3244_v60 = vld [vmem:[%s5616_s0 + $0x438] sm:$0xf]  ;;  %v3547_v61 = vld [vmem:[%s5616_s0 + $0x440] sm:$0xf0]  ;;  %64 = vst.msk [vmem:[#allocation2 + $0x160] sm:$0xff] %vm19_vm0, %v3599_v38  ;;  %v2829_v54 = vor.u32 %v3441_v48, %v2826_v49 }
  0x44   :  { %65 = vst.msk [vmem:[#allocation2 + $0x168] sm:$0xff] %vm19_vm0, %v3599_v38 }
  0x45   :  { %66 = vst.msk [vmem:[#allocation2 + $0x170] sm:$0xff] %vm19_vm0, %v3599_v38 }
  0x46   :  { %67 = vst.msk [vmem:[#allocation2 + $0x178] sm:$0xff] %vm19_vm0, %v3599_v38 }
  0x47   :  { %3593 = vmatpush.bf16.msra.mxu3 %v3641_v5  ;;  %v2772_v5 = vld [vmem:[%s5616_s0 + $0x80] sm:$0xf]  ;;  %68 = vst.msk [vmem:[#allocation2 + $0x180] sm:$0xff] %vm19_vm0, %v3599_v38 }
  0x48   :  { %v2773_v7 = vor.u32 %v3428_v6, %v2772_v5  ;;  %69 = vst.msk [vmem:[#allocation2 + $0x188] sm:$0xff] %vm19_vm0, %v3599_v38 }
  0x49   :  { %70 = vst.msk [vmem:[#allocation2 + $0x190] sm:$0xff] %vm19_vm0, %v3599_v38 }
  0x4a   :  { %3366 = vmatmul.msk.bf16.gmra.mxu2 %vm19_vm0, %v2761_v59  ;;  %v3436_v59 = vld [vmem:[%s5616_s0 + $0xc8] sm:$0xf0]  ;;  %71 = vst.msk [vmem:[#allocation2 + $0x198] sm:$0xff] %vm19_vm0, %v3599_v38 }
  0x4b   :  { %v2801_v0 = vor.u32 %v3436_v59, %v2800_v58  ;;  %72 = vst.msk [vmem:[#allocation2 + $0x1a0] sm:$0xff] %vm19_vm0, %v3599_v38  ;;  %v3449_v58 = vld [vmem:[%s5616_s0 + $0x130] sm:$0xf0] }
  0x4c   :  { %73 = vst.msk [vmem:[#allocation2 + $0x1a8] sm:$0xff] %vm19_vm0, %v3599_v38 }
  0x4d   :  { %74 = vst.msk [vmem:[#allocation2 + $0x1b0] sm:$0xff] %vm19_vm0, %v3599_v38 }
  0x4e   :  { %75 = vst.msk [vmem:[#allocation2 + $0x1b8] sm:$0xff] %vm19_vm0, %v3599_v38 }
  0x4f   :  { %76 = vst.msk [vmem:[#allocation2 + $0x1c0] sm:$0xff] %vm19_vm0, %v3599_v38 }
  0x50   :  { %77 = vst.msk [vmem:[#allocation2 + $0x1c8] sm:$0xff] %vm19_vm0, %v3599_v38 }
  0x51   :  { %1462 = vmatmul.bf16.gmra.mxu0 %v2741_v2  ;;  %v3245_v2 = vor.u32 %v3547_v61, %v3244_v60  ;;  %78 = vst.msk [vmem:[#allocation2 + $0x1d0] sm:$0xff] %vm19_vm0, %v3599_v38 }
  0x52   :  { %1647 = vmatmul.bf16.gmra.mxu3 %v3185_v3  ;;  %1716 = vmatmul.bf16.gmra.mxu1 %v2745_v4  ;;  %v2805_v3 = vor.u32 %v3435_v62, %v2802_v63  ;;  %79 = vst.msk [vmem:[#allocation2 + $0x1d8] sm:$0xff] %vm19_vm0, %v3599_v38 }
  0x53   :  { %80 = vst.msk [vmem:[#allocation2 + $0x1e0] sm:$0xff] %vm19_vm0, %v3599_v38 }
  0x54   :  { %81 = vst.msk [vmem:[#allocation2 + $0x1e8] sm:$0xff] %vm19_vm0, %v3599_v38 }
  0x55   :  { %82 = vst.msk [vmem:[#allocation2 + $0x1f0] sm:$0xff] %vm19_vm0, %v3599_v38 }
  0x56   :  { %83 = vst.msk [vmem:[#allocation2 + $0x1f8] sm:$0xff] %vm19_vm0, %v3599_v38 }
  0x57   :  { %84 = vst.msk [vmem:[#allocation2 + $0x200] sm:$0xff] %vm19_vm0, %v3599_v38 }
  0x58   :  { %85 = vst.msk [vmem:[#allocation2 + $0x208] sm:$0xff] %vm19_vm0, %v3599_v38 }
  0x59   :  { %86 = vst.msk [vmem:[#allocation2 + $0x210] sm:$0xff] %vm19_vm0, %v3599_v38 }
  0x5a   :  { %3367 = vmatmul.msk.bf16.gmra.mxu2 %vm19_vm0, %v2773_v7  ;;  %v118_v7 = vld [vmem:[#allocation2] sm:$0xff]  ;;  %87 = vst.msk [vmem:[#allocation2 + $0x218] sm:$0xff] %vm19_vm0, %v3599_v38 }
  0x5b   :  { %88 = vst.msk [vmem:[#allocation2 + $0x220] sm:$0xff] %vm19_vm0, %v3599_v38 }
  0x5c   :  { %89 = vst.msk [vmem:[#allocation2 + $0x228] sm:$0xff] %vm19_vm0, %v3599_v38 }
  0x5d   :  { %90 = vst.msk [vmem:[#allocation2 + $0x230] sm:$0xff] %vm19_vm0, %v3599_v38 }
  0x5e   :  { %91 = vst.msk [vmem:[#allocation2 + $0x238] sm:$0xff] %vm19_vm0, %v3599_v38 }
  0x5f   :  { %92 = vst.msk [vmem:[#allocation2 + $0x240] sm:$0xff] %vm19_vm0, %v3599_v38 }
  0x60   :  { %93 = vst.msk [vmem:[#allocation2 + $0x248] sm:$0xff] %vm19_vm0, %v3599_v38 }
  0x61   :  { %1467 = vmatmul.bf16.gmra.mxu0 %v2753_v14  ;;  %94 = vst.msk [vmem:[#allocation2 + $0x250] sm:$0xff] %vm19_vm0, %v3599_v38 }
  0x62   :  { %1652 = vmatmul.bf16.gmra.mxu3 %v3197_v15  ;;  %1721 = vmatmul.bf16.gmra.mxu1 %v2757_v16  ;;  %95 = vst.msk [vmem:[#allocation2 + $0x258] sm:$0xff] %vm19_vm0, %v3599_v38 }
  0x63   :  { %96 = vst.msk [vmem:[#allocation2 + $0x260] sm:$0xff] %vm19_vm0, %v3599_v38 }
  0x64   :  { %97 = vst.msk [vmem:[#allocation2 + $0x268] sm:$0xff] %vm19_vm0, %v3599_v38 }
  0x65   :  { %98 = vst.msk [vmem:[#allocation2 + $0x270] sm:$0xff] %vm19_vm0, %v3599_v38 }
  0x66   :  { %99 = vst.msk [vmem:[#allocation2 + $0x278] sm:$0xff] %vm19_vm0, %v3599_v38 }
  0x67   :  { %100 = vst.msk [vmem:[#allocation2 + $0x280] sm:$0xff] %vm19_vm0, %v3599_v38 }
  0x68   :  { %101 = vst.msk [vmem:[#allocation2 + $0x288] sm:$0xff] %vm19_vm0, %v3599_v38 }
  0x69   :  { %102 = vst.msk [vmem:[#allocation2 + $0x290] sm:$0xff] %vm19_vm0, %v3599_v38 }
  0x6a   :  { %3368 = vmatmul.msk.bf16.gmra.mxu2 %vm19_vm0, %v2785_v19  ;;  %v3443_v19 = vld [vmem:[%s5616_s0 + $0x100] sm:$0xf0]  ;;  %103 = vst.msk [vmem:[#allocation2 + $0x298] sm:$0xff] %vm19_vm0, %v3599_v38 }
  0x6b   :  { %v2833_v20 = vor.u32 %v3443_v19, %v2832_v18  ;;  %104 = vst.msk [vmem:[#allocation2 + $0x2a0] sm:$0xff] %vm19_vm0, %v3599_v38  ;;  %v3445_v18 = vld [vmem:[%s5616_s0 + $0x110] sm:$0xf0] }
  0x6c   :  { %105 = vst.msk [vmem:[#allocation2 + $0x2a8] sm:$0xff] %vm19_vm0, %v3599_v38 }
  0x6d   :  { %106 = vst.msk [vmem:[#allocation2 + $0x2b0] sm:$0xff] %vm19_vm0, %v3599_v38 }
  0x6e   :  { %107 = vst.msk [vmem:[#allocation2 + $0x2b8] sm:$0xff] %vm19_vm0, %v3599_v38 }
  0x6f   :  { %108 = vst.msk [vmem:[#allocation2 + $0x2c0] sm:$0xff] %vm19_vm0, %v3599_v38 }
  0x70   :  { %109 = vst.msk [vmem:[#allocation2 + $0x2c8] sm:$0xff] %vm19_vm0, %v3599_v38 }
  0x71   :  { %1472 = vmatmul.bf16.gmra.mxu0 %v2765_v26  ;;  %v3439_v26 = vld [vmem:[%s5616_s0 + $0xe0] sm:$0xf0]  ;;  %110 = vst.msk [vmem:[#allocation2 + $0x2d0] sm:$0xff] %vm19_vm0, %v3599_v38 }
  0x72   :  { %1657 = vmatmul.bf16.gmra.mxu3 %v3209_v27  ;;  %1726 = vmatmul.bf16.gmra.mxu1 %v2769_v28  ;;  %v2813_v27 = vor.u32 %v3439_v26, %v2812_v25  ;;  %v3256_v28 = vld [vmem:[%s5616_s0 + $0x450] sm:$0xf]  ;;  %111 = vst.msk [vmem:[#allocation2 + $0x2d8] sm:$0xff] %vm19_vm0, %v3599_v38  ;;  %v3444_v26 = vld [vmem:[%s5616_s0 + $0x10c] sm:$0xf] }
  0x73   :  { %v3257_v30 = vor.u32 %v3550_v29, %v3256_v28  ;;  %112 = vst.msk [vmem:[#allocation2 + $0x2e0] sm:$0xff] %vm19_vm0, %v3599_v38 }
  0x74   :  { %113 = vst.msk [vmem:[#allocation2 + $0x2e8] sm:$0xff] %vm19_vm0, %v3599_v38 }
  0x75   :  { %114 = vst.msk [vmem:[#allocation2 + $0x2f0] sm:$0xff] %vm19_vm0, %v3599_v38 }
  0x76   :  { %115 = vst.msk [vmem:[#allocation2 + $0x2f8] sm:$0xff] %vm19_vm0, %v3599_v38 }
  0x77   :  { %116 = vst.msk [vmem:[#allocation2 + $0x300] sm:$0xff] %vm19_vm0, %v3599_v38 }
  0x78   :  { %117 = vst.msk [vmem:[#allocation2 + $0x308] sm:$0xff] %vm19_vm0, %v3599_v38 }
  0x7a   :  { %3369 = vmatmul.msk.bf16.gmra.mxu2 %vm19_vm0, %v2797_v31  ;;  %v3438_v31 = vld [vmem:[%s5616_s0 + $0xdc] sm:$0xf] }
  0x7b   :  { %v2817_v33 = vor.u32 %v3438_v31, %v2814_v32 }
  0x81   :  { %1477 = vmatmul.bf16.gmra.mxu0 %v2777_v39  ;;  %v2844_v39 = vld [vmem:[%s5616_s0 + $0x110] sm:$0xf] }
  0x82   :  { %1662 = vmatmul.bf16.gmra.mxu3 %v3221_v40  ;;  %1731 = vmatmul.bf16.gmra.mxu1 %v2781_v41  ;;  %v3446_v40 = vld [vmem:[%s5616_s0 + $0x118] sm:$0xf0] }
  0x83   :  { %v2845_v41 = vor.u32 %v3446_v40, %v2844_v39  ;;  %v3452_v39 = vld [vmem:[%s5616_s0 + $0x148] sm:$0xf0] }
  0x8a   :  { %3370 = vmatmul.msk.bf16.gmra.mxu2 %vm19_vm0, %v2809_v44  ;;  %v3268_v44 = vld [vmem:[%s5616_s0 + $0x468] sm:$0xf] }
  0x8d   :  { %v1956_v57 = vpop.f32.mrf.mxu2 }
  0x91   :  { %1482 = vmatmul.bf16.gmra.mxu0 %v2789_v51 }
  0x92   :  { %1667 = vmatmul.bf16.gmra.mxu3 %v3233_v52  ;;  %1736 = vmatmul.bf16.gmra.mxu1 %v2793_v53  ;;  %v3269_v53 = vor.u32 %v3553_v45, %v3268_v44 }
  0x95   :  { %v3988_v6 = vpop.f32.mrf.mxu2 }
  0x9a   :  { %3371 = vmatmul.msk.bf16.gmra.mxu2 %vm19_vm0, %v2821_v56 }
  0x9d   :  { %v4014_v11 = vpop.f32.mrf.mxu2 }
  0x9e   :  { %v1448_v1 = vpop.f32.mrf.mxu0 }
  0x9f   :  { %v1702_v4 = vpop.f32.mrf.mxu1 }
  0xa0   :  { %v1703_v5 = vadd.f32 %v1702_v4, %v1448_v1  ;;  %v119_v1 = vld [vmem:[#allocation2 + $0x8] sm:$0xff] }
  0xa1   :  { %1487 = vmatmul.bf16.gmra.mxu0 %v2801_v0 }
  0xa2   :  { %v1957_v8 = vadd.f32 %v1956_v57, %v1703_v5  ;;  %1672 = vmatmul.bf16.gmra.mxu3 %v3245_v2  ;;  %1741 = vmatmul.bf16.gmra.mxu1 %v2805_v3  ;;  %v2856_v57 = vld [vmem:[%s5616_s0 + $0x128] sm:$0xf]  ;;  %v120_v5 = vld [vmem:[#allocation2 + $0x10] sm:$0xff] }
  0xa3   :  { %v2857_v0 = vor.u32 %v3449_v58, %v2856_v57  ;;  %v125_v57 = vld [vmem:[#allocation2 + $0x38] sm:$0xff] }
  0xa4   :  { %v2201_v9 = vadd.f32 %v1957_v8, %v118_v7 }
  0xa5   :  { %v4041_v14 = vpop.f32.mrf.mxu3  ;;  %v4043_v15 = vpop.f32.mrf.mxu2 }
  0xa6   :  { %2299 = vst.msk [vmem:[#allocation2] sm:$0xff] %vm19_vm0, %v2201_v9  ;;  %v4049_v16 = vpop.f32.mrf.mxu0 }
  0xa7   :  { %5619 = vst [vmem:[#allocation3_spill] sm:$0xff] %v4041_v14  ;;  %v4051_v17 = vpop.f32.mrf.mxu1 }
  0xa8   :  { %v1705_v55 = vadd.f32 %v4051_v17, %v4049_v16  ;;  %v123_v16 = vld [vmem:[#allocation2 + $0x28] sm:$0xff] }
  0xa9   :  { %v2836_v17 = vld [vmem:[%s5616_s0 + $0x108] sm:$0xf] }
  0xaa   :  { %3372 = vmatmul.msk.bf16.gmra.mxu2 %vm19_vm0, %v2833_v20  ;;  %v1959_v63 = vadd.f32 %v3988_v6, %v1705_v55  ;;  %v121_v6 = vld [vmem:[#allocation2 + $0x18] sm:$0xff]  ;;  %v3280_v20 = vld [vmem:[%s5616_s0 + $0x480] sm:$0xf]  ;;  %v2837_v29 = vor.u32 %v3445_v18, %v2836_v17 }
  0xab   :  { %v2880_v18 = vld [vmem:[%s5616_s0 + $0x158] sm:$0xf] }
  0xad   :  { %v2400_v12 = vld [vmem:[#allocation2] sm:$0xff]  ;;  %v4076_v21 = vpop.f32.mrf.mxu3  ;;  %v4078_v22 = vpop.f32.mrf.mxu2 }
  0xae   :  { %v2502_v13 = vadd.f32 %v4010_v10, %v2400_v12  ;;  %5620 = vst [vmem:[#allocation4_spill] sm:$0xff] %v4076_v21  ;;  %v1453_v23 = vpop.f32.mrf.mxu0  ;;  %v2202_v12 = vadd.f32 %v1959_v63, %v119_v1  ;;  %v3448_v63 = vld [vmem:[%s5616_s0 + $0x128] sm:$0xf0]  ;;  %v3150_v1 = vld [vmem:[%s5616_s0 + $0x384] sm:$0xf0] }
  0xaf   :  { %v1707_v24 = vpop.f32.mrf.mxu1 }
  0xb0   :  { %2600 = vst.msk [vmem:[%s5618_s3] sm:$0xff] %vm19_vm0, %v2502_v13  ;;  %v1708_v56 = vadd.f32 %v1707_v24, %v1453_v23 }
  0xb1   :  { %1492 = vmatmul.bf16.gmra.mxu0 %v2813_v27  ;;  %v2838_v27 = vld [vmem:[%s5616_s0 + $0x114] sm:$0xf0]  ;;  %2300 = vst.msk [vmem:[#allocation2 + $0x8] sm:$0xff] %vm19_vm0, %v2202_v12 }
  0xb2   :  { %1677 = vmatmul.bf16.gmra.mxu3 %v3257_v30  ;;  %1746 = vmatmul.bf16.gmra.mxu1 %v2817_v33  ;;  %v1962_v2 = vadd.f32 %v4014_v11, %v1708_v56  ;;  %v122_v11 = vld [vmem:[#allocation2 + $0x20] sm:$0xff]  ;;  %v2841_v33 = vor.u32 %v3444_v26, %v2838_v27 }
  0xb5   :  { %v4114_v34 = vpop.f32.mrf.mxu3  ;;  %v4116_v35 = vpop.f32.mrf.mxu2 }
  0xb6   :  { %v1455_v36 = vpop.f32.mrf.mxu0 }
  0xb7   :  { %v1709_v37 = vpop.f32.mrf.mxu1 }
  0xb8   :  { %v1710_v59 = vadd.f32 %v1709_v37, %v1455_v36  ;;  %v2868_v37 = vld [vmem:[%s5616_s0 + $0x140] sm:$0xf] }
  0xba   :  { %3373 = vmatmul.msk.bf16.gmra.mxu2 %vm19_vm0, %v2845_v41  ;;  %v1964_v7 = vadd.f32 %v4043_v15, %v1710_v59  ;;  %v2203_v15 = vadd.f32 %v1962_v2, %v120_v5  ;;  %v2401_v41 = vld [vmem:[#allocation2 + $0x8] sm:$0xff]  ;;  %v3447_v5 = vld [vmem:[%s5616_s0 + $0x124] sm:$0xf] }
  0xbb   :  { %v2503_v44 = vadd.f32 %v4010_v10, %v2401_v41 }
  0xbc   :  { %v2204_v19 = vadd.f32 %v1964_v7, %v121_v6  ;;  %2301 = vst.msk [vmem:[#allocation2 + $0x10] sm:$0xff] %vm19_vm0, %v2203_v15  ;;  %v2850_v7 = vld [vmem:[%s5616_s0 + $0x12c] sm:$0xf0] }
  0xbd   :  { %v4153_v46 = vpop.f32.mrf.mxu3  ;;  %v4155_v47 = vpop.f32.mrf.mxu2  ;;  %2601 = vst.msk [vmem:[%s5618_s3 + $0x8] sm:$0xff] %vm19_vm0, %v2503_v44  ;;  %v2853_v15 = vor.u32 %v3447_v5, %v2850_v7  ;;  %v2862_v44 = vld [vmem:[%s5616_s0 + $0x144] sm:$0xf0]  ;;  %v2872_v7 = vld [vmem:[%s5616_s0 + $0x150] sm:$0xf] }
  0xbe   :  { %v1458_v51 = vpop.f32.mrf.mxu0  ;;  %2302 = vst.msk [vmem:[#allocation2 + $0x18] sm:$0xff] %vm19_vm0, %v2204_v19  ;;  %v3455_v19 = vld [vmem:[%s5616_s0 + $0x160] sm:$0xf0] }
  0xbf   :  { %v1712_v52 = vpop.f32.mrf.mxu1 }
  0xc0   :  { %v1713_v60 = vadd.f32 %v1712_v52, %v1458_v51 }
  0xc1   :  { %1497 = vmatmul.bf16.gmra.mxu0 %v2825_v50 }
  0xc2   :  { %1682 = vmatmul.bf16.gmra.mxu3 %v3269_v53  ;;  %1751 = vmatmul.bf16.gmra.mxu1 %v2829_v54  ;;  %v1967_v9 = vadd.f32 %v4078_v22, %v1713_v60  ;;  %v3556_v22 = vld [vmem:[%s5616_s0 + $0x488] sm:$0xf0]  ;;  %v2848_v60 = vld [vmem:[%s5616_s0 + $0x120] sm:$0xf] }
  0xc3   :  { %v3281_v31 = vor.u32 %v3556_v22, %v3280_v20  ;;  %v2402_v45 = vld [vmem:[#allocation2 + $0x10] sm:$0xff]  ;;  %v2849_v6 = vor.u32 %v3448_v63, %v2848_v60 }
  0xc4   :  { %v2205_v23 = vadd.f32 %v1967_v9, %v122_v11  ;;  %v2504_v48 = vadd.f32 %v4010_v10, %v2402_v45 }
  0xc5   :  { %v4187_v61 = vpop.f32.mrf.mxu3  ;;  %v4189_v62 = vpop.f32.mrf.mxu2  ;;  %v2403_v49 = vld [vmem:[#allocation2 + $0x18] sm:$0xff] }
  0xc6   :  { %v1460_v3 = vpop.f32.mrf.mxu0  ;;  %2303 = vst.msk [vmem:[#allocation2 + $0x20] sm:$0xff] %vm19_vm0, %v2205_v23  ;;  %v2505_v52 = vadd.f32 %v4010_v10, %v2403_v49 }
  0xc7   :  { %v1714_v4 = vpop.f32.mrf.mxu1  ;;  %2602 = vst.msk [vmem:[%s5618_s3 + $0x10] sm:$0xff] %vm19_vm0, %v2504_v48 }
  0xc8   :  { %v1715_v8 = vadd.f32 %v1714_v4, %v1460_v3  ;;  %2603 = vst.msk [vmem:[%s5618_s3 + $0x18] sm:$0xff] %vm19_vm0, %v2505_v52 }
  0xca   :  { %v1969_v13 = vadd.f32 %v4116_v35, %v1715_v8  ;;  %3374 = vmatmul.msk.bf16.gmra.mxu2 %vm19_vm0, %v2857_v0  ;;  %v124_v35 = vld [vmem:[#allocation2 + $0x30] sm:$0xff]  ;;  %v3522_v0 = vld [vmem:[%s5616_s0 + $0x37c] sm:$0xf] }
  0xcb   :  { %v3153_v11 = vor.u32 %v3522_v0, %v3150_v1 }
  0xcc   :  { %v2206_v28 = vadd.f32 %v1969_v13, %v123_v16  ;;  %v126_v16 = vld [vmem:[#allocation2 + $0x40] sm:$0xff] }
  0xcd   :  { %v4225_v24 = vpop.f32.mrf.mxu3  ;;  %v4227_v25 = vpop.f32.mrf.mxu2  ;;  %v2404_v53 = vld [vmem:[#allocation2 + $0x20] sm:$0xff] }
  0xce   :  { %v1463_v38 = vpop.f32.mrf.mxu0  ;;  %2304 = vst.msk [vmem:[#allocation2 + $0x28] sm:$0xff] %vm19_vm0, %v2206_v28  ;;  %v2506_v55 = vadd.f32 %v4010_v10, %v2404_v53  ;;  %v128_v53 = vld [vmem:[#allocation2 + $0x50] sm:$0xff] }
  0xcf   :  { %v1717_v30 = vpop.f32.mrf.mxu1 }
  0xd0   :  { %v1718_v32 = vadd.f32 %v1717_v30, %v1463_v38  ;;  %2604 = vst.msk [vmem:[%s5618_s3 + $0x20] sm:$0xff] %vm19_vm0, %v2506_v55  ;;  %v127_v30 = vld [vmem:[#allocation2 + $0x48] sm:$0xff]  ;;  %v2892_v55 = vld [vmem:[%s5616_s0 + $0x170] sm:$0xf] }
  0xd1   :  { %1502 = vmatmul.bf16.gmra.mxu0 %v2837_v29 }
  0xd2   :  { %v1972_v36 = vadd.f32 %v4155_v47, %v1718_v32  ;;  %1687 = vmatmul.bf16.gmra.mxu3 %v3281_v31  ;;  %1756 = vmatmul.bf16.gmra.mxu1 %v2841_v33  ;;  %v2869_v47 = vor.u32 %v3452_v39, %v2868_v37  ;;  %v2860_v32 = vld [vmem:[%s5616_s0 + $0x138] sm:$0xf]  ;;  %v3451_v33 = vld [vmem:[%s5616_s0 + $0x140] sm:$0xf0]  ;;  %v3162_v37 = vld [vmem:[%s5616_s0 + $0x39c] sm:$0xf0] }
  0xd4   :  { %v2207_v40 = vadd.f32 %v1972_v36, %v124_v35  ;;  %v3525_v36 = vld [vmem:[%s5616_s0 + $0x394] sm:$0xf] }
  0xd5   :  { %v4247_v42 = vpop.f32.mrf.mxu3  ;;  %v1978_v43 = vpop.f32.mrf.mxu2  ;;  %v2405_v56 = vld [vmem:[#allocation2 + $0x28] sm:$0xff] }
  0xd6   :  { %2305 = vst.msk [vmem:[#allocation2 + $0x30] sm:$0xff] %vm19_vm0, %v2207_v40  ;;  %v1465_v50 = vpop.f32.mrf.mxu0  ;;  %v2507_v58 = vadd.f32 %v4010_v10, %v2405_v56  ;;  %v3458_v56 = vld [vmem:[%s5616_s0 + $0x178] sm:$0xf0] }
  0xd7   :  { %v1719_v51 = vpop.f32.mrf.mxu1 }
  0xd8   :  { %v1720_v54 = vadd.f32 %v1719_v51, %v1465_v50  ;;  %2605 = vst.msk [vmem:[%s5618_s3 + $0x28] sm:$0xff] %vm19_vm0, %v2507_v58  ;;  %v3165_v50 = vor.u32 %v3525_v36, %v3162_v37 }
  0xda   :  { %v1974_v59 = vadd.f32 %v4189_v62, %v1720_v54  ;;  %3375 = vmatmul.msk.bf16.gmra.mxu2 %vm19_vm0, %v2869_v47  ;;  %v2861_v47 = vor.u32 %v3451_v33, %v2860_v32 }
  0xdc   :  { %v2208_v62 = vadd.f32 %v1974_v59, %v125_v57 }
  0xdd   :  { %v2406_v2 = vld [vmem:[#allocation2 + $0x30] sm:$0xff]  ;;  %v4289_v3 = vpop.f32.mrf.mxu3  ;;  %v1981_v4 = vpop.f32.mrf.mxu2 }
  0xde   :  { %v2508_v8 = vadd.f32 %v4010_v10, %v2406_v2  ;;  %2306 = vst.msk [vmem:[#allocation2 + $0x38] sm:$0xff] %vm19_vm0, %v2208_v62  ;;  %v1468_v9 = vpop.f32.mrf.mxu0  ;;  %v2893_v62 = vor.u32 %v3458_v56, %v2892_v55  ;;  %v3456_v55 = vld [vmem:[%s5616_s0 + $0x16c] sm:$0xf]  ;;  %v2886_v56 = vld [vmem:[%s5616_s0 + $0x174] sm:$0xf0] }
  0xdf   :  { %v1722_v12 = vpop.f32.mrf.mxu1 }
  0xe0   :  { %2606 = vst.msk [vmem:[%s5618_s3 + $0x30] sm:$0xff] %vm19_vm0, %v2508_v8  ;;  %v1723_v13 = vadd.f32 %v1722_v12, %v1468_v9  ;;  %v3454_v8 = vld [vmem:[%s5616_s0 + $0x158] sm:$0xf0]  ;;  %v3528_v9 = vld [vmem:[%s5616_s0 + $0x3ac] sm:$0xf] }
  0xe1   :  { %1507 = vmatmul.bf16.gmra.mxu0 %v2849_v6  ;;  %v3174_v12 = vld [vmem:[%s5616_s0 + $0x3b4] sm:$0xf0] }
  0xe2   :  { %v1977_v17 = vadd.f32 %v4227_v25, %v1723_v13  ;;  %1886 = vmatmul.bf16.vlgmr.msrb.gmra.mxu3 %v3153_v11  ;;  %1761 = vmatmul.bf16.gmra.mxu1 %v2853_v15  ;;  %v2881_v25 = vor.u32 %v3455_v19, %v2880_v18  ;;  %v2873_v19 = vor.u32 %v3454_v8, %v2872_v7  ;;  %v3464_v7 = vld [vmem:[%s5616_s0 + $0x1a8] sm:$0xf0] }
  0xe4   :  { %v2209_v20 = vadd.f32 %v1977_v17, %v126_v16  ;;  %v3453_v16 = vld [vmem:[%s5616_s0 + $0x154] sm:$0xf]  ;;  %v2874_v17 = vld [vmem:[%s5616_s0 + $0x15c] sm:$0xf0] }
  0xe5   :  { %v2407_v22 = vld [vmem:[#allocation2 + $0x38] sm:$0xff]  ;;  %v4310_v23 = vpop.f32.mrf.mxu3  ;;  %v1983_v26 = vpop.f32.mrf.mxu2 }
  0xe6   :  { %v2509_v27 = vadd.f32 %v4010_v10, %v2407_v22  ;;  %2307 = vst.msk [vmem:[#allocation2 + $0x40] sm:$0xff] %vm19_vm0, %v2209_v20  ;;  %v1470_v28 = vpop.f32.mrf.mxu0 }
  0xe7   :  { %v1724_v29 = vpop.f32.mrf.mxu1 }
  0xe8   :  { %2607 = vst.msk [vmem:[%s5618_s3 + $0x38] sm:$0xff] %vm19_vm0, %v2509_v27  ;;  %v1725_v38 = vadd.f32 %v1724_v29, %v1470_v28  ;;  %v130_v28 = vld [vmem:[#allocation2 + $0x60] sm:$0xff] }
  0xea   :  { %v1979_v31 = vadd.f32 %v1978_v43, %v1725_v38  ;;  %3376 = vmatmul.msk.bf16.gmra.mxu2 %vm19_vm0, %v2881_v25  ;;  %v3450_v43 = vld [vmem:[%s5616_s0 + $0x13c] sm:$0xf]  ;;  %v2877_v25 = vor.u32 %v3453_v16, %v2874_v17  ;;  %v2904_v38 = vld [vmem:[%s5616_s0 + $0x188] sm:$0xf] }
  0xeb   :  { %v2865_v52 = vor.u32 %v3450_v43, %v2862_v44  ;;  %v131_v44 = vld [vmem:[#allocation2 + $0x68] sm:$0xff] }
  0xec   :  { %v2210_v35 = vadd.f32 %v1979_v31, %v127_v30  ;;  %v3461_v30 = vld [vmem:[%s5616_s0 + $0x190] sm:$0xf0] }
  0xed   :  { %v2408_v39 = vld [vmem:[#allocation2 + $0x40] sm:$0xff]  ;;  %v4331_v40 = vpop.f32.mrf.mxu3  ;;  %v1986_v41 = vpop.f32.mrf.mxu2  ;;  %v2905_v37 = vor.u32 %v3461_v30, %v2904_v38 }
  0xee   :  { %v2510_v45 = vadd.f32 %v4010_v10, %v2408_v39  ;;  %2308 = vst.msk [vmem:[#allocation2 + $0x48] sm:$0xff] %vm19_vm0, %v2210_v35  ;;  %v1473_v48 = vpop.f32.mrf.mxu0 }
  0xef   :  { %v1727_v49 = vpop.f32.mrf.mxu1 }
  0xf0   :  { %2608 = vst.msk [vmem:[%s5618_s3 + $0x40] sm:$0xff] %vm19_vm0, %v2510_v45  ;;  %v1728_v51 = vadd.f32 %v1727_v49, %v1473_v48  ;;  %v3457_v48 = vld [vmem:[%s5616_s0 + $0x170] sm:$0xf0] }
  0xf1   :  { %1512 = vmatmul.bf16.gmra.mxu0 %v2861_v47  ;;  %v2884_v47 = vld [vmem:[%s5616_s0 + $0x168] sm:$0xf] }
  0xf2   :  { %v1982_v54 = vadd.f32 %v1981_v4, %v1728_v51  ;;  %1891 = vmatmul.bf16.gmra.mxu3 %v3165_v50  ;;  %1766 = vmatmul.bf16.gmra.mxu1 %v2865_v52  ;;  %v129_v4 = vld [vmem:[#allocation2 + $0x58] sm:$0xff]  ;;  %v3531_v50 = vld [vmem:[%s5616_s0 + $0x3c4] sm:$0xf]  ;;  %v3186_v51 = vld [vmem:[%s5616_s0 + $0x3cc] sm:$0xf0] }
  0xf4   :  { %v2211_v57 = vadd.f32 %v1982_v54, %v128_v53 }
  0xf5   :  { %v2409_v58 = vld [vmem:[#allocation2 + $0x48] sm:$0xff]  ;;  %v4351_v59 = vpop.f32.mrf.mxu3  ;;  %v1988_v60 = vpop.f32.mrf.mxu2 }
  0xf6   :  { %v2511_v63 = vadd.f32 %v4010_v10, %v2409_v58  ;;  %2309 = vst.msk [vmem:[#allocation2 + $0x50] sm:$0xff] %vm19_vm0, %v2211_v57  ;;  %v1475_v0 = vpop.f32.mrf.mxu0  ;;  %v2885_v58 = vor.u32 %v3457_v48, %v2884_v47  ;;  %v2928_v48 = vld [vmem:[%s5616_s0 + $0x1b8] sm:$0xf] }
  0xf7   :  { %v1729_v1 = vpop.f32.mrf.mxu1 }
  0xf8   :  { %2609 = vst.msk [vmem:[%s5618_s3 + $0x48] sm:$0xff] %vm19_vm0, %v2511_v63  ;;  %v1730_v2 = vadd.f32 %v1729_v1, %v1475_v0  ;;  %v2889_v1 = vor.u32 %v3456_v55, %v2886_v56 }
  0xfa   :  { %v1984_v5 = vadd.f32 %v1983_v26, %v1730_v2  ;;  %3377 = vmatmul.msk.bf16.gmra.mxu2 %vm19_vm0, %v2893_v62  ;;  %v3177_v26 = vor.u32 %v3528_v9, %v3174_v12  ;;  %v3189_v62 = vor.u32 %v3531_v50, %v3186_v51  ;;  %v132_v2 = vld [vmem:[#allocation2 + $0x70] sm:$0xff] }
  0xfc   :  { %v2212_v6 = vadd.f32 %v1984_v5, %v129_v4  ;;  %v2916_v5 = vld [vmem:[%s5616_s0 + $0x1a0] sm:$0xf] }
  0xfd   :  { %v2410_v11 = vld [vmem:[#allocation2 + $0x50] sm:$0xff]  ;;  %v4372_v13 = vpop.f32.mrf.mxu3  ;;  %v1991_v15 = vpop.f32.mrf.mxu2 }
  0xfe   :  { %v2512_v18 = vadd.f32 %v4010_v10, %v2410_v11  ;;  %2310 = vst.msk [vmem:[#allocation2 + $0x58] sm:$0xff] %vm19_vm0, %v2212_v6  ;;  %v1478_v20 = vpop.f32.mrf.mxu0 }
  0xff   :  { %v1732_v22 = vpop.f32.mrf.mxu1 }
 0x100   :  { %2610 = vst.msk [vmem:[%s5618_s3 + $0x50] sm:$0xff] %vm19_vm0, %v2512_v18  ;;  %v1733_v27 = vadd.f32 %v1732_v22, %v1478_v20  ;;  %v2896_v22 = vld [vmem:[%s5616_s0 + $0x180] sm:$0xf] }
 0x101   :  { %1517 = vmatmul.bf16.gmra.mxu0 %v2873_v19  ;;  %v133_v19 = vld [vmem:[#allocation2 + $0x78] sm:$0xff] }
 0x102   :  { %v1987_v29 = vadd.f32 %v1986_v41, %v1733_v27  ;;  %1896 = vmatmul.bf16.gmra.mxu3 %v3177_v26  ;;  %1771 = vmatmul.bf16.gmra.mxu1 %v2877_v25  ;;  %v3460_v26 = vld [vmem:[%s5616_s0 + $0x188] sm:$0xf0]  ;;  %v3534_v25 = vld [vmem:[%s5616_s0 + $0x3dc] sm:$0xf] }
 0x104   :  { %v2213_v31 = vadd.f32 %v1987_v29, %v130_v28  ;;  %v3198_v28 = vld [vmem:[%s5616_s0 + $0x3e4] sm:$0xf0] }
 0x105   :  { %v2411_v32 = vld [vmem:[#allocation2 + $0x58] sm:$0xff]  ;;  %v4392_v33 = vpop.f32.mrf.mxu3  ;;  %v1993_v35 = vpop.f32.mrf.mxu2 }
 0x106   :  { %v2513_v36 = vadd.f32 %v4010_v10, %v2411_v32  ;;  %2311 = vst.msk [vmem:[#allocation2 + $0x60] sm:$0xff] %vm19_vm0, %v2213_v31  ;;  %v1480_v39 = vpop.f32.mrf.mxu0  ;;  %v3459_v31 = vld [vmem:[%s5616_s0 + $0x184] sm:$0xf]  ;;  %v2898_v32 = vld [vmem:[%s5616_s0 + $0x18c] sm:$0xf0] }
 0x107   :  { %v1734_v41 = vpop.f32.mrf.mxu1 }
 0x108   :  { %2611 = vst.msk [vmem:[%s5618_s3 + $0x58] sm:$0xff] %vm19_vm0, %v2513_v36  ;;  %v1735_v43 = vadd.f32 %v1734_v41, %v1480_v39  ;;  %v2897_v36 = vor.u32 %v3460_v26, %v2896_v22  ;;  %v3201_v41 = vor.u32 %v3534_v25, %v3198_v28  ;;  %v136_v26 = vld [vmem:[#allocation2 + $0x90] sm:$0xff]  ;;  %v3470_v25 = vld [vmem:[%s5616_s0 + $0x1d8] sm:$0xf0] }
 0x10a   :  { %v1989_v45 = vadd.f32 %v1988_v60, %v1735_v43  ;;  %3378 = vmatmul.msk.bf16.gmra.mxu2 %vm19_vm0, %v2905_v37 }
 0x10c   :  { %v2214_v49 = vadd.f32 %v1989_v45, %v131_v44  ;;  %v2901_v44 = vor.u32 %v3459_v31, %v2898_v32  ;;  %v134_v45 = vld [vmem:[#allocation2 + $0x80] sm:$0xff] }
 0x10d   :  { %v2412_v52 = vld [vmem:[#allocation2 + $0x60] sm:$0xff]  ;;  %v4413_v53 = vpop.f32.mrf.mxu3  ;;  %v1996_v54 = vpop.f32.mrf.mxu2 }
 0x10e   :  { %v2514_v57 = vadd.f32 %v4010_v10, %v2412_v52  ;;  %2312 = vst.msk [vmem:[#allocation2 + $0x68] sm:$0xff] %vm19_vm0, %v2214_v49  ;;  %v1483_v60 = vpop.f32.mrf.mxu0  ;;  %v3467_v49 = vld [vmem:[%s5616_s0 + $0x1c0] sm:$0xf0] }
 0x10f   :  { %v1737_v63 = vpop.f32.mrf.mxu1 }
 0x110   :  { %2612 = vst.msk [vmem:[%s5618_s3 + $0x60] sm:$0xff] %vm19_vm0, %v2514_v57  ;;  %v1738_v0 = vadd.f32 %v1737_v63, %v1483_v60  ;;  %v135_v63 = vld [vmem:[#allocation2 + $0x88] sm:$0xff] }
 0x111   :  { %1522 = vmatmul.bf16.gmra.mxu0 %v2885_v58 }
 0x112   :  { %v1992_v4 = vadd.f32 %v1991_v15, %v1738_v0  ;;  %1901 = vmatmul.bf16.gmra.mxu3 %v3189_v62  ;;  %1776 = vmatmul.bf16.gmra.mxu1 %v2889_v1  ;;  %v2917_v15 = vor.u32 %v3464_v7, %v2916_v5  ;;  %v2908_v0 = vld [vmem:[%s5616_s0 + $0x198] sm:$0xf]  ;;  %v3463_v1 = vld [vmem:[%s5616_s0 + $0x1a0] sm:$0xf0]  ;;  %v3210_v5 = vld [vmem:[%s5616_s0 + $0x3fc] sm:$0xf0] }
 0x114   :  { %v2215_v8 = vadd.f32 %v1992_v4, %v132_v2  ;;  %v3537_v4 = vld [vmem:[%s5616_s0 + $0x3f4] sm:$0xf] }
 0x115   :  { %v2413_v6 = vld [vmem:[#allocation2 + $0x68] sm:$0xff]  ;;  %v4433_v9 = vpop.f32.mrf.mxu3  ;;  %v1998_v12 = vpop.f32.mrf.mxu2 }
 0x116   :  { %v2515_v11 = vadd.f32 %v4010_v10, %v2413_v6  ;;  %2313 = vst.msk [vmem:[#allocation2 + $0x70] sm:$0xff] %vm19_vm0, %v2215_v8  ;;  %v1485_v16 = vpop.f32.mrf.mxu0 }
 0x117   :  { %v1739_v17 = vpop.f32.mrf.mxu1 }
 0x118   :  { %2613 = vst.msk [vmem:[%s5618_s3 + $0x68] sm:$0xff] %vm19_vm0, %v2515_v11  ;;  %v1740_v18 = vadd.f32 %v1739_v17, %v1485_v16  ;;  %v2910_v11 = vld [vmem:[%s5616_s0 + $0x1a4] sm:$0xf0]  ;;  %v2909_v16 = vor.u32 %v3463_v1, %v2908_v0 }
 0x11a   :  { %v1994_v20 = vadd.f32 %v1993_v35, %v1740_v18  ;;  %3379 = vmatmul.msk.bf16.gmra.mxu2 %vm19_vm0, %v2917_v15  ;;  %v3213_v18 = vor.u32 %v3537_v4, %v3210_v5  ;;  %v138_v4 = vld [vmem:[#allocation2 + $0xa0] sm:$0xff]  ;;  %v2952_v5 = vld [vmem:[%s5616_s0 + $0x1e8] sm:$0xf] }
 0x11c   :  { %v2216_v27 = vadd.f32 %v1994_v20, %v133_v19 }
 0x11d   :  { %v2414_v29 = vld [vmem:[#allocation2 + $0x70] sm:$0xff]  ;;  %v4454_v38 = vpop.f32.mrf.mxu3  ;;  %v2001_v30 = vpop.f32.mrf.mxu2 }
 0x11e   :  { %v2516_v35 = vadd.f32 %v4010_v10, %v2414_v29  ;;  %2314 = vst.msk [vmem:[#allocation2 + $0x78] sm:$0xff] %vm19_vm0, %v2216_v27  ;;  %v1488_v37 = vpop.f32.mrf.mxu0  ;;  %v2940_v27 = vld [vmem:[%s5616_s0 + $0x1d0] sm:$0xf] }
 0x11f   :  { %v1742_v39 = vpop.f32.mrf.mxu1 }
 0x120   :  { %2614 = vst.msk [vmem:[%s5618_s3 + $0x70] sm:$0xff] %vm19_vm0, %v2516_v35  ;;  %v1743_v43 = vadd.f32 %v1742_v39, %v1488_v37  ;;  %v2941_v37 = vor.u32 %v3470_v25, %v2940_v27  ;;  %v2932_v27 = vld [vmem:[%s5616_s0 + $0x1c8] sm:$0xf]  ;;  %v3469_v25 = vld [vmem:[%s5616_s0 + $0x1d0] sm:$0xf0] }
 0x121   :  { %1527 = vmatmul.bf16.gmra.mxu0 %v2897_v36 }
 0x122   :  { %v1997_v47 = vadd.f32 %v1996_v54, %v1743_v43  ;;  %1906 = vmatmul.bf16.gmra.mxu3 %v3201_v41  ;;  %1781 = vmatmul.bf16.gmra.mxu1 %v2901_v44  ;;  %v2929_v54 = vor.u32 %v3467_v49, %v2928_v48  ;;  %v2920_v44 = vld [vmem:[%s5616_s0 + $0x1b0] sm:$0xf]  ;;  %v3540_v48 = vld [vmem:[%s5616_s0 + $0x40c] sm:$0xf]  ;;  %v3222_v49 = vld [vmem:[%s5616_s0 + $0x414] sm:$0xf0] }
 0x124   :  { %v2217_v50 = vadd.f32 %v1997_v47, %v134_v45  ;;  %v3466_v45 = vld [vmem:[%s5616_s0 + $0x1b8] sm:$0xf0] }
 0x125   :  { %v2415_v51 = vld [vmem:[#allocation2 + $0x78] sm:$0xff]  ;;  %v4474_v52 = vpop.f32.mrf.mxu3  ;;  %v2003_v55 = vpop.f32.mrf.mxu2 }
 0x126   :  { %v2517_v56 = vadd.f32 %v4010_v10, %v2415_v51  ;;  %2315 = vst.msk [vmem:[#allocation2 + $0x80] sm:$0xff] %vm19_vm0, %v2217_v50  ;;  %v1490_v57 = vpop.f32.mrf.mxu0  ;;  %v3465_v51 = vld [vmem:[%s5616_s0 + $0x1b4] sm:$0xf] }
 0x127   :  { %v1744_v58 = vpop.f32.mrf.mxu1 }
 0x128   :  { %2615 = vst.msk [vmem:[%s5618_s3 + $0x78] sm:$0xff] %vm19_vm0, %v2517_v56  ;;  %v1745_v60 = vadd.f32 %v1744_v58, %v1490_v57  ;;  %v2922_v56 = vld [vmem:[%s5616_s0 + $0x1bc] sm:$0xf0] }
 0x12a   :  { %v1999_v62 = vadd.f32 %v1998_v12, %v1745_v60  ;;  %3380 = vmatmul.msk.bf16.gmra.mxu2 %vm19_vm0, %v2929_v54  ;;  %v3462_v12 = vld [vmem:[%s5616_s0 + $0x19c] sm:$0xf]  ;;  %v3225_v60 = vor.u32 %v3540_v48, %v3222_v49 }
 0x12b   :  { %v2913_v19 = vor.u32 %v3462_v12, %v2910_v11 }
 0x12c   :  { %v2218_v2 = vadd.f32 %v1999_v62, %v135_v63  ;;  %v2925_v62 = vor.u32 %v3465_v51, %v2922_v56  ;;  %v140_v56 = vld [vmem:[#allocation2 + $0xb0] sm:$0xff] }
 0x12d   :  { %v2416_v7 = vld [vmem:[#allocation2 + $0x80] sm:$0xff]  ;;  %v4495_v8 = vpop.f32.mrf.mxu3  ;;  %v2006_v6 = vpop.f32.mrf.mxu2 }
 0x12e   :  { %v2518_v15 = vadd.f32 %v4010_v10, %v2416_v7  ;;  %2316 = vst.msk [vmem:[#allocation2 + $0x88] sm:$0xff] %vm19_vm0, %v2218_v2  ;;  %v1493_v17 = vpop.f32.mrf.mxu0  ;;  %v3473_v7 = vld [vmem:[%s5616_s0 + $0x1f0] sm:$0xf0] }
 0x12f   :  { %v1747_v20 = vpop.f32.mrf.mxu1 }
 0x130   :  { %2616 = vst.msk [vmem:[%s5618_s3 + $0x80] sm:$0xff] %vm19_vm0, %v2518_v15  ;;  %v1748_v22 = vadd.f32 %v1747_v20, %v1493_v17  ;;  %v2953_v17 = vor.u32 %v3473_v7, %v2952_v5 }
 0x131   :  { %1532 = vmatmul.bf16.gmra.mxu0 %v2909_v16 }
 0x132   :  { %1911 = vmatmul.bf16.gmra.mxu3 %v3213_v18  ;;  %v2002_v28 = vadd.f32 %v2001_v30, %v1748_v22  ;;  %1786 = vmatmul.bf16.gmra.mxu1 %v2913_v19  ;;  %v137_v30 = vld [vmem:[#allocation2 + $0x98] sm:$0xff] }
 0x134   :  { %v2219_v35 = vadd.f32 %v2002_v28, %v136_v26 }
 0x135   :  { %v2417_v29 = vld [vmem:[#allocation2 + $0x88] sm:$0xff]  ;;  %v2008_v31 = vpop.f32.mrf.mxu2  ;;  %v4516_v36 = vpop.f32.mrf.mxu3 }
 0x136   :  { %v2519_v32 = vadd.f32 %v4010_v10, %v2417_v29  ;;  %v1495_v39 = vpop.f32.mrf.mxu0  ;;  %2317 = vst.msk [vmem:[#allocation2 + $0x90] sm:$0xff] %vm19_vm0, %v2219_v35  ;;  %v3543_v29 = vld [vmem:[%s5616_s0 + $0x424] sm:$0xf] }
 0x137   :  { %v1749_v41 = vpop.f32.mrf.mxu1 }
 0x138   :  { %2617 = vst.msk [vmem:[%s5618_s3 + $0x88] sm:$0xff] %vm19_vm0, %v2519_v32  ;;  %v1750_v43 = vadd.f32 %v1749_v41, %v1495_v39  ;;  %v3234_v32 = vld [vmem:[%s5616_s0 + $0x42c] sm:$0xf0]  ;;  %v2934_v39 = vld [vmem:[%s5616_s0 + $0x1d4] sm:$0xf0] }
 0x13a   :  { %3381 = vmatmul.msk.bf16.gmra.mxu2 %vm19_vm0, %v2941_v37  ;;  %v2004_v47 = vadd.f32 %v2003_v55, %v1750_v43  ;;  %v2921_v55 = vor.u32 %v3466_v45, %v2920_v44  ;;  %v3468_v37 = vld [vmem:[%s5616_s0 + $0x1cc] sm:$0xf]  ;;  %v3237_v45 = vor.u32 %v3543_v29, %v3234_v32  ;;  %v4629_v29 = vld [vmem:[%s5617_s2] ss:$0 sm:$0xff] }
 0x13b   :  { %v2937_v48 = vor.u32 %v3468_v37, %v2934_v39 }
 0x13c   :  { %v2220_v54 = vadd.f32 %v2004_v47, %v137_v30 }
 0x13d   :  { %v2011_v50 = vpop.f32.mrf.mxu2  ;;  %v4542_v57 = vpop.f32.mrf.mxu3  ;;  %v2418_v63 = vld [vmem:[#allocation2 + $0x90] sm:$0xff] }
 0x13e   :  { %v1498_v58 = vpop.f32.mrf.mxu0  ;;  %2318 = vst.msk [vmem:[#allocation2 + $0x98] sm:$0xff] %vm19_vm0, %v2220_v54  ;;  %v2520_v0 = vadd.f32 %v4010_v10, %v2418_v63  ;;  %v2964_v54 = vld [vmem:[%s5616_s0 + $0x200] sm:$0xf] }
 0x13f   :  { %v1752_v1 = vpop.f32.mrf.mxu1 }
 0x140   :  { %v1753_v2 = vadd.f32 %v1752_v1, %v1498_v58  ;;  %2618 = vst.msk [vmem:[%s5618_s3 + $0x90] sm:$0xff] %vm19_vm0, %v2520_v0 }
 0x141   :  { %1537 = vmatmul.bf16.gmra.mxu0 %v2921_v55  ;;  %v3476_v55 = vld [vmem:[%s5616_s0 + $0x208] sm:$0xf0] }
 0x142   :  { %1916 = vmatmul.bf16.gmra.mxu3 %v3225_v60  ;;  %v2007_v12 = vadd.f32 %v2006_v6, %v1753_v2  ;;  %1791 = vmatmul.bf16.gmra.mxu1 %v2925_v62  ;;  %v139_v6 = vld [vmem:[#allocation2 + $0xa8] sm:$0xff]  ;;  %v2965_v0 = vor.u32 %v3476_v55, %v2964_v54 }
 0x144   :  { %v2221_v15 = vadd.f32 %v2007_v12, %v138_v4  ;;  %v2944_v12 = vld [vmem:[%s5616_s0 + $0x1e0] sm:$0xf] }
 0x145   :  { %v2013_v11 = vpop.f32.mrf.mxu2  ;;  %v4556_v16 = vpop.f32.mrf.mxu3  ;;  %v2419_v18 = vld [vmem:[#allocation2 + $0x98] sm:$0xff] }
 0x146   :  { %v1500_v19 = vpop.f32.mrf.mxu0  ;;  %v2521_v20 = vadd.f32 %v4010_v10, %v2419_v18  ;;  %2319 = vst.msk [vmem:[#allocation2 + $0xa0] sm:$0xff] %vm19_vm0, %v2221_v15  ;;  %v3246_v18 = vld [vmem:[%s5616_s0 + $0x444] sm:$0xf0] }
 0x147   :  { %v1754_v22 = vpop.f32.mrf.mxu1 }
 0x148   :  { %2619 = vst.msk [vmem:[%s5618_s3 + $0x98] sm:$0xff] %vm19_vm0, %v2521_v20  ;;  %v1755_v26 = vadd.f32 %v1754_v22, %v1500_v19  ;;  %v3471_v20 = vld [vmem:[%s5616_s0 + $0x1e4] sm:$0xf]  ;;  %v2946_v22 = vld [vmem:[%s5616_s0 + $0x1ec] sm:$0xf0] }
 0x149   :  { %v2949_v37 = vor.u32 %v3471_v20, %v2946_v22 }
 0x14a   :  { %3382 = vmatmul.msk.bf16.gmra.mxu2 %vm19_vm0, %v2953_v17  ;;  %v2009_v28 = vadd.f32 %v2008_v31, %v1755_v26  ;;  %v2933_v31 = vor.u32 %v3469_v25, %v2932_v27  ;;  %v3546_v17 = vld [vmem:[%s5616_s0 + $0x43c] sm:$0xf] }
 0x14c   :  { %v2222_v41 = vadd.f32 %v2009_v28, %v139_v6  ;;  %v3249_v28 = vor.u32 %v3546_v17, %v3246_v18 }
 0x14d   :  { %v2016_v35 = vpop.f32.mrf.mxu2  ;;  %v4583_v43 = vpop.f32.mrf.mxu3  ;;  %v2420_v30 = vld [vmem:[#allocation2 + $0xa0] sm:$0xff] }
 0x14e   :  { %v1503_v44 = vpop.f32.mrf.mxu0  ;;  %v2522_v47 = vadd.f32 %v4010_v10, %v2420_v30  ;;  %2320 = vst.msk [vmem:[#allocation2 + $0xa8] sm:$0xff] %vm19_vm0, %v2222_v41  ;;  %v2976_v30 = vld [vmem:[%s5616_s0 + $0x218] sm:$0xf] }
 0x14f   :  { %v1757_v49 = vpop.f32.mrf.mxu1 }
 0x150   :  { %2620 = vst.msk [vmem:[%s5618_s3 + $0xa0] sm:$0xff] %vm19_vm0, %v2522_v47  ;;  %v1758_v51 = vadd.f32 %v1757_v49, %v1503_v44  ;;  %v3479_v44 = vld [vmem:[%s5616_s0 + $0x220] sm:$0xf0] }
 0x151   :  { %1542 = vmatmul.bf16.gmra.mxu0 %v2933_v31  ;;  %v142_v31 = vld [vmem:[#allocation2 + $0xc0] sm:$0xff] }
 0x152   :  { %1921 = vmatmul.bf16.gmra.mxu3 %v3237_v45  ;;  %v2012_v58 = vadd.f32 %v2011_v50, %v1758_v51  ;;  %1796 = vmatmul.bf16.gmra.mxu1 %v2937_v48  ;;  %v141_v50 = vld [vmem:[#allocation2 + $0xb8] sm:$0xff]  ;;  %v2977_v51 = vor.u32 %v3479_v44, %v2976_v30 }
 0x154   :  { %v2223_v63 = vadd.f32 %v2012_v58, %v140_v56 }
 0x155   :  { %v2018_v60 = vpop.f32.mrf.mxu2  ;;  %v4597_v62 = vpop.f32.mrf.mxu3  ;;  %v2421_v1 = vld [vmem:[#allocation2 + $0xa8] sm:$0xff] }
 0x156   :  { %v1505_v2 = vpop.f32.mrf.mxu0  ;;  %v2523_v4 = vadd.f32 %v4010_v10, %v2421_v1  ;;  %2321 = vst.msk [vmem:[#allocation2 + $0xb0] sm:$0xff] %vm19_vm0, %v2223_v63  ;;  %v3472_v10 = vld [vmem:[%s5616_s0 + $0x1e8] sm:$0xf0]  ;;  %v3475_v1 = vld [vmem:[%s5616_s0 + $0x200] sm:$0xf0] }
 0x157   :  { %v1759_v5 = vpop.f32.mrf.mxu1 }
 0x158   :  { %2621 = vst.msk [vmem:[%s5618_s3 + $0xa8] sm:$0xff] %vm19_vm0, %v2523_v4  ;;  %v1760_v7 = vadd.f32 %v1759_v5, %v1505_v2  ;;  %v3549_v4 = vld [vmem:[%s5616_s0 + $0x454] sm:$0xf]  ;;  %v3258_v5 = vld [vmem:[%s5616_s0 + $0x45c] sm:$0xf0] }
 0x159   :  { %v3261_v20 = vor.u32 %v3549_v4, %v3258_v5 }
 0x15a   :  { %3383 = vmatmul.msk.bf16.gmra.mxu2 %vm19_vm0, %v2965_v0  ;;  %v2014_v15 = vadd.f32 %v2013_v11, %v1760_v7  ;;  %v2945_v11 = vor.u32 %v3472_v10, %v2944_v12  ;;  %v2956_v0 = vld [vmem:[%s5616_s0 + $0x1f8] sm:$0xf]  ;;  %v2958_v12 = vld [vmem:[%s5616_s0 + $0x204] sm:$0xf0] }
 0x15c   :  { %v2224_v26 = vadd.f32 %v2014_v15, %v141_v50  ;;  %v3474_v50 = vld [vmem:[%s5616_s0 + $0x1fc] sm:$0xf] }
 0x15d   :  { %v2021_v19 = vpop.f32.mrf.mxu2  ;;  %v4624_v6 = vpop.f32.mrf.mxu3  ;;  %v2422_v27 = vld [vmem:[#allocation2 + $0xb0] sm:$0xff] }
 0x15e   :  { %5621 = vst [vmem:[#allocation5_spill] sm:$0xff] %v4624_v6  ;;  %v1508_v25 = vpop.f32.mrf.mxu0  ;;  %v2524_v32 = vadd.f32 %v4629_v29, %v2422_v27 }
 0x15f   :  { %2322 = vst.msk [vmem:[#allocation2 + $0xb8] sm:$0xff] %vm19_vm0, %v2224_v26  ;;  %v1762_v39 = vpop.f32.mrf.mxu1  ;;  %v2961_v26 = vor.u32 %v3474_v50, %v2958_v12 }
 0x160   :  { %2622 = vst.msk [vmem:[%s5618_s3 + $0xb0] sm:$0xff] %vm19_vm0, %v2524_v32  ;;  %v1763_v41 = vadd.f32 %v1762_v39, %v1508_v25  ;;  %v144_v25 = vld [vmem:[#allocation2 + $0xd0] sm:$0xff]  ;;  %v3482_v32 = vld [vmem:[%s5616_s0 + $0x238] sm:$0xf0] }
 0x161   :  { %1547 = vmatmul.bf16.gmra.mxu0 %v2945_v11 }
 0x162   :  { %1926 = vmatmul.bf16.gmra.mxu3 %v3249_v28  ;;  %v2017_v45 = vadd.f32 %v2016_v35, %v1763_v41  ;;  %1801 = vmatmul.bf16.gmra.mxu1 %v2949_v37  ;;  %v143_v35 = vld [vmem:[#allocation2 + $0xc8] sm:$0xff]  ;;  %v2988_v28 = vld [vmem:[%s5616_s0 + $0x230] sm:$0xf] }
 0x163   :  { %v2989_v30 = vor.u32 %v3482_v32, %v2988_v28 }
 0x164   :  { %v2225_v48 = vadd.f32 %v2017_v45, %v142_v31 }
 0x165   :  { %v2023_v47 = vpop.f32.mrf.mxu2  ;;  %v4643_v49 = vpop.f32.mrf.mxu3 }
 0x166   :  { %5622 = vst [vmem:[#allocation6_spill] sm:$0xff] %v4643_v49  ;;  %v2423_v56 = vld [vmem:[#allocation2 + $0xb8] sm:$0xff]  ;;  %v1510_v54 = vpop.f32.mrf.mxu0 }
 0x167   :  { %v2525_v55 = vadd.f32 %v4629_v29, %v2423_v56  ;;  %2323 = vst.msk [vmem:[#allocation2 + $0xc0] sm:$0xff] %vm19_vm0, %v2225_v48  ;;  %v1764_v58 = vpop.f32.mrf.mxu1 }
 0x168   :  { %v1765_v63 = vadd.f32 %v1764_v58, %v1510_v54  ;;  %v2968_v54 = vld [vmem:[%s5616_s0 + $0x210] sm:$0xf] }
 0x169   :  { %2623 = vst.msk [vmem:[%s5618_s3 + $0xb8] sm:$0xff] %vm19_vm0, %v2525_v55  ;;  %v3478_v55 = vld [vmem:[%s5616_s0 + $0x218] sm:$0xf0] }
 0x16a   :  { %3384 = vmatmul.msk.bf16.gmra.mxu2 %vm19_vm0, %v2977_v51  ;;  %v2019_v2 = vadd.f32 %v2018_v60, %v1765_v63  ;;  %v2957_v60 = vor.u32 %v3475_v1, %v2956_v0  ;;  %v3552_v63 = vld [vmem:[%s5616_s0 + $0x46c] sm:$0xf]  ;;  %v3477_v1 = vld [vmem:[%s5616_s0 + $0x214] sm:$0xf] }
 0x16c   :  { %v2226_v10 = vadd.f32 %v2019_v2, %v143_v35  ;;  %v3270_v35 = vld [vmem:[%s5616_s0 + $0x474] sm:$0xf0]  ;;  %v2970_v2 = vld [vmem:[%s5616_s0 + $0x21c] sm:$0xf0] }
 0x16d   :  { %v2026_v7 = vpop.f32.mrf.mxu2  ;;  %v4670_v15 = vpop.f32.mrf.mxu3 }
 0x16e   :  { %5623 = vst [vmem:[#allocation7_spill] sm:$0xff] %v4670_v15  ;;  %v2424_v17 = vld [vmem:[#allocation2 + $0xc0] sm:$0xff]  ;;  %v1513_v18 = vpop.f32.mrf.mxu0 }
 0x16f   :  { %v2526_v22 = vadd.f32 %v4629_v29, %v2424_v17  ;;  %2324 = vst.msk [vmem:[#allocation2 + $0xc8] sm:$0xff] %vm19_vm0, %v2226_v10  ;;  %v1767_v11 = vpop.f32.mrf.mxu1  ;;  %v3273_v10 = vor.u32 %v3552_v63, %v3270_v35  ;;  %v2973_v17 = vor.u32 %v3477_v1, %v2970_v2  ;;  %v3480_v63 = vld [vmem:[%s5616_s0 + $0x22c] sm:$0xf]  ;;  %v2982_v35 = vld [vmem:[%s5616_s0 + $0x234] sm:$0xf0] }
 0x170   :  { %v1768_v27 = vadd.f32 %v1767_v11, %v1513_v18  ;;  %v3485_v11 = vld [vmem:[%s5616_s0 + $0x250] sm:$0xf0] }
 0x171   :  { %2624 = vst.msk [vmem:[%s5618_s3 + $0xc0] sm:$0xff] %vm19_vm0, %v2526_v22  ;;  %1552 = vmatmul.bf16.gmra.mxu0 %v2957_v60  ;;  %v146_v22 = vld [vmem:[#allocation2 + $0xe0] sm:$0xff] }
 0x172   :  { %1931 = vmatmul.bf16.gmra.mxu3 %v3261_v20  ;;  %v2022_v37 = vadd.f32 %v2021_v19, %v1768_v27  ;;  %1806 = vmatmul.bf16.gmra.mxu1 %v2961_v26  ;;  %v145_v19 = vld [vmem:[#allocation2 + $0xd8] sm:$0xff]  ;;  %v3000_v26 = vld [vmem:[%s5616_s0 + $0x248] sm:$0xf] }
 0x174   :  { %v2227_v41 = vadd.f32 %v2022_v37, %v144_v25  ;;  %v3001_v37 = vor.u32 %v3485_v11, %v3000_v26 }
 0x175   :  { %v2028_v39 = vpop.f32.mrf.mxu2  ;;  %v4684_v31 = vpop.f32.mrf.mxu3 }
 0x176   :  { %v2425_v44 = vld [vmem:[#allocation2 + $0xc8] sm:$0xff]  ;;  %v1515_v45 = vpop.f32.mrf.mxu0  ;;  %2325 = vst.msk [vmem:[#allocation2 + $0xd0] sm:$0xff] %vm19_vm0, %v2227_v41 }
 0x177   :  { %v2527_v48 = vadd.f32 %v4629_v29, %v2425_v44  ;;  %v1769_v51 = vpop.f32.mrf.mxu1 }
 0x178   :  { %v1770_v56 = vadd.f32 %v1769_v51, %v1515_v45  ;;  %v2980_v51 = vld [vmem:[%s5616_s0 + $0x228] sm:$0xf] }
 0x179   :  { %2625 = vst.msk [vmem:[%s5618_s3 + $0xc8] sm:$0xff] %vm19_vm0, %v2527_v48 }
 0x17a   :  { %3385 = vmatmul.msk.bf16.gmra.mxu2 %vm19_vm0, %v2989_v30  ;;  %v2024_v58 = vadd.f32 %v2023_v47, %v1770_v56  ;;  %v2969_v47 = vor.u32 %v3478_v55, %v2968_v54  ;;  %v3481_v56 = vld [vmem:[%s5616_s0 + $0x230] sm:$0xf0]  ;;  %v3555_v54 = vld [vmem:[%s5616_s0 + $0x484] sm:$0xf]  ;;  %v3282_v55 = vld [vmem:[%s5616_s0 + $0x48c] sm:$0xf0] }
 0x17c   :  { %v2228_v4 = vadd.f32 %v2024_v58, %v145_v19 }
 0x17d   :  { %v2031_v0 = vpop.f32.mrf.mxu2  ;;  %v4711_v5 = vpop.f32.mrf.mxu3  ;;  %v2426_v50 = vld [vmem:[#allocation2 + $0xd0] sm:$0xff] }
 0x17e   :  { %v1518_v12 = vpop.f32.mrf.mxu0  ;;  %v2528_v60 = vadd.f32 %v4629_v29, %v2426_v50  ;;  %2326 = vst.msk [vmem:[#allocation2 + $0xd8] sm:$0xff] %vm19_vm0, %v2228_v4  ;;  %v3285_v50 = vor.u32 %v3555_v54, %v3282_v55  ;;  %v3527_v54 = vld [vmem:[%s5616_s0 + $0x3a0] sm:$0xf0] }
 0x17f   :  { %v1772_v18 = vpop.f32.mrf.mxu1 }
 0x180   :  { %2626 = vst.msk [vmem:[%s5618_s3 + $0xd0] sm:$0xff] %vm19_vm0, %v2528_v60  ;;  %v1773_v20 = vadd.f32 %v1772_v18, %v1518_v12  ;;  %v148_v18 = vld [vmem:[#allocation2 + $0xf0] sm:$0xff] }
 0x181   :  { %1557 = vmatmul.bf16.gmra.mxu0 %v2969_v47 }
 0x182   :  { %1936 = vmatmul.bf16.gmra.mxu3 %v3273_v10  ;;  %v2027_v27 = vadd.f32 %v2026_v7, %v1773_v20  ;;  %1811 = vmatmul.bf16.gmra.mxu1 %v2973_v17  ;;  %v147_v7 = vld [vmem:[#allocation2 + $0xe8] sm:$0xff]  ;;  %v2985_v10 = vor.u32 %v3480_v63, %v2982_v35  ;;  %v3012_v20 = vld [vmem:[%s5616_s0 + $0x260] sm:$0xf]  ;;  %v3483_v63 = vld [vmem:[%s5616_s0 + $0x244] sm:$0xf] }
 0x183   :  { %v2994_v35 = vld [vmem:[%s5616_s0 + $0x24c] sm:$0xf0] }
 0x184   :  { %v2229_v28 = vadd.f32 %v2027_v27, %v146_v22  ;;  %v3488_v22 = vld [vmem:[%s5616_s0 + $0x268] sm:$0xf0] }
 0x185   :  { %v2033_v25 = vpop.f32.mrf.mxu2  ;;  %v4725_v32 = vpop.f32.mrf.mxu3  ;;  %v2427_v41 = vld [vmem:[#allocation2 + $0xd8] sm:$0xff] }
 0x186   :  { %v1520_v30 = vpop.f32.mrf.mxu0  ;;  %v2529_v44 = vadd.f32 %v4629_v29, %v2427_v41  ;;  %2327 = vst.msk [vmem:[#allocation2 + $0xe0] sm:$0xff] %vm19_vm0, %v2229_v28 }
 0x187   :  { %v1774_v45 = vpop.f32.mrf.mxu1 }
 0x188   :  { %2627 = vst.msk [vmem:[%s5618_s3 + $0xd8] sm:$0xff] %vm19_vm0, %v2529_v44  ;;  %v1775_v48 = vadd.f32 %v1774_v45, %v1520_v30 }
 0x18a   :  { %3386 = vmatmul.msk.bf16.gmra.mxu2 %vm19_vm0, %v3001_v37  ;;  %v2029_v19 = vadd.f32 %v2028_v39, %v1775_v48  ;;  %v2981_v39 = vor.u32 %v3481_v56, %v2980_v51  ;;  %v3013_v37 = vor.u32 %v3488_v22, %v3012_v20  ;;  %v3484_v51 = vld [vmem:[%s5616_s0 + $0x248] sm:$0xf0]  ;;  %v3024_v20 = vld [vmem:[%s5616_s0 + $0x278] sm:$0xf]  ;;  %v3491_v22 = vld [vmem:[%s5616_s0 + $0x280] sm:$0xf0] }
 0x18c   :  { %v2230_v1 = vadd.f32 %v2029_v19, %v147_v7  ;;  %v2992_v7 = vld [vmem:[%s5616_s0 + $0x240] sm:$0xf]  ;;  %v3168_v19 = vld [vmem:[%s5616_s0 + $0x398] sm:$0xf] }
 0x18d   :  { %v2036_v58 = vpop.f32.mrf.mxu2  ;;  %v4752_v2 = vpop.f32.mrf.mxu3  ;;  %v2428_v4 = vld [vmem:[#allocation2 + $0xe0] sm:$0xff] }
 0x18e   :  { %v1523_v47 = vpop.f32.mrf.mxu0  ;;  %v2530_v12 = vadd.f32 %v4629_v29, %v2428_v4  ;;  %2328 = vst.msk [vmem:[#allocation2 + $0xe8] sm:$0xff] %vm19_vm0, %v2230_v1 }
 0x18f   :  { %v1777_v60 = vpop.f32.mrf.mxu1 }
 0x190   :  { %2628 = vst.msk [vmem:[%s5618_s3 + $0xe0] sm:$0xff] %vm19_vm0, %v2530_v12  ;;  %v1778_v17 = vadd.f32 %v1777_v60, %v1523_v47 }
 0x191   :  { %1562 = vmatmul.bf16.gmra.mxu0 %v2981_v39 }
 0x192   :  { %1941 = vmatmul.bf16.gmra.mxu3 %v3285_v50  ;;  %v2032_v26 = vadd.f32 %v2031_v0, %v1778_v17  ;;  %1816 = vmatmul.bf16.gmra.mxu1 %v2985_v10  ;;  %v149_v0 = vld [vmem:[#allocation2 + $0xf8] sm:$0xff]  ;;  %v3169_v50 = vor.u32 %v3527_v54, %v3168_v19  ;;  %v2997_v10 = vor.u32 %v3483_v63, %v2994_v35  ;;  %v3180_v54 = vld [vmem:[%s5616_s0 + $0x3b0] sm:$0xf] }
 0x193   :  { %v3530_v63 = vld [vmem:[%s5616_s0 + $0x3b8] sm:$0xf0] }
 0x194   :  { %v2231_v27 = vadd.f32 %v2032_v26, %v148_v18  ;;  %v150_v18 = vld [vmem:[#allocation2 + $0x100] sm:$0xff] }
 0x195   :  { %v2038_v11 = vpop.f32.mrf.mxu2  ;;  %v4766_v28 = vpop.f32.mrf.mxu3  ;;  %v2429_v41 = vld [vmem:[#allocation2 + $0xe8] sm:$0xff] }
 0x196   :  { %v1525_v30 = vpop.f32.mrf.mxu0  ;;  %v2531_v44 = vadd.f32 %v4629_v29, %v2429_v41  ;;  %2329 = vst.msk [vmem:[#allocation2 + $0xf0] sm:$0xff] %vm19_vm0, %v2231_v27 }
 0x197   :  { %v1779_v45 = vpop.f32.mrf.mxu1 }
 0x198   :  { %2629 = vst.msk [vmem:[%s5618_s3 + $0xe8] sm:$0xff] %vm19_vm0, %v2531_v44  ;;  %v1780_v48 = vadd.f32 %v1779_v45, %v1525_v30  ;;  %v3025_v30 = vor.u32 %v3491_v22, %v3024_v20  ;;  %v152_v22 = vld [vmem:[#allocation2 + $0x110] sm:$0xff] }
 0x19a   :  { %3387 = vmatmul.msk.bf16.gmra.mxu2 %vm19_vm0, %v3013_v37  ;;  %v2034_v56 = vadd.f32 %v2033_v25, %v1780_v48  ;;  %v2993_v25 = vor.u32 %v3484_v51, %v2992_v7  ;;  %v3004_v51 = vld [vmem:[%s5616_s0 + $0x258] sm:$0xf] }
 0x19c   :  { %v2232_v1 = vadd.f32 %v2034_v56, %v149_v0  ;;  %v3487_v56 = vld [vmem:[%s5616_s0 + $0x260] sm:$0xf0] }
 0x19d   :  { %v2041_v55 = vpop.f32.mrf.mxu2  ;;  %v4793_v39 = vpop.f32.mrf.mxu3  ;;  %v2430_v4 = vld [vmem:[#allocation2 + $0xf0] sm:$0xff] }
 0x19e   :  { %v1528_v47 = vpop.f32.mrf.mxu0  ;;  %v2532_v12 = vadd.f32 %v4629_v29, %v2430_v4  ;;  %2330 = vst.msk [vmem:[#allocation2 + $0xf8] sm:$0xff] %vm19_vm0, %v2232_v1  ;;  %v3486_v1 = vld [vmem:[%s5616_s0 + $0x25c] sm:$0xf] }
 0x19f   :  { %v1782_v60 = vpop.f32.mrf.mxu1 }
 0x1a0   :  { %2630 = vst.msk [vmem:[%s5618_s3 + $0xf0] sm:$0xff] %vm19_vm0, %v2532_v12  ;;  %v1783_v17 = vadd.f32 %v1782_v60, %v1528_v47 }
 0x1a1   :  { %1567 = vmatmul.bf16.gmra.mxu0 %v2993_v25  ;;  %v3006_v25 = vld [vmem:[%s5616_s0 + $0x264] sm:$0xf0] }
 0x1a2   :  { %3400 = vmatmul.msk.bf16.vlgmr.msra.gmra.mxu3 %vm19_vm0, %v3169_v50  ;;  %v2037_v26 = vadd.f32 %v2036_v58, %v1783_v17  ;;  %1821 = vmatmul.bf16.gmra.mxu1 %v2997_v10  ;;  %v151_v58 = vld [vmem:[#allocation2 + $0x108] sm:$0xff]  ;;  %v3181_v10 = vor.u32 %v3530_v63, %v3180_v54  ;;  %v3009_v17 = vor.u32 %v3486_v1, %v3006_v25  ;;  %v3016_v54 = vld [vmem:[%s5616_s0 + $0x270] sm:$0xf]  ;;  %v3490_v63 = vld [vmem:[%s5616_s0 + $0x278] sm:$0xf0] }
 0x1a3   :  { %v3192_v25 = vld [vmem:[%s5616_s0 + $0x3c8] sm:$0xf] }
 0x1a4   :  { %v2233_v37 = vadd.f32 %v2037_v26, %v150_v18  ;;  %v3036_v26 = vld [vmem:[%s5616_s0 + $0x290] sm:$0xf] }
 0x1a5   :  { %v2043_v27 = vpop.f32.mrf.mxu2  ;;  %v4808_v41 = vpop.f32.mrf.mxu3  ;;  %v2431_v44 = vld [vmem:[#allocation2 + $0xf8] sm:$0xff] }
 0x1a6   :  { %v1530_v45 = vpop.f32.mrf.mxu0  ;;  %v2533_v48 = vadd.f32 %v4629_v29, %v2431_v44  ;;  %2331 = vst.msk [vmem:[#allocation2 + $0x100] sm:$0xff] %vm19_vm0, %v2233_v37  ;;  %v3494_v37 = vld [vmem:[%s5616_s0 + $0x298] sm:$0xf0] }
 0x1a7   :  { %v1784_v0 = vpop.f32.mrf.mxu1 }
 0x1a8   :  { %2631 = vst.msk [vmem:[%s5618_s3 + $0xf8] sm:$0xff] %vm19_vm0, %v2533_v48  ;;  %v1785_v7 = vadd.f32 %v1784_v0, %v1530_v45  ;;  %v3037_v0 = vor.u32 %v3494_v37, %v3036_v26 }
 0x1aa   :  { %3388 = vmatmul.msk.bf16.gmra.mxu2 %vm19_vm0, %v3025_v30  ;;  %v2039_v19 = vadd.f32 %v2038_v11, %v1785_v7  ;;  %v3005_v11 = vor.u32 %v3487_v56, %v3004_v51 }
 0x1ac   :  { %v2234_v4 = vadd.f32 %v2039_v19, %v151_v58 }
 0x1ad   :  { %v2046_v35 = vpop.f32.mrf.mxu2  ;;  %v4835_v47 = vpop.f32.mrf.mxu3  ;;  %v2432_v50 = vld [vmem:[#allocation2 + $0x100] sm:$0xff] }
 0x1ae   :  { %v1533_v12 = vpop.f32.mrf.mxu0  ;;  %v2534_v60 = vadd.f32 %v4629_v29, %v2432_v50  ;;  %2332 = vst.msk [vmem:[#allocation2 + $0x108] sm:$0xff] %vm19_vm0, %v2234_v4  ;;  %v3533_v4 = vld [vmem:[%s5616_s0 + $0x3d0] sm:$0xf0] }
 0x1af   :  { %v1787_v18 = vpop.f32.mrf.mxu1  ;;  %v3489_v50 = vld [vmem:[%s5616_s0 + $0x274] sm:$0xf] }
 0x1b0   :  { %2632 = vst.msk [vmem:[%s5618_s3 + $0x100] sm:$0xff] %vm19_vm0, %v2534_v60  ;;  %v1788_v20 = vadd.f32 %v1787_v18, %v1533_v12  ;;  %v3018_v12 = vld [vmem:[%s5616_s0 + $0x27c] sm:$0xf0] }
 0x1b1   :  { %1572 = vmatmul.bf16.gmra.mxu0 %v3005_v11  ;;  %v3021_v26 = vor.u32 %v3489_v50, %v3018_v12  ;;  %v3028_v50 = vld [vmem:[%s5616_s0 + $0x288] sm:$0xf]  ;;  %v3493_v12 = vld [vmem:[%s5616_s0 + $0x290] sm:$0xf0] }
 0x1b2   :  { %3401 = vmatmul.msk.bf16.gmra.mxu3 %vm19_vm0, %v3181_v10  ;;  %v2042_v30 = vadd.f32 %v2041_v55, %v1788_v20  ;;  %1826 = vmatmul.bf16.gmra.mxu1 %v3009_v17  ;;  %v153_v55 = vld [vmem:[#allocation2 + $0x118] sm:$0xff]  ;;  %v3193_v20 = vor.u32 %v3533_v4, %v3192_v25 }
 0x1b4   :  { %v2235_v45 = vadd.f32 %v2042_v30, %v152_v22 }
 0x1b5   :  { %v2048_v44 = vpop.f32.mrf.mxu2  ;;  %v4850_v48 = vpop.f32.mrf.mxu3  ;;  %v2433_v7 = vld [vmem:[#allocation2 + $0x108] sm:$0xff] }
 0x1b6   :  { %v1535_v58 = vpop.f32.mrf.mxu0  ;;  %v2535_v51 = vadd.f32 %v4629_v29, %v2433_v7  ;;  %2333 = vst.msk [vmem:[#allocation2 + $0x110] sm:$0xff] %vm19_vm0, %v2235_v45  ;;  %v154_v45 = vld [vmem:[#allocation2 + $0x120] sm:$0xff]  ;;  %v3497_v7 = vld [vmem:[%s5616_s0 + $0x2b0] sm:$0xf0] }
 0x1b7   :  { %v1789_v56 = vpop.f32.mrf.mxu1 }
 0x1b8   :  { %2633 = vst.msk [vmem:[%s5618_s3 + $0x108] sm:$0xff] %vm19_vm0, %v2535_v51  ;;  %v1790_v19 = vadd.f32 %v1789_v56, %v1535_v58 }
 0x1ba   :  { %3389 = vmatmul.msk.bf16.gmra.mxu2 %vm19_vm0, %v3037_v0  ;;  %v2044_v1 = vadd.f32 %v2043_v27, %v1790_v19  ;;  %v3017_v27 = vor.u32 %v3490_v63, %v3016_v54  ;;  %v3048_v0 = vld [vmem:[%s5616_s0 + $0x2a8] sm:$0xf] }
 0x1bc   :  { %v2236_v10 = vadd.f32 %v2044_v1, %v153_v55  ;;  %v3049_v55 = vor.u32 %v3497_v7, %v3048_v0 }
 0x1bd   :  { %v2051_v11 = vpop.f32.mrf.mxu2  ;;  %v4877_v60 = vpop.f32.mrf.mxu3  ;;  %v2434_v17 = vld [vmem:[#allocation2 + $0x110] sm:$0xff] }
 0x1be   :  { %v1538_v18 = vpop.f32.mrf.mxu0  ;;  %v2536_v22 = vadd.f32 %v4629_v29, %v2434_v17  ;;  %2334 = vst.msk [vmem:[#allocation2 + $0x118] sm:$0xff] %vm19_vm0, %v2236_v10  ;;  %v3536_v17 = vld [vmem:[%s5616_s0 + $0x3e8] sm:$0xf0] }
 0x1bf   :  { %v1792_v37 = vpop.f32.mrf.mxu1 }
 0x1c0   :  { %2634 = vst.msk [vmem:[%s5618_s3 + $0x110] sm:$0xff] %vm19_vm0, %v2536_v22  ;;  %v1793_v30 = vadd.f32 %v1792_v37, %v1538_v18  ;;  %v3030_v22 = vld [vmem:[%s5616_s0 + $0x294] sm:$0xf0] }
 0x1c1   :  { %1577 = vmatmul.bf16.gmra.mxu0 %v3017_v27  ;;  %v3204_v27 = vld [vmem:[%s5616_s0 + $0x3e0] sm:$0xf] }
 0x1c2   :  { %3402 = vmatmul.msk.bf16.gmra.mxu3 %vm19_vm0, %v3193_v20  ;;  %v2047_v58 = vadd.f32 %v2046_v35, %v1793_v30  ;;  %1831 = vmatmul.bf16.gmra.mxu1 %v3021_v26  ;;  %v155_v35 = vld [vmem:[#allocation2 + $0x128] sm:$0xff]  ;;  %v3205_v0 = vor.u32 %v3536_v17, %v3204_v27 }
 0x1c3   :  { %v3492_v20 = vld [vmem:[%s5616_s0 + $0x28c] sm:$0xf] }
 0x1c4   :  { %v2237_v56 = vadd.f32 %v2047_v58, %v154_v45  ;;  %v3033_v58 = vor.u32 %v3492_v20, %v3030_v22 }
 0x1c5   :  { %v2053_v51 = vpop.f32.mrf.mxu2  ;;  %v4892_v19 = vpop.f32.mrf.mxu3  ;;  %v2435_v54 = vld [vmem:[#allocation2 + $0x118] sm:$0xff] }
 0x1c6   :  { %v1540_v63 = vpop.f32.mrf.mxu0  ;;  %v2537_v1 = vadd.f32 %v4629_v29, %v2435_v54  ;;  %2335 = vst.msk [vmem:[#allocation2 + $0x120] sm:$0xff] %vm19_vm0, %v2237_v56  ;;  %v156_v54 = vld [vmem:[#allocation2 + $0x130] sm:$0xff] }
 0x1c7   :  { %v1794_v25 = vpop.f32.mrf.mxu1 }
 0x1c8   :  { %2635 = vst.msk [vmem:[%s5618_s3 + $0x118] sm:$0xff] %vm19_vm0, %v2537_v1  ;;  %v1795_v4 = vadd.f32 %v1794_v25, %v1540_v63  ;;  %v3060_v63 = vld [vmem:[%s5616_s0 + $0x2c0] sm:$0xf]  ;;  %v3500_v1 = vld [vmem:[%s5616_s0 + $0x2c8] sm:$0xf0] }
 0x1ca   :  { %3390 = vmatmul.msk.bf16.gmra.mxu2 %vm19_vm0, %v3049_v55  ;;  %v2049_v10 = vadd.f32 %v2048_v44, %v1795_v4  ;;  %v3029_v44 = vor.u32 %v3493_v12, %v3028_v50  ;;  %v3061_v12 = vor.u32 %v3500_v1, %v3060_v63 }
 0x1cc   :  { %v2238_v26 = vadd.f32 %v2049_v10, %v155_v35 }
 0x1cd   :  { %v2056_v18 = vpop.f32.mrf.mxu2  ;;  %v4919_v37 = vpop.f32.mrf.mxu3  ;;  %v2436_v30 = vld [vmem:[#allocation2 + $0x120] sm:$0xff] }
 0x1ce   :  { %v1543_v45 = vpop.f32.mrf.mxu0  ;;  %v2538_v7 = vadd.f32 %v4629_v29, %v2436_v30  ;;  %2336 = vst.msk [vmem:[#allocation2 + $0x128] sm:$0xff] %vm19_vm0, %v2238_v26  ;;  %v3040_v26 = vld [vmem:[%s5616_s0 + $0x2a0] sm:$0xf] }
 0x1cf   :  { %v1797_v56 = vpop.f32.mrf.mxu1 }
 0x1d0   :  { %2636 = vst.msk [vmem:[%s5618_s3 + $0x120] sm:$0xff] %vm19_vm0, %v2538_v7  ;;  %v1798_v55 = vadd.f32 %v1797_v56, %v1543_v45  ;;  %v3216_v45 = vld [vmem:[%s5616_s0 + $0x3f8] sm:$0xf]  ;;  %v3042_v56 = vld [vmem:[%s5616_s0 + $0x2ac] sm:$0xf0] }
 0x1d1   :  { %1582 = vmatmul.bf16.gmra.mxu0 %v3029_v44  ;;  %v3496_v44 = vld [vmem:[%s5616_s0 + $0x2a8] sm:$0xf0] }
 0x1d2   :  { %3403 = vmatmul.msk.bf16.gmra.mxu3 %vm19_vm0, %v3205_v0  ;;  %v2052_v25 = vadd.f32 %v2051_v11, %v1798_v55  ;;  %1836 = vmatmul.bf16.gmra.mxu1 %v3033_v58  ;;  %v157_v11 = vld [vmem:[#allocation2 + $0x138] sm:$0xff]  ;;  %v3539_v0 = vld [vmem:[%s5616_s0 + $0x400] sm:$0xf0] }
 0x1d3   :  { %v3495_v58 = vld [vmem:[%s5616_s0 + $0x2a4] sm:$0xf] }
 0x1d4   :  { %v2239_v35 = vadd.f32 %v2052_v25, %v156_v54  ;;  %v3217_v25 = vor.u32 %v3539_v0, %v3216_v45 }
 0x1d5   :  { %v2058_v4 = vpop.f32.mrf.mxu2  ;;  %v4934_v50 = vpop.f32.mrf.mxu3  ;;  %v2437_v10 = vld [vmem:[#allocation2 + $0x128] sm:$0xff] }
 0x1d6   :  { %v1545_v27 = vpop.f32.mrf.mxu0  ;;  %v2539_v17 = vadd.f32 %v4629_v29, %v2437_v10  ;;  %2337 = vst.msk [vmem:[#allocation2 + $0x130] sm:$0xff] %vm19_vm0, %v2239_v35 }
 0x1d7   :  { %v1799_v20 = vpop.f32.mrf.mxu1 }
 0x1d8   :  { %2637 = vst.msk [vmem:[%s5618_s3 + $0x128] sm:$0xff] %vm19_vm0, %v2539_v17  ;;  %v1800_v22 = vadd.f32 %v1799_v20, %v1545_v27  ;;  %v158_v17 = vld [vmem:[#allocation2 + $0x140] sm:$0xff]  ;;  %v3072_v20 = vld [vmem:[%s5616_s0 + $0x2d8] sm:$0xf] }
 0x1da   :  { %3391 = vmatmul.msk.bf16.gmra.mxu2 %vm19_vm0, %v3061_v12  ;;  %v2054_v30 = vadd.f32 %v2053_v51, %v1800_v22  ;;  %v3041_v51 = vor.u32 %v3496_v44, %v3040_v26  ;;  %v3045_v12 = vor.u32 %v3495_v58, %v3042_v56  ;;  %v3503_v22 = vld [vmem:[%s5616_s0 + $0x2e0] sm:$0xf0] }
 0x1db   :  { %v3073_v45 = vor.u32 %v3503_v22, %v3072_v20 }
 0x1dc   :  { %v2240_v55 = vadd.f32 %v2054_v30, %v157_v11 }
 0x1dd   :  { %v2061_v7 = vpop.f32.mrf.mxu2  ;;  %v4961_v54 = vpop.f32.mrf.mxu3  ;;  %v2438_v63 = vld [vmem:[#allocation2 + $0x130] sm:$0xff] }
 0x1de   :  { %v1548_v1 = vpop.f32.mrf.mxu0  ;;  %v2540_v35 = vadd.f32 %v4629_v29, %v2438_v63  ;;  %2338 = vst.msk [vmem:[#allocation2 + $0x138] sm:$0xff] %vm19_vm0, %v2240_v55  ;;  %v3052_v63 = vld [vmem:[%s5616_s0 + $0x2b8] sm:$0xf] }
 0x1df   :  { %v1802_v10 = vpop.f32.mrf.mxu1 }
 0x1e0   :  { %2638 = vst.msk [vmem:[%s5618_s3 + $0x130] sm:$0xff] %vm19_vm0, %v2540_v35  ;;  %v1803_v27 = vadd.f32 %v1802_v10, %v1548_v1  ;;  %v3499_v1 = vld [vmem:[%s5616_s0 + $0x2c0] sm:$0xf0]  ;;  %v3228_v35 = vld [vmem:[%s5616_s0 + $0x410] sm:$0xf] }
 0x1e1   :  { %1587 = vmatmul.bf16.gmra.mxu0 %v3041_v51 }
 0x1e2   :  { %3404 = vmatmul.msk.bf16.gmra.mxu3 %vm19_vm0, %v3217_v25  ;;  %v2057_v11 = vadd.f32 %v2056_v18, %v1803_v27  ;;  %1841 = vmatmul.bf16.gmra.mxu1 %v3045_v12  ;;  %v159_v18 = vld [vmem:[#allocation2 + $0x148] sm:$0xff]  ;;  %v3542_v12 = vld [vmem:[%s5616_s0 + $0x418] sm:$0xf0] }
 0x1e3   :  { %v3498_v27 = vld [vmem:[%s5616_s0 + $0x2bc] sm:$0xf] }
 0x1e4   :  { %v2241_v44 = vadd.f32 %v2057_v11, %v158_v17  ;;  %v3054_v17 = vld [vmem:[%s5616_s0 + $0x2c4] sm:$0xf0] }
 0x1e5   :  { %v2063_v26 = vpop.f32.mrf.mxu2  ;;  %v4976_v30 = vpop.f32.mrf.mxu3  ;;  %v2439_v0 = vld [vmem:[#allocation2 + $0x138] sm:$0xff] }
 0x1e6   :  { %v1550_v58 = vpop.f32.mrf.mxu0  ;;  %v2541_v56 = vadd.f32 %v4629_v29, %v2439_v0  ;;  %2339 = vst.msk [vmem:[#allocation2 + $0x140] sm:$0xff] %vm19_vm0, %v2241_v44 }
 0x1e7   :  { %v1804_v55 = vpop.f32.mrf.mxu1 }
 0x1e8   :  { %2639 = vst.msk [vmem:[%s5618_s3 + $0x138] sm:$0xff] %vm19_vm0, %v2541_v56  ;;  %v1805_v51 = vadd.f32 %v1804_v55, %v1550_v58  ;;  %v3057_v58 = vor.u32 %v3498_v27, %v3054_v17 }
 0x1ea   :  { %3392 = vmatmul.msk.bf16.gmra.mxu2 %vm19_vm0, %v3073_v45  ;;  %v2059_v25 = vadd.f32 %v2058_v4, %v1805_v51  ;;  %v3053_v4 = vor.u32 %v3499_v1, %v3052_v63  ;;  %v3229_v45 = vor.u32 %v3542_v12, %v3228_v35  ;;  %v160_v51 = vld [vmem:[#allocation2 + $0x150] sm:$0xff]  ;;  %v3506_v63 = vld [vmem:[%s5616_s0 + $0x2f8] sm:$0xf0] }
 0x1ec   :  { %v2242_v20 = vadd.f32 %v2059_v25, %v159_v18  ;;  %v3084_v18 = vld [vmem:[%s5616_s0 + $0x2f0] sm:$0xf] }
 0x1ed   :  { %v2066_v10 = vpop.f32.mrf.mxu2  ;;  %v5003_v22 = vpop.f32.mrf.mxu3  ;;  %v2440_v11 = vld [vmem:[#allocation2 + $0x140] sm:$0xff]  ;;  %v3085_v27 = vor.u32 %v3506_v63, %v3084_v18  ;;  %v3501_v18 = vld [vmem:[%s5616_s0 + $0x2d4] sm:$0xf] }
 0x1ee   :  { %v1553_v44 = vpop.f32.mrf.mxu0  ;;  %v2542_v0 = vadd.f32 %v4629_v29, %v2440_v11  ;;  %2340 = vst.msk [vmem:[#allocation2 + $0x148] sm:$0xff] %vm19_vm0, %v2242_v20  ;;  %v3066_v63 = vld [vmem:[%s5616_s0 + $0x2dc] sm:$0xf0] }
 0x1ef   :  { %v1807_v56 = vpop.f32.mrf.mxu1 }
 0x1f0   :  { %2640 = vst.msk [vmem:[%s5618_s3 + $0x140] sm:$0xff] %vm19_vm0, %v2542_v0  ;;  %v1808_v55 = vadd.f32 %v1807_v56, %v1553_v44  ;;  %v3502_v0 = vld [vmem:[%s5616_s0 + $0x2d8] sm:$0xf0]  ;;  %v3240_v56 = vld [vmem:[%s5616_s0 + $0x428] sm:$0xf] }
 0x1f1   :  { %1592 = vmatmul.bf16.gmra.mxu0 %v3053_v4 }
 0x1f2   :  { %3405 = vmatmul.msk.bf16.gmra.mxu3 %vm19_vm0, %v3229_v45  ;;  %v2062_v1 = vadd.f32 %v2061_v7, %v1808_v55  ;;  %1846 = vmatmul.bf16.gmra.mxu1 %v3057_v58  ;;  %v161_v7 = vld [vmem:[#allocation2 + $0x158] sm:$0xff]  ;;  %v3064_v45 = vld [vmem:[%s5616_s0 + $0x2d0] sm:$0xf]  ;;  %v3545_v55 = vld [vmem:[%s5616_s0 + $0x430] sm:$0xf0] }
 0x1f4   :  { %v2243_v35 = vadd.f32 %v2062_v1, %v160_v51 }
 0x1f5   :  { %v2068_v25 = vpop.f32.mrf.mxu2  ;;  %v5018_v12 = vpop.f32.mrf.mxu3  ;;  %v2441_v17 = vld [vmem:[#allocation2 + $0x148] sm:$0xff] }
 0x1f6   :  { %v1555_v20 = vpop.f32.mrf.mxu0  ;;  %v2543_v4 = vadd.f32 %v4629_v29, %v2441_v17  ;;  %2341 = vst.msk [vmem:[#allocation2 + $0x150] sm:$0xff] %vm19_vm0, %v2243_v35 }
 0x1f7   :  { %v1809_v11 = vpop.f32.mrf.mxu1 }
 0x1f8   :  { %2641 = vst.msk [vmem:[%s5618_s3 + $0x148] sm:$0xff] %vm19_vm0, %v2543_v4  ;;  %v1810_v44 = vadd.f32 %v1809_v11, %v1555_v20  ;;  %v3241_v20 = vor.u32 %v3545_v55, %v3240_v56  ;;  %v3069_v11 = vor.u32 %v3501_v18, %v3066_v63 }
 0x1fa   :  { %3393 = vmatmul.msk.bf16.gmra.mxu2 %vm19_vm0, %v3085_v27  ;;  %v2064_v58 = vadd.f32 %v2063_v26, %v1810_v44  ;;  %v3065_v26 = vor.u32 %v3502_v0, %v3064_v45  ;;  %v3096_v45 = vld [vmem:[%s5616_s0 + $0x308] sm:$0xf]  ;;  %v3509_v0 = vld [vmem:[%s5616_s0 + $0x310] sm:$0xf0] }
 0x1fb   :  { %v3097_v63 = vor.u32 %v3509_v0, %v3096_v45  ;;  %v3504_v0 = vld [vmem:[%s5616_s0 + $0x2ec] sm:$0xf] }
 0x1fc   :  { %v2244_v1 = vadd.f32 %v2064_v58, %v161_v7  ;;  %v162_v7 = vld [vmem:[#allocation2 + $0x160] sm:$0xff] }
 0x1fd   :  { %v2071_v51 = vpop.f32.mrf.mxu2  ;;  %v5045_v35 = vpop.f32.mrf.mxu3  ;;  %v2442_v27 = vld [vmem:[#allocation2 + $0x150] sm:$0xff] }
 0x1fe   :  { %v1558_v17 = vpop.f32.mrf.mxu0  ;;  %v2544_v4 = vadd.f32 %v4629_v29, %v2442_v27  ;;  %2342 = vst.msk [vmem:[#allocation2 + $0x158] sm:$0xff] %vm19_vm0, %v2244_v1 }
 0x1ff   :  { %v1812_v44 = vpop.f32.mrf.mxu1 }
 0x200   :  { %2642 = vst.msk [vmem:[%s5618_s3 + $0x150] sm:$0xff] %vm19_vm0, %v2544_v4  ;;  %v1813_v15 = vadd.f32 %v1812_v44, %v1558_v17  ;;  %v3505_v4 = vld [vmem:[%s5616_s0 + $0x2f0] sm:$0xf0]  ;;  %v3252_v44 = vld [vmem:[%s5616_s0 + $0x440] sm:$0xf] }
 0x201   :  { %1597 = vmatmul.bf16.gmra.mxu0 %v3065_v26 }
 0x202   :  { %3406 = vmatmul.msk.bf16.gmra.mxu3 %vm19_vm0, %v3241_v20  ;;  %v2067_v58 = vadd.f32 %v2066_v10, %v1813_v15  ;;  %1851 = vmatmul.bf16.gmra.mxu1 %v3069_v11  ;;  %v163_v15 = vld [vmem:[#allocation2 + $0x168] sm:$0xff] }
 0x203   :  { %v3076_v10 = vld [vmem:[%s5616_s0 + $0x2e8] sm:$0xf] }
 0x204   :  { %v2245_v55 = vadd.f32 %v2067_v58, %v162_v7  ;;  %v3548_v7 = vld [vmem:[%s5616_s0 + $0x448] sm:$0xf0]  ;;  %v3078_v58 = vld [vmem:[%s5616_s0 + $0x2f4] sm:$0xf0] }
 0x205   :  { %v2073_v56 = vpop.f32.mrf.mxu2  ;;  %v5060_v18 = vpop.f32.mrf.mxu3  ;;  %v2443_v1 = vld [vmem:[#allocation2 + $0x158] sm:$0xff] }
 0x206   :  { %v1560_v26 = vpop.f32.mrf.mxu0  ;;  %v2545_v27 = vadd.f32 %v4629_v29, %v2443_v1  ;;  %2343 = vst.msk [vmem:[#allocation2 + $0x160] sm:$0xff] %vm19_vm0, %v2245_v55 }
 0x207   :  { %v1814_v17 = vpop.f32.mrf.mxu1 }
 0x208   :  { %2643 = vst.msk [vmem:[%s5618_s3 + $0x158] sm:$0xff] %vm19_vm0, %v2545_v27  ;;  %v1815_v20 = vadd.f32 %v1814_v17, %v1560_v26  ;;  %v3253_v27 = vor.u32 %v3548_v7, %v3252_v44 }
 0x20a   :  { %3394 = vmatmul.msk.bf16.gmra.mxu2 %vm19_vm0, %v3097_v63  ;;  %v2069_v11 = vadd.f32 %v2068_v25, %v1815_v20  ;;  %v3077_v25 = vor.u32 %v3505_v4, %v3076_v10  ;;  %v3081_v20 = vor.u32 %v3504_v0, %v3078_v58  ;;  %v3108_v10 = vld [vmem:[%s5616_s0 + $0x320] sm:$0xf]  ;;  %v3512_v4 = vld [vmem:[%s5616_s0 + $0x328] sm:$0xf0] }
 0x20b   :  { %v3109_v58 = vor.u32 %v3512_v4, %v3108_v10  ;;  %v3507_v4 = vld [vmem:[%s5616_s0 + $0x304] sm:$0xf] }
 0x20c   :  { %v2246_v55 = vadd.f32 %v2069_v11, %v163_v15  ;;  %v164_v15 = vld [vmem:[#allocation2 + $0x170] sm:$0xff] }
 0x20d   :  { %v2076_v45 = vpop.f32.mrf.mxu2  ;;  %v5087_v63 = vpop.f32.mrf.mxu3  ;;  %v2444_v1 = vld [vmem:[#allocation2 + $0x160] sm:$0xff] }
 0x20e   :  { %v1563_v26 = vpop.f32.mrf.mxu0  ;;  %v2546_v17 = vadd.f32 %v4629_v29, %v2444_v1  ;;  %2344 = vst.msk [vmem:[#allocation2 + $0x168] sm:$0xff] %vm19_vm0, %v2246_v55 }
 0x20f   :  { %v1817_v21 = vpop.f32.mrf.mxu1 }
 0x210   :  { %2644 = vst.msk [vmem:[%s5618_s3 + $0x160] sm:$0xff] %vm19_vm0, %v2546_v17  ;;  %v1818_v49 = vadd.f32 %v1817_v21, %v1563_v26 }
 0x211   :  { %1602 = vmatmul.bf16.gmra.mxu0 %v3077_v25 }
 0x212   :  { %3407 = vmatmul.msk.bf16.gmra.mxu3 %vm19_vm0, %v3253_v27  ;;  %v2072_v11 = vadd.f32 %v2071_v51, %v1818_v49  ;;  %1856 = vmatmul.bf16.gmra.mxu1 %v3081_v20  ;;  %v165_v49 = vld [vmem:[#allocation2 + $0x178] sm:$0xff]  ;;  %v3088_v51 = vld [vmem:[%s5616_s0 + $0x300] sm:$0xf]  ;;  %v3508_v27 = vld [vmem:[%s5616_s0 + $0x308] sm:$0xf0] }
 0x213   :  { %v3264_v20 = vld [vmem:[%s5616_s0 + $0x458] sm:$0xf] }
 0x214   :  { %v2247_v7 = vadd.f32 %v2072_v11, %v164_v15  ;;  %v3551_v15 = vld [vmem:[%s5616_s0 + $0x460] sm:$0xf0]  ;;  %v3090_v11 = vld [vmem:[%s5616_s0 + $0x30c] sm:$0xf0] }
 0x215   :  { %v2078_v44 = vpop.f32.mrf.mxu2  ;;  %v5102_v0 = vpop.f32.mrf.mxu3  ;;  %v2445_v21 = vld [vmem:[#allocation2 + $0x168] sm:$0xff] }
 0x216   :  { %v1565_v55 = vpop.f32.mrf.mxu0  ;;  %v2547_v25 = vadd.f32 %v4629_v29, %v2445_v21  ;;  %2345 = vst.msk [vmem:[#allocation2 + $0x170] sm:$0xff] %vm19_vm0, %v2247_v7 }
 0x217   :  { %v1819_v1 = vpop.f32.mrf.mxu1 }
 0x218   :  { %2645 = vst.msk [vmem:[%s5618_s3 + $0x168] sm:$0xff] %vm19_vm0, %v2547_v25  ;;  %v1820_v26 = vadd.f32 %v1819_v1, %v1565_v55  ;;  %v3265_v25 = vor.u32 %v3551_v15, %v3264_v20  ;;  %v1893_v20 = vadd.f32 %v4684_v31, %v4114_v34  ;;  %v3100_v31 = vld [vmem:[%s5616_s0 + $0x318] sm:$0xf] }
 0x21a   :  { %3395 = vmatmul.msk.bf16.gmra.mxu2 %vm19_vm0, %v3109_v58  ;;  %v2074_v17 = vadd.f32 %v2073_v56, %v1820_v26  ;;  %v3089_v58 = vor.u32 %v3508_v27, %v3088_v51  ;;  %v3093_v26 = vor.u32 %v3507_v4, %v3090_v11  ;;  %v3120_v51 = vld [vmem:[%s5616_s0 + $0x338] sm:$0xf]  ;;  %v3515_v27 = vld [vmem:[%s5616_s0 + $0x340] sm:$0xf0] }
 0x21b   :  { %v194_v4 = vld [vmem:[#allocation2 + $0x260] sm:$0xff] }
 0x21c   :  { %v2248_v7 = vadd.f32 %v2074_v17, %v165_v49  ;;  %v166_v49 = vld [vmem:[#allocation2 + $0x180] sm:$0xff] }
 0x21d   :  { %v5123_v10 = vpop.f32.mrf.mxu2  ;;  %v5131_v56 = vpop.f32.mrf.mxu3  ;;  %v2446_v21 = vld [vmem:[#allocation2 + $0x170] sm:$0xff] }
 0x21e   :  { %5624 = vst [vmem:[#allocation8_spill] sm:$0xff] %v5131_v56  ;;  %v1568_v55 = vpop.f32.mrf.mxu0  ;;  %v2548_v1 = vadd.f32 %v4629_v29, %v2446_v21 }
 0x21f   :  { %2346 = vst.msk [vmem:[#allocation2 + $0x178] sm:$0xff] %vm19_vm0, %v2248_v7  ;;  %v1822_v14 = vpop.f32.mrf.mxu1  ;;  %v3121_v7 = vor.u32 %v3515_v27, %v3120_v51  ;;  %v3510_v27 = vld [vmem:[%s5616_s0 + $0x31c] sm:$0xf] }
 0x220   :  { %2646 = vst.msk [vmem:[%s5618_s3 + $0x170] sm:$0xff] %vm19_vm0, %v2548_v1  ;;  %v1823_v6 = vadd.f32 %v1822_v14, %v1568_v55 }
 0x221   :  { %1607 = vmatmul.bf16.gmra.mxu0 %v3089_v58 }
 0x222   :  { %3408 = vmatmul.msk.bf16.gmra.mxu3 %vm19_vm0, %v3265_v25  ;;  %v2077_v17 = vadd.f32 %v2076_v45, %v1823_v6  ;;  %1861 = vmatmul.bf16.gmra.mxu1 %v3093_v26  ;;  %v167_v6 = vld [vmem:[#allocation2 + $0x188] sm:$0xff]  ;;  %v3276_v26 = vld [vmem:[%s5616_s0 + $0x470] sm:$0xf] }
 0x224   :  { %v2249_v14 = vadd.f32 %v2077_v17, %v166_v49  ;;  %v1895_v49 = vadd.f32 %v4711_v5, %v4153_v46  ;;  %v5183_v46 = vld [vmem:[%s5617_s2] ss:$0 sm:$0xff] }
 0x225   :  { %v5148_v15 = vpop.f32.mrf.mxu2  ;;  %v2146_v11 = vpop.f32.mrf.mxu3 }
 0x226   :  { %v2447_v58 = vld [vmem:[#allocation2 + $0x178] sm:$0xff]  ;;  %v2147_v21 = vadd.f32 %v2146_v11, %v1893_v20  ;;  %v1570_v55 = vpop.f32.mrf.mxu0  ;;  %2347 = vst.msk [vmem:[#allocation2 + $0x180] sm:$0xff] %vm19_vm0, %v2249_v14  ;;  %v195_v20 = vld [vmem:[#allocation2 + $0x268] sm:$0xff] }
 0x227   :  { %v2549_v25 = vadd.f32 %v4629_v29, %v2447_v58  ;;  %v1824_v56 = vpop.f32.mrf.mxu1  ;;  %v3511_v29 = vld [vmem:[%s5616_s0 + $0x320] sm:$0xf0] }
 0x228   :  { %v2277_v1 = vadd.f32 %v2147_v21, %v194_v4  ;;  %v1825_v34 = vadd.f32 %v1824_v56, %v1570_v55  ;;  %v3554_v56 = vld [vmem:[%s5616_s0 + $0x478] sm:$0xf0]  ;;  %v3101_v4 = vor.u32 %v3511_v29, %v3100_v31  ;;  %v168_v29 = vld [vmem:[#allocation2 + $0x190] sm:$0xff] }
 0x229   :  { %2647 = vst.msk [vmem:[%s5618_s3 + $0x178] sm:$0xff] %vm19_vm0, %v2549_v25  ;;  %v3277_v21 = vor.u32 %v3554_v56, %v3276_v26  ;;  %v3518_v26 = vld [vmem:[%s5616_s0 + $0x358] sm:$0xf0] }
 0x22a   :  { %3396 = vmatmul.msk.bf16.gmra.mxu2 %vm19_vm0, %v3121_v7  ;;  %2375 = vst.msk [vmem:[#allocation2 + $0x260] sm:$0xff] %vm19_vm0, %v2277_v1  ;;  %v2079_v45 = vadd.f32 %v2078_v44, %v1825_v34  ;;  %v3102_v44 = vld [vmem:[%s5616_s0 + $0x324] sm:$0xf0] }
 0x22b   :  { %v3105_v55 = vor.u32 %v3510_v27, %v3102_v44 }
 0x22c   :  { %v2250_v17 = vadd.f32 %v2079_v45, %v167_v6  ;;  %v3132_v45 = vld [vmem:[%s5616_s0 + $0x350] sm:$0xf] }
 0x22d   :  { %v5172_v51 = vpop.f32.mrf.mxu2  ;;  %v2148_v14 = vpop.f32.mrf.mxu3  ;;  %v2448_v11 = vld [vmem:[#allocation2 + $0x180] sm:$0xff] }
 0x22e   :  { %v2149_v7 = vadd.f32 %v2148_v14, %v1895_v49  ;;  %v1573_v58 = vpop.f32.mrf.mxu0  ;;  %v2550_v5 = vadd.f32 %v5183_v46, %v2448_v11  ;;  %2348 = vst.msk [vmem:[#allocation2 + $0x188] sm:$0xff] %vm19_vm0, %v2250_v17  ;;  %v1898_v49 = vadd.f32 %v4725_v32, %v4187_v61  ;;  %v196_v17 = vld [vmem:[#allocation2 + $0x270] sm:$0xff]  ;;  %v3133_v14 = vor.u32 %v3518_v26, %v3132_v45  ;;  %v3114_v26 = vld [vmem:[%s5616_s0 + $0x33c] sm:$0xf0] }
 0x22f   :  { %v1827_v1 = vpop.f32.mrf.mxu1 }
 0x230   :  { %v2278_v25 = vadd.f32 %v2149_v7, %v195_v20  ;;  %2648 = vst.msk [vmem:[%s5618_s3 + $0x180] sm:$0xff] %vm19_vm0, %v2550_v5  ;;  %v1828_v6 = vadd.f32 %v1827_v1, %v1573_v58  ;;  %v3514_v1 = vld [vmem:[%s5616_s0 + $0x338] sm:$0xf0] }
 0x231   :  { %v2476_v34 = vld [vmem:[#allocation2 + $0x260] sm:$0xff]  ;;  %1612 = vmatmul.bf16.gmra.mxu0 %v3101_v4 }
 0x232   :  { %v2578_v31 = vadd.f32 %v5183_v46, %v2476_v34  ;;  %2376 = vst.msk [vmem:[#allocation2 + $0x268] sm:$0xff] %vm19_vm0, %v2278_v25  ;;  %3409 = vmatmul.msk.bf16.gmra.mxu3 %vm19_vm0, %v3277_v21  ;;  %v2082_v56 = vadd.f32 %v5123_v10, %v1828_v6  ;;  %1866 = vmatmul.bf16.gmra.mxu1 %v3105_v55  ;;  %v169_v55 = vld [vmem:[#allocation2 + $0x198] sm:$0xff]  ;;  %v3112_v25 = vld [vmem:[%s5616_s0 + $0x330] sm:$0xf]  ;;  %v3288_v6 = vld [vmem:[%s5616_s0 + $0x488] sm:$0xf] }
 0x234   :  { %2676 = vst.msk [vmem:[%s5618_s3 + $0x260] sm:$0xff] %vm19_vm0, %v2578_v31  ;;  %v2251_v44 = vadd.f32 %v2082_v56, %v168_v29  ;;  %v3557_v31 = vld [vmem:[%s5616_s0 + $0x490] sm:$0xf0]  ;;  %v1900_v29 = vadd.f32 %v4752_v2, %v4225_v24 }
 0x235   :  { %v5207_v27 = vpop.f32.mrf.mxu2  ;;  %v2151_v20 = vpop.f32.mrf.mxu3  ;;  %v2449_v4 = vld [vmem:[#allocation2 + $0x188] sm:$0xff] }
 0x236   :  { %v2152_v11 = vadd.f32 %v2151_v20, %v1898_v49  ;;  %v1575_v7 = vpop.f32.mrf.mxu0  ;;  %v2551_v10 = vadd.f32 %v5183_v46, %v2449_v4  ;;  %2349 = vst.msk [vmem:[#allocation2 + $0x190] sm:$0xff] %vm19_vm0, %v2251_v44  ;;  %v197_v49 = vld [vmem:[#allocation2 + $0x278] sm:$0xff] }
 0x237   :  { %v1829_v61 = vpop.f32.mrf.mxu1 }
 0x238   :  { %v2279_v58 = vadd.f32 %v2152_v11, %v196_v17  ;;  %2649 = vst.msk [vmem:[%s5618_s3 + $0x188] sm:$0xff] %vm19_vm0, %v2551_v10  ;;  %v1830_v21 = vadd.f32 %v1829_v61, %v1575_v7  ;;  %v3113_v17 = vor.u32 %v3514_v1, %v3112_v25  ;;  %v1903_v1 = vadd.f32 %v4766_v28, %v4247_v42 }
 0x239   :  { %v2477_v32 = vld [vmem:[#allocation2 + $0x268] sm:$0xff] }
 0x23a   :  { %3397 = vmatmul.msk.bf16.gmra.mxu2 %vm19_vm0, %v3133_v14  ;;  %v2579_v5 = vadd.f32 %v5183_v46, %v2477_v32  ;;  %2377 = vst.msk [vmem:[#allocation2 + $0x270] sm:$0xff] %vm19_vm0, %v2279_v58  ;;  %v2084_v34 = vadd.f32 %v5148_v15, %v1830_v21  ;;  %v3513_v15 = vld [vmem:[%s5616_s0 + $0x334] sm:$0xf]  ;;  %v3289_v14 = vor.u32 %v3557_v31, %v3288_v6  ;;  %v170_v21 = vld [vmem:[#allocation2 + $0x1a0] sm:$0xff] }
 0x23b   :  { %v3117_v11 = vor.u32 %v3513_v15, %v3114_v26  ;;  %v198_v31 = vld [vmem:[#allocation2 + $0x280] sm:$0xff] }
 0x23c   :  { %2677 = vst.msk [vmem:[%s5618_s3 + $0x268] sm:$0xff] %vm19_vm0, %v2579_v5  ;;  %v2252_v56 = vadd.f32 %v2084_v34, %v169_v55  ;;  %v3144_v5 = vld [vmem:[%s5616_s0 + $0x368] sm:$0xf]  ;;  %v3521_v55 = vld [vmem:[%s5616_s0 + $0x370] sm:$0xf0] }
 0x23d   :  { %v5237_v45 = vpop.f32.mrf.mxu2  ;;  %v2153_v44 = vpop.f32.mrf.mxu3  ;;  %v2450_v24 = vld [vmem:[#allocation2 + $0x190] sm:$0xff]  ;;  %v3145_v15 = vor.u32 %v3521_v55, %v3144_v5 }
 0x23e   :  { %v2154_v2 = vadd.f32 %v2153_v44, %v1900_v29  ;;  %v1578_v20 = vpop.f32.mrf.mxu0  ;;  %v2552_v4 = vadd.f32 %v5183_v46, %v2450_v24  ;;  %2350 = vst.msk [vmem:[#allocation2 + $0x198] sm:$0xff] %vm19_vm0, %v2252_v56 }
 0x23f   :  { %v1832_v10 = vpop.f32.mrf.mxu1 }
 0x240   :  { %v2280_v7 = vadd.f32 %v2154_v2, %v197_v49  ;;  %2650 = vst.msk [vmem:[%s5618_s3 + $0x190] sm:$0xff] %vm19_vm0, %v2552_v4  ;;  %v1833_v61 = vadd.f32 %v1832_v10, %v1578_v20  ;;  %v171_v2 = vld [vmem:[#allocation2 + $0x1a8] sm:$0xff] }
 0x241   :  { %v2478_v58 = vld [vmem:[#allocation2 + $0x270] sm:$0xff]  ;;  %1617 = vmatmul.bf16.gmra.mxu0 %v3113_v17  ;;  %v3124_v20 = vld [vmem:[%s5616_s0 + $0x348] sm:$0xf]  ;;  %v3516_v10 = vld [vmem:[%s5616_s0 + $0x34c] sm:$0xf] }
 0x242   :  { %v2580_v32 = vadd.f32 %v5183_v46, %v2478_v58  ;;  %2378 = vst.msk [vmem:[#allocation2 + $0x278] sm:$0xff] %vm19_vm0, %v2280_v7  ;;  %3410 = vmatmul.msk.bf16.gmra.mxu3 %vm19_vm0, %v3289_v14  ;;  %v2087_v25 = vadd.f32 %v5172_v51, %v1833_v61  ;;  %1871 = vmatmul.bf16.gmra.mxu1 %v3117_v11  ;;  %v3517_v14 = vld [vmem:[%s5616_s0 + $0x350] sm:$0xf0]  ;;  %v3126_v58 = vld [vmem:[%s5616_s0 + $0x354] sm:$0xf0] }
 0x243   :  { %v1905_v11 = vadd.f32 %v4793_v39, %v4289_v3 }
 0x244   :  { %2678 = vst.msk [vmem:[%s5618_s3 + $0x270] sm:$0xff] %vm19_vm0, %v2580_v32  ;;  %v2253_v6 = vadd.f32 %v2087_v25, %v170_v21  ;;  %v3125_v21 = vor.u32 %v3517_v14, %v3124_v20  ;;  %v3129_v25 = vor.u32 %v3516_v10, %v3126_v58 }
 0x245   :  { %v5267_v34 = vpop.f32.mrf.mxu2  ;;  %v2156_v29 = vpop.f32.mrf.mxu3  ;;  %v2451_v26 = vld [vmem:[#allocation2 + $0x198] sm:$0xff] }
 0x246   :  { %v2157_v56 = vadd.f32 %v2156_v29, %v1903_v1  ;;  %v1580_v49 = vpop.f32.mrf.mxu0  ;;  %v2553_v51 = vadd.f32 %v5183_v46, %v2451_v26  ;;  %2351 = vst.msk [vmem:[#allocation2 + $0x1a0] sm:$0xff] %vm19_vm0, %v2253_v6  ;;  %v172_v26 = vld [vmem:[#allocation2 + $0x1b0] sm:$0xff] }
 0x247   :  { %v1834_v42 = vpop.f32.mrf.mxu1 }
 0x248   :  { %v2281_v44 = vadd.f32 %v2157_v56, %v198_v31  ;;  %2651 = vst.msk [vmem:[%s5618_s3 + $0x198] sm:$0xff] %vm19_vm0, %v2553_v51  ;;  %v1835_v17 = vadd.f32 %v1834_v42, %v1580_v49  ;;  %v3156_v56 = vld [vmem:[%s5616_s0 + $0x380] sm:$0xf]  ;;  %v3524_v49 = vld [vmem:[%s5616_s0 + $0x388] sm:$0xf0] }
 0x249   :  { %v2479_v28 = vld [vmem:[#allocation2 + $0x278] sm:$0xff] }
 0x24a   :  { %3398 = vmatmul.msk.bf16.gmra.mxu2 %vm19_vm0, %v3145_v15  ;;  %v2581_v24 = vadd.f32 %v5183_v46, %v2479_v28  ;;  %2379 = vst.msk [vmem:[#allocation2 + $0x280] sm:$0xff] %vm19_vm0, %v2281_v44  ;;  %v2089_v4 = vadd.f32 %v5207_v27, %v1835_v17  ;;  %v199_v27 = vld [vmem:[#allocation2 + $0x288] sm:$0xff]  ;;  %v1908_v44 = vadd.f32 %v4808_v41, %v4310_v23  ;;  %v200_v17 = vld [vmem:[#allocation2 + $0x290] sm:$0xff] }
 0x24c   :  { %2679 = vst.msk [vmem:[%s5618_s3 + $0x278] sm:$0xff] %vm19_vm0, %v2581_v24  ;;  %v2254_v61 = vadd.f32 %v2089_v4, %v171_v2  ;;  %v3157_v2 = vor.u32 %v3524_v49, %v3156_v56 }
 0x24d   :  { %v5291_v7 = vpop.f32.mrf.mxu2  ;;  %v2158_v32 = vpop.f32.mrf.mxu3  ;;  %v2452_v3 = vld [vmem:[#allocation2 + $0x1a0] sm:$0xff] }
 0x24e   :  { %v2159_v39 = vadd.f32 %v2158_v32, %v1905_v11  ;;  %v1583_v5 = vpop.f32.mrf.mxu0  ;;  %v2554_v55 = vadd.f32 %v5183_v46, %v2452_v3  ;;  %2352 = vst.msk [vmem:[#allocation2 + $0x1a8] sm:$0xff] %vm19_vm0, %v2254_v61  ;;  %v173_v61 = vld [vmem:[#allocation2 + $0x1b8] sm:$0xff]  ;;  %v3520_v32 = vld [vmem:[%s5616_s0 + $0x368] sm:$0xf0]  ;;  %v1910_v3 = vadd.f32 %v4835_v47, %v4331_v40 }
 0x24f   :  { %v1837_v6 = vpop.f32.mrf.mxu1 }
 0x250   :  { %v2282_v1 = vadd.f32 %v2159_v39, %v199_v27  ;;  %2652 = vst.msk [vmem:[%s5618_s3 + $0x1a0] sm:$0xff] %vm19_vm0, %v2554_v55  ;;  %v1838_v29 = vadd.f32 %v1837_v6, %v1583_v5  ;;  %v3136_v27 = vld [vmem:[%s5616_s0 + $0x360] sm:$0xf]  ;;  %v3519_v5 = vld [vmem:[%s5616_s0 + $0x364] sm:$0xf] }
 0x251   :  { %v2480_v31 = vld [vmem:[#allocation2 + $0x280] sm:$0xff]  ;;  %1622 = vmatmul.bf16.gmra.mxu0 %v3125_v21  ;;  %v3138_v55 = vld [vmem:[%s5616_s0 + $0x36c] sm:$0xf0]  ;;  %v3137_v6 = vor.u32 %v3520_v32, %v3136_v27  ;;  %v1915_v32 = vadd.f32 %v4877_v60, %v4372_v13 }
 0x252   :  { %v2582_v15 = vadd.f32 %v5183_v46, %v2480_v31  ;;  %2380 = vst.msk [vmem:[#allocation2 + $0x288] sm:$0xff] %vm19_vm0, %v2282_v1  ;;  %v2092_v51 = vadd.f32 %v5237_v45, %v1838_v29  ;;  %1876 = vmatmul.bf16.gmra.mxu1 %v3129_v25 }
 0x254   :  { %2680 = vst.msk [vmem:[%s5618_s3 + $0x280] sm:$0xff] %vm19_vm0, %v2582_v15  ;;  %v2255_v28 = vadd.f32 %v2092_v51, %v172_v26  ;;  %v3141_v15 = vor.u32 %v3519_v5, %v3138_v55  ;;  %v203_v5 = vld [vmem:[#allocation2 + $0x2a8] sm:$0xff] }
 0x255   :  { %v5320_v42 = vpop.f32.mrf.mxu2  ;;  %v2161_v24 = vpop.f32.mrf.mxu3  ;;  %v2453_v20 = vld [vmem:[#allocation2 + $0x1a8] sm:$0xff] }
 0x256   :  { %v2162_v14 = vadd.f32 %v2161_v24, %v1908_v44  ;;  %v1585_v4 = vpop.f32.mrf.mxu0  ;;  %v2555_v45 = vadd.f32 %v5183_v46, %v2453_v20  ;;  %2353 = vst.msk [vmem:[#allocation2 + $0x1b0] sm:$0xff] %vm19_vm0, %v2255_v28  ;;  %v174_v28 = vld [vmem:[#allocation2 + $0x1c0] sm:$0xff]  ;;  %v1913_v24 = vadd.f32 %v4850_v48, %v4351_v59 }
 0x257   :  { %v1839_v23 = vpop.f32.mrf.mxu1 }
 0x258   :  { %v2283_v11 = vadd.f32 %v2162_v14, %v200_v17  ;;  %2653 = vst.msk [vmem:[%s5618_s3 + $0x1a8] sm:$0xff] %vm19_vm0, %v2555_v45  ;;  %v1840_v10 = vadd.f32 %v1839_v23, %v1585_v4  ;;  %v202_v14 = vld [vmem:[#allocation2 + $0x2a0] sm:$0xff] }
 0x259   :  { %v2481_v41 = vld [vmem:[#allocation2 + $0x288] sm:$0xff] }
 0x25a   :  { %3399 = vmatmul.msk.bf16.gmra.mxu2 %vm19_vm0, %v3157_v2  ;;  %v2583_v58 = vadd.f32 %v5183_v46, %v2481_v41  ;;  %2381 = vst.msk [vmem:[#allocation2 + $0x290] sm:$0xff] %vm19_vm0, %v2283_v11  ;;  %v2094_v21 = vadd.f32 %v5267_v34, %v1840_v10  ;;  %v201_v34 = vld [vmem:[#allocation2 + $0x298] sm:$0xff] }
 0x25c   :  { %2681 = vst.msk [vmem:[%s5618_s3 + $0x288] sm:$0xff] %vm19_vm0, %v2583_v58  ;;  %v2256_v25 = vadd.f32 %v2094_v21, %v173_v61  ;;  %v175_v61 = vld [vmem:[#allocation2 + $0x1c8] sm:$0xff] }
 0x25d   :  { %v5344_v39 = vpop.f32.mrf.mxu2  ;;  %v2163_v1 = vpop.f32.mrf.mxu3  ;;  %v2454_v40 = vld [vmem:[#allocation2 + $0x1b0] sm:$0xff] }
 0x25e   :  { %v2164_v47 = vadd.f32 %v2163_v1, %v1910_v3  ;;  %v1588_v31 = vpop.f32.mrf.mxu0  ;;  %v2556_v29 = vadd.f32 %v5183_v46, %v2454_v40  ;;  %2354 = vst.msk [vmem:[#allocation2 + $0x1b8] sm:$0xff] %vm19_vm0, %v2256_v25 }
 0x25f   :  { %v1842_v56 = vpop.f32.mrf.mxu1 }
 0x260   :  { %v2284_v26 = vadd.f32 %v2164_v47, %v201_v34  ;;  %2654 = vst.msk [vmem:[%s5618_s3 + $0x1b0] sm:$0xff] %vm19_vm0, %v2556_v29  ;;  %v1843_v51 = vadd.f32 %v1842_v56, %v1588_v31  ;;  %v176_v31 = vld [vmem:[#allocation2 + $0x1d0] sm:$0xff] }
 0x261   :  { %v2482_v49 = vld [vmem:[#allocation2 + $0x290] sm:$0xff]  ;;  %1627 = vmatmul.bf16.gmra.mxu0 %v3137_v6 }
 0x262   :  { %v2584_v44 = vadd.f32 %v5183_v46, %v2482_v49  ;;  %2382 = vst.msk [vmem:[#allocation2 + $0x298] sm:$0xff] %vm19_vm0, %v2284_v26  ;;  %v2097_v17 = vadd.f32 %v5291_v7, %v1843_v51  ;;  %1881 = vmatmul.bf16.gmra.mxu1 %v3141_v15  ;;  %v1918_v15 = vadd.f32 %v4892_v19, %v4392_v33  ;;  %v204_v49 = vld [vmem:[#allocation2 + $0x2b0] sm:$0xff] }
 0x264   :  { %2682 = vst.msk [vmem:[%s5618_s3 + $0x290] sm:$0xff] %vm19_vm0, %v2584_v44  ;;  %v2257_v20 = vadd.f32 %v2097_v17, %v174_v28 }
 0x265   :  { %v2103_v2 = vpop.f32.mrf.mxu2  ;;  %v2166_v4 = vpop.f32.mrf.mxu3  ;;  %v2455_v45 = vld [vmem:[#allocation2 + $0x1b8] sm:$0xff] }
 0x266   :  { %v2167_v11 = vadd.f32 %v2166_v4, %v1913_v24  ;;  %v1590_v23 = vpop.f32.mrf.mxu0  ;;  %v2557_v41 = vadd.f32 %v5183_v46, %v2455_v45  ;;  %2355 = vst.msk [vmem:[#allocation2 + $0x1c0] sm:$0xff] %vm19_vm0, %v2257_v20  ;;  %v177_v4 = vld [vmem:[#allocation2 + $0x1d8] sm:$0xff] }
 0x267   :  { %v1844_v10 = vpop.f32.mrf.mxu1 }
 0x268   :  { %v2285_v7 = vadd.f32 %v2167_v11, %v202_v14  ;;  %2655 = vst.msk [vmem:[%s5618_s3 + $0x1b8] sm:$0xff] %vm19_vm0, %v2557_v41  ;;  %v1845_v48 = vadd.f32 %v1844_v10, %v1590_v23  ;;  %v1920_v11 = vadd.f32 %v4919_v37, %v4413_v53 }
 0x269   :  { %v2483_v59 = vld [vmem:[#allocation2 + $0x298] sm:$0xff] }
 0x26a   :  { %v2585_v58 = vadd.f32 %v5183_v46, %v2483_v59  ;;  %2383 = vst.msk [vmem:[#allocation2 + $0x2a0] sm:$0xff] %vm19_vm0, %v2285_v7  ;;  %v2099_v27 = vadd.f32 %v5320_v42, %v1845_v48  ;;  %v205_v7 = vld [vmem:[#allocation2 + $0x2b8] sm:$0xff] }
 0x26c   :  { %2683 = vst.msk [vmem:[%s5618_s3 + $0x298] sm:$0xff] %vm19_vm0, %v2585_v58  ;;  %v2258_v3 = vadd.f32 %v2099_v27, %v175_v61 }
 0x26d   :  { %v2106_v21 = vpop.f32.mrf.mxu2  ;;  %v2168_v55 = vpop.f32.mrf.mxu3  ;;  %v2456_v25 = vld [vmem:[#allocation2 + $0x1c0] sm:$0xff] }
 0x26e   :  { %v2169_v34 = vadd.f32 %v2168_v55, %v1915_v32  ;;  %v1593_v1 = vpop.f32.mrf.mxu0  ;;  %v2558_v6 = vadd.f32 %v5183_v46, %v2456_v25  ;;  %2356 = vst.msk [vmem:[#allocation2 + $0x1c8] sm:$0xff] %vm19_vm0, %v2258_v3  ;;  %v178_v3 = vld [vmem:[#allocation2 + $0x1e0] sm:$0xff]  ;;  %v1923_v55 = vadd.f32 %v4934_v50, %v4433_v9 }
 0x26f   :  { %v1847_v40 = vpop.f32.mrf.mxu1 }
 0x270   :  { %v2286_v42 = vadd.f32 %v2169_v34, %v203_v5  ;;  %2656 = vst.msk [vmem:[%s5618_s3 + $0x1c0] sm:$0xff] %vm19_vm0, %v2558_v6  ;;  %v1848_v60 = vadd.f32 %v1847_v40, %v1593_v1  ;;  %v206_v1 = vld [vmem:[#allocation2 + $0x2c0] sm:$0xff] }
 0x271   :  { %v2484_v13 = vld [vmem:[#allocation2 + $0x2a0] sm:$0xff] }
 0x272   :  { %v2586_v47 = vadd.f32 %v5183_v46, %v2484_v13  ;;  %2384 = vst.msk [vmem:[#allocation2 + $0x2a8] sm:$0xff] %vm19_vm0, %v2286_v42  ;;  %v2102_v29 = vadd.f32 %v5344_v39, %v1848_v60 }
 0x274   :  { %2684 = vst.msk [vmem:[%s5618_s3 + $0x2a0] sm:$0xff] %vm19_vm0, %v2586_v47  ;;  %v2259_v56 = vadd.f32 %v2102_v29, %v176_v31  ;;  %v179_v29 = vld [vmem:[#allocation2 + $0x1e8] sm:$0xff] }
 0x275   :  { %v2108_v26 = vpop.f32.mrf.mxu2  ;;  %v2171_v51 = vpop.f32.mrf.mxu3  ;;  %v2457_v44 = vld [vmem:[#allocation2 + $0x1c8] sm:$0xff] }
 0x276   :  { %v2172_v28 = vadd.f32 %v2171_v51, %v1918_v15  ;;  %v1595_v17 = vpop.f32.mrf.mxu0  ;;  %v2559_v24 = vadd.f32 %v5183_v46, %v2457_v44  ;;  %2357 = vst.msk [vmem:[#allocation2 + $0x1d0] sm:$0xff] %vm19_vm0, %v2259_v56  ;;  %v1925_v56 = vadd.f32 %v4961_v54, %v4454_v38  ;;  %v207_v44 = vld [vmem:[#allocation2 + $0x2c8] sm:$0xff] }
 0x277   :  { %v1849_v20 = vpop.f32.mrf.mxu1 }
 0x278   :  { %v2287_v39 = vadd.f32 %v2172_v28, %v204_v49  ;;  %2657 = vst.msk [vmem:[%s5618_s3 + $0x1c8] sm:$0xff] %vm19_vm0, %v2559_v24  ;;  %v1850_v19 = vadd.f32 %v1849_v20, %v1595_v17 }
 0x279   :  { %v2485_v33 = vld [vmem:[#allocation2 + $0x2a8] sm:$0xff] }
 0x27a   :  { %v2587_v14 = vadd.f32 %v5183_v46, %v2485_v33  ;;  %2385 = vst.msk [vmem:[#allocation2 + $0x2b0] sm:$0xff] %vm19_vm0, %v2287_v39  ;;  %v2104_v45 = vadd.f32 %v2103_v2, %v1850_v19 }
 0x27c   :  { %2685 = vst.msk [vmem:[%s5618_s3 + $0x2a8] sm:$0xff] %vm19_vm0, %v2587_v14  ;;  %v2260_v41 = vadd.f32 %v2104_v45, %v177_v4  ;;  %v180_v14 = vld [vmem:[#allocation2 + $0x1f0] sm:$0xff]  ;;  %v1928_v45 = vadd.f32 %v4976_v30, %v4474_v52 }
 0x27d   :  { %v2111_v23 = vpop.f32.mrf.mxu2  ;;  %v2173_v10 = vpop.f32.mrf.mxu3  ;;  %v2458_v59 = vld [vmem:[#allocation2 + $0x1d0] sm:$0xff] }
 0x27e   :  { %v2174_v48 = vadd.f32 %v2173_v10, %v1920_v11  ;;  %v1598_v58 = vpop.f32.mrf.mxu0  ;;  %v2560_v61 = vadd.f32 %v5183_v46, %v2458_v59  ;;  %2358 = vst.msk [vmem:[#allocation2 + $0x1d8] sm:$0xff] %vm19_vm0, %v2260_v41 }
 0x27f   :  { %v1852_v27 = vpop.f32.mrf.mxu1 }
 0x280   :  { %v2288_v2 = vadd.f32 %v2174_v48, %v205_v7  ;;  %2658 = vst.msk [vmem:[%s5618_s3 + $0x1d0] sm:$0xff] %vm19_vm0, %v2560_v61  ;;  %v1853_v37 = vadd.f32 %v1852_v27, %v1598_v58  ;;  %v208_v7 = vld [vmem:[#allocation2 + $0x2d0] sm:$0xff] }
 0x281   :  { %v2486_v53 = vld [vmem:[#allocation2 + $0x2b0] sm:$0xff] }
 0x282   :  { %v2588_v32 = vadd.f32 %v5183_v46, %v2486_v53  ;;  %2386 = vst.msk [vmem:[#allocation2 + $0x2b8] sm:$0xff] %vm19_vm0, %v2288_v2  ;;  %v2107_v5 = vadd.f32 %v2106_v21, %v1853_v37  ;;  %v181_v53 = vld [vmem:[#allocation2 + $0x1f8] sm:$0xff] }
 0x284   :  { %2686 = vst.msk [vmem:[%s5618_s3 + $0x2b0] sm:$0xff] %vm19_vm0, %v2588_v32  ;;  %v2261_v34 = vadd.f32 %v2107_v5, %v178_v3  ;;  %v1930_v32 = vadd.f32 %v5003_v22, %v4495_v8 }
 0x285   :  { %v2113_v25 = vpop.f32.mrf.mxu2  ;;  %v2176_v6 = vpop.f32.mrf.mxu3  ;;  %v2459_v42 = vld [vmem:[#allocation2 + $0x1d8] sm:$0xff] }
 0x286   :  { %v2177_v40 = vadd.f32 %v2176_v6, %v1923_v55  ;;  %v1600_v13 = vpop.f32.mrf.mxu0  ;;  %v2561_v60 = vadd.f32 %v5183_v46, %v2459_v42  ;;  %2359 = vst.msk [vmem:[#allocation2 + $0x1e0] sm:$0xff] %vm19_vm0, %v2261_v34  ;;  %v209_v55 = vld [vmem:[#allocation2 + $0x2d8] sm:$0xff] }
 0x287   :  { %v1854_v47 = vpop.f32.mrf.mxu1 }
 0x288   :  { %v2289_v21 = vadd.f32 %v2177_v40, %v206_v1  ;;  %2659 = vst.msk [vmem:[%s5618_s3 + $0x1d8] sm:$0xff] %vm19_vm0, %v2561_v60  ;;  %v1855_v50 = vadd.f32 %v1854_v47, %v1600_v13 }
 0x289   :  { %v2487_v9 = vld [vmem:[#allocation2 + $0x2b8] sm:$0xff] }
 0x28a   :  { %v2589_v31 = vadd.f32 %v5183_v46, %v2487_v9  ;;  %2387 = vst.msk [vmem:[#allocation2 + $0x2c0] sm:$0xff] %vm19_vm0, %v2289_v21  ;;  %v2109_v15 = vadd.f32 %v2108_v26, %v1855_v50  ;;  %v182_v21 = vld [vmem:[#allocation2 + $0x200] sm:$0xff]  ;;  %v1933_v9 = vadd.f32 %v5018_v12, %v4516_v36 }
 0x28c   :  { %2687 = vst.msk [vmem:[%s5618_s3 + $0x2b8] sm:$0xff] %vm19_vm0, %v2589_v31  ;;  %v2262_v51 = vadd.f32 %v2109_v15, %v179_v29  ;;  %v210_v29 = vld [vmem:[#allocation2 + $0x2e0] sm:$0xff] }
 0x28d   :  { %v2116_v49 = vpop.f32.mrf.mxu2  ;;  %v2178_v28 = vpop.f32.mrf.mxu3  ;;  %v2460_v17 = vld [vmem:[#allocation2 + $0x1e0] sm:$0xff] }
 0x28e   :  { %v2179_v24 = vadd.f32 %v2178_v28, %v1925_v56  ;;  %v1603_v39 = vpop.f32.mrf.mxu0  ;;  %v2562_v20 = vadd.f32 %v5183_v46, %v2460_v17  ;;  %2360 = vst.msk [vmem:[#allocation2 + $0x1e8] sm:$0xff] %vm19_vm0, %v2262_v51 }
 0x28f   :  { %v1857_v33 = vpop.f32.mrf.mxu1 }
 0x290   :  { %v2290_v26 = vadd.f32 %v2179_v24, %v207_v44  ;;  %2660 = vst.msk [vmem:[%s5618_s3 + $0x1e0] sm:$0xff] %vm19_vm0, %v2562_v20  ;;  %v1858_v54 = vadd.f32 %v1857_v33, %v1603_v39  ;;  %v183_v39 = vld [vmem:[#allocation2 + $0x208] sm:$0xff] }
 0x291   :  { %v2488_v38 = vld [vmem:[#allocation2 + $0x2c0] sm:$0xff] }
 0x292   :  { %v2590_v19 = vadd.f32 %v5183_v46, %v2488_v38  ;;  %2388 = vst.msk [vmem:[#allocation2 + $0x2c8] sm:$0xff] %vm19_vm0, %v2290_v26  ;;  %v2112_v4 = vadd.f32 %v2111_v23, %v1858_v54  ;;  %v1935_v26 = vadd.f32 %v5045_v35, %v4542_v57  ;;  %v211_v54 = vld [vmem:[#allocation2 + $0x2e8] sm:$0xff] }
 0x294   :  { %2688 = vst.msk [vmem:[%s5618_s3 + $0x2c0] sm:$0xff] %vm19_vm0, %v2590_v19  ;;  %v2263_v41 = vadd.f32 %v2112_v4, %v180_v14 }
 0x295   :  { %v2118_v11 = vpop.f32.mrf.mxu2  ;;  %v2181_v10 = vpop.f32.mrf.mxu3  ;;  %v2461_v59 = vld [vmem:[#allocation2 + $0x1e8] sm:$0xff] }
 0x296   :  { %v2182_v48 = vadd.f32 %v2181_v10, %v1928_v45  ;;  %v1605_v58 = vpop.f32.mrf.mxu0  ;;  %v2563_v61 = vadd.f32 %v5183_v46, %v2461_v59  ;;  %2361 = vst.msk [vmem:[#allocation2 + $0x1f0] sm:$0xff] %vm19_vm0, %v2263_v41  ;;  %v184_v59 = vld [vmem:[#allocation2 + $0x210] sm:$0xff] }
 0x297   :  { %v1859_v2 = vpop.f32.mrf.mxu1 }
 0x298   :  { %v2291_v23 = vadd.f32 %v2182_v48, %v208_v7  ;;  %2661 = vst.msk [vmem:[%s5618_s3 + $0x1e8] sm:$0xff] %vm19_vm0, %v2563_v61  ;;  %v1860_v30 = vadd.f32 %v1859_v2, %v1605_v58  ;;  %v1938_v58 = vadd.f32 %v5060_v18, %v4556_v16  ;;  %v212_v2 = vld [vmem:[#allocation2 + $0x2f0] sm:$0xff] }
 0x299   :  { %v2489_v52 = vld [vmem:[#allocation2 + $0x2c8] sm:$0xff] }
 0x29a   :  { %v2591_v27 = vadd.f32 %v5183_v46, %v2489_v52  ;;  %2389 = vst.msk [vmem:[#allocation2 + $0x2d0] sm:$0xff] %vm19_vm0, %v2291_v23  ;;  %v2114_v37 = vadd.f32 %v2113_v25, %v1860_v30 }
 0x29c   :  { %2689 = vst.msk [vmem:[%s5618_s3 + $0x2c8] sm:$0xff] %vm19_vm0, %v2591_v27  ;;  %v2264_v5 = vadd.f32 %v2114_v37, %v181_v53 }
 0x29d   :  { %v2121_v3 = vpop.f32.mrf.mxu2  ;;  %v2183_v34 = vpop.f32.mrf.mxu3  ;;  %v2462_v1 = vld [vmem:[#allocation2 + $0x1f0] sm:$0xff] }
 0x29e   :  { %v2184_v6 = vadd.f32 %v2183_v34, %v1930_v32  ;;  %v1608_v42 = vpop.f32.mrf.mxu0  ;;  %v2564_v40 = vadd.f32 %v5183_v46, %v2462_v1  ;;  %2362 = vst.msk [vmem:[#allocation2 + $0x1f8] sm:$0xff] %vm19_vm0, %v2264_v5  ;;  %v1940_v1 = vadd.f32 %v5087_v63, %v4583_v43 }
 0x29f   :  { %v1862_v13 = vpop.f32.mrf.mxu1 }
 0x2a0   :  { %v2292_v25 = vadd.f32 %v2184_v6, %v209_v55  ;;  %2662 = vst.msk [vmem:[%s5618_s3 + $0x1f0] sm:$0xff] %vm19_vm0, %v2564_v40  ;;  %v1863_v22 = vadd.f32 %v1862_v13, %v1608_v42  ;;  %v185_v55 = vld [vmem:[#allocation2 + $0x218] sm:$0xff] }
 0x2a1   :  { %v2490_v8 = vld [vmem:[#allocation2 + $0x2d0] sm:$0xff]  ;;  %v213_v40 = vld [vmem:[#allocation2 + $0x2f8] sm:$0xff] }
 0x2a2   :  { %v2592_v60 = vadd.f32 %v5183_v46, %v2490_v8  ;;  %2390 = vst.msk [vmem:[#allocation2 + $0x2d8] sm:$0xff] %vm19_vm0, %v2292_v25  ;;  %v2117_v47 = vadd.f32 %v2116_v49, %v1863_v22 }
 0x2a4   :  { %2690 = vst.msk [vmem:[%s5618_s3 + $0x2d0] sm:$0xff] %vm19_vm0, %v2592_v60  ;;  %v2265_v31 = vadd.f32 %v2117_v47, %v182_v21 }
 0x2a5   :  { %v2123_v50 = vpop.f32.mrf.mxu2  ;;  %v2186_v15 = vpop.f32.mrf.mxu3  ;;  %v2463_v56 = vld [vmem:[#allocation2 + $0x1f8] sm:$0xff] }
 0x2a6   :  { %v2187_v51 = vadd.f32 %v2186_v15, %v1933_v9  ;;  %v1610_v44 = vpop.f32.mrf.mxu0  ;;  %v2565_v28 = vadd.f32 %v5183_v46, %v2463_v56  ;;  %2363 = vst.msk [vmem:[#allocation2 + $0x200] sm:$0xff] %vm19_vm0, %v2265_v31 }
 0x2a7   :  { %v1864_v17 = vpop.f32.mrf.mxu1 }
 0x2a8   :  { %v2293_v49 = vadd.f32 %v2187_v51, %v210_v29  ;;  %2663 = vst.msk [vmem:[%s5618_s3 + $0x1f8] sm:$0xff] %vm19_vm0, %v2565_v28  ;;  %v1865_v12 = vadd.f32 %v1864_v17, %v1610_v44  ;;  %v1943_v29 = vadd.f32 %v5102_v0, %v4597_v62  ;;  %v214_v51 = vld [vmem:[#allocation2 + $0x300] sm:$0xff] }
 0x2a9   :  { %v2491_v36 = vld [vmem:[#allocation2 + $0x2d8] sm:$0xff] }
 0x2aa   :  { %v2593_v24 = vadd.f32 %v5183_v46, %v2491_v36  ;;  %2391 = vst.msk [vmem:[#allocation2 + $0x2e0] sm:$0xff] %vm19_vm0, %v2293_v49  ;;  %v2119_v20 = vadd.f32 %v2118_v11, %v1865_v12 }
 0x2ac   :  { %2691 = vst.msk [vmem:[%s5618_s3 + $0x2d8] sm:$0xff] %vm19_vm0, %v2593_v24  ;;  %v2266_v38 = vadd.f32 %v2119_v20, %v183_v39  ;;  %v187_v20 = vld [vmem:[#allocation2 + $0x228] sm:$0xff] }
 0x2ad   :  { %v2126_v33 = vpop.f32.mrf.mxu2  ;;  %v2188_v19 = vpop.f32.mrf.mxu3  ;;  %v2464_v14 = vld [vmem:[#allocation2 + $0x200] sm:$0xff] }
 0x2ae   :  { %v2189_v4 = vadd.f32 %v2188_v19, %v1935_v26  ;;  %v1613_v45 = vpop.f32.mrf.mxu0  ;;  %v2566_v41 = vadd.f32 %v5183_v46, %v2464_v14  ;;  %2364 = vst.msk [vmem:[#allocation2 + $0x208] sm:$0xff] %vm19_vm0, %v2266_v38  ;;  %v5626_v38 = vld [vmem:[#allocation8_spill] sm:$0xff] }
 0x2af   :  { %v1867_v7 = vpop.f32.mrf.mxu1 }
 0x2b0   :  { %v2294_v11 = vadd.f32 %v2189_v4, %v211_v54  ;;  %2664 = vst.msk [vmem:[%s5618_s3 + $0x200] sm:$0xff] %vm19_vm0, %v2566_v41  ;;  %v1868_v35 = vadd.f32 %v1867_v7, %v1613_v45  ;;  %v215_v4 = vld [vmem:[#allocation2 + $0x308] sm:$0xff] }
 0x2b1   :  { %v2492_v57 = vld [vmem:[#allocation2 + $0x2e0] sm:$0xff] }
 0x2b2   :  { %v2594_v10 = vadd.f32 %v5183_v46, %v2492_v57  ;;  %2392 = vst.msk [vmem:[#allocation2 + $0x2e8] sm:$0xff] %vm19_vm0, %v2294_v11  ;;  %v2122_v48 = vadd.f32 %v2121_v3, %v1868_v35 }
 0x2b4   :  { %2692 = vst.msk [vmem:[%s5618_s3 + $0x2e0] sm:$0xff] %vm19_vm0, %v2594_v10  ;;  %v2267_v23 = vadd.f32 %v2122_v48, %v184_v59 }
 0x2b5   :  { %v2128_v61 = vpop.f32.mrf.mxu2  ;;  %v2191_v52 = vpop.f32.mrf.mxu3  ;;  %v2465_v30 = vld [vmem:[#allocation2 + $0x208] sm:$0xff] }
 0x2b6   :  { %v2192_v27 = vadd.f32 %v2191_v52, %v1938_v58  ;;  %v1615_v53 = vpop.f32.mrf.mxu0  ;;  %v2567_v37 = vadd.f32 %v5183_v46, %v2465_v30  ;;  %2365 = vst.msk [vmem:[#allocation2 + $0x210] sm:$0xff] %vm19_vm0, %v2267_v23 }
 0x2b7   :  { %v1869_v3 = vpop.f32.mrf.mxu1 }
 0x2b8   :  { %v2295_v32 = vadd.f32 %v2192_v27, %v212_v2  ;;  %2665 = vst.msk [vmem:[%s5618_s3 + $0x208] sm:$0xff] %vm19_vm0, %v2567_v37  ;;  %v1870_v18 = vadd.f32 %v1869_v3, %v1615_v53 }
 0x2b9   :  { %v2493_v16 = vld [vmem:[#allocation2 + $0x2e8] sm:$0xff] }
 0x2ba   :  { %v2595_v5 = vadd.f32 %v5183_v46, %v2493_v16  ;;  %2393 = vst.msk [vmem:[#allocation2 + $0x2f0] sm:$0xff] %vm19_vm0, %v2295_v32  ;;  %v2124_v34 = vadd.f32 %v2123_v50, %v1870_v18  ;;  %v186_v50 = vld [vmem:[#allocation2 + $0x220] sm:$0xff]  ;;  %v189_v18 = vld [vmem:[#allocation2 + $0x238] sm:$0xff] }
 0x2bc   :  { %2693 = vst.msk [vmem:[%s5618_s3 + $0x2e8] sm:$0xff] %vm19_vm0, %v2595_v5  ;;  %v2268_v42 = vadd.f32 %v2124_v34, %v185_v55  ;;  %v5627_v5 = vld [vmem:[#allocation3_spill] sm:$0xff]  ;;  %v5628_v55 = vld [vmem:[#allocation6_spill] sm:$0xff] }
 0x2bd   :  { %v2131_v6 = vpop.f32.mrf.mxu2  ;;  %v2193_v25 = vpop.f32.mrf.mxu3  ;;  %v2466_v13 = vld [vmem:[#allocation2 + $0x210] sm:$0xff]  ;;  %v1888_v34 = vadd.f32 %v5628_v55, %v5627_v5 }
 0x2be   :  { %v2194_v8 = vadd.f32 %v2193_v25, %v1940_v1  ;;  %v1618_v22 = vpop.f32.mrf.mxu0  ;;  %v2568_v60 = vadd.f32 %v5183_v46, %v2466_v13  ;;  %2366 = vst.msk [vmem:[#allocation2 + $0x218] sm:$0xff] %vm19_vm0, %v2268_v42 }
 0x2bf   :  { %v1872_v47 = vpop.f32.mrf.mxu1 }
 0x2c0   :  { %v2296_v21 = vadd.f32 %v2194_v8, %v213_v40  ;;  %2666 = vst.msk [vmem:[%s5618_s3 + $0x210] sm:$0xff] %vm19_vm0, %v2568_v60  ;;  %v1873_v63 = vadd.f32 %v1872_v47, %v1618_v22 }
 0x2c1   :  { %v2494_v43 = vld [vmem:[#allocation2 + $0x2f0] sm:$0xff] }
 0x2c2   :  { %v2596_v9 = vadd.f32 %v5183_v46, %v2494_v43  ;;  %2394 = vst.msk [vmem:[#allocation2 + $0x2f8] sm:$0xff] %vm19_vm0, %v2296_v21  ;;  %v2127_v31 = vadd.f32 %v2126_v33, %v1873_v63  ;;  %v5625_v33 = vld [vmem:[#allocation5_spill] sm:$0xff]  ;;  %v5629_v63 = vld [vmem:[#allocation4_spill] sm:$0xff] }
 0x2c3   :  { %v1945_v54 = vadd.f32 %v5626_v38, %v5625_v33  ;;  %v190_v43 = vld [vmem:[#allocation2 + $0x240] sm:$0xff] }
 0x2c4   :  { %2694 = vst.msk [vmem:[%s5618_s3 + $0x2f0] sm:$0xff] %vm19_vm0, %v2596_v9  ;;  %v2269_v56 = vadd.f32 %v2127_v31, %v186_v50  ;;  %v5630_v9 = vld [vmem:[#allocation7_spill] sm:$0xff] }
 0x2c5   :  { %v2133_v15 = vpop.f32.mrf.mxu2  ;;  %v2196_v44 = vpop.f32.mrf.mxu3  ;;  %v2467_v28 = vld [vmem:[#allocation2 + $0x218] sm:$0xff]  ;;  %v1890_v50 = vadd.f32 %v5630_v9, %v5629_v63 }
 0x2c6   :  { %v2197_v49 = vadd.f32 %v2196_v44, %v1943_v29  ;;  %v1620_v17 = vpop.f32.mrf.mxu0  ;;  %v2569_v36 = vadd.f32 %v5183_v46, %v2467_v28  ;;  %2367 = vst.msk [vmem:[#allocation2 + $0x220] sm:$0xff] %vm19_vm0, %v2269_v56  ;;  %v193_v29 = vld [vmem:[#allocation2 + $0x258] sm:$0xff] }
 0x2c7   :  { %v1874_v24 = vpop.f32.mrf.mxu1 }
 0x2c8   :  { %v2297_v12 = vadd.f32 %v2197_v49, %v214_v51  ;;  %2667 = vst.msk [vmem:[%s5618_s3 + $0x218] sm:$0xff] %vm19_vm0, %v2569_v36  ;;  %v1875_v0 = vadd.f32 %v1874_v24, %v1620_v17 }
 0x2c9   :  { %v2495_v62 = vld [vmem:[#allocation2 + $0x2f8] sm:$0xff] }
 0x2ca   :  { %v2597_v39 = vadd.f32 %v5183_v46, %v2495_v62  ;;  %2395 = vst.msk [vmem:[#allocation2 + $0x300] sm:$0xff] %vm19_vm0, %v2297_v12  ;;  %v2129_v26 = vadd.f32 %v2128_v61, %v1875_v0  ;;  %v188_v61 = vld [vmem:[#allocation2 + $0x230] sm:$0xff]  ;;  %v191_v0 = vld [vmem:[#allocation2 + $0x248] sm:$0xff] }
 0x2cc   :  { %2695 = vst.msk [vmem:[%s5618_s3 + $0x2f8] sm:$0xff] %vm19_vm0, %v2597_v39  ;;  %v2270_v14 = vadd.f32 %v2129_v26, %v187_v20 }
 0x2cd   :  { %v2136_v19 = vpop.f32.mrf.mxu2  ;;  %v2198_v45 = vpop.f32.mrf.mxu3  ;;  %v2468_v41 = vld [vmem:[#allocation2 + $0x220] sm:$0xff] }
 0x2ce   :  { %v2199_v11 = vadd.f32 %v2198_v45, %v1945_v54  ;;  %v1623_v7 = vpop.f32.mrf.mxu0  ;;  %v2570_v57 = vadd.f32 %v5183_v46, %v2468_v41  ;;  %2368 = vst.msk [vmem:[#allocation2 + $0x228] sm:$0xff] %vm19_vm0, %v2270_v14  ;;  %v3598_v14 = vld [vmem:[%s5617_s2] ss:$0 sm:$0xff] }
 0x2cf   :  { %v1877_v10 = vpop.f32.mrf.mxu1 }
 0x2d0   :  { %v2298_v35 = vadd.f32 %v2199_v11, %v215_v4  ;;  %2668 = vst.msk [vmem:[%s5618_s3 + $0x220] sm:$0xff] %vm19_vm0, %v2570_v57  ;;  %v1878_v48 = vadd.f32 %v1877_v10, %v1623_v7 }
 0x2d1   :  { %v2496_v59 = vld [vmem:[#allocation2 + $0x300] sm:$0xff] }
 0x2d2   :  { %v2598_v58 = vadd.f32 %v5183_v46, %v2496_v59  ;;  %2396 = vst.msk [vmem:[#allocation2 + $0x308] sm:$0xff] %vm19_vm0, %v2298_v35  ;;  %v2132_v23 = vadd.f32 %v2131_v6, %v1878_v48  ;;  %v192_v6 = vld [vmem:[#allocation2 + $0x250] sm:$0xff] }
 0x2d4   :  { %2696 = vst.msk [vmem:[%s5618_s3 + $0x300] sm:$0xff] %vm19_vm0, %v2598_v58  ;;  %v2271_v52 = vadd.f32 %v2132_v23, %v188_v61 }
 0x2d5   :  { %v2138_v2 = vpop.f32.mrf.mxu2  ;;  %v2469_v30 = vld [vmem:[#allocation2 + $0x228] sm:$0xff] }
 0x2d6   :  { %v1625_v27 = vpop.f32.mrf.mxu0  ;;  %v2571_v53 = vadd.f32 %v5183_v46, %v2469_v30  ;;  %2369 = vst.msk [vmem:[#allocation2 + $0x230] sm:$0xff] %vm19_vm0, %v2271_v52 }
 0x2d7   :  { %v1879_v37 = vpop.f32.mrf.mxu1 }
 0x2d8   :  { %2669 = vst.msk [vmem:[%s5618_s3 + $0x228] sm:$0xff] %vm19_vm0, %v2571_v53  ;;  %v1880_v3 = vadd.f32 %v1879_v37, %v1625_v27 }
 0x2d9   :  { %v2497_v32 = vld [vmem:[#allocation2 + $0x308] sm:$0xff] }
 0x2da   :  { %v2599_v16 = vadd.f32 %v5183_v46, %v2497_v32  ;;  %v2134_v1 = vadd.f32 %v2133_v15, %v1880_v3 }
 0x2dc   :  { %2697 = vst.msk [vmem:[%s5618_s3 + $0x308] sm:$0xff] %vm19_vm0, %v2599_v16  ;;  %v2272_v40 = vadd.f32 %v2134_v1, %v189_v18 }
 0x2dd   :  { %v2141_v42 = vpop.f32.mrf.mxu2  ;;  %v2470_v13 = vld [vmem:[#allocation2 + $0x230] sm:$0xff] }
 0x2de   :  { %v2142_v25 = vadd.f32 %v2141_v42, %v1888_v34  ;;  %v1628_v8 = vpop.f32.mrf.mxu0  ;;  %v2572_v22 = vadd.f32 %v5183_v46, %v2470_v13  ;;  %2370 = vst.msk [vmem:[#allocation2 + $0x238] sm:$0xff] %vm19_vm0, %v2272_v40 }
 0x2df   :  { %v1882_v21 = vpop.f32.mrf.mxu1 }
 0x2e0   :  { %v2275_v60 = vadd.f32 %v2142_v25, %v192_v6  ;;  %2670 = vst.msk [vmem:[%s5618_s3 + $0x230] sm:$0xff] %vm19_vm0, %v2572_v22  ;;  %v1883_v47 = vadd.f32 %v1882_v21, %v1628_v8 }
 0x2e2   :  { %2373 = vst.msk [vmem:[#allocation2 + $0x250] sm:$0xff] %vm19_vm0, %v2275_v60  ;;  %v2137_v31 = vadd.f32 %v2136_v19, %v1883_v47 }
 0x2e4   :  { %v2273_v56 = vadd.f32 %v2137_v31, %v190_v43 }
 0x2e5   :  { %v2143_v15 = vpop.f32.mrf.mxu2  ;;  %v2471_v44 = vld [vmem:[#allocation2 + $0x238] sm:$0xff] }
 0x2e6   :  { %v2144_v51 = vadd.f32 %v2143_v15, %v1890_v50  ;;  %v1630_v28 = vpop.f32.mrf.mxu0  ;;  %v2573_v49 = vadd.f32 %v5183_v46, %v2471_v44  ;;  %2371 = vst.msk [vmem:[#allocation2 + $0x240] sm:$0xff] %vm19_vm0, %v2273_v56 }
 0x2e7   :  { %v1884_v36 = vpop.f32.mrf.mxu1 }
 0x2e8   :  { %v2276_v17 = vadd.f32 %v2144_v51, %v193_v29  ;;  %2671 = vst.msk [vmem:[%s5618_s3 + $0x238] sm:$0xff] %vm19_vm0, %v2573_v49  ;;  %v1885_v24 = vadd.f32 %v1884_v36, %v1630_v28 }
 0x2e9   :  { %v2474_v12 = vld [vmem:[#allocation2 + $0x250] sm:$0xff] }
 0x2ea   :  { %v2576_v62 = vadd.f32 %v5183_v46, %v2474_v12  ;;  %2374 = vst.msk [vmem:[#allocation2 + $0x258] sm:$0xff] %vm19_vm0, %v2276_v17  ;;  %v2139_v39 = vadd.f32 %v2138_v2, %v1885_v24 }
 0x2ec   :  { %2674 = vst.msk [vmem:[%s5618_s3 + $0x250] sm:$0xff] %vm19_vm0, %v2576_v62  ;;  %v2274_v20 = vadd.f32 %v2139_v39, %v191_v0 }
 0x2ed   :  { %v2472_v26 = vld [vmem:[#allocation2 + $0x240] sm:$0xff] }
 0x2ee   :  { %v2574_v33 = vadd.f32 %v5183_v46, %v2472_v26  ;;  %2372 = vst.msk [vmem:[#allocation2 + $0x248] sm:$0xff] %vm19_vm0, %v2274_v20 }
 0x2f0   :  { %2672 = vst.msk [vmem:[%s5618_s3 + $0x240] sm:$0xff] %vm19_vm0, %v2574_v33 }
 0x2f1   :  { %v2475_v38 = vld [vmem:[#allocation2 + $0x258] sm:$0xff] }
 0x2f2   :  { %v2577_v54 = vadd.f32 %v5183_v46, %v2475_v38 }
 0x2f4   :  { %2675 = vst.msk [vmem:[%s5618_s3 + $0x258] sm:$0xff] %vm19_vm0, %v2577_v54 }
 0x2f5   :  { %v2473_v19 = vld [vmem:[#allocation2 + $0x248] sm:$0xff] }
 0x2f6   :  { %v2575_v4 = vadd.f32 %v3598_v14, %v2473_v19 }
 0x2f8   :  { %2673 = vst.msk [vmem:[%s5618_s3 + $0x248] sm:$0xff] %vm19_vm0, %v2575_v4 }

// kernel: mnist_net_forward.11
= control target key start
LH: loop header
LB: loop body
LE: loop exit
PB: predicated region body
PF: predicated region fallthrough
CT: control target
= control target key end

     0   :  { %vm441_vm0 = vcmask 261120   ;;  %v804_v59 = vmov 0.0   ;;  %s987_s1 = inlined_call_operand.vmem [shape: bf16[800,128], index: 1, kind: input, shape index: {}]   ;;  %s988_s0 = inlined_call_operand.vmem [shape: bf16[4,800], index: 0, kind: input, shape index: {}]   ;;  %s989_s2 = inlined_call_operand.vmem [shape: f32[1,128], index: 2, kind: input, shape index: {}]   ;;  %s990_s3 = inlined_call_operand.vmem [shape: f32[4,128], index: 3, kind: output, shape index: {}]  }
   0x1   :  { %v759_v0 = vld [vmem:[%s987_s1 + $0x38] sm:$0xff]  ;;  %v758_v3 = vld [vmem:[%s987_s1 + $0x30] sm:$0xff]  ;;  %v757_v8 = vld [vmem:[%s987_s1 + $0x28] sm:$0xff]  ;;  %19 = vst [vmem:[#allocation2] sm:$0xf] %v804_v59 }
   0x2   :  { %v767_v1 = vld [vmem:[%s987_s1 + $0x78] sm:$0xff]  ;;  %444 = vmatpush.bf16.msra.mxu0 %v759_v0  ;;  %v766_v4 = vld [vmem:[%s987_s1 + $0x70] sm:$0xff]  ;;  %v765_v9 = vld [vmem:[%s987_s1 + $0x68] sm:$0xff] }
   0x3   :  { %v775_v2 = vld [vmem:[%s987_s1 + $0xb8] sm:$0xff]  ;;  %457 = vmatpush.bf16.msra.mxu1 %v767_v1  ;;  %v774_v5 = vld [vmem:[%s987_s1 + $0xb0] sm:$0xff]  ;;  %v773_v10 = vld [vmem:[%s987_s1 + $0xa8] sm:$0xff] }
   0x4   :  { %470 = vmatpush.bf16.msra.mxu2 %v775_v2  ;;  %v783_v6 = vld [vmem:[%s987_s1 + $0xf8] sm:$0xff]  ;;  %v782_v7 = vld [vmem:[%s987_s1 + $0xf0] sm:$0xff]  ;;  %v781_v11 = vld [vmem:[%s987_s1 + $0xe8] sm:$0xff] }
   0x5   :  { %483 = vmatpush.bf16.msra.mxu3 %v783_v6  ;;  %v756_v12 = vld [vmem:[%s987_s1 + $0x20] sm:$0xff]  ;;  %v22_v16 = vld [vmem:[%s988_s0 + $0x8] sm:$0x3f]  ;;  %v755_v18 = vld [vmem:[%s987_s1 + $0x18] sm:$0xff] }
   0x6   :  { %445 = vmatpush.bf16.msra.mxu0 %v758_v3  ;;  %v764_v13 = vld [vmem:[%s987_s1 + $0x60] sm:$0xff]  ;;  %127 = vst [vmem:[#allocation1 + $0x20] ss:$4 sm:$0xff] %v22_v16  ;;  %v763_v19 = vld [vmem:[%s987_s1 + $0x58] sm:$0xff]  ;;  %v754_v22 = vld [vmem:[%s987_s1 + $0x10] sm:$0xff] }
   0x7   :  { %458 = vmatpush.bf16.msra.mxu1 %v766_v4  ;;  %v772_v14 = vld [vmem:[%s987_s1 + $0xa0] sm:$0xff]  ;;  %v771_v20 = vld [vmem:[%s987_s1 + $0x98] sm:$0xff]  ;;  %v762_v23 = vld [vmem:[%s987_s1 + $0x50] sm:$0xff] }
   0x8   :  { %471 = vmatpush.bf16.msra.mxu2 %v774_v5  ;;  %v21_v15 = vld [vmem:[%s988_s0] sm:$0xff]  ;;  %v779_v21 = vld [vmem:[%s987_s1 + $0xd8] sm:$0xff]  ;;  %v770_v24 = vld [vmem:[%s987_s1 + $0x90] sm:$0xff] }
   0x9   :  { %484 = vmatpush.bf16.msra.mxu3 %v782_v7  ;;  %124 = vst [vmem:[#allocation1] ss:$4 sm:$0xff] %v21_v15  ;;  %v780_v17 = vld [vmem:[%s987_s1 + $0xe0] sm:$0xff]  ;;  %v778_v25 = vld [vmem:[%s987_s1 + $0xd0] sm:$0xff]  ;;  %v753_v26 = vld [vmem:[%s987_s1 + $0x8] sm:$0xff] }
   0xa   :  { %446 = vmatpush.bf16.msra.mxu0 %v757_v8  ;;  %v761_v27 = vld [vmem:[%s987_s1 + $0x48] sm:$0xff]  ;;  %v752_v30 = vld [vmem:[%s987_s1] sm:$0xff]  ;;  %v791_v32 = vld [vmem:[%s987_s1 + $0x138] sm:$0xff] }
   0xb   :  { %459 = vmatpush.bf16.msra.mxu1 %v765_v9  ;;  %v769_v28 = vld [vmem:[%s987_s1 + $0x88] sm:$0xff]  ;;  %v760_v31 = vld [vmem:[%s987_s1 + $0x40] sm:$0xff]  ;;  %v799_v33 = vld [vmem:[%s987_s1 + $0x178] sm:$0xff] }
   0xc   :  { %472 = vmatpush.bf16.msra.mxu2 %v773_v10  ;;  %v777_v29 = vld [vmem:[%s987_s1 + $0xc8] sm:$0xff]  ;;  %v768_v34 = vld [vmem:[%s987_s1 + $0x80] sm:$0xff]  ;;  %v790_v39 = vld [vmem:[%s987_s1 + $0x130] sm:$0xff] }
   0xd   :  { %485 = vmatpush.bf16.msra.mxu3 %v781_v11  ;;  %v776_v35 = vld [vmem:[%s987_s1 + $0xc0] sm:$0xff]  ;;  %v801_v36 = vld [vmem:[%s987_s1 + $0x188] sm:$0xff]  ;;  %v798_v40 = vld [vmem:[%s987_s1 + $0x170] sm:$0xff] }
   0xe   :  { %447 = vmatpush.bf16.msra.mxu0 %v756_v12  ;;  %v800_v43 = vld [vmem:[%s987_s1 + $0x180] sm:$0xff]  ;;  %v789_v44 = vld [vmem:[%s987_s1 + $0x128] sm:$0xff]  ;;  %v787_v48 = vld [vmem:[%s987_s1 + $0x118] sm:$0xff] }
   0xf   :  { %460 = vmatpush.bf16.msra.mxu1 %v764_v13  ;;  %v797_v45 = vld [vmem:[%s987_s1 + $0x168] sm:$0xff]  ;;  %v788_v46 = vld [vmem:[%s987_s1 + $0x120] sm:$0xff]  ;;  %v795_v49 = vld [vmem:[%s987_s1 + $0x158] sm:$0xff] }
  0x10   :  { %473 = vmatpush.bf16.msra.mxu2 %v772_v14  ;;  %v128_v37 = vld.sshfl [vmem:[#allocation1] sm:$0xff pattern:$0x73625140]  ;;  %v129_v38 = vld.sshfl [vmem:[#allocation1 + $0x8] sm:$0xff pattern:$0x73625140] }
  0x11   :  { %486 = vmatpush.bf16.msra.mxu3 %v780_v17  ;;  %v130_v41 = vld.sshfl [vmem:[#allocation1 + $0x10] sm:$0xff pattern:$0x73625140]  ;;  %v131_v42 = vld.sshfl [vmem:[#allocation1 + $0x18] sm:$0xff pattern:$0x73625140] }
  0x12   :  { %448 = vmatpush.bf16.msra.mxu0 %v755_v18  ;;  %v796_v47 = vld [vmem:[%s987_s1 + $0x160] sm:$0xff]  ;;  %v786_v50 = vld [vmem:[%s987_s1 + $0x110] sm:$0xff]  ;;  %v785_v53 = vld [vmem:[%s987_s1 + $0x108] sm:$0xff] }
  0x13   :  { %461 = vmatpush.bf16.msra.mxu1 %v763_v19  ;;  %v794_v51 = vld [vmem:[%s987_s1 + $0x150] sm:$0xff]  ;;  %v793_v54 = vld [vmem:[%s987_s1 + $0x148] sm:$0xff]  ;;  %v784_v55 = vld [vmem:[%s987_s1 + $0x100] sm:$0xff] }
  0x14   :  { %474 = vmatpush.bf16.msra.mxu2 %v771_v20  ;;  %v134_v52 = vld.sshfl [vmem:[#allocation1 + $0x30] sm:$0xff pattern:$0x73625140]  ;;  %v792_v56 = vld [vmem:[%s987_s1 + $0x140] sm:$0xff]  ;;  %v20_v12 = vld [vmem:[#allocation2] sm:$0xf] }
  0x15   :  { %487 = vmatpush.bf16.msra.mxu3 %v779_v21  ;;  %v132_v57 = vld.sshfl [vmem:[#allocation1 + $0x20] sm:$0xff pattern:$0x73625140]  ;;  %v133_v58 = vld.sshfl [vmem:[#allocation1 + $0x28] sm:$0xff pattern:$0x73625140] }
  0x16   :  { %449 = vmatpush.bf16.msra.mxu0 %v754_v22  ;;  %v803_v18 = vld [vmem:[%s989_s2] ss:$0 sm:$0xff] }
  0x17   :  { %462 = vmatpush.bf16.msra.mxu1 %v762_v23 }
  0x18   :  { %475 = vmatpush.bf16.msra.mxu2 %v770_v24 }
  0x19   :  { %488 = vmatpush.bf16.msra.mxu3 %v778_v25 }
  0x1a   :  { %450 = vmatpush.bf16.msra.mxu0 %v753_v26 }
  0x1b   :  { %463 = vmatpush.bf16.msra.mxu1 %v761_v27 }
  0x1c   :  { %476 = vmatpush.bf16.msra.mxu2 %v769_v28 }
  0x1d   :  { %489 = vmatpush.bf16.msra.mxu3 %v777_v29 }
  0x1e   :  { %451 = vmatpush.bf16.msra.mxu0 %v752_v30 }
  0x1f   :  { %464 = vmatpush.bf16.msra.mxu1 %v760_v31 }
  0x20   :  { %477 = vmatpush.bf16.msra.mxu2 %v768_v34 }
  0x21   :  { %452 = vmatmul.bf16.vlgmr.msra.gmra.mxu0 %v128_v37  ;;  %490 = vmatpush.bf16.msra.mxu3 %v776_v35 }
  0x22   :  { %496 = vmatpush.bf16.msrb.mxu0 %v791_v32  ;;  %465 = vmatmul.bf16.vlgmr.msra.gmra.mxu1 %v129_v38 }
  0x23   :  { %509 = vmatpush.bf16.msrb.mxu1 %v799_v33  ;;  %478 = vmatmul.bf16.vlgmr.msra.gmra.mxu2 %v130_v41 }
  0x24   :  { %528 = vmatpush.bf16.msrb.mxu2 %v801_v36  ;;  %491 = vmatmul.bf16.vlgmr.msra.gmra.mxu3 %v131_v42 }
  0x26   :  { %497 = vmatpush.bf16.msrb.mxu0 %v790_v39 }
  0x27   :  { %510 = vmatpush.bf16.msrb.mxu1 %v798_v40 }
  0x28   :  { %529 = vmatpush.bf16.msrb.mxu2 %v800_v43 }
  0x2a   :  { %498 = vmatpush.bf16.msrb.mxu0 %v789_v44 }
  0x2b   :  { %511 = vmatpush.bf16.msrb.mxu1 %v797_v45 }
  0x2e   :  { %499 = vmatpush.bf16.msrb.mxu0 %v788_v46 }
  0x2f   :  { %512 = vmatpush.bf16.msrb.mxu1 %v796_v47 }
  0x32   :  { %500 = vmatpush.bf16.msrb.mxu0 %v787_v48 }
  0x33   :  { %513 = vmatpush.bf16.msrb.mxu1 %v795_v49  ;;  %751 = vmatmul.msk.bf16.vlgmr.msrb.gmra.mxu2 %vm441_vm0, %v134_v52 }
  0x36   :  { %501 = vmatpush.bf16.msrb.mxu0 %v786_v50 }
  0x37   :  { %514 = vmatpush.bf16.msrb.mxu1 %v794_v51 }
  0x3a   :  { %502 = vmatpush.bf16.msrb.mxu0 %v785_v53 }
  0x3b   :  { %515 = vmatpush.bf16.msrb.mxu1 %v793_v54 }
  0x3e   :  { %503 = vmatpush.bf16.msrb.mxu0 %v784_v55 }
  0x3f   :  { %516 = vmatpush.bf16.msrb.mxu1 %v792_v56 }
  0x41   :  { %504 = vmatmul.bf16.vlgmr.msrb.gmra.mxu0 %v132_v57 }
  0x42   :  { %517 = vmatmul.bf16.vlgmr.msrb.gmra.mxu1 %v133_v58 }
  0x9e   :  { %v453_v60 = vpop.f32.mrf.mxu0 }
  0x9f   :  { %v466_v61 = vpop.f32.mrf.mxu1 }
  0xa0   :  { %v467_v4 = vadd.f32 %v466_v61, %v453_v60 }
  0xa6   :  { %v455_v62 = vpop.f32.mrf.mxu0  ;;  %v479_v0 = vpop.f32.mrf.mxu2 }
  0xa7   :  { %v468_v63 = vpop.f32.mrf.mxu1  ;;  %v492_v1 = vpop.f32.mrf.mxu3  ;;  %v480_v5 = vadd.f32 %v479_v0, %v467_v4 }
  0xa9   :  { %v493_v7 = vadd.f32 %v492_v1, %v480_v5 }
  0xae   :  { %v481_v2 = vpop.f32.mrf.mxu2 }
  0xaf   :  { %v494_v3 = vpop.f32.mrf.mxu3 }
  0xb6   :  { %v531_v6 = vpop.f32.mrf.mxu2 }
  0xbe   :  { %v505_v8 = vpop.f32.mrf.mxu0  ;;  %v533_v13 = vpop.f32.mrf.mxu2 }
  0xbf   :  { %v518_v9 = vpop.f32.mrf.mxu1  ;;  %v506_v10 = vadd.f32 %v505_v8, %v493_v7 }
  0xc1   :  { %v519_v11 = vadd.f32 %v518_v9, %v506_v10 }
  0xc3   :  { %v532_v14 = vadd.f32 %v531_v6, %v519_v11 }
  0xc5   :  { %v535_v15 = vadd.f32 %v532_v14, %v20_v12 }
  0xc6   :  { %v507_v16 = vpop.f32.mrf.mxu0 }
  0xc7   :  { %v520_v17 = vpop.f32.mrf.mxu1  ;;  %536 = vst [vmem:[#allocation2] sm:$0xf] %v535_v15 }
  0xce   :  { %v540_v19 = vld [vmem:[#allocation2] sm:$0xf] }
  0xcf   :  { %v545_v20 = vadd.f32 %v803_v18, %v540_v19 }
  0xd1   :  { %546 = vst [vmem:[%s990_s3] sm:$0xf] %v545_v20 }

// kernel: mnist_net_forward.10
= control target key start
LH: loop header
LB: loop body
LE: loop exit
PB: predicated region body
PF: predicated region fallthrough
CT: control target
= control target key end

     0   :  { %s5697_s12 = smov 0   ;;  %s5699_s13 = smov 0   ;;  %s6696_s0 = inlined_call_operand.vmem [shape: bf16[4,6272], index: 0, kind: input, shape index: {}]   ;;  %s6697_s1 = inlined_call_operand.vmem [shape: bf16[6272,800], index: 1, kind: input, shape index: {}]   ;;  %s6698_s2 = inlined_call_operand.vmem [shape: f32[1,800], index: 2, kind: input, shape index: {}]   ;;  %s6699_s3 = inlined_call_operand.vmem [shape: bf16[4,800], index: 3, kind: output, shape index: {}]  }
   0x1   :  { %s5701_s14 = smov 0  }
   0x2 LB: > { %s25_s15 = sadd.s32 1, %s5669_s13  ;;  %p3631_p0 = scmp.ge.s32.totalorder %s5673_s14, 1  ;;  %s5673_s14 = sphi %s5701_s14, %s13_s14   ;;  %s5669_s13 = sphi %s5699_s13, %s6701_s13   ;;  %s5665_s12 = sphi %s5697_s12, %s6700_s12  }
   0x3   : > { %p26_p1 = scmp.ge.s32.totalorder %s25_s15, 7  ;;  %p164_p2 = scmp.lt.s32.totalorder %s5673_s14, 8 }
   0x5   : > { %s6703_s15 = smov (%p26_p1, %s25_s15), 0  ;;  %p165_p3 = pnand %p3631_p0, %p164_p2 }
   0x6   : > { %s189_s16 = smul.u32 (!%p165_p3), 7, %s5665_s12  ;;  %p3634_p6 = scmp.ne.s32.totalorder (!%p165_p3), %s5665_s12, 0 }
   0x7   : > { %168 = sbr.rel (%p165_p3) target bundleno = 617 (0x269), region = 32 }
   0x8   : > { %s195_s17 = smul.u32 (!%p165_p3), 112, %s5665_s12  ;;  %p190_p4 = scmp.lt.s32.totalorder (!%p165_p3), %s189_s16, 48 }
   0xa   : > { %p196_p5 = scmp.lt.s32.totalorder (!%p165_p3), %s195_s17, 783 }
   0xc   : > { %s6705_s16 = smov (!%p190_p4, %s189_s16), 48  ;;  %s6707_s17 = smov (!%p196_p5, %s195_s17), 783 }
   0xd   : > { %s3632_s18 = sshll.u32 %s6705_s16, 1  ;;  %s5610_s22 = smul.u32 28, %s6707_s17 }
   0xe   : > { %s5722_s21 = scalar_lea.vmem %s6696_s0, %s3632_s18  ;;  %205 = sbr.rel (%p3634_p6) target bundleno = 24 (0x18), region = 36 }
   0xf   : > { %s5727_s25 = scalar_lea.vmem %s6697_s1, %s5610_s22 }
  0x13   : > { %v5675_v0 = vmov 0.0   ;;  %vm209_vm0 = vcmask 257024  }
  0x14   : > { %206 = vst [vmem:[#allocation2] sm:$0xff] %v5675_v0 }
  0x15   : > { %207 = vst [vmem:[#allocation2 + $0x8] sm:$0xff] %v5675_v0 }
  0x16   : > { %208 = vst [vmem:[#allocation2 + $0x10] sm:$0xff] %v5675_v0 }
  0x17   : > { %210 = vst.msk [vmem:[#allocation2 + $0x18] sm:$0xf] %vm209_vm0, %v5675_v0 }
  0x18 PF: > { %v3833_v1 = vld [vmem:[%s5727_s25 + $0x188] sm:$0xf]  ;;  %v5270_v2 = vld [vmem:[%s5727_s25 + $0x1a0] sm:$0xf0]  ;;  %v3805_v12 = vld [vmem:[%s5727_s25 + $0x150] sm:$0xf] }
  0x19   : > { %v4281_v3 = vld [vmem:[%s5727_s25 + $0x508] sm:$0xf]  ;;  %v3834_v4 = vor.u32 %v5270_v2, %v3833_v1  ;;  %v5382_v5 = vld [vmem:[%s5727_s25 + $0x520] sm:$0xf0]  ;;  %v5263_v14 = vld [vmem:[%s5727_s25 + $0x168] sm:$0xf0] }
  0x1a   : > { %v4057_v6 = vld [vmem:[%s5727_s25 + $0x348] sm:$0xf]  ;;  %v5326_v7 = vld [vmem:[%s5727_s25 + $0x360] sm:$0xf0]  ;;  %v4282_v8 = vor.u32 %v5382_v5, %v4281_v3  ;;  %v4253_v15 = vld [vmem:[%s5727_s25 + $0x4d0] sm:$0xf]  ;;  %v3806_v17 = vor.u32 %v5263_v14, %v3805_v12 }
  0x1b   : > { %v4058_v9 = vor.u32 %v5326_v7, %v4057_v6  ;;  %v4505_v10 = vld [vmem:[%s5727_s25 + $0x6c8] sm:$0xf]  ;;  %v5438_v11 = vld [vmem:[%s5727_s25 + $0x6e0] sm:$0xf0]  ;;  %2700 = vmatpush.bf16.msra.mxu0 %v3834_v4  ;;  %v5375_v16 = vld [vmem:[%s5727_s25 + $0x4e8] sm:$0xf0] }
  0x1c   : > { %v4506_v13 = vor.u32 %v5438_v11, %v4505_v10  ;;  %2726 = vmatpush.bf16.msra.mxu2 %v4282_v8  ;;  %v4254_v18 = vor.u32 %v5375_v16, %v4253_v15  ;;  %v4029_v19 = vld [vmem:[%s5727_s25 + $0x310] sm:$0xf]  ;;  %v5319_v20 = vld [vmem:[%s5727_s25 + $0x328] sm:$0xf0]  ;;  %v3777_v24 = vld [vmem:[%s5727_s25 + $0x118] sm:$0xf] }
  0x1d   : > { %2713 = vmatpush.bf16.msra.mxu1 %v4058_v9  ;;  %v4477_v21 = vld [vmem:[%s5727_s25 + $0x690] sm:$0xf]  ;;  %v4030_v22 = vor.u32 %v5319_v20, %v4029_v19  ;;  %v5431_v23 = vld [vmem:[%s5727_s25 + $0x6a8] sm:$0xf0]  ;;  %v5256_v25 = vld [vmem:[%s5727_s25 + $0x130] sm:$0xf0] }
  0x1e   : > { %2739 = vmatpush.bf16.msra.mxu3 %v4506_v13  ;;  %v4478_v26 = vor.u32 %v5431_v23, %v4477_v21  ;;  %v4225_v27 = vld [vmem:[%s5727_s25 + $0x498] sm:$0xf]  ;;  %v5368_v28 = vld [vmem:[%s5727_s25 + $0x4b0] sm:$0xf0]  ;;  %v3778_v30 = vor.u32 %v5256_v25, %v3777_v24  ;;  %v3749_v36 = vld [vmem:[%s5727_s25 + $0xe0] sm:$0xf] }
  0x1f   : > { %v4001_v29 = vld [vmem:[%s5727_s25 + $0x2d8] sm:$0xf]  ;;  %2701 = vmatpush.bf16.msra.mxu0 %v3806_v17  ;;  %v5312_v31 = vld [vmem:[%s5727_s25 + $0x2f0] sm:$0xf0]  ;;  %v4226_v34 = vor.u32 %v5368_v28, %v4225_v27  ;;  %v5249_v37 = vld [vmem:[%s5727_s25 + $0xf8] sm:$0xf0] }
  0x20   : > { %v4449_v32 = vld [vmem:[%s5727_s25 + $0x658] sm:$0xf]  ;;  %v5424_v33 = vld [vmem:[%s5727_s25 + $0x670] sm:$0xf0]  ;;  %2727 = vmatpush.bf16.msra.mxu2 %v4254_v18  ;;  %v4002_v35 = vor.u32 %v5312_v31, %v4001_v29  ;;  %v4197_v38 = vld [vmem:[%s5727_s25 + $0x460] sm:$0xf]  ;;  %v3750_v45 = vor.u32 %v5249_v37, %v3749_v36 }
  0x21   : > { %2714 = vmatpush.bf16.msra.mxu1 %v4030_v22  ;;  %v4450_v39 = vor.u32 %v5424_v33, %v4449_v32  ;;  %v5361_v40 = vld [vmem:[%s5727_s25 + $0x478] sm:$0xf0]  ;;  %v3973_v41 = vld [vmem:[%s5727_s25 + $0x2a0] sm:$0xf]  ;;  %v3721_v48 = vld [vmem:[%s5727_s25 + $0xa8] sm:$0xf] }
  0x22   : > { %2740 = vmatpush.bf16.msra.mxu3 %v4478_v26  ;;  %v5305_v42 = vld [vmem:[%s5727_s25 + $0x2b8] sm:$0xf0]  ;;  %v4421_v43 = vld [vmem:[%s5727_s25 + $0x620] sm:$0xf]  ;;  %v4198_v46 = vor.u32 %v5361_v40, %v4197_v38  ;;  %v5242_v49 = vld [vmem:[%s5727_s25 + $0xc0] sm:$0xf0] }
  0x23   : > { %v5417_v44 = vld [vmem:[%s5727_s25 + $0x638] sm:$0xf0]  ;;  %2702 = vmatpush.bf16.msra.mxu0 %v3778_v30  ;;  %v3974_v47 = vor.u32 %v5305_v42, %v3973_v41  ;;  %v4169_v50 = vld [vmem:[%s5727_s25 + $0x428] sm:$0xf]  ;;  %v5354_v52 = vld [vmem:[%s5727_s25 + $0x440] sm:$0xf0]  ;;  %v3722_v57 = vor.u32 %v5242_v49, %v3721_v48 }
  0x24   : > { %2728 = vmatpush.bf16.msra.mxu2 %v4226_v34  ;;  %v4422_v51 = vor.u32 %v5417_v44, %v4421_v43  ;;  %v3945_v53 = vld [vmem:[%s5727_s25 + $0x268] sm:$0xf]  ;;  %v5298_v54 = vld [vmem:[%s5727_s25 + $0x280] sm:$0xf0]  ;;  %v4170_v58 = vor.u32 %v5354_v52, %v4169_v50  ;;  %v3693_v60 = vld [vmem:[%s5727_s25 + $0x70] sm:$0xf] }
  0x25   : > { %2715 = vmatpush.bf16.msra.mxu1 %v4002_v35  ;;  %v4393_v55 = vld [vmem:[%s5727_s25 + $0x5e8] sm:$0xf]  ;;  %v5410_v56 = vld [vmem:[%s5727_s25 + $0x600] sm:$0xf0]  ;;  %v3946_v59 = vor.u32 %v5298_v54, %v3945_v53  ;;  %v5235_v61 = vld [vmem:[%s5727_s25 + $0x88] sm:$0xf0] }
  0x26   : > { %2741 = vmatpush.bf16.msra.mxu3 %v4450_v39  ;;  %v4141_v62 = vld [vmem:[%s5727_s25 + $0x3f0] sm:$0xf]  ;;  %v4394_v63 = vor.u32 %v5410_v56, %v4393_v55  ;;  %v5347_v0 = vld [vmem:[%s5727_s25 + $0x408] sm:$0xf0]  ;;  %v3694_v5 = vor.u32 %v5235_v61, %v3693_v60  ;;  %v3665_v8 = vld [vmem:[%s5727_s25 + $0x38] sm:$0xf] }
  0x27   : > { %2703 = vmatpush.bf16.msra.mxu0 %v3750_v45  ;;  %v3917_v1 = vld [vmem:[%s5727_s25 + $0x230] sm:$0xf]  ;;  %v5291_v2 = vld [vmem:[%s5727_s25 + $0x248] sm:$0xf0]  ;;  %v4142_v6 = vor.u32 %v5347_v0, %v4141_v62  ;;  %v5228_v9 = vld [vmem:[%s5727_s25 + $0x50] sm:$0xf0] }
  0x28   : > { %2729 = vmatpush.bf16.msra.mxu2 %v4198_v46  ;;  %v4365_v3 = vld [vmem:[%s5727_s25 + $0x5b0] sm:$0xf]  ;;  %v5403_v4 = vld [vmem:[%s5727_s25 + $0x5c8] sm:$0xf0]  ;;  %v3918_v7 = vor.u32 %v5291_v2, %v3917_v1  ;;  %v4113_v10 = vld [vmem:[%s5727_s25 + $0x3b8] sm:$0xf]  ;;  %v3666_v17 = vor.u32 %v5228_v9, %v3665_v8 }
  0x29   : > { %2716 = vmatpush.bf16.msra.mxu1 %v3974_v47  ;;  %v4366_v11 = vor.u32 %v5403_v4, %v4365_v3  ;;  %v5340_v12 = vld [vmem:[%s5727_s25 + $0x3d0] sm:$0xf0]  ;;  %v3889_v13 = vld [vmem:[%s5727_s25 + $0x1f8] sm:$0xf]  ;;  %v3637_v18 = vld [vmem:[%s5727_s25] sm:$0xf] }
  0x2a   : > { %2742 = vmatpush.bf16.msra.mxu3 %v4422_v51  ;;  %v5284_v14 = vld [vmem:[%s5727_s25 + $0x210] sm:$0xf0]  ;;  %v4337_v15 = vld [vmem:[%s5727_s25 + $0x578] sm:$0xf]  ;;  %v5221_v19 = vld [vmem:[%s5727_s25 + $0x18] sm:$0xf0]  ;;  %v4114_v20 = vor.u32 %v5340_v12, %v4113_v10 }
  0x2b   : > { %2704 = vmatpush.bf16.msra.mxu0 %v3722_v57  ;;  %v5396_v16 = vld [vmem:[%s5727_s25 + $0x590] sm:$0xf0]  ;;  %v3890_v21 = vor.u32 %v5284_v14, %v3889_v13  ;;  %v4085_v22 = vld [vmem:[%s5727_s25 + $0x380] sm:$0xf]  ;;  %v5333_v23 = vld [vmem:[%s5727_s25 + $0x398] sm:$0xf0]  ;;  %v3638_v32 = vor.u32 %v5221_v19, %v3637_v18 }
  0x2c   : > { %2730 = vmatpush.bf16.msra.mxu2 %v4170_v58  ;;  %v4729_v24 = vld [vmem:[%s5727_s25 + $0x888] sm:$0xf]  ;;  %v4338_v25 = vor.u32 %v5396_v16, %v4337_v15  ;;  %v5494_v26 = vld [vmem:[%s5727_s25 + $0x8a0] sm:$0xf0]  ;;  %v3861_v29 = vld [vmem:[%s5727_s25 + $0x1c0] sm:$0xf]  ;;  %v4086_v36 = vor.u32 %v5333_v23, %v4085_v22 }
  0x2d   : > { %2717 = vmatpush.bf16.msra.mxu1 %v3946_v59  ;;  %v5177_v27 = vld [vmem:[%s5727_s25 + $0xc08] sm:$0xf]  ;;  %v5606_v28 = vld [vmem:[%s5727_s25 + $0xc20] sm:$0xf0]  ;;  %v5277_v30 = vld [vmem:[%s5727_s25 + $0x1d8] sm:$0xf0]  ;;  %v4730_v37 = vor.u32 %v5494_v26, %v4729_v24 }
  0x2e   : > { %2743 = vmatpush.bf16.msra.mxu3 %v4394_v63  ;;  %v4309_v31 = vld [vmem:[%s5727_s25 + $0x540] sm:$0xf]  ;;  %v5389_v33 = vld [vmem:[%s5727_s25 + $0x558] sm:$0xf0]  ;;  %v4953_v34 = vld [vmem:[%s5727_s25 + $0xa48] sm:$0xf]  ;;  %v5178_v40 = vor.u32 %v5606_v28, %v5177_v27  ;;  %v3862_v41 = vor.u32 %v5277_v30, %v3861_v29 }
  0x2f   : > { %2705 = vmatpush.bf16.msra.mxu0 %v3694_v5  ;;  %v5550_v35 = vld [vmem:[%s5727_s25 + $0xa60] sm:$0xf0]  ;;  %v5267_v38 = vld [vmem:[%s5727_s25 + $0x18c] sm:$0xf]  ;;  %v3835_v39 = vld [vmem:[%s5727_s25 + $0x1a4] sm:$0xf0]  ;;  %v4310_v44 = vor.u32 %v5389_v33, %v4309_v31 }
  0x30   : > { %2731 = vmatpush.bf16.msra.mxu2 %v4142_v6  ;;  %v4701_v42 = vld [vmem:[%s5727_s25 + $0x850] sm:$0xf]  ;;  %v5487_v43 = vld [vmem:[%s5727_s25 + $0x868] sm:$0xf0]  ;;  %v4954_v45 = vor.u32 %v5550_v35, %v4953_v34  ;;  %v3838_v48 = vor.u32 %v5267_v38, %v3835_v39  ;;  %v5260_v52 = vld [vmem:[%s5727_s25 + $0x154] sm:$0xf] }
  0x31   : > { %2718 = vmatpush.bf16.msra.mxu1 %v3918_v7  ;;  %v5149_v46 = vld [vmem:[%s5727_s25 + $0xbd0] sm:$0xf]  ;;  %v5599_v47 = vld [vmem:[%s5727_s25 + $0xbe8] sm:$0xf0]  ;;  %v4702_v51 = vor.u32 %v5487_v43, %v4701_v42  ;;  %v4673_v55 = vld [vmem:[%s5727_s25 + $0x818] sm:$0xf] }
  0x32   : > { %2744 = vmatpush.bf16.msra.mxu3 %v4366_v11  ;;  %v4925_v49 = vld [vmem:[%s5727_s25 + $0xa10] sm:$0xf]  ;;  %v5543_v50 = vld [vmem:[%s5727_s25 + $0xa28] sm:$0xf0]  ;;  %v5150_v54 = vor.u32 %v5599_v47, %v5149_v46  ;;  %v5480_v56 = vld [vmem:[%s5727_s25 + $0x830] sm:$0xf0] }
  0x33   : > { %2706 = vmatpush.bf16.msra.mxu0 %v3666_v17  ;;  %v3807_v53 = vld [vmem:[%s5727_s25 + $0x16c] sm:$0xf0]  ;;  %v215_v57 = vld [vmem:[%s5722_s21] sm:$0xff]  ;;  %v4926_v58 = vor.u32 %v5543_v50, %v4925_v49  ;;  %v5121_v59 = vld [vmem:[%s5727_s25 + $0xb98] sm:$0xf]  ;;  %v4674_v0 = vor.u32 %v5480_v56, %v4673_v55  ;;  %vm3346_vm1 = vcmask 1043456  }
  0x34   : > { %2732 = vmatpush.bf16.msra.mxu2 %v4114_v20  ;;  %v5592_v60 = vld [vmem:[%s5727_s25 + $0xbb0] sm:$0xf0]  ;;  %666 = vst [vmem:[#allocation1] ss:$4 sm:$0xff] %v215_v57  ;;  %v3810_v61 = vor.u32 %v5260_v52, %v3807_v53  ;;  %v4897_v62 = vld [vmem:[%s5727_s25 + $0x9d8] sm:$0xf] }
  0x35   : > { %2719 = vmatpush.bf16.msra.mxu1 %v3890_v21  ;;  %v5536_v63 = vld [vmem:[%s5727_s25 + $0x9f0] sm:$0xf0]  ;;  %v5253_v1 = vld [vmem:[%s5727_s25 + $0x11c] sm:$0xf]  ;;  %v3779_v2 = vld [vmem:[%s5727_s25 + $0x134] sm:$0xf0]  ;;  %v5122_v3 = vor.u32 %v5592_v60, %v5121_v59 }
  0x36   : > { %2745 = vmatpush.bf16.msra.mxu3 %v4338_v25  ;;  %v4645_v4 = vld [vmem:[%s5727_s25 + $0x7e0] sm:$0xf]  ;;  %v5473_v5 = vld [vmem:[%s5727_s25 + $0x7f8] sm:$0xf0]  ;;  %v4898_v7 = vor.u32 %v5536_v63, %v4897_v62  ;;  %v3782_v11 = vor.u32 %v5253_v1, %v3779_v2  ;;  %v5246_v12 = vld [vmem:[%s5727_s25 + $0xe4] sm:$0xf] }
  0x37   : > { %2707 = vmatpush.bf16.msra.mxu0 %v3638_v32  ;;  %v5093_v6 = vld [vmem:[%s5727_s25 + $0xb60] sm:$0xf]  ;;  %v5585_v8 = vld [vmem:[%s5727_s25 + $0xb78] sm:$0xf0]  ;;  %v4617_v14 = vld [vmem:[%s5727_s25 + $0x7a8] sm:$0xf]  ;;  %v4646_v15 = vor.u32 %v5473_v5, %v4645_v4 }
  0x38   : > { %2733 = vmatpush.bf16.msra.mxu2 %v4086_v36  ;;  %v4869_v9 = vld [vmem:[%s5727_s25 + $0x9a0] sm:$0xf]  ;;  %v5529_v10 = vld [vmem:[%s5727_s25 + $0x9b8] sm:$0xf0]  ;;  %v5466_v16 = vld [vmem:[%s5727_s25 + $0x7c0] sm:$0xf0]  ;;  %v5094_v19 = vor.u32 %v5585_v8, %v5093_v6 }
  0x39   : > { %2720 = vmatpush.bf16.msra.mxu1 %v3862_v41  ;;  %v3751_v13 = vld [vmem:[%s5727_s25 + $0xfc] sm:$0xf0]  ;;  %v5065_v17 = vld [vmem:[%s5727_s25 + $0xb28] sm:$0xf]  ;;  %v5578_v18 = vld [vmem:[%s5727_s25 + $0xb40] sm:$0xf0]  ;;  %v4870_v22 = vor.u32 %v5529_v10, %v4869_v9  ;;  %v4618_v28 = vor.u32 %v5466_v16, %v4617_v14 }
  0x3a   : > { %2746 = vmatpush.bf16.msra.mxu3 %v4310_v44  ;;  %v3754_v25 = vor.u32 %v5246_v12, %v3751_v13  ;;  %v4841_v26 = vld [vmem:[%s5727_s25 + $0x968] sm:$0xf]  ;;  %v5522_v27 = vld [vmem:[%s5727_s25 + $0x980] sm:$0xf0]  ;;  %v5239_v29 = vld [vmem:[%s5727_s25 + $0xac] sm:$0xf]  ;;  %v5066_v31 = vor.u32 %v5578_v18, %v5065_v17 }
  0x3b   : > { %2752 = vmatpush.bf16.msrb.mxu0 %v4730_v37  ;;  %v5831_v20 = vld.sshfl [vmem:[#allocation1 + $0x10] sm:$0xff pattern:$0x73625140]  ;;  %v5833_v21 = vld.sshfl [vmem:[#allocation1] sm:$0xff pattern:$0x73625140]  ;;  %v4842_v34 = vor.u32 %v5522_v27, %v4841_v26 }
  0x3c   : > { %2778 = vmatpush.bf16.msrb.mxu2 %v5178_v40  ;;  %v5836_v23 = vld.sshfl [vmem:[#allocation1 + $0x8] sm:$0xff pattern:$0x73625140]  ;;  %v5838_v24 = vld.sshfl [vmem:[#allocation1 + $0x18] sm:$0xff pattern:$0x73625140]  ;;  %2708 = vmatmul.bf16.vlgmr.msra.gmra.mxu0 %v5833_v21 }
  0x3d   : > { %2765 = vmatpush.bf16.msrb.mxu1 %v4954_v45  ;;  %2734 = vmatmul.bf16.vlgmr.msra.gmra.mxu2 %v5831_v20  ;;  %v3723_v30 = vld [vmem:[%s5727_s25 + $0xc4] sm:$0xf0]  ;;  %v4589_v32 = vld [vmem:[%s5727_s25 + $0x770] sm:$0xf]  ;;  %v5459_v33 = vld [vmem:[%s5727_s25 + $0x788] sm:$0xf0] }
  0x3e   : > { %2791 = vmatpush.bf16.msrb.mxu3 %v3838_v48  ;;  %2721 = vmatmul.bf16.vlgmr.msra.gmra.mxu1 %v5836_v23  ;;  %v5037_v35 = vld [vmem:[%s5727_s25 + $0xaf0] sm:$0xf]  ;;  %v5571_v36 = vld [vmem:[%s5727_s25 + $0xb08] sm:$0xf0]  ;;  %v3726_v37 = vor.u32 %v5239_v29, %v3723_v30  ;;  %v4590_v40 = vor.u32 %v5459_v33, %v4589_v32  ;;  %v5232_v41 = vld [vmem:[%s5727_s25 + $0x74] sm:$0xf] }
  0x3f   : > { %2753 = vmatpush.bf16.msrb.mxu0 %v4702_v51  ;;  %2747 = vmatmul.bf16.vlgmr.msra.gmra.mxu3 %v5838_v24  ;;  %v4813_v38 = vld [vmem:[%s5727_s25 + $0x930] sm:$0xf]  ;;  %v5515_v39 = vld [vmem:[%s5727_s25 + $0x948] sm:$0xf0]  ;;  %v5038_v44 = vor.u32 %v5571_v36, %v5037_v35  ;;  %v4561_v45 = vld [vmem:[%s5727_s25 + $0x738] sm:$0xf] }
  0x40   : > { %2779 = vmatpush.bf16.msrb.mxu2 %v5150_v54  ;;  %v3695_v42 = vld [vmem:[%s5727_s25 + $0x8c] sm:$0xf0]  ;;  %v216_v43 = vld [vmem:[%s5722_s21 + $0x8] sm:$0x3f]  ;;  %v5452_v46 = vld [vmem:[%s5727_s25 + $0x750] sm:$0xf0]  ;;  %v4814_v47 = vor.u32 %v5515_v39, %v4813_v38 }
  0x41   : > { %2766 = vmatpush.bf16.msrb.mxu1 %v4926_v58  ;;  %669 = vst [vmem:[#allocation1 + $0x20] ss:$4 sm:$0xff] %v216_v43  ;;  %v5009_v48 = vld [vmem:[%s5727_s25 + $0xab8] sm:$0xf]  ;;  %v5564_v49 = vld [vmem:[%s5727_s25 + $0xad0] sm:$0xf0]  ;;  %v3698_v50 = vor.u32 %v5232_v41, %v3695_v42  ;;  %v4562_v54 = vor.u32 %v5452_v46, %v4561_v45 }
  0x42   : > { %2792 = vmatpush.bf16.msrb.mxu3 %v3810_v61  ;;  %v4785_v51 = vld [vmem:[%s5727_s25 + $0x8f8] sm:$0xf]  ;;  %v5508_v52 = vld [vmem:[%s5727_s25 + $0x910] sm:$0xf0]  ;;  %v5225_v53 = vld [vmem:[%s5727_s25 + $0x3c] sm:$0xf]  ;;  %v5010_v58 = vor.u32 %v5564_v49, %v5009_v48 }
  0x43   : > { %2754 = vmatpush.bf16.msrb.mxu0 %v4674_v0  ;;  %v3667_v55 = vld [vmem:[%s5727_s25 + $0x54] sm:$0xf0]  ;;  %v4533_v56 = vld [vmem:[%s5727_s25 + $0x700] sm:$0xf]  ;;  %v5445_v57 = vld [vmem:[%s5727_s25 + $0x718] sm:$0xf0]  ;;  %v4786_v62 = vor.u32 %v5508_v52, %v4785_v51 }
  0x44   : > { %2780 = vmatpush.bf16.msrb.mxu2 %v5122_v3  ;;  %v4981_v59 = vld [vmem:[%s5727_s25 + $0xa80] sm:$0xf]  ;;  %v5557_v60 = vld [vmem:[%s5727_s25 + $0xa98] sm:$0xf0]  ;;  %v5323_v61 = vld [vmem:[%s5727_s25 + $0x34c] sm:$0xf]  ;;  %v3670_v2 = vor.u32 %v5225_v53, %v3667_v55  ;;  %v4534_v6 = vor.u32 %v5445_v57, %v4533_v56 }
  0x45   : > { %2767 = vmatpush.bf16.msrb.mxu1 %v4898_v7  ;;  %v4059_v63 = vld [vmem:[%s5727_s25 + $0x364] sm:$0xf0]  ;;  %v5435_v0 = vld [vmem:[%s5727_s25 + $0x6cc] sm:$0xf]  ;;  %v4757_v3 = vld [vmem:[%s5727_s25 + $0x8c0] sm:$0xf]  ;;  %v4982_v10 = vor.u32 %v5557_v60, %v4981_v59 }
  0x46   : > { %2793 = vmatpush.bf16.msrb.mxu3 %v3782_v11  ;;  %v4507_v1 = vld [vmem:[%s5727_s25 + $0x6e4] sm:$0xf0]  ;;  %v5501_v4 = vld [vmem:[%s5727_s25 + $0x8d8] sm:$0xf0]  ;;  %v5218_v5 = vld [vmem:[%s5727_s25 + $0x4] sm:$0xf]  ;;  %v4062_v11 = vor.u32 %v5323_v61, %v4059_v63 }
  0x47   : > { %2755 = vmatpush.bf16.msrb.mxu0 %v4646_v15  ;;  %v3639_v7 = vld [vmem:[%s5727_s25 + $0x1c] sm:$0xf0]  ;;  %v5379_v8 = vld [vmem:[%s5727_s25 + $0x50c] sm:$0xf]  ;;  %v4283_v9 = vld [vmem:[%s5727_s25 + $0x524] sm:$0xf0]  ;;  %v4510_v14 = vor.u32 %v5435_v0, %v4507_v1  ;;  %v4758_v15 = vor.u32 %v5501_v4, %v4757_v3 }
  0x48   : > { %2781 = vmatpush.bf16.msrb.mxu2 %v5094_v19  ;;  %v5491_v12 = vld [vmem:[%s5727_s25 + $0x88c] sm:$0xf]  ;;  %v4731_v13 = vld [vmem:[%s5727_s25 + $0x8a4] sm:$0xf0]  ;;  %v5316_v16 = vld [vmem:[%s5727_s25 + $0x314] sm:$0xf]  ;;  %v3642_v19 = vor.u32 %v5218_v5, %v3639_v7 }
  0x49   : > { %2768 = vmatpush.bf16.msrb.mxu1 %v4870_v22  ;;  %v4031_v17 = vld [vmem:[%s5727_s25 + $0x32c] sm:$0xf0]  ;;  %v5428_v18 = vld [vmem:[%s5727_s25 + $0x694] sm:$0xf]  ;;  %v4286_v22 = vor.u32 %v5379_v8, %v4283_v9  ;;  %v5365_v42 = vld [vmem:[%s5727_s25 + $0x49c] sm:$0xf] }
  0x4a   : > { %2794 = vmatpush.bf16.msrb.mxu3 %v3754_v25  ;;  %v4479_v25 = vld [vmem:[%s5727_s25 + $0x6ac] sm:$0xf0]  ;;  %v5372_v26 = vld [vmem:[%s5727_s25 + $0x4d4] sm:$0xf]  ;;  %v4034_v33 = vor.u32 %v5316_v16, %v4031_v17  ;;  %v4227_v43 = vld [vmem:[%s5727_s25 + $0x4b4] sm:$0xf0] }
  0x4b   : > { %2756 = vmatpush.bf16.msrb.mxu0 %v4618_v28  ;;  %v4255_v27 = vld [vmem:[%s5727_s25 + $0x4ec] sm:$0xf0]  ;;  %v4734_v28 = vor.u32 %v5491_v12, %v4731_v13  ;;  %v5484_v29 = vld [vmem:[%s5727_s25 + $0x854] sm:$0xf]  ;;  %v4482_v35 = vor.u32 %v5428_v18, %v4479_v25  ;;  %v5477_v45 = vld [vmem:[%s5727_s25 + $0x81c] sm:$0xf] }
  0x4c   : > { %2782 = vmatpush.bf16.msrb.mxu2 %v5066_v31  ;;  %v4703_v30 = vld [vmem:[%s5727_s25 + $0x86c] sm:$0xf0]  ;;  %v5309_v31 = vld [vmem:[%s5727_s25 + $0x2dc] sm:$0xf]  ;;  %v4258_v39 = vor.u32 %v5372_v26, %v4255_v27  ;;  %v4675_v46 = vld [vmem:[%s5727_s25 + $0x834] sm:$0xf0] }
  0x4d   : > { %2769 = vmatpush.bf16.msrb.mxu1 %v4842_v34  ;;  %v5889_v32 = vld.sshfl [vmem:[#allocation1 + $0x30] sm:$0xff pattern:$0x73625140]  ;;  %v4003_v34 = vld [vmem:[%s5727_s25 + $0x2f4] sm:$0xf0]  ;;  %v4706_v41 = vor.u32 %v5484_v29, %v4703_v30  ;;  %v4678_v53 = vor.u32 %v5477_v45, %v4675_v46  ;;  %vm3360_vm2 = vcmask 257024  }
  0x4e   : > { %2795 = vmatpush.bf16.msrb.mxu3 %v3726_v37  ;;  %v5892_v36 = vld.sshfl [vmem:[#allocation1 + $0x28] sm:$0xff pattern:$0x73625140]  ;;  %v5421_v37 = vld [vmem:[%s5727_s25 + $0x65c] sm:$0xf]  ;;  %p5203_p7 = scmp.ne.s32.totalorder %s5665_s12, 6 }
  0x4f   : > { %2757 = vmatpush.bf16.msrb.mxu0 %v4590_v40  ;;  %v5895_v38 = vld.sshfl [vmem:[#allocation1 + $0x20] sm:$0xff pattern:$0x73625140]  ;;  %v4451_v40 = vld [vmem:[%s5727_s25 + $0x674] sm:$0xf0] }
  0x50   : > { %2783 = vmatpush.bf16.msrb.mxu2 %v5038_v44  ;;  %v4006_v44 = vor.u32 %v5309_v31, %v4003_v34  ;;  %v5302_v48 = vld [vmem:[%s5727_s25 + $0x2a4] sm:$0xf]  ;;  %v3975_v49 = vld [vmem:[%s5727_s25 + $0x2bc] sm:$0xf0]  ;;  %v5295_v60 = vld [vmem:[%s5727_s25 + $0x26c] sm:$0xf] }
  0x51   : > { %2770 = vmatpush.bf16.msrb.mxu1 %v4814_v47  ;;  %v4454_v47 = vor.u32 %v5421_v37, %v4451_v40  ;;  %v5414_v51 = vld [vmem:[%s5727_s25 + $0x624] sm:$0xf]  ;;  %v4423_v52 = vld [vmem:[%s5727_s25 + $0x63c] sm:$0xf0]  ;;  %v3978_v56 = vor.u32 %v5302_v48, %v3975_v49  ;;  %v3947_v61 = vld [vmem:[%s5727_s25 + $0x284] sm:$0xf0] }
  0x52   : > { %2796 = vmatpush.bf16.msrb.mxu3 %v3698_v50  ;;  %v4230_v50 = vor.u32 %v5365_v42, %v4227_v43  ;;  %v4199_v55 = vld [vmem:[%s5727_s25 + $0x47c] sm:$0xf0]  ;;  %v5470_v57 = vld [vmem:[%s5727_s25 + $0x7e4] sm:$0xf]  ;;  %v4426_v59 = vor.u32 %v5414_v51, %v4423_v52  ;;  %v5407_v63 = vld [vmem:[%s5727_s25 + $0x5ec] sm:$0xf]  ;;  %v3950_v4 = vor.u32 %v5295_v60, %v3947_v61 }
  0x53   : > { %2758 = vmatpush.bf16.msrb.mxu0 %v4562_v54  ;;  %v5358_v54 = vld [vmem:[%s5727_s25 + $0x464] sm:$0xf]  ;;  %v4395_v0 = vld [vmem:[%s5727_s25 + $0x604] sm:$0xf0]  ;;  %v5463_v5 = vld [vmem:[%s5727_s25 + $0x7ac] sm:$0xf] }
  0x54   : > { %2784 = vmatpush.bf16.msrb.mxu2 %v5010_v58  ;;  %v4647_v58 = vld [vmem:[%s5727_s25 + $0x7fc] sm:$0xf0]  ;;  %v4171_v3 = vld [vmem:[%s5727_s25 + $0x444] sm:$0xf0]  ;;  %v4398_v7 = vor.u32 %v5407_v63, %v4395_v0  ;;  %v5288_v8 = vld [vmem:[%s5727_s25 + $0x234] sm:$0xf] }
  0x55   : > { %2771 = vmatpush.bf16.msrb.mxu1 %v4786_v62  ;;  %v4202_v62 = vor.u32 %v5358_v54, %v4199_v55  ;;  %v4650_v1 = vor.u32 %v5470_v57, %v4647_v58  ;;  %v3919_v9 = vld [vmem:[%s5727_s25 + $0x24c] sm:$0xf0]  ;;  %v5456_v17 = vld [vmem:[%s5727_s25 + $0x774] sm:$0xf]  ;;  %v3891_v25 = vld [vmem:[%s5727_s25 + $0x214] sm:$0xf0] }
  0x56   : > { %2797 = vmatpush.bf16.msrb.mxu3 %v3670_v2  ;;  %v5351_v2 = vld [vmem:[%s5727_s25 + $0x42c] sm:$0xf]  ;;  %v4367_v12 = vld [vmem:[%s5727_s25 + $0x5cc] sm:$0xf0]  ;;  %v3922_v16 = vor.u32 %v5288_v8, %v3919_v9  ;;  %v5393_v27 = vld [vmem:[%s5727_s25 + $0x57c] sm:$0xf] }
  0x57   : > { %2759 = vmatpush.bf16.msrb.mxu0 %v4534_v6  ;;  %v4619_v6 = vld [vmem:[%s5727_s25 + $0x7c4] sm:$0xf0]  ;;  %v4591_v18 = vld [vmem:[%s5727_s25 + $0x78c] sm:$0xf0]  ;;  %v5337_v30 = vld [vmem:[%s5727_s25 + $0x3bc] sm:$0xf] }
  0x58   : > { %2785 = vmatpush.bf16.msrb.mxu2 %v4982_v10  ;;  %v4174_v10 = vor.u32 %v5351_v2, %v4171_v3  ;;  %v4622_v13 = vor.u32 %v5463_v5, %v4619_v6  ;;  %v4594_v29 = vor.u32 %v5456_v17, %v4591_v18  ;;  %v4115_v31 = vld [vmem:[%s5727_s25 + $0x3d4] sm:$0xf0]  ;;  %v5274_v37 = vld [vmem:[%s5727_s25 + $0x1c4] sm:$0xf]  ;;  %v4311_v42 = vld [vmem:[%s5727_s25 + $0x55c] sm:$0xf0] }
  0x59   : > { %2772 = vmatpush.bf16.msrb.mxu1 %v4758_v15  ;;  %v4143_v15 = vld [vmem:[%s5727_s25 + $0x40c] sm:$0xf0]  ;;  %v5547_v43 = vld [vmem:[%s5727_s25 + $0xa4c] sm:$0xf]  ;;  %v4955_v45 = vld [vmem:[%s5727_s25 + $0xa64] sm:$0xf0] }
  0x5a   : > { %2798 = vmatpush.bf16.msrb.mxu3 %v3642_v19  ;;  %2760 = vmatmul.bf16.vlgmr.msrb.gmra.mxu0 %v5895_v38  ;;  %v3841_v46 = vld [vmem:[%s5727_s25 + $0x190] sm:$0xf]  ;;  %v5330_v49 = vld [vmem:[%s5727_s25 + $0x384] sm:$0xf]  ;;  %v5603_v54 = vld [vmem:[%s5727_s25 + $0xc0c] sm:$0xf]  ;;  %v4958_v57 = vor.u32 %v5547_v43, %v4955_v45 }
  0x5b   : > { %2804 = vmatpush.bf16.msra.mxu0 %v4062_v11  ;;  %2786 = vmatmul.bf16.vlgmr.msrb.gmra.mxu2 %v5889_v32  ;;  %v5400_v11 = vld [vmem:[%s5727_s25 + $0x5b4] sm:$0xf]  ;;  %v5442_v51 = vld [vmem:[%s5727_s25 + $0x704] sm:$0xf]  ;;  %v5179_v55 = vld [vmem:[%s5727_s25 + $0xc24] sm:$0xf0] }
  0x5c   : > { %2830 = vmatpush.bf16.msra.mxu2 %v4510_v14  ;;  %2773 = vmatmul.bf16.vlgmr.msrb.gmra.mxu1 %v5892_v36  ;;  %v5344_v14 = vld [vmem:[%s5727_s25 + $0x3f4] sm:$0xf]  ;;  %v4370_v19 = vor.u32 %v5400_v11, %v4367_v12  ;;  %v4065_v58 = vld [vmem:[%s5727_s25 + $0x350] sm:$0xf]  ;;  %v3813_v2 = vld [vmem:[%s5727_s25 + $0x158] sm:$0xf] }
  0x5d   : > { %2817 = vmatpush.bf16.msra.mxu1 %v4286_v22  ;;  %2799 = vmatmul.bf16.vlgmr.msrb.gmra.mxu3 %v5833_v21  ;;  %v5281_v22 = vld [vmem:[%s5727_s25 + $0x1fc] sm:$0xf]  ;;  %v4146_v26 = vor.u32 %v5344_v14, %v4143_v15  ;;  %v4927_v63 = vld [vmem:[%s5727_s25 + $0xa2c] sm:$0xf0]  ;;  %v5264_v3 = vld [vmem:[%s5727_s25 + $0x170] sm:$0xf0] }
  0x5e   : > { %2843 = vmatpush.bf16.msra.mxu3 %v4734_v28  ;;  %v4339_v28 = vld [vmem:[%s5727_s25 + $0x594] sm:$0xf0]  ;;  %v3894_v34 = vor.u32 %v5281_v22, %v3891_v25  ;;  %v5596_v5 = vld [vmem:[%s5727_s25 + $0xbd4] sm:$0xf]  ;;  %v5151_v6 = vld [vmem:[%s5727_s25 + $0xbec] sm:$0xf0] }
  0x5f   : > { %2805 = vmatpush.bf16.msra.mxu0 %v4034_v33  ;;  %v5449_v33 = vld [vmem:[%s5727_s25 + $0x73c] sm:$0xf]  ;;  %v4342_v40 = vor.u32 %v5393_v27, %v4339_v28  ;;  %v4037_v8 = vld [vmem:[%s5727_s25 + $0x318] sm:$0xf]  ;;  %v5320_v9 = vld [vmem:[%s5727_s25 + $0x330] sm:$0xf0] }
  0x60   : > { %2831 = vmatpush.bf16.msra.mxu2 %v4482_v35  ;;  %v4563_v35 = vld [vmem:[%s5727_s25 + $0x754] sm:$0xf0]  ;;  %v5533_v11 = vld [vmem:[%s5727_s25 + $0x9dc] sm:$0xf]  ;;  %v3785_v14 = vld [vmem:[%s5727_s25 + $0x120] sm:$0xf] }
  0x61   : > { %2818 = vmatpush.bf16.msra.mxu1 %v4258_v39  ;;  %v3863_v39 = vld [vmem:[%s5727_s25 + $0x1dc] sm:$0xf0]  ;;  %v4566_v48 = vor.u32 %v5449_v33, %v4563_v35  ;;  %v4899_v12 = vld [vmem:[%s5727_s25 + $0x9f4] sm:$0xf0]  ;;  %v5257_v15 = vld [vmem:[%s5727_s25 + $0x138] sm:$0xf0] }
  0x62   : > { %2844 = vmatpush.bf16.msra.mxu3 %v4706_v41  ;;  %v5386_v41 = vld [vmem:[%s5727_s25 + $0x544] sm:$0xf]  ;;  %v3866_v52 = vor.u32 %v5274_v37, %v3863_v39  ;;  %v5589_v17 = vld [vmem:[%s5727_s25 + $0xb9c] sm:$0xf]  ;;  %v5123_v18 = vld [vmem:[%s5727_s25 + $0xbb4] sm:$0xf0] }
  0x63   : > { %2806 = vmatpush.bf16.msra.mxu0 %v4006_v44  ;;  %v4118_v44 = vor.u32 %v5337_v30, %v4115_v31  ;;  %v4009_v22 = vld [vmem:[%s5727_s25 + $0x2e0] sm:$0xf]  ;;  %v5313_v25 = vld [vmem:[%s5727_s25 + $0x2f8] sm:$0xf0]  ;;  %v5526_v27 = vld [vmem:[%s5727_s25 + $0x9a4] sm:$0xf] }
  0x64   : > { %2832 = vmatpush.bf16.msra.mxu2 %v4454_v47  ;;  %v5271_v47 = vld [vmem:[%s5727_s25 + $0x1a8] sm:$0xf0]  ;;  %v4871_v28 = vld [vmem:[%s5727_s25 + $0x9bc] sm:$0xf0]  ;;  %v3757_v30 = vld [vmem:[%s5727_s25 + $0xe8] sm:$0xf] }
  0x65   : > { %2819 = vmatpush.bf16.msra.mxu1 %v4230_v50  ;;  %v4087_v50 = vld [vmem:[%s5727_s25 + $0x39c] sm:$0xf0]  ;;  %v3842_v60 = vor.u32 %v5271_v47, %v3841_v46  ;;  %v5250_v31 = vld [vmem:[%s5727_s25 + $0x100] sm:$0xf0]  ;;  %v4874_v35 = vor.u32 %v5526_v27, %v4871_v28  ;;  %v3981_v37 = vld [vmem:[%s5727_s25 + $0x2a8] sm:$0xf] }
  0x66   : > { %2845 = vmatpush.bf16.msra.mxu3 %v4678_v53  ;;  %v4535_v53 = vld [vmem:[%s5727_s25 + $0x71c] sm:$0xf0]  ;;  %v4090_v61 = vor.u32 %v5330_v49, %v4087_v50  ;;  %v5582_v33 = vld [vmem:[%s5727_s25 + $0xb64] sm:$0xf]  ;;  %v3729_v43 = vld [vmem:[%s5727_s25 + $0xb0] sm:$0xf] }
  0x67   : > { %2807 = vmatpush.bf16.msra.mxu0 %v3978_v56  ;;  %v4314_v56 = vor.u32 %v5386_v41, %v4311_v42  ;;  %v4538_v0 = vor.u32 %v5442_v51, %v4535_v53  ;;  %v5306_v39 = vld [vmem:[%s5727_s25 + $0x2c0] sm:$0xf0]  ;;  %v5519_v41 = vld [vmem:[%s5727_s25 + $0x96c] sm:$0xf]  ;;  %v4843_v42 = vld [vmem:[%s5727_s25 + $0x984] sm:$0xf0] }
  0x68   : > { %2833 = vmatpush.bf16.msra.mxu2 %v4426_v59  ;;  %v5327_v59 = vld [vmem:[%s5727_s25 + $0x368] sm:$0xf0]  ;;  %v3982_v45 = vor.u32 %v5306_v39, %v3981_v37  ;;  %v5067_v47 = vld [vmem:[%s5727_s25 + $0xb44] sm:$0xf0]  ;;  %v3953_v49 = vld [vmem:[%s5727_s25 + $0x270] sm:$0xf] }
  0x69   : > { %2820 = vmatpush.bf16.msra.mxu1 %v4202_v62  ;;  %v5540_v62 = vld [vmem:[%s5727_s25 + $0xa14] sm:$0xf]  ;;  %v5575_v46 = vld [vmem:[%s5727_s25 + $0xb2c] sm:$0xf]  ;;  %v4815_v53 = vld [vmem:[%s5727_s25 + $0x94c] sm:$0xf0] }
  0x6a   : > { %2846 = vmatpush.bf16.msra.mxu3 %v4650_v1  ;;  %v5182_v1 = vor.u32 %v5603_v54, %v5179_v55  ;;  %v5299_v50 = vld [vmem:[%s5727_s25 + $0x288] sm:$0xf0]  ;;  %v5070_v54 = vor.u32 %v5575_v46, %v5067_v47  ;;  %v3701_v55 = vld [vmem:[%s5727_s25 + $0x78] sm:$0xf]  ;;  %v4983_v27 = vld [vmem:[%s5727_s25 + $0xa9c] sm:$0xf0] }
  0x6b   : > { %2808 = vmatpush.bf16.msra.mxu0 %v3950_v4  ;;  %v4066_v4 = vor.u32 %v5327_v59, %v4065_v58  ;;  %v5568_v58 = vld [vmem:[%s5727_s25 + $0xaf4] sm:$0xf]  ;;  %v5039_v59 = vld [vmem:[%s5727_s25 + $0xb0c] sm:$0xf0]  ;;  %v5551_v37 = vld [vmem:[%s5727_s25 + $0xa68] sm:$0xf0] }
  0x6c   : > { %2834 = vmatpush.bf16.msra.mxu2 %v4398_v7  ;;  %v4930_v7 = vor.u32 %v5540_v62, %v4927_v63  ;;  %v5292_v62 = vld [vmem:[%s5727_s25 + $0x250] sm:$0xf0]  ;;  %v4485_v47 = vld [vmem:[%s5727_s25 + $0x698] sm:$0xf] }
  0x6d   : > { %2821 = vmatpush.bf16.msra.mxu1 %v4174_v10  ;;  %v3814_v10 = vor.u32 %v5264_v3, %v3813_v2  ;;  %v5042_v2 = vor.u32 %v5568_v58, %v5039_v59  ;;  %v3673_v3 = vld [vmem:[%s5727_s25 + $0x40] sm:$0xf] }
  0x6e   : > { %2847 = vmatpush.bf16.msra.mxu3 %v4622_v13  ;;  %v5154_v13 = vor.u32 %v5596_v5, %v5151_v6  ;;  %v5561_v6 = vld [vmem:[%s5727_s25 + $0xabc] sm:$0xf]  ;;  %v4457_v59 = vld [vmem:[%s5727_s25 + $0x660] sm:$0xf] }
  0x6f   : > { %2809 = vmatpush.bf16.msra.mxu0 %v3922_v16  ;;  %v4038_v16 = vor.u32 %v5320_v9, %v4037_v8  ;;  %v3897_v9 = vld [vmem:[%s5727_s25 + $0x200] sm:$0xf] }
  0x70   : > { %2835 = vmatpush.bf16.msra.mxu2 %v4370_v19  ;;  %v4902_v19 = vor.u32 %v5533_v11, %v4899_v12  ;;  %v5498_v11 = vld [vmem:[%s5727_s25 + $0x8c4] sm:$0xf] }
  0x71   : > { %2822 = vmatpush.bf16.msra.mxu1 %v4146_v26  ;;  %v3786_v26 = vor.u32 %v5257_v15, %v3785_v14  ;;  %v3645_v14 = vld [vmem:[%s5727_s25 + $0x8] sm:$0xf]  ;;  %v5222_v15 = vld [vmem:[%s5727_s25 + $0x20] sm:$0xf0] }
  0x72   : > { %2848 = vmatpush.bf16.msra.mxu3 %v4594_v29  ;;  %v5126_v29 = vor.u32 %v5589_v17, %v5123_v18  ;;  %v4289_v17 = vld [vmem:[%s5727_s25 + $0x510] sm:$0xf]  ;;  %v5383_v18 = vld [vmem:[%s5727_s25 + $0x528] sm:$0xf0] }
  0x73   : > { %2810 = vmatpush.bf16.msra.mxu0 %v3894_v34  ;;  %v5095_v34 = vld [vmem:[%s5727_s25 + $0xb7c] sm:$0xf0] }
  0x74   : > { %2836 = vmatpush.bf16.msra.mxu2 %v4342_v40  ;;  %v3758_v40 = vor.u32 %v5250_v31, %v3757_v30  ;;  %v5278_v30 = vld [vmem:[%s5727_s25 + $0x1e0] sm:$0xf0]  ;;  %v4513_v31 = vld [vmem:[%s5727_s25 + $0x6d0] sm:$0xf] }
  0x75   : > { %2823 = vmatpush.bf16.msra.mxu1 %v4118_v44  ;;  %v5243_v44 = vld [vmem:[%s5727_s25 + $0xc8] sm:$0xf0] }
  0x76   : > { %2849 = vmatpush.bf16.msra.mxu3 %v4566_v48  ;;  %v4846_v48 = vor.u32 %v5519_v41, %v4843_v42  ;;  %v3730_v51 = vor.u32 %v5243_v44, %v3729_v43  ;;  %v4261_v41 = vld [vmem:[%s5727_s25 + $0x4d8] sm:$0xf]  ;;  %v5376_v42 = vld [vmem:[%s5727_s25 + $0x4f0] sm:$0xf0] }
  0x77   : > { %2811 = vmatpush.bf16.msra.mxu0 %v3866_v52  ;;  %v5512_v52 = vld [vmem:[%s5727_s25 + $0x934] sm:$0xf]  ;;  %v4709_v43 = vld [vmem:[%s5727_s25 + $0x858] sm:$0xf] }
  0x78   : > { %2837 = vmatpush.bf16.msra.mxu2 %v4314_v56  ;;  %v5236_v56 = vld [vmem:[%s5727_s25 + $0x90] sm:$0xf0] }
  0x79   : > { %2824 = vmatpush.bf16.msra.mxu1 %v4090_v61  ;;  %v3925_v61 = vld [vmem:[%s5727_s25 + $0x238] sm:$0xf]  ;;  %v3702_v63 = vor.u32 %v5236_v56, %v3701_v55  ;;  %v5488_v44 = vld [vmem:[%s5727_s25 + $0x870] sm:$0xf0]  ;;  %v4681_v55 = vld [vmem:[%s5727_s25 + $0x820] sm:$0xf] }
  0x7a   : > { %2850 = vmatpush.bf16.msra.mxu3 %v4538_v0  ;;  %2812 = vmatmul.bf16.vlgmr.msra.gmra.mxu0 %v5836_v23  ;;  %v5505_v0 = vld [vmem:[%s5727_s25 + $0x8fc] sm:$0xf]  ;;  %v3926_v5 = vor.u32 %v5292_v62, %v3925_v61  ;;  %v4905_v62 = vld [vmem:[%s5727_s25 + $0x9e0] sm:$0xf] }
  0x7b   : > { %2856 = vmatpush.bf16.msrb.mxu0 %v4958_v57  ;;  %2838 = vmatmul.bf16.vlgmr.msra.gmra.mxu2 %v5838_v24  ;;  %v5098_v24 = vor.u32 %v5582_v33, %v5095_v34  ;;  %v3954_v57 = vor.u32 %v5299_v50, %v3953_v49  ;;  %v4290_v33 = vor.u32 %v5383_v18, %v4289_v17  ;;  %v5439_v34 = vld [vmem:[%s5727_s25 + $0x6e8] sm:$0xf0]  ;;  %v5432_v49 = vld [vmem:[%s5727_s25 + $0x6b0] sm:$0xf0]  ;;  %v4933_v50 = vld [vmem:[%s5727_s25 + $0xa18] sm:$0xf] }
  0x7c   : > { %2882 = vmatpush.bf16.msrb.mxu2 %v3842_v60  ;;  %2825 = vmatmul.bf16.vlgmr.msra.gmra.mxu1 %v5831_v20  ;;  %v4010_v20 = vor.u32 %v5313_v25, %v4009_v22  ;;  %v4818_v60 = vor.u32 %v5512_v52, %v4815_v53  ;;  %v5495_v25 = vld [vmem:[%s5727_s25 + $0x8a8] sm:$0xf0]  ;;  %v4710_v52 = vor.u32 %v5488_v44, %v4709_v43  ;;  %v4233_v53 = vld [vmem:[%s5727_s25 + $0x4a0] sm:$0xf]  ;;  %v5481_v56 = vld [vmem:[%s5727_s25 + $0x838] sm:$0xf0] }
  0x7d   : > { %2869 = vmatpush.bf16.msrb.mxu1 %v5182_v1  ;;  %2851 = vmatmul.bf16.vlgmr.msra.gmra.mxu3 %v5895_v38  ;;  %v4787_v1 = vld [vmem:[%s5727_s25 + $0x914] sm:$0xf0]  ;;  %v5425_v61 = vld [vmem:[%s5727_s25 + $0x678] sm:$0xf0]  ;;  %v5411_v18 = vld [vmem:[%s5727_s25 + $0x608] sm:$0xf0] }
  0x7e   : > { %2895 = vmatpush.bf16.msrb.mxu3 %v4066_v4  ;;  %v5229_v4 = vld [vmem:[%s5727_s25 + $0x58] sm:$0xf0]  ;;  %v4790_v8 = vor.u32 %v5505_v0, %v4787_v1  ;;  %v4682_v0 = vor.u32 %v5481_v56, %v4681_v55  ;;  %v4205_v1 = vld [vmem:[%s5727_s25 + $0x468] sm:$0xf]  ;;  %v5185_v55 = vld [vmem:[%s5727_s25 + $0xc10] sm:$0xf] }
  0x7f   : > { %2857 = vmatpush.bf16.msrb.mxu0 %v4930_v7  ;;  %v5011_v7 = vld [vmem:[%s5727_s25 + $0xad4] sm:$0xf0]  ;;  %v3674_v12 = vor.u32 %v5229_v4, %v3673_v3  ;;  %v4653_v3 = vld [vmem:[%s5727_s25 + $0x7e8] sm:$0xf]  ;;  %v5474_v4 = vld [vmem:[%s5727_s25 + $0x800] sm:$0xf0] }
  0x80   : > { %2883 = vmatpush.bf16.msrb.mxu2 %v3814_v10  ;;  %v5285_v10 = vld [vmem:[%s5727_s25 + $0x218] sm:$0xf0]  ;;  %v5607_v56 = vld [vmem:[%s5727_s25 + $0xc28] sm:$0xf0] }
  0x81   : > { %2870 = vmatpush.bf16.msrb.mxu1 %v5154_v13  ;;  %v4759_v13 = vld [vmem:[%s5727_s25 + $0x8dc] sm:$0xf0]  ;;  %v3898_v22 = vor.u32 %v5285_v10, %v3897_v9  ;;  %v4877_v9 = vld [vmem:[%s5727_s25 + $0x9a8] sm:$0xf]  ;;  %v4654_v10 = vor.u32 %v5474_v4, %v4653_v3  ;;  %v5186_v4 = vor.u32 %v5607_v56, %v5185_v55  ;;  %v5240_v55 = vld [vmem:[%s5727_s25 + $0xb4] sm:$0xf] }
  0x82   : > { %2896 = vmatpush.bf16.msrb.mxu3 %v4038_v16  ;;  %v5014_v16 = vor.u32 %v5561_v6, %v5011_v7  ;;  %v4762_v28 = vor.u32 %v5498_v11, %v4759_v13  ;;  %v4429_v6 = vld [vmem:[%s5727_s25 + $0x628] sm:$0xf]  ;;  %v4177_v11 = vld [vmem:[%s5727_s25 + $0x430] sm:$0xf]  ;;  %v5467_v13 = vld [vmem:[%s5727_s25 + $0x7c8] sm:$0xf0] }
  0x83   : > { %2858 = vmatpush.bf16.msrb.mxu0 %v4902_v19  ;;  %v4737_v19 = vld [vmem:[%s5727_s25 + $0x890] sm:$0xf] }
  0x84   : > { %2884 = vmatpush.bf16.msrb.mxu2 %v3786_v26  ;;  %v5554_v26 = vld [vmem:[%s5727_s25 + $0xa84] sm:$0xf]  ;;  %v4738_v39 = vor.u32 %v5495_v25, %v4737_v19  ;;  %v4849_v19 = vld [vmem:[%s5727_s25 + $0x970] sm:$0xf] }
  0x85   : > { %2871 = vmatpush.bf16.msrb.mxu1 %v5126_v29  ;;  %v3869_v29 = vld [vmem:[%s5727_s25 + $0x1c8] sm:$0xf] }
  0x86   : > { %2897 = vmatpush.bf16.msrb.mxu3 %v4010_v20  ;;  %v3646_v20 = vor.u32 %v5222_v15, %v3645_v14 }
  0x87   : > { %2859 = vmatpush.bf16.msrb.mxu0 %v4874_v35  ;;  %v4961_v35 = vld [vmem:[%s5727_s25 + $0xa50] sm:$0xf] }
  0x88   : > { %2885 = vmatpush.bf16.msrb.mxu2 %v3758_v40  ;;  %v4986_v40 = vor.u32 %v5554_v26, %v4983_v27  ;;  %v4962_v46 = vor.u32 %v5551_v37, %v4961_v35  ;;  %v4149_v26 = vld [vmem:[%s5727_s25 + $0x3f8] sm:$0xf]  ;;  %v5348_v27 = vld [vmem:[%s5727_s25 + $0x410] sm:$0xf0] }
  0x89   : > { %2872 = vmatpush.bf16.msrb.mxu1 %v5098_v24  ;;  %v3870_v24 = vor.u32 %v5278_v30, %v3869_v29  ;;  %v5460_v29 = vld [vmem:[%s5727_s25 + $0x790] sm:$0xf0]  ;;  %v4821_v35 = vld [vmem:[%s5727_s25 + $0x938] sm:$0xf] }
  0x8a   : > { %2898 = vmatpush.bf16.msrb.mxu3 %v3982_v45  ;;  %v4514_v45 = vor.u32 %v5439_v34, %v4513_v31  ;;  %v5404_v34 = vld [vmem:[%s5727_s25 + $0x5d0] sm:$0xf0] }
  0x8b   : > { %2860 = vmatpush.bf16.msrb.mxu0 %v4846_v48  ;;  %v4262_v48 = vor.u32 %v5376_v42, %v4261_v41  ;;  %v5516_v37 = vld [vmem:[%s5727_s25 + $0x950] sm:$0xf0]  ;;  %v5341_v41 = vld [vmem:[%s5727_s25 + $0x3d8] sm:$0xf0]  ;;  %v4569_v42 = vld [vmem:[%s5727_s25 + $0x740] sm:$0xf] }
  0x8c   : > { %2886 = vmatpush.bf16.msrb.mxu2 %v3730_v51  ;;  %v5544_v51 = vld [vmem:[%s5727_s25 + $0xa30] sm:$0xf0]  ;;  %v4822_v44 = vor.u32 %v5516_v37, %v4821_v35  ;;  %v5101_v37 = vld [vmem:[%s5727_s25 + $0xb68] sm:$0xf] }
  0x8d   : > { %2873 = vmatpush.bf16.msrb.mxu1 %v5070_v54  ;;  %v5369_v54 = vld [vmem:[%s5727_s25 + $0x4b8] sm:$0xf0]  ;;  %v4934_v58 = vor.u32 %v5544_v51, %v4933_v50  ;;  %v4093_v50 = vld [vmem:[%s5727_s25 + $0x388] sm:$0xf] }
  0x8e   : > { %2899 = vmatpush.bf16.msrb.mxu3 %v3954_v57  ;;  %v4486_v57 = vor.u32 %v5432_v49, %v4485_v47  ;;  %v5509_v49 = vld [vmem:[%s5727_s25 + $0x918] sm:$0xf0] }
  0x8f   : > { %2861 = vmatpush.bf16.msrb.mxu0 %v4818_v60  ;;  %v4234_v60 = vor.u32 %v5369_v54, %v4233_v53  ;;  %v4541_v53 = vld [vmem:[%s5727_s25 + $0x708] sm:$0xf]  ;;  %v5446_v54 = vld [vmem:[%s5727_s25 + $0x720] sm:$0xf0] }
  0x90   : > { %2887 = vmatpush.bf16.msrb.mxu2 %v3702_v63  ;;  %v5537_v63 = vld [vmem:[%s5727_s25 + $0x9f8] sm:$0xf0]  ;;  %v4542_v3 = vor.u32 %v5446_v54, %v4541_v53 }
  0x91   : > { %2874 = vmatpush.bf16.msrb.mxu1 %v5042_v2  ;;  %v5362_v2 = vld [vmem:[%s5727_s25 + $0x480] sm:$0xf0] }
  0x92   : > { %2900 = vmatpush.bf16.msrb.mxu3 %v3926_v5  ;;  %v4906_v5 = vor.u32 %v5537_v63, %v4905_v62  ;;  %v4206_v7 = vor.u32 %v5362_v2, %v4205_v1  ;;  %v5390_v62 = vld [vmem:[%s5727_s25 + $0x560] sm:$0xf0]  ;;  %v5268_v2 = vld [vmem:[%s5727_s25 + $0x194] sm:$0xf] }
  0x93   : > { %2862 = vmatpush.bf16.msrb.mxu0 %v4790_v8  ;;  %v5418_v8 = vld [vmem:[%s5727_s25 + $0x640] sm:$0xf0] }
  0x94   : > { %2888 = vmatpush.bf16.msrb.mxu2 %v3674_v12  ;;  %v4625_v12 = vld [vmem:[%s5727_s25 + $0x7b0] sm:$0xf]  ;;  %v4430_v14 = vor.u32 %v5418_v8, %v4429_v6  ;;  %v5502_v1 = vld [vmem:[%s5727_s25 + $0x8e0] sm:$0xf0]  ;;  %v5157_v8 = vld [vmem:[%s5727_s25 + $0xbd8] sm:$0xf] }
  0x95   : > { %2875 = vmatpush.bf16.msrb.mxu1 %v5014_v16  ;;  %v4401_v16 = vld [vmem:[%s5727_s25 + $0x5f0] sm:$0xf]  ;;  %v4626_v25 = vor.u32 %v5467_v13, %v4625_v12 }
  0x96   : > { %2901 = vmatpush.bf16.msrb.mxu3 %v3898_v22  ;;  %v5523_v22 = vld [vmem:[%s5727_s25 + $0x988] sm:$0xf0]  ;;  %v4402_v30 = vor.u32 %v5411_v18, %v4401_v16  ;;  %v4291_v6 = vld [vmem:[%s5727_s25 + $0x52c] sm:$0xf0]  ;;  %v3815_v16 = vld [vmem:[%s5727_s25 + $0x174] sm:$0xf0] }
  0x97   : > { %2863 = vmatpush.bf16.msrb.mxu0 %v4762_v28  ;;  %v4597_v28 = vld [vmem:[%s5727_s25 + $0x778] sm:$0xf]  ;;  %v4850_v31 = vor.u32 %v5523_v22, %v4849_v19  ;;  %v5129_v22 = vld [vmem:[%s5727_s25 + $0xba0] sm:$0xf] }
  0x98   : > { %2889 = vmatpush.bf16.msrb.mxu2 %v3646_v20  ;;  %v4373_v20 = vld [vmem:[%s5727_s25 + $0x5b8] sm:$0xf] }
  0x99   : > { %2876 = vmatpush.bf16.msrb.mxu1 %v4986_v40  ;;  %v4121_v40 = vld [vmem:[%s5727_s25 + $0x3c0] sm:$0xf]  ;;  %v4374_v43 = vor.u32 %v5404_v34, %v4373_v20  ;;  %v4263_v18 = vld [vmem:[%s5727_s25 + $0x4f4] sm:$0xf0] }
  0x9a   : > { %2902 = vmatpush.bf16.msrb.mxu3 %v3870_v24  ;;  %2864 = vmatmul.bf16.vlgmr.msrb.gmra.mxu0 %v5892_v36  ;;  %v5453_v24 = vld [vmem:[%s5727_s25 + $0x758] sm:$0xf0]  ;;  %v4122_v47 = vor.u32 %v5341_v41, %v4121_v40  ;;  %v3787_v20 = vld [vmem:[%s5727_s25 + $0x13c] sm:$0xf0]  ;;  %v5303_v41 = vld [vmem:[%s5727_s25 + $0x2ac] sm:$0xf] }
  0x9b   : > { %2908 = vmatpush.bf16.msra.mxu0 %v4290_v33  ;;  %2890 = vmatmul.bf16.vlgmr.msrb.gmra.mxu2 %v5833_v21  ;;  %v5355_v21 = vld [vmem:[%s5727_s25 + $0x448] sm:$0xf0]  ;;  %v4150_v33 = vor.u32 %v5348_v27, %v4149_v26  ;;  %v4570_v51 = vor.u32 %v5453_v24, %v4569_v42  ;;  %v5310_v26 = vld [vmem:[%s5727_s25 + $0x2e4] sm:$0xf]  ;;  %v4011_v27 = vld [vmem:[%s5727_s25 + $0x2fc] sm:$0xf0] }
  0x9c   : > { %2934 = vmatpush.bf16.msra.mxu2 %v4738_v39  ;;  %2877 = vmatmul.bf16.vlgmr.msrb.gmra.mxu1 %v5889_v32  ;;  %v4458_v32 = vor.u32 %v5425_v61, %v4457_v59  ;;  %v4178_v17 = vor.u32 %v5355_v21, %v4177_v11  ;;  %v4598_v39 = vor.u32 %v5460_v29, %v4597_v28  ;;  %v4317_v61 = vld [vmem:[%s5727_s25 + $0x548] sm:$0xf]  ;;  %v5317_v11 = vld [vmem:[%s5727_s25 + $0x31c] sm:$0xf]  ;;  %v4039_v21 = vld [vmem:[%s5727_s25 + $0x334] sm:$0xf0] }
  0x9d   : > { %2921 = vmatpush.bf16.msra.mxu1 %v4514_v45  ;;  %2903 = vmatmul.bf16.vlgmr.msrb.gmra.mxu3 %v5836_v23  ;;  %v5530_v23 = vld [vmem:[%s5727_s25 + $0x9c0] sm:$0xf0]  ;;  %v4345_v45 = vld [vmem:[%s5727_s25 + $0x580] sm:$0xf]  ;;  %v4042_v19 = vor.u32 %v5317_v11, %v4039_v21  ;;  %v4014_v35 = vor.u32 %v5310_v26, %v4011_v27  ;;  %v3983_v42 = vld [vmem:[%s5727_s25 + $0x2c4] sm:$0xf0] }
  0x9e   : > { %2947 = vmatpush.bf16.msra.mxu3 %v4962_v46  ;;  %v4878_v15 = vor.u32 %v5530_v23, %v4877_v9  ;;  %v5397_v46 = vld [vmem:[%s5727_s25 + $0x598] sm:$0xf0]  ;;  %v5600_v9 = vld [vmem:[%s5727_s25 + $0xbf0] sm:$0xf0]  ;;  %v4318_v23 = vor.u32 %v5390_v62, %v4317_v61  ;;  %v4235_v34 = vld [vmem:[%s5727_s25 + $0x4bc] sm:$0xf0] }
  0x9f   : > { %2909 = vmatpush.bf16.msra.mxu0 %v4262_v48  ;;  %v4793_v48 = vld [vmem:[%s5727_s25 + $0x900] sm:$0xf]  ;;  %v6109_v40 = vld.sshfl [vmem:[#allocation1 + $0x10] sm:$0xff pattern:$0x73625140] }
  0xa0   : > { %2935 = vmatpush.bf16.msra.mxu2 %v4710_v52  ;;  %v5334_v52 = vld [vmem:[%s5727_s25 + $0x3a0] sm:$0xf0]  ;;  %v4794_v59 = vor.u32 %v5509_v49, %v4793_v48  ;;  %v6115_v24 = vld.sshfl [vmem:[#allocation1 + $0x18] sm:$0xff pattern:$0x73625140]  ;;  %v3986_v48 = vor.u32 %v5303_v41, %v3983_v42 }
  0xa1   : > { %2922 = vmatpush.bf16.msra.mxu1 %v4486_v57  ;;  %v5324_v57 = vld [vmem:[%s5727_s25 + $0x354] sm:$0xf]  ;;  %v4094_v63 = vor.u32 %v5334_v52, %v4093_v50  ;;  %v5073_v49 = vld [vmem:[%s5727_s25 + $0xb30] sm:$0xf]  ;;  %v5579_v50 = vld [vmem:[%s5727_s25 + $0xb48] sm:$0xf0] }
  0xa2   : > { %2948 = vmatpush.bf16.msra.mxu3 %v4934_v58  ;;  %v4346_v58 = vor.u32 %v5397_v46, %v4345_v45  ;;  %v3759_v46 = vld [vmem:[%s5727_s25 + $0x104] sm:$0xf0]  ;;  %v3955_v52 = vld [vmem:[%s5727_s25 + $0x28c] sm:$0xf0]  ;;  %v5074_v56 = vor.u32 %v5579_v50, %v5073_v49  ;;  %v5045_v61 = vld [vmem:[%s5727_s25 + $0xaf8] sm:$0xf] }
  0xa3   : > { %2910 = vmatpush.bf16.msra.mxu0 %v4234_v60  ;;  %v4067_v60 = vld [vmem:[%s5727_s25 + $0x36c] sm:$0xf0]  ;;  %v5572_v62 = vld [vmem:[%s5727_s25 + $0xb10] sm:$0xf0]  ;;  %v3871_v26 = vld [vmem:[%s5727_s25 + $0x1e4] sm:$0xf0] }
  0xa4   : > { %2936 = vmatpush.bf16.msra.mxu2 %v4682_v0  ;;  %v4765_v0 = vld [vmem:[%s5727_s25 + $0x8c8] sm:$0xf]  ;;  %v5331_v41 = vld [vmem:[%s5727_s25 + $0x38c] sm:$0xf]  ;;  %v5429_v50 = vld [vmem:[%s5727_s25 + $0x69c] sm:$0xf] }
  0xa5   : > { %2923 = vmatpush.bf16.msra.mxu1 %v4458_v32  ;;  %v3843_v32 = vld [vmem:[%s5727_s25 + $0x1ac] sm:$0xf0]  ;;  %v4095_v42 = vld [vmem:[%s5727_s25 + $0x3a4] sm:$0xf0] }
  0xa6   : > { %2949 = vmatpush.bf16.msra.mxu3 %v4906_v5  ;;  %v5380_v5 = vld [vmem:[%s5727_s25 + $0x514] sm:$0xf]  ;;  %v3846_v12 = vor.u32 %v5268_v2, %v3843_v32  ;;  %v3703_v32 = vld [vmem:[%s5727_s25 + $0x94] sm:$0xf0] }
  0xa7   : > { %2911 = vmatpush.bf16.msra.mxu0 %v4206_v7  ;;  %v4070_v7 = vor.u32 %v5324_v57, %v4067_v60  ;;  %v4294_v13 = vor.u32 %v5380_v5, %v4291_v6  ;;  %v3731_v57 = vld [vmem:[%s5727_s25 + $0xcc] sm:$0xf0]  ;;  %v5345_v5 = vld [vmem:[%s5727_s25 + $0x3fc] sm:$0xf]  ;;  %v4151_v6 = vld [vmem:[%s5727_s25 + $0x414] sm:$0xf0] }
  0xa8   : > { %2937 = vmatpush.bf16.msra.mxu2 %v4654_v10  ;;  %v4766_v10 = vor.u32 %v5502_v1, %v4765_v0  ;;  %v3927_v0 = vld [vmem:[%s5727_s25 + $0x254] sm:$0xf0]  ;;  %v3734_v1 = vor.u32 %v5240_v55, %v3731_v57  ;;  %v4154_v21 = vor.u32 %v5345_v5, %v4151_v6  ;;  %v5534_v5 = vld [vmem:[%s5727_s25 + $0x9e4] sm:$0xf]  ;;  %v4907_v6 = vld [vmem:[%s5727_s25 + $0x9fc] sm:$0xf0] }
  0xa9   : > { %2924 = vmatpush.bf16.msra.mxu1 %v4430_v14  ;;  %v5261_v14 = vld [vmem:[%s5727_s25 + $0x15c] sm:$0xf]  ;;  %v4935_v55 = vld [vmem:[%s5727_s25 + $0xa34] sm:$0xf0] }
  0xaa   : > { %2950 = vmatpush.bf16.msra.mxu3 %v4878_v15  ;;  %v5158_v15 = vor.u32 %v5600_v9, %v5157_v8  ;;  %v3818_v28 = vor.u32 %v5261_v14, %v3815_v16  ;;  %v5017_v8 = vld [vmem:[%s5727_s25 + $0xac0] sm:$0xf]  ;;  %v5565_v9 = vld [vmem:[%s5727_s25 + $0xad8] sm:$0xf0] }
  0xab   : > { %2912 = vmatpush.bf16.msra.mxu0 %v4178_v17  ;;  %v5373_v17 = vld [vmem:[%s5727_s25 + $0x4dc] sm:$0xf]  ;;  %v5018_v14 = vor.u32 %v5565_v9, %v5017_v8  ;;  %v4123_v16 = vld [vmem:[%s5727_s25 + $0x3dc] sm:$0xf0]  ;;  %v5478_v9 = vld [vmem:[%s5727_s25 + $0x824] sm:$0xf] }
  0xac   : > { %2938 = vmatpush.bf16.msra.mxu2 %v4626_v25  ;;  %v5593_v25 = vld [vmem:[%s5727_s25 + $0xbb8] sm:$0xf0]  ;;  %v4266_v29 = vor.u32 %v5373_v17, %v4263_v18  ;;  %v4989_v18 = vld [vmem:[%s5727_s25 + $0xa88] sm:$0xf] }
  0xad   : > { %2925 = vmatpush.bf16.msra.mxu1 %v4402_v30  ;;  %v5254_v30 = vld [vmem:[%s5727_s25 + $0x124] sm:$0xf] }
  0xae   : > { %2951 = vmatpush.bf16.msra.mxu3 %v4850_v31  ;;  %v5130_v31 = vor.u32 %v5593_v25, %v5129_v22  ;;  %v5558_v22 = vld [vmem:[%s5727_s25 + $0xaa0] sm:$0xf0]  ;;  %v5275_v25 = vld [vmem:[%s5727_s25 + $0x1cc] sm:$0xf] }
  0xaf   : > { %2913 = vmatpush.bf16.msra.mxu0 %v4150_v33  ;;  %v5366_v33 = vld [vmem:[%s5727_s25 + $0x4a4] sm:$0xf] }
  0xb0   : > { %2939 = vmatpush.bf16.msra.mxu2 %v4598_v39  ;;  %v5586_v39 = vld [vmem:[%s5727_s25 + $0xb80] sm:$0xf0] }
  0xb1   : > { %2926 = vmatpush.bf16.msra.mxu1 %v4374_v43  ;;  %v4238_v43 = vor.u32 %v5366_v33, %v4235_v34  ;;  %v5102_v45 = vor.u32 %v5586_v39, %v5101_v37  ;;  %v4963_v34 = vld [vmem:[%s5727_s25 + $0xa6c] sm:$0xf0]  ;;  %v3647_v37 = vld [vmem:[%s5727_s25 + $0x24] sm:$0xf0]  ;;  %v4990_v39 = vor.u32 %v5558_v22, %v4989_v18  ;;  %v5527_v18 = vld [vmem:[%s5727_s25 + $0x9ac] sm:$0xf] }
  0xb2   : > { %2952 = vmatpush.bf16.msra.mxu3 %v4822_v44  ;;  %v5247_v44 = vld [vmem:[%s5727_s25 + $0xec] sm:$0xf]  ;;  %v6191_v22 = vld.sshfl [vmem:[#allocation1] sm:$0xff pattern:$0x73625140] }
  0xb3   : > { %2914 = vmatpush.bf16.msra.mxu0 %v4122_v47  ;;  %v5359_v47 = vld [vmem:[%s5727_s25 + $0x46c] sm:$0xf]  ;;  %v3762_v53 = vor.u32 %v5247_v44, %v3759_v46  ;;  %v5604_v46 = vld [vmem:[%s5727_s25 + $0xc14] sm:$0xf] }
  0xb4   : > { %2940 = vmatpush.bf16.msra.mxu2 %v4570_v51  ;;  %v5296_v51 = vld [vmem:[%s5727_s25 + $0x274] sm:$0xf] }
  0xb5   : > { %2927 = vmatpush.bf16.msra.mxu1 %v4346_v58  ;;  %v5352_v58 = vld [vmem:[%s5727_s25 + $0x434] sm:$0xf]  ;;  %v3958_v60 = vor.u32 %v5296_v51, %v3955_v52  ;;  %v4487_v51 = vld [vmem:[%s5727_s25 + $0x6b4] sm:$0xf0] }
  0xb6   : > { %2953 = vmatpush.bf16.msra.mxu3 %v4794_v59  ;;  %v4179_v59 = vld [vmem:[%s5727_s25 + $0x44c] sm:$0xf0] }
  0xb7   : > { %2915 = vmatpush.bf16.msra.mxu0 %v4094_v63  ;;  %v5289_v63 = vld [vmem:[%s5727_s25 + $0x23c] sm:$0xf]  ;;  %v4182_v2 = vor.u32 %v5352_v58, %v4179_v59 }
  0xb8   : > { %2941 = vmatpush.bf16.msra.mxu2 %v4542_v3  ;;  %v5233_v3 = vld [vmem:[%s5727_s25 + $0x7c] sm:$0xf] }
  0xb9   : > { %2928 = vmatpush.bf16.msra.mxu1 %v4318_v23  ;;  %v5282_v23 = vld [vmem:[%s5727_s25 + $0x204] sm:$0xf]  ;;  %v3706_v11 = vor.u32 %v5233_v3, %v3703_v32  ;;  %v2709_v17 = vpop.f32.mrf.mxu0  ;;  %v5485_v58 = vld [vmem:[%s5727_s25 + $0x85c] sm:$0xf]  ;;  %v4459_v32 = vld [vmem:[%s5727_s25 + $0x67c] sm:$0xf0] }
  0xba   : > { %2954 = vmatpush.bf16.msra.mxu3 %v4766_v10  ;;  %2916 = vmatmul.bf16.vlgmr.msra.gmra.mxu0 %v6109_v40  ;;  %v3899_v10 = vld [vmem:[%s5727_s25 + $0x21c] sm:$0xf0] }
  0xbb   : > { %2960 = vmatpush.bf16.msrb.mxu0 %v5186_v4  ;;  %2942 = vmatmul.bf16.vlgmr.msra.gmra.mxu2 %v5895_v38  ;;  %v3790_v38 = vor.u32 %v5254_v30, %v3787_v20  ;;  %v5046_v4 = vor.u32 %v5572_v62, %v5045_v61  ;;  %v2722_v27 = vpop.f32.mrf.mxu1  ;;  %v5548_v30 = vld [vmem:[%s5727_s25 + $0xa54] sm:$0xf]  ;;  %v4490_v61 = vor.u32 %v5429_v50, %v4487_v51  ;;  %v4711_v62 = vld [vmem:[%s5727_s25 + $0x874] sm:$0xf0]  ;;  %v5513_v51 = vld [vmem:[%s5727_s25 + $0x93c] sm:$0xf] }
  0xbc   : > { %2986 = vmatpush.bf16.msrb.mxu2 %v4070_v7  ;;  %2929 = vmatmul.bf16.vlgmr.msra.gmra.mxu1 %v6115_v24  ;;  %v3930_v7 = vor.u32 %v5289_v63, %v3927_v0  ;;  %v5597_v63 = vld [vmem:[%s5727_s25 + $0xbdc] sm:$0xf]  ;;  %v5159_v0 = vld [vmem:[%s5727_s25 + $0xbf4] sm:$0xf0] }
  0xbd   : > { %2973 = vmatpush.bf16.msrb.mxu1 %v3846_v12  ;;  %2955 = vmatmul.bf16.vlgmr.msra.gmra.mxu3 %v5892_v36  ;;  %v4207_v36 = vld [vmem:[%s5727_s25 + $0x484] sm:$0xf0]  ;;  %v5226_v12 = vld [vmem:[%s5727_s25 + $0x44] sm:$0xf]  ;;  %v5162_v8 = vor.u32 %v5597_v63, %v5159_v0 }
  0xbe   : > { %2999 = vmatpush.bf16.msrb.mxu3 %v4294_v13  ;;  %v4210_v54 = vor.u32 %v5359_v47, %v4207_v36  ;;  %v3675_v13 = vld [vmem:[%s5727_s25 + $0x5c] sm:$0xf0]  ;;  %v5187_v47 = vld [vmem:[%s5727_s25 + $0xc2c] sm:$0xf0]  ;;  %v5506_v0 = vld [vmem:[%s5727_s25 + $0x904] sm:$0xf] }
  0xbf   : > { %2961 = vmatpush.bf16.msrb.mxu0 %v5158_v15  ;;  %v5338_v15 = vld [vmem:[%s5727_s25 + $0x3c4] sm:$0xf]  ;;  %v3678_v20 = vor.u32 %v5226_v12, %v3675_v13  ;;  %v5190_v57 = vor.u32 %v5604_v46, %v5187_v47  ;;  %v6180_v13 = vld.sshfl [vmem:[#allocation1 + $0x8] sm:$0xff pattern:$0x73625140] }
  0xc0   : > { %2987 = vmatpush.bf16.msrb.mxu2 %v4042_v19  ;;  %v3902_v19 = vor.u32 %v5282_v23, %v3899_v10  ;;  %v4126_v33 = vor.u32 %v5338_v15, %v4123_v16  ;;  %v2735_v36 = vpop.f32.mrf.mxu2  ;;  %v4683_v10 = vld [vmem:[%s5727_s25 + $0x83c] sm:$0xf0]  ;;  %v4910_v15 = vor.u32 %v5534_v5, %v4907_v6  ;;  %v5415_v16 = vld [vmem:[%s5727_s25 + $0x62c] sm:$0xf]  ;;  %v5075_v46 = vld [vmem:[%s5727_s25 + $0xb4c] sm:$0xf0] }
  0xc1   : > { %2974 = vmatpush.bf16.msrb.mxu1 %v3818_v28  ;;  %v5436_v28 = vld [vmem:[%s5727_s25 + $0x6d4] sm:$0xf]  ;;  %v2711_v59 = vpop.f32.mrf.mxu0  ;;  %v4571_v6 = vld [vmem:[%s5727_s25 + $0x75c] sm:$0xf0] }
  0xc2   : > { %3000 = vmatpush.bf16.msrb.mxu3 %v4266_v29  ;;  %v4515_v29 = vld [vmem:[%s5727_s25 + $0x6ec] sm:$0xf0]  ;;  %v5047_v59 = vld [vmem:[%s5727_s25 + $0xb14] sm:$0xf0] }
  0xc3   : > { %2962 = vmatpush.bf16.msrb.mxu0 %v5130_v31  ;;  %v2723_v31 = vadd.f32 %v2722_v27, %v2709_v17  ;;  %v4518_v44 = vor.u32 %v5436_v28, %v4515_v29  ;;  %v4431_v17 = vld [vmem:[%s5727_s25 + $0x644] sm:$0xf0]  ;;  %v5471_v27 = vld [vmem:[%s5727_s25 + $0x7ec] sm:$0xf] }
  0xc4   : > { %2988 = vmatpush.bf16.msrb.mxu2 %v4014_v35  ;;  %v5219_v35 = vld [vmem:[%s5727_s25 + $0xc] sm:$0xf]  ;;  %v4434_v29 = vor.u32 %v5415_v16, %v4431_v17  ;;  %v3849_v16 = vld [vmem:[%s5727_s25 + $0x198] sm:$0xf]  ;;  %v5272_v17 = vld [vmem:[%s5727_s25 + $0x1b0] sm:$0xf0] }
  0xc5   : > { %2975 = vmatpush.bf16.msrb.mxu1 %v3790_v38  ;;  %v5492_v38 = vld [vmem:[%s5727_s25 + $0x894] sm:$0xf]  ;;  %v2736_v49 = vadd.f32 %v2735_v36, %v2723_v31  ;;  %v3650_v52 = vor.u32 %v5219_v35, %v3647_v37  ;;  %v5583_v31 = vld [vmem:[%s5727_s25 + $0xb6c] sm:$0xf]  ;;  %v4403_v35 = vld [vmem:[%s5727_s25 + $0x60c] sm:$0xf0] }
  0xc6   : > { %3001 = vmatpush.bf16.msrb.mxu3 %v4238_v43  ;;  %v3874_v43 = vor.u32 %v5275_v25, %v3871_v26  ;;  %v4686_v25 = vor.u32 %v5478_v9, %v4683_v10  ;;  %v5520_v37 = vld [vmem:[%s5727_s25 + $0x974] sm:$0xf]  ;;  %v4319_v10 = vld [vmem:[%s5727_s25 + $0x564] sm:$0xf0] }
  0xc7   : > { %2963 = vmatpush.bf16.msrb.mxu0 %v5102_v45  ;;  %v4739_v45 = vld [vmem:[%s5727_s25 + $0x8ac] sm:$0xf0] }
  0xc8   : > { %2989 = vmatpush.bf16.msrb.mxu2 %v3986_v48  ;;  %v4966_v48 = vor.u32 %v5548_v30, %v4963_v34  ;;  %v2737_v12 = vpop.f32.mrf.mxu2  ;;  %v4655_v30 = vld [vmem:[%s5727_s25 + $0x804] sm:$0xf0]  ;;  %v5408_v34 = vld [vmem:[%s5727_s25 + $0x5f4] sm:$0xf] }
  0xc9   : > { %2976 = vmatpush.bf16.msrb.mxu1 %v3762_v53  ;;  %v4098_v53 = vor.u32 %v5331_v41, %v4095_v42  ;;  %v4658_v41 = vor.u32 %v5471_v27, %v4655_v30  ;;  %v4297_v27 = vld [vmem:[%s5727_s25 + $0x518] sm:$0xf]  ;;  %v4543_v30 = vld [vmem:[%s5727_s25 + $0x724] sm:$0xf0] }
  0xca   : > { %3002 = vmatpush.bf16.msrb.mxu3 %v4210_v54  ;;  %v5541_v54 = vld [vmem:[%s5727_s25 + $0xa1c] sm:$0xf] }
  0xcb   : > { %2964 = vmatpush.bf16.msrb.mxu0 %v5074_v56  ;;  %v4742_v56 = vor.u32 %v5492_v38, %v4739_v45  ;;  %v4938_v3 = vor.u32 %v5541_v54, %v4935_v55  ;;  %v5464_v38 = vld [vmem:[%s5727_s25 + $0x7b4] sm:$0xf]  ;;  %v5457_v55 = vld [vmem:[%s5727_s25 + $0x77c] sm:$0xf] }
  0xcc   : > { %2990 = vmatpush.bf16.msrb.mxu2 %v3958_v60  ;;  %v2748_v60 = vpop.f32.mrf.mxu3  ;;  %v5576_v45 = vld [vmem:[%s5727_s25 + $0xb34] sm:$0xf] }
  0xcd   : > { %2977 = vmatpush.bf16.msrb.mxu1 %v3734_v1  ;;  %v2724_v1 = vpop.f32.mrf.mxu1  ;;  %v5078_v54 = vor.u32 %v5576_v45, %v5075_v46  ;;  %v3821_v45 = vld [vmem:[%s5727_s25 + $0x160] sm:$0xf]  ;;  %v5265_v46 = vld [vmem:[%s5727_s25 + $0x178] sm:$0xf0] }
  0xce   : > { %3003 = vmatpush.bf16.msrb.mxu3 %v4182_v2  ;;  %v6170_v2 = vadd.f32 %v2748_v60, %v2736_v49  ;;  %v4375_v49 = vld [vmem:[%s5727_s25 + $0x5d4] sm:$0xf0]  ;;  %v4795_v1 = vld [vmem:[%s5727_s25 + $0x91c] sm:$0xf0] }
  0xcf   : > { %2965 = vmatpush.bf16.msrb.mxu0 %v5046_v4  ;;  %v5422_v4 = vld [vmem:[%s5727_s25 + $0x664] sm:$0xf]  ;;  %v4798_v9 = vor.u32 %v5506_v0, %v4795_v1  ;;  %v4241_v0 = vld [vmem:[%s5727_s25 + $0x4a8] sm:$0xf] }
  0xd0   : > { %2991 = vmatpush.bf16.msrb.mxu2 %v3930_v7  ;;  %v4714_v7 = vor.u32 %v5485_v58, %v4711_v62  ;;  %v4462_v23 = vor.u32 %v5422_v4, %v4459_v32  ;;  %v5569_v58 = vld [vmem:[%s5727_s25 + $0xafc] sm:$0xf]  ;;  %v4347_v62 = vld [vmem:[%s5727_s25 + $0x59c] sm:$0xf0]  ;;  %v5450_v32 = vld [vmem:[%s5727_s25 + $0x744] sm:$0xf] }
  0xd1   : > { %2978 = vmatpush.bf16.msrb.mxu1 %v3706_v11  ;;  %v5590_v11 = vld [vmem:[%s5727_s25 + $0xba4] sm:$0xf]  ;;  %v5050_v4 = vor.u32 %v5569_v58, %v5047_v59  ;;  %v3793_v59 = vld [vmem:[%s5727_s25 + $0x128] sm:$0xf] }
  0xd2   : > { %3004 = vmatpush.bf16.msrb.mxu3 %v4154_v21  ;;  %v5131_v21 = vld [vmem:[%s5727_s25 + $0xbbc] sm:$0xf0]  ;;  %v5370_v1 = vld [vmem:[%s5727_s25 + $0x4c0] sm:$0xf0] }
  0xd3   : > { %2966 = vmatpush.bf16.msrb.mxu0 %v5018_v14  ;;  %v6183_v14 = vld.sshfl [vmem:[#allocation1 + $0x30] sm:$0xff pattern:$0x73625140]  ;;  %v5134_v26 = vor.u32 %v5590_v11, %v5131_v21  ;;  %v5499_v11 = vld [vmem:[%s5727_s25 + $0x8cc] sm:$0xf] }
  0xd4   : > { %2992 = vmatpush.bf16.msrb.mxu2 %v3902_v19  ;;  %v4879_v19 = vld [vmem:[%s5727_s25 + $0x9c4] sm:$0xf0]  ;;  %v2750_v28 = vpop.f32.mrf.mxu3 }
  0xd5   : > { %2979 = vmatpush.bf16.msrb.mxu1 %v3678_v20  ;;  %v5103_v20 = vld [vmem:[%s5727_s25 + $0xb84] sm:$0xf0]  ;;  %v5384_v28 = vld [vmem:[%s5727_s25 + $0x530] sm:$0xf0] }
  0xd6   : > { %3005 = vmatpush.bf16.msrb.mxu3 %v4126_v33  ;;  %v4882_v33 = vor.u32 %v5527_v18, %v4879_v19  ;;  %v5106_v42 = vor.u32 %v5583_v31, %v5103_v20  ;;  %v4574_v19 = vor.u32 %v5450_v32, %v4571_v6  ;;  %v5555_v31 = vld [vmem:[%s5727_s25 + $0xa8c] sm:$0xf]  ;;  %v4991_v20 = vld [vmem:[%s5727_s25 + $0xaa4] sm:$0xf0] }
  0xd7   : > { %2967 = vmatpush.bf16.msrb.mxu0 %v4990_v39  ;;  %v4851_v39 = vld [vmem:[%s5727_s25 + $0x98c] sm:$0xf0]  ;;  %v6210_v50 = vpop.f32.mrf.mxu0  ;;  %v4465_v6 = vld [vmem:[%s5727_s25 + $0x668] sm:$0xf] }
  0xd8   : > { %2993 = vmatpush.bf16.msrb.mxu2 %v3874_v43  ;;  %v4406_v43 = vor.u32 %v5408_v34, %v4403_v35  ;;  %v4854_v47 = vor.u32 %v5520_v37, %v4851_v39  ;;  %v3850_v34 = vor.u32 %v5272_v17, %v3849_v16  ;;  %v4073_v35 = vld [vmem:[%s5727_s25 + $0x358] sm:$0xf]  ;;  %v5328_v37 = vld [vmem:[%s5727_s25 + $0x370] sm:$0xf0]  ;;  %v4298_v39 = vor.u32 %v5384_v28, %v4297_v27  ;;  %v3989_v16 = vld [vmem:[%s5727_s25 + $0x2b0] sm:$0xf] }
  0xd9   : > { %2980 = vmatpush.bf16.msrb.mxu1 %v3650_v52  ;;  %v6206_v36 = vpop.f32.mrf.mxu1  ;;  %v4823_v52 = vld [vmem:[%s5727_s25 + $0x954] sm:$0xf0]  ;;  %v5307_v17 = vld [vmem:[%s5727_s25 + $0x2c8] sm:$0xf0] }
  0xda   : > { %3006 = vmatpush.bf16.msrb.mxu3 %v4098_v53  ;;  %2968 = vmatmul.bf16.vlgmr.msrb.gmra.mxu0 %v6183_v14  ;;  %v4826_v60 = vor.u32 %v5513_v51, %v4823_v52  ;;  %v4045_v51 = vld [vmem:[%s5727_s25 + $0x320] sm:$0xf]  ;;  %v5321_v52 = vld [vmem:[%s5727_s25 + $0x338] sm:$0xf0]  ;;  %v3737_v28 = vld [vmem:[%s5727_s25 + $0xb8] sm:$0xf] }
  0xdb   : > { %3012 = vmatpush.bf16.msra.mxu0 %v4518_v44  ;;  %2994 = vmatmul.bf16.vlgmr.msrb.gmra.mxu2 %v6180_v13  ;;  %v4627_v44 = vld [vmem:[%s5727_s25 + $0x7cc] sm:$0xf0] }
  0xdc   : > { %3038 = vmatpush.bf16.msra.mxu2 %v4966_v48  ;;  %2981 = vmatmul.bf16.vlgmr.msrb.gmra.mxu1 %v6191_v22  ;;  %v5401_v48 = vld [vmem:[%s5727_s25 + $0x5bc] sm:$0xf]  ;;  %v4630_v53 = vor.u32 %v5464_v38, %v4627_v44  ;;  %v4994_v44 = vor.u32 %v5555_v31, %v4991_v20  ;;  %v4185_v31 = vld [vmem:[%s5727_s25 + $0x438] sm:$0xf]  ;;  %v5356_v20 = vld [vmem:[%s5727_s25 + $0x450] sm:$0xf0] }
  0xdd   : > { %3025 = vmatpush.bf16.msra.mxu1 %v4742_v56  ;;  %3007 = vmatmul.bf16.vlgmr.msrb.gmra.mxu3 %v6109_v40  ;;  %v4378_v56 = vor.u32 %v5401_v48, %v4375_v49  ;;  %v4269_v48 = vld [vmem:[%s5727_s25 + $0x4e0] sm:$0xf]  ;;  %v5377_v49 = vld [vmem:[%s5727_s25 + $0x4f8] sm:$0xf0] }
  0xde   : > { %3051 = vmatpush.bf16.msra.mxu3 %v5190_v57  ;;  %v4599_v57 = vld [vmem:[%s5727_s25 + $0x794] sm:$0xf0]  ;;  %v6220_v63 = vpop.f32.mrf.mxu2  ;;  %v4270_v58 = vor.u32 %v5377_v49, %v4269_v48  ;;  %v5349_v48 = vld [vmem:[%s5727_s25 + $0x418] sm:$0xf0]  ;;  %v3933_v49 = vld [vmem:[%s5727_s25 + $0x240] sm:$0xf] }
  0xdf   : > { %3013 = vmatpush.bf16.msra.mxu0 %v4490_v61  ;;  %v5394_v61 = vld [vmem:[%s5727_s25 + $0x584] sm:$0xf]  ;;  %v2763_v18 = vpop.f32.mrf.mxu0 }
  0xe0   : > { %3039 = vmatpush.bf16.msra.mxu2 %v4938_v3  ;;  %v4602_v3 = vor.u32 %v5457_v55, %v4599_v57  ;;  %v4350_v5 = vor.u32 %v5394_v61, %v4347_v62  ;;  %v6231_v12 = vpop.f32.mrf.mxu3  ;;  %v3822_v55 = vor.u32 %v5265_v46, %v3821_v45  ;;  %v5433_v57 = vld [vmem:[%s5727_s25 + $0x6b8] sm:$0xf0]  ;;  %v6256_v61 = vld.sshfl [vmem:[#allocation1 + $0x28] sm:$0xff pattern:$0x73625140]  ;;  %v4046_v62 = vor.u32 %v5321_v52, %v4045_v51 }
  0xe1   : > { %3026 = vmatpush.bf16.msra.mxu1 %v4714_v7  ;;  %v5562_v7 = vld [vmem:[%s5727_s25 + $0xac4] sm:$0xf]  ;;  %v2776_v21 = vpop.f32.mrf.mxu1  ;;  %v5237_v45 = vld [vmem:[%s5727_s25 + $0x98] sm:$0xf0] }
  0xe2   : > { %3052 = vmatpush.bf16.msra.mxu3 %v5162_v8  ;;  %v5019_v8 = vld [vmem:[%s5727_s25 + $0xadc] sm:$0xf0]  ;;  %v4213_v21 = vld [vmem:[%s5727_s25 + $0x470] sm:$0xf]  ;;  %v5293_v51 = vld [vmem:[%s5727_s25 + $0x258] sm:$0xf0] }
  0xe3   : > { %3014 = vmatpush.bf16.msra.mxu0 %v4462_v23  ;;  %v5387_v23 = vld [vmem:[%s5727_s25 + $0x54c] sm:$0xf] }
  0xe4   : > { %3040 = vmatpush.bf16.msra.mxu2 %v4910_v15  ;;  %v4767_v15 = vld [vmem:[%s5727_s25 + $0x8e4] sm:$0xf0] }
  0xe5   : > { %3027 = vmatpush.bf16.msra.mxu1 %v4686_v25  ;;  %v5022_v25 = vor.u32 %v5562_v7, %v5019_v8  ;;  %v5426_v7 = vld [vmem:[%s5727_s25 + $0x680] sm:$0xf0] }
  0xe6   : > { %3053 = vmatpush.bf16.msra.mxu3 %v5134_v26  ;;  %v5443_v26 = vld [vmem:[%s5727_s25 + $0x70c] sm:$0xf]  ;;  %v2789_v38 = vpop.f32.mrf.mxu2  ;;  %v6267_v8 = vld.sshfl [vmem:[#allocation1 + $0x20] sm:$0xff pattern:$0x73625140]  ;;  %v4466_v18 = vor.u32 %v5426_v7, %v4465_v6 }
  0xe7   : > { %3015 = vmatpush.bf16.msra.mxu0 %v4434_v29  ;;  %v4322_v29 = vor.u32 %v5387_v23, %v4319_v10  ;;  %v3765_v23 = vld [vmem:[%s5727_s25 + $0xf0] sm:$0xf]  ;;  %v5251_v10 = vld [vmem:[%s5727_s25 + $0x108] sm:$0xf0]  ;;  %v5412_v38 = vld [vmem:[%s5727_s25 + $0x610] sm:$0xf0] }
  0xe8   : > { %3041 = vmatpush.bf16.msra.mxu2 %v4882_v33  ;;  %v4770_v33 = vor.u32 %v5499_v11, %v4767_v15  ;;  %v5363_v15 = vld [vmem:[%s5727_s25 + $0x488] sm:$0xf0] }
  0xe9   : > { %3028 = vmatpush.bf16.msra.mxu1 %v4658_v41  ;;  %v4521_v41 = vld [vmem:[%s5727_s25 + $0x6d8] sm:$0xf]  ;;  %v4214_v27 = vor.u32 %v5363_v15, %v4213_v21  ;;  %v5223_v7 = vld [vmem:[%s5727_s25 + $0x28] sm:$0xf0] }
  0xea   : > { %3054 = vmatpush.bf16.msra.mxu3 %v5106_v42  ;;  %v5440_v42 = vld [vmem:[%s5727_s25 + $0x6f0] sm:$0xf0]  ;;  %v4745_v15 = vld [vmem:[%s5727_s25 + $0x898] sm:$0xf] }
  0xeb   : > { %3016 = vmatpush.bf16.msra.mxu0 %v4406_v43  ;;  %v4546_v43 = vor.u32 %v5443_v26, %v4543_v30  ;;  %v5419_v26 = vld [vmem:[%s5727_s25 + $0x648] sm:$0xf0]  ;;  %v3990_v30 = vor.u32 %v5307_v17, %v3989_v16  ;;  %v5496_v16 = vld [vmem:[%s5727_s25 + $0x8b0] sm:$0xf0]  ;;  %v3877_v17 = vld [vmem:[%s5727_s25 + $0x1d0] sm:$0xf] }
  0xec   : > { %3042 = vmatpush.bf16.msra.mxu2 %v4854_v47  ;;  %v4074_v47 = vor.u32 %v5328_v37, %v4073_v35 }
  0xed   : > { %3029 = vmatpush.bf16.msra.mxu1 %v4630_v53  ;;  %v4522_v53 = vor.u32 %v5440_v42, %v4521_v41  ;;  %v4409_v42 = vld [vmem:[%s5727_s25 + $0x5f8] sm:$0xf] }
  0xee   : > { %3055 = vmatpush.bf16.msra.mxu3 %v5078_v54  ;;  %v2802_v54 = vpop.f32.mrf.mxu3  ;;  %v4410_v52 = vor.u32 %v5412_v38, %v4409_v42  ;;  %v5269_v38 = vld [vmem:[%s5727_s25 + $0x19c] sm:$0xf] }
  0xef   : > { %3017 = vmatpush.bf16.msra.mxu0 %v4378_v56  ;;  %v4493_v56 = vld [vmem:[%s5727_s25 + $0x6a0] sm:$0xf] }
  0xf0   : > { %3043 = vmatpush.bf16.msra.mxu2 %v4826_v60  ;;  %v5258_v60 = vld [vmem:[%s5727_s25 + $0x140] sm:$0xf0]  ;;  %v4494_v32 = vor.u32 %v5433_v57, %v4493_v56  ;;  %v4381_v54 = vld [vmem:[%s5727_s25 + $0x5c0] sm:$0xf]  ;;  %v3681_v57 = vld [vmem:[%s5727_s25 + $0x48] sm:$0xf] }
  0xf1   : > { %3030 = vmatpush.bf16.msra.mxu1 %v4602_v3  ;;  %v4017_v3 = vld [vmem:[%s5727_s25 + $0x2e8] sm:$0xf] }
  0xf2   : > { %3056 = vmatpush.bf16.msra.mxu3 %v5050_v4  ;;  %v5314_v4 = vld [vmem:[%s5727_s25 + $0x300] sm:$0xf0] }
  0xf3   : > { %3018 = vmatpush.bf16.msra.mxu0 %v4350_v5  ;;  %v3794_v5 = vor.u32 %v5258_v60, %v3793_v59  ;;  %v4018_v11 = vor.u32 %v5314_v4, %v4017_v3  ;;  %v3934_v59 = vor.u32 %v5293_v51, %v3933_v49  ;;  %v4129_v60 = vld [vmem:[%s5727_s25 + $0x3c8] sm:$0xf]  ;;  %v3653_v3 = vld [vmem:[%s5727_s25 + $0x10] sm:$0xf] }
  0xf4   : > { %3044 = vmatpush.bf16.msra.mxu2 %v4798_v9  ;;  %v4242_v9 = vor.u32 %v5370_v1, %v4241_v0  ;;  %v3905_v0 = vld [vmem:[%s5727_s25 + $0x208] sm:$0xf]  ;;  %v5286_v1 = vld [vmem:[%s5727_s25 + $0x220] sm:$0xf0] }
  0xf5   : > { %3031 = vmatpush.bf16.msra.mxu1 %v4574_v19  ;;  %v3766_v19 = vor.u32 %v5251_v10, %v3765_v23  ;;  %v4353_v10 = vld [vmem:[%s5727_s25 + $0x588] sm:$0xf] }
  0xf6   : > { %3057 = vmatpush.bf16.msra.mxu3 %v5022_v25  ;;  %v4437_v25 = vld [vmem:[%s5727_s25 + $0x630] sm:$0xf] }
  0xf7   : > { %3019 = vmatpush.bf16.msra.mxu0 %v4322_v29  ;;  %v5244_v29 = vld [vmem:[%s5727_s25 + $0xd0] sm:$0xf0]  ;;  %v2813_v35 = vpop.f32.mrf.mxu0  ;;  %v4438_v37 = vor.u32 %v5419_v26, %v4437_v25  ;;  %v4101_v25 = vld [vmem:[%s5727_s25 + $0x390] sm:$0xf]  ;;  %v5335_v26 = vld [vmem:[%s5727_s25 + $0x3a8] sm:$0xf0] }
  0xf8   : > { %3045 = vmatpush.bf16.msra.mxu2 %v4770_v33  ;;  %v3961_v33 = vld [vmem:[%s5727_s25 + $0x278] sm:$0xf]  ;;  %v4102_v42 = vor.u32 %v5335_v26, %v4101_v25  ;;  %v5531_v25 = vld [vmem:[%s5727_s25 + $0x9c8] sm:$0xf0] }
  0xf9   : > { %3032 = vmatpush.bf16.msra.mxu1 %v4546_v43  ;;  %v6284_v41 = vpop.f32.mrf.mxu1  ;;  %v4186_v43 = vor.u32 %v5356_v20, %v4185_v31  ;;  %v2814_v31 = vadd.f32 %v2813_v35, %v6231_v12  ;;  %v3654_v20 = vor.u32 %v5223_v7, %v3653_v3  ;;  %v5165_v35 = vld [vmem:[%s5727_s25 + $0xbe0] sm:$0xf]  ;;  %v5594_v3 = vld [vmem:[%s5727_s25 + $0xbc0] sm:$0xf0] }
  0xfa   : > { %3058 = vmatpush.bf16.msra.mxu3 %v4994_v44  ;;  %3020 = vmatmul.bf16.vlgmr.msra.gmra.mxu0 %v6115_v24  ;;  %v3709_v44 = vld [vmem:[%s5727_s25 + $0x80] sm:$0xf] }
  0xfb   : > { %3064 = vmatpush.bf16.msrb.mxu0 %v3850_v34  ;;  %3046 = vmatmul.bf16.vlgmr.msra.gmra.mxu2 %v6256_v61  ;;  %v5300_v34 = vld [vmem:[%s5727_s25 + $0x290] sm:$0xf0] }
  0xfc   : > { %3090 = vmatpush.bf16.msrb.mxu2 %v4298_v39  ;;  %3033 = vmatmul.bf16.vlgmr.msra.gmra.mxu1 %v6267_v8  ;;  %v3738_v39 = vor.u32 %v5244_v29, %v3737_v28  ;;  %v3962_v46 = vor.u32 %v5300_v34, %v3961_v33  ;;  %v5193_v28 = vld [vmem:[%s5727_s25 + $0xc18] sm:$0xf]  ;;  %v5608_v29 = vld [vmem:[%s5727_s25 + $0xc30] sm:$0xf0]  ;;  %v4325_v34 = vld [vmem:[%s5727_s25 + $0x550] sm:$0xf] }
  0xfd   : > { %3077 = vmatpush.bf16.msrb.mxu1 %v4074_v47  ;;  %3059 = vmatmul.bf16.vlgmr.msra.gmra.mxu3 %v6183_v14  ;;  %v4157_v47 = vld [vmem:[%s5727_s25 + $0x400] sm:$0xf]  ;;  %v5552_v33 = vld [vmem:[%s5727_s25 + $0xa70] sm:$0xf0] }
  0xfe   : > { %3103 = vmatpush.bf16.msrb.mxu3 %v4522_v53  ;;  %v3710_v53 = vor.u32 %v5237_v45, %v3709_v44  ;;  %v4158_v56 = vor.u32 %v5349_v48, %v4157_v47  ;;  %v2839_v23 = vpop.f32.mrf.mxu2  ;;  %v5194_v45 = vor.u32 %v5608_v29, %v5193_v28  ;;  %v5489_v47 = vld [vmem:[%s5727_s25 + $0x878] sm:$0xf0]  ;;  %v5248_v28 = vld [vmem:[%s5727_s25 + $0xf4] sm:$0xf]  ;;  %v3767_v29 = vld [vmem:[%s5727_s25 + $0x10c] sm:$0xf0] }
  0xff   : > { %3065 = vmatpush.bf16.msrb.mxu0 %v3822_v55  ;;  %v5405_v55 = vld [vmem:[%s5727_s25 + $0x5d8] sm:$0xf0]  ;;  %v2815_v4 = vpop.f32.mrf.mxu0 }
 0x100   : > { %3091 = vmatpush.bf16.msrb.mxu2 %v4270_v58  ;;  %v5230_v58 = vld [vmem:[%s5727_s25 + $0x60] sm:$0xf0]  ;;  %v5601_v48 = vld [vmem:[%s5727_s25 + $0xbf8] sm:$0xf0] }
 0x101   : > { %3078 = vmatpush.bf16.msrb.mxu1 %v4046_v62  ;;  %v5342_v62 = vld [vmem:[%s5727_s25 + $0x3e0] sm:$0xf0]  ;;  %v3682_v6 = vor.u32 %v5230_v58, %v3681_v57 }
 0x102   : > { %3104 = vmatpush.bf16.msrb.mxu3 %v4494_v32  ;;  %v4382_v32 = vor.u32 %v5405_v55, %v4381_v54  ;;  %v4130_v21 = vor.u32 %v5342_v62, %v4129_v60  ;;  %v5545_v54 = vld [vmem:[%s5727_s25 + $0xa38] sm:$0xf0]  ;;  %v5262_v58 = vld [vmem:[%s5727_s25 + $0x164] sm:$0xf]  ;;  %v5166_v60 = vor.u32 %v5601_v48, %v5165_v35  ;;  %v4689_v62 = vld [vmem:[%s5727_s25 + $0x828] sm:$0xf] }
 0x103   : > { %3066 = vmatpush.bf16.msrb.mxu0 %v3794_v5  ;;  %v6303_v5 = vpop.f32.mrf.mxu3  ;;  %v5053_v48 = vld [vmem:[%s5727_s25 + $0xb00] sm:$0xf] }
 0x104   : > { %3092 = vmatpush.bf16.msrb.mxu2 %v4242_v9  ;;  %v2828_v9 = vpop.f32.mrf.mxu1 }
 0x105   : > { %3079 = vmatpush.bf16.msrb.mxu1 %v4018_v11  ;;  %v5398_v11 = vld [vmem:[%s5727_s25 + $0x5a0] sm:$0xf0] }
 0x106   : > { %3105 = vmatpush.bf16.msrb.mxu3 %v4466_v18  ;;  %v3906_v18 = vor.u32 %v5286_v1, %v3905_v0  ;;  %v5137_v1 = vld [vmem:[%s5727_s25 + $0xba8] sm:$0xf] }
 0x107   : > { %3067 = vmatpush.bf16.msrb.mxu0 %v3766_v19  ;;  %v5279_v19 = vld [vmem:[%s5727_s25 + $0x1e8] sm:$0xf0] }
 0x108   : > { %3093 = vmatpush.bf16.msrb.mxu2 %v4214_v27  ;;  %v4969_v27 = vld [vmem:[%s5727_s25 + $0xa58] sm:$0xf]  ;;  %v3878_v44 = vor.u32 %v5279_v19, %v3877_v17  ;;  %v5587_v17 = vld [vmem:[%s5727_s25 + $0xb88] sm:$0xf0]  ;;  %v4885_v19 = vld [vmem:[%s5727_s25 + $0x9b0] sm:$0xf] }
 0x109   : > { %3080 = vmatpush.bf16.msrb.mxu1 %v3990_v30  ;;  %v4354_v30 = vor.u32 %v5398_v11, %v4353_v10  ;;  %v4970_v12 = vor.u32 %v5552_v33, %v4969_v27  ;;  %v5255_v10 = vld [vmem:[%s5727_s25 + $0x12c] sm:$0xf]  ;;  %v3795_v11 = vld [vmem:[%s5727_s25 + $0x144] sm:$0xf0] }
 0x10a   : > { %3106 = vmatpush.bf16.msrb.mxu3 %v4438_v37  ;;  %v5391_v37 = vld [vmem:[%s5727_s25 + $0x568] sm:$0xf0]  ;;  %v3798_v26 = vor.u32 %v5255_v10, %v3795_v11 }
 0x10b   : > { %3068 = vmatpush.bf16.msrb.mxu0 %v3738_v39  ;;  %v4746_v39 = vor.u32 %v5496_v16, %v4745_v15  ;;  %v4326_v49 = vor.u32 %v5391_v37, %v4325_v34  ;;  %v2854_v51 = vpop.f32.mrf.mxu3  ;;  %v4661_v15 = vld [vmem:[%s5727_s25 + $0x7f0] sm:$0xf]  ;;  %v4857_v37 = vld [vmem:[%s5727_s25 + $0x978] sm:$0xf] }
 0x10c   : > { %3094 = vmatpush.bf16.msrb.mxu2 %v4186_v43  ;;  %v3851_v43 = vld [vmem:[%s5727_s25 + $0x1b4] sm:$0xf0] }
 0x10d   : > { %3081 = vmatpush.bf16.msrb.mxu1 %v3962_v46  ;;  %v4717_v46 = vld [vmem:[%s5727_s25 + $0x860] sm:$0xf]  ;;  %v3854_v55 = vor.u32 %v5269_v38, %v3851_v43 }
 0x10e   : > { %3107 = vmatpush.bf16.msrb.mxu3 %v4410_v52  ;;  %v2827_v52 = vadd.f32 %v6284_v41, %v2814_v31  ;;  %v4718_v57 = vor.u32 %v5489_v47, %v4717_v46  ;;  %v5482_v41 = vld [vmem:[%s5727_s25 + $0x840] sm:$0xf0]  ;;  %v5468_v31 = vld [vmem:[%s5727_s25 + $0x7d0] sm:$0xf0] }
 0x10f   : > { %3069 = vmatpush.bf16.msrb.mxu0 %v3710_v53  ;;  %v4941_v53 = vld [vmem:[%s5727_s25 + $0xa20] sm:$0xf]  ;;  %v4690_v9 = vor.u32 %v5482_v41, %v4689_v62  ;;  %v5454_v41 = vld [vmem:[%s5727_s25 + $0x760] sm:$0xf0] }
 0x110   : > { %3095 = vmatpush.bf16.msrb.mxu2 %v4158_v56  ;;  %v2841_v56 = vpop.f32.mrf.mxu2  ;;  %v4942_v0 = vor.u32 %v5545_v54, %v4941_v53  ;;  %v2840_v4 = vadd.f32 %v2839_v23, %v2827_v52  ;;  %v5475_v23 = vld [vmem:[%s5727_s25 + $0x808] sm:$0xf0]  ;;  %v4829_v54 = vld [vmem:[%s5727_s25 + $0x940] sm:$0xf] }
 0x111   : > { %3082 = vmatpush.bf16.msrb.mxu1 %v3934_v59  ;;  %v3823_v59 = vld [vmem:[%s5727_s25 + $0x17c] sm:$0xf0]  ;;  %v4662_v27 = vor.u32 %v5475_v23, %v4661_v15  ;;  %v211_v52 = vld [vmem:[#allocation2] sm:$0xff] }
 0x112   : > { %3108 = vmatpush.bf16.msrb.mxu3 %v4382_v32  ;;  %v4913_v32 = vld [vmem:[%s5727_s25 + $0x9e8] sm:$0xf]  ;;  %v3826_v7 = vor.u32 %v5262_v58, %v3823_v59  ;;  %v5234_v58 = vld [vmem:[%s5727_s25 + $0x84] sm:$0xf]  ;;  %v3711_v59 = vld [vmem:[%s5727_s25 + $0x9c] sm:$0xf0] }
 0x113   : > { %3070 = vmatpush.bf16.msrb.mxu0 %v3682_v6  ;;  %v5538_v6 = vld [vmem:[%s5727_s25 + $0xa00] sm:$0xf0]  ;;  %v3714_v10 = vor.u32 %v5234_v58, %v3711_v59  ;;  %v3683_v15 = vld [vmem:[%s5727_s25 + $0x64] sm:$0xf0]  ;;  %v4719_v59 = vld [vmem:[%s5727_s25 + $0x87c] sm:$0xf0] }
 0x114   : > { %3096 = vmatpush.bf16.msrb.mxu2 %v4130_v21  ;;  %v5138_v21 = vor.u32 %v5594_v3, %v5137_v1  ;;  %v4914_v16 = vor.u32 %v5538_v6, %v4913_v32  ;;  %v5025_v3 = vld [vmem:[%s5727_s25 + $0xac8] sm:$0xf] }
 0x115   : > { %3083 = vmatpush.bf16.msrb.mxu1 %v3906_v18  ;;  %v2853_v18 = vadd.f32 %v6303_v5, %v2840_v4  ;;  %v5081_v5 = vld [vmem:[%s5727_s25 + $0xb38] sm:$0xf]  ;;  %v5566_v4 = vld [vmem:[%s5727_s25 + $0xae0] sm:$0xf0]  ;;  %v4801_v6 = vld [vmem:[%s5727_s25 + $0x908] sm:$0xf] }
 0x116   : > { %3109 = vmatpush.bf16.msrb.mxu3 %v4354_v30 }
 0x117   : > { %3071 = vmatpush.bf16.msrb.mxu0 %v3654_v20  ;;  %v5580_v20 = vld [vmem:[%s5727_s25 + $0xb50] sm:$0xf0] }
 0x118   : > { %3097 = vmatpush.bf16.msrb.mxu2 %v4102_v42  ;;  %v3770_v42 = vor.u32 %v5248_v28, %v3767_v29  ;;  %v5082_v47 = vor.u32 %v5580_v20, %v5081_v5  ;;  %v5503_v28 = vld [vmem:[%s5727_s25 + $0x8e8] sm:$0xf0]  ;;  %v4299_v5 = vld [vmem:[%s5727_s25 + $0x534] sm:$0xf0] }
 0x119   : > { %3084 = vmatpush.bf16.msrb.mxu1 %v3878_v44  ;;  %v2878_v38 = vpop.f32.mrf.mxu1  ;;  %v5241_v44 = vld [vmem:[%s5727_s25 + $0xbc] sm:$0xf] }
 0x11a   : > { %3110 = vmatpush.bf16.msrb.mxu3 %v4326_v49  ;;  %3072 = vmatmul.bf16.vlgmr.msrb.gmra.mxu0 %v6191_v22  ;;  %v5573_v49 = vld [vmem:[%s5727_s25 + $0xb18] sm:$0xf0] }
 0x11b   : > { %3116 = vmatpush.bf16.msra.mxu0 %v4746_v39  ;;  %3098 = vmatmul.bf16.vlgmr.msrb.gmra.mxu2 %v6109_v40  ;;  %v5109_v40 = vld [vmem:[%s5727_s25 + $0xb70] sm:$0xf]  ;;  %v5524_v39 = vld [vmem:[%s5727_s25 + $0x990] sm:$0xf0]  ;;  %v5054_v62 = vor.u32 %v5573_v49, %v5053_v48  ;;  %v4271_v48 = vld [vmem:[%s5727_s25 + $0x4fc] sm:$0xf0] }
 0x11c   : > { %3142 = vmatpush.bf16.msra.mxu2 %v5194_v45  ;;  %3085 = vmatmul.bf16.vlgmr.msrb.gmra.mxu1 %v6180_v13  ;;  %v2762_v13 = vadd.f32 %v6210_v50, %v6170_v2  ;;  %v5110_v30 = vor.u32 %v5587_v17, %v5109_v40  ;;  %v2865_v2 = vpop.f32.mrf.mxu0  ;;  %v4886_v50 = vor.u32 %v5531_v25, %v4885_v19  ;;  %v3739_v45 = vld [vmem:[%s5727_s25 + $0xd4] sm:$0xf0]  ;;  %v5447_v40 = vld [vmem:[%s5727_s25 + $0x728] sm:$0xf0]  ;;  %v5325_v17 = vld [vmem:[%s5727_s25 + $0x35c] sm:$0xf] }
 0x11d   : > { %3129 = vmatpush.bf16.msra.mxu1 %v4970_v12  ;;  %3111 = vmatmul.bf16.vlgmr.msrb.gmra.mxu3 %v6115_v24  ;;  %v4633_v24 = vld [vmem:[%s5727_s25 + $0x7b8] sm:$0xf]  ;;  %v2866_v34 = vadd.f32 %v2865_v2, %v2853_v18  ;;  %v4605_v12 = vld [vmem:[%s5727_s25 + $0x780] sm:$0xf]  ;;  %v4858_v35 = vor.u32 %v5524_v39, %v4857_v37  ;;  %v3742_v56 = vor.u32 %v5241_v44, %v3739_v45  ;;  %v4773_v25 = vld [vmem:[%s5727_s25 + $0x8d0] sm:$0xf] }
 0x11e   : > { %3155 = vmatpush.bf16.msra.mxu3 %v3854_v55  ;;  %v2775_v33 = vadd.f32 %v6206_v36, %v2762_v13  ;;  %v4634_v43 = vor.u32 %v5468_v31, %v4633_v24  ;;  %v5461_v36 = vld [vmem:[%s5727_s25 + $0x798] sm:$0xf0]  ;;  %v4075_v13 = vld [vmem:[%s5727_s25 + $0x374] sm:$0xf0]  ;;  %v2891_v18 = vpop.f32.mrf.mxu2  ;;  %v5220_v37 = vld [vmem:[%s5727_s25 + $0x14] sm:$0xf] }
 0x11f   : > { %3117 = vmatpush.bf16.msra.mxu0 %v4718_v57  ;;  %v2879_v46 = vadd.f32 %v2878_v38, %v2866_v34  ;;  %v5517_v55 = vld [vmem:[%s5727_s25 + $0x958] sm:$0xf0]  ;;  %v4606_v57 = vor.u32 %v5461_v36, %v4605_v12  ;;  %v4523_v24 = vld [vmem:[%s5727_s25 + $0x6f4] sm:$0xf0]  ;;  %v3655_v39 = vld [vmem:[%s5727_s25 + $0x2c] sm:$0xf0] }
 0x120   : > { %3143 = vmatpush.bf16.msra.mxu2 %v5166_v60  ;;  %v2788_v51 = vadd.f32 %v6220_v63, %v2775_v33  ;;  %v4577_v63 = vld [vmem:[%s5727_s25 + $0x748] sm:$0xf]  ;;  %v4830_v1 = vor.u32 %v5517_v55, %v4829_v54  ;;  %v2904_v31 = vpop.f32.mrf.mxu3  ;;  %v4078_v33 = vor.u32 %v5325_v17, %v4075_v13  ;;  %v5318_v38 = vld [vmem:[%s5727_s25 + $0x324] sm:$0xf]  ;;  %v5493_v45 = vld [vmem:[%s5727_s25 + $0x89c] sm:$0xf]  ;;  %v3658_v49 = vor.u32 %v5220_v37, %v3655_v39 }
 0x121   : > { %3130 = vmatpush.bf16.msra.mxu1 %v4942_v0  ;;  %v3343_v53 = vrot.slane %v2879_v46, 4  ;;  %v4578_v11 = vor.u32 %v5454_v41, %v4577_v63  ;;  %v2880_v23 = vpop.f32.mrf.mxu1  ;;  %v6394_v20 = vadd.f32 %v2904_v31, %v2891_v18  ;;  %v5430_v12 = vld [vmem:[%s5727_s25 + $0x6a4] sm:$0xf]  ;;  %v4495_v36 = vld [vmem:[%s5727_s25 + $0x6bc] sm:$0xf0] }
 0x122   : > { %3156 = vmatpush.bf16.msra.mxu3 %v3826_v7  ;;  %v5510_v7 = vld [vmem:[%s5727_s25 + $0x920] sm:$0xf0]  ;;  %v4019_v54 = vld [vmem:[%s5727_s25 + $0x304] sm:$0xf0]  ;;  %v5367_v41 = vld [vmem:[%s5727_s25 + $0x4ac] sm:$0xf] }
 0x123   : > { %3118 = vmatpush.bf16.msra.mxu0 %v4690_v9  ;;  %v3347_v60 = vsel %vm3346_vm1, %v2788_v51, %v3343_v53  ;;  %v4549_v9 = vld [vmem:[%s5727_s25 + $0x710] sm:$0xf]  ;;  %v4802_v19 = vor.u32 %v5510_v7, %v4801_v6  ;;  %v5311_v53 = vld [vmem:[%s5727_s25 + $0x2ec] sm:$0xf]  ;;  %v5297_v23 = vld [vmem:[%s5727_s25 + $0x27c] sm:$0xf] }
 0x124   : > { %3144 = vmatpush.bf16.msra.mxu2 %v5138_v21  ;;  %v3353_v0 = vadd.f32 %v3347_v60, %v211_v52  ;;  %v2867_v32 = vpop.f32.mrf.mxu0  ;;  %v5227_v21 = vld [vmem:[%s5727_s25 + $0x4c] sm:$0xf]  ;;  %v4550_v2 = vor.u32 %v5447_v40, %v4549_v9  ;;  %v4691_v9 = vld [vmem:[%s5727_s25 + $0x844] sm:$0xf0]  ;;  %v5472_v13 = vld [vmem:[%s5727_s25 + $0x7f4] sm:$0xf] }
 0x125   : > { %3131 = vmatpush.bf16.msra.mxu1 %v4914_v16  ;;  %v5026_v16 = vor.u32 %v5566_v4, %v5025_v3  ;;  %v3686_v29 = vor.u32 %v5227_v21, %v3683_v15  ;;  %v5423_v60 = vld [vmem:[%s5727_s25 + $0x66c] sm:$0xf]  ;;  %v5304_v3 = vld [vmem:[%s5727_s25 + $0x2b4] sm:$0xf]  ;;  %v3991_v4 = vld [vmem:[%s5727_s25 + $0x2cc] sm:$0xf0] }
 0x126   : > { %3157 = vmatpush.bf16.msra.mxu3 %v3798_v26  ;;  %3357 = vst [vmem:[#allocation2] sm:$0xff] %v3353_v0  ;;  %v4997_v26 = vld [vmem:[%s5727_s25 + $0xa90] sm:$0xf]  ;;  %v2893_v52 = vpop.f32.mrf.mxu2  ;;  %v4243_v0 = vld [vmem:[%s5727_s25 + $0x4c4] sm:$0xf0]  ;;  %v3994_v15 = vor.u32 %v5304_v3, %v3991_v4 }
 0x127   : > { %3119 = vmatpush.bf16.msra.mxu0 %v4662_v27  ;;  %v5559_v27 = vld [vmem:[%s5727_s25 + $0xaa8] sm:$0xf0]  ;;  %v4246_v7 = vor.u32 %v5367_v41, %v4243_v0  ;;  %v4215_v21 = vld [vmem:[%s5727_s25 + $0x48c] sm:$0xf0]  ;;  %v4383_v37 = vld [vmem:[%s5727_s25 + $0x5dc] sm:$0xf0] }
 0x128   : > { %3145 = vmatpush.bf16.msra.mxu2 %v5110_v30  ;;  %v5437_v30 = vld [vmem:[%s5727_s25 + $0x6dc] sm:$0xf]  ;;  %v4998_v34 = vor.u32 %v5559_v27, %v4997_v26  ;;  %v2906_v63 = vpop.f32.mrf.mxu3  ;;  %v5479_v6 = vld [vmem:[%s5727_s25 + $0x82c] sm:$0xf]  ;;  %v4187_v27 = vld [vmem:[%s5727_s25 + $0x454] sm:$0xf0] }
 0x129   : > { %3132 = vmatpush.bf16.msra.mxu1 %v4886_v50  ;;  %v5381_v50 = vld [vmem:[%s5727_s25 + $0x51c] sm:$0xf]  ;;  %v4526_v44 = vor.u32 %v5437_v30, %v4523_v24  ;;  %v4694_v40 = vor.u32 %v5479_v6, %v4691_v9  ;;  %v3935_v30 = vld [vmem:[%s5727_s25 + $0x25c] sm:$0xf0]  ;;  %v5339_v52 = vld [vmem:[%s5727_s25 + $0x3cc] sm:$0xf] }
 0x12a   : > { %3158 = vmatpush.bf16.msra.mxu3 %v3770_v42  ;;  %v4774_v42 = vor.u32 %v5503_v28, %v4773_v25  ;;  %v4302_v46 = vor.u32 %v5381_v50, %v4299_v5  ;;  %v4411_v25 = vld [vmem:[%s5727_s25 + $0x614] sm:$0xf0]  ;;  %v5353_v26 = vld [vmem:[%s5727_s25 + $0x43c] sm:$0xf]  ;;  %v5451_v3 = vld [vmem:[%s5727_s25 + $0x74c] sm:$0xf] }
 0x12b   : > { %3120 = vmatpush.bf16.msra.mxu0 %v4634_v43  ;;  %v4047_v43 = vld [vmem:[%s5727_s25 + $0x33c] sm:$0xf0]  ;;  %v4190_v5 = vor.u32 %v5353_v26, %v4187_v27  ;;  %v4579_v4 = vld [vmem:[%s5727_s25 + $0x764] sm:$0xf0]  ;;  %v5388_v6 = vld [vmem:[%s5727_s25 + $0x554] sm:$0xf] }
 0x12c   : > { %3146 = vmatpush.bf16.msra.mxu2 %v5082_v47  ;;  %v4747_v47 = vld [vmem:[%s5727_s25 + $0x8b4] sm:$0xf0]  ;;  %v4050_v51 = vor.u32 %v5318_v38, %v4047_v43  ;;  %v4159_v38 = vld [vmem:[%s5727_s25 + $0x41c] sm:$0xf0] }
 0x12d   : > { %3133 = vmatpush.bf16.msra.mxu1 %v4858_v35  ;;  %v5374_v35 = vld [vmem:[%s5727_s25 + $0x4e4] sm:$0xf]  ;;  %v4750_v55 = vor.u32 %v5493_v45, %v4747_v47  ;;  %v3907_v45 = vld [vmem:[%s5727_s25 + $0x224] sm:$0xf0]  ;;  %v4081_v27 = vld [vmem:[%s5727_s25 + $0x360] sm:$0xf] }
 0x12e   : > { %3159 = vmatpush.bf16.msra.mxu3 %v3742_v56  ;;  %v4498_v56 = vor.u32 %v5430_v12, %v4495_v36  ;;  %v4274_v58 = vor.u32 %v5374_v35, %v4271_v48  ;;  %v5458_v12 = vld [vmem:[%s5727_s25 + $0x784] sm:$0xf]  ;;  %v4607_v35 = vld [vmem:[%s5727_s25 + $0x79c] sm:$0xf0]  ;;  %v5395_v48 = vld [vmem:[%s5727_s25 + $0x58c] sm:$0xf] }
 0x12f   : > { %3121 = vmatpush.bf16.msra.mxu0 %v4606_v57  ;;  %v5486_v57 = vld [vmem:[%s5727_s25 + $0x864] sm:$0xf] }
 0x130   : > { %3147 = vmatpush.bf16.msra.mxu2 %v5054_v62  ;;  %v4467_v62 = vld [vmem:[%s5727_s25 + $0x684] sm:$0xf0]  ;;  %v4722_v32 = vor.u32 %v5486_v57, %v4719_v59  ;;  %v4971_v59 = vld [vmem:[%s5727_s25 + $0xa74] sm:$0xf0] }
 0x131   : > { %3134 = vmatpush.bf16.msra.mxu1 %v4830_v1  ;;  %v4022_v1 = vor.u32 %v5311_v53, %v4019_v54  ;;  %v4131_v53 = vld [vmem:[%s5727_s25 + $0x3e4] sm:$0xf0] }
 0x132   : > { %3160 = vmatpush.bf16.msra.mxu3 %v3714_v10  ;;  %v5416_v10 = vld [vmem:[%s5727_s25 + $0x634] sm:$0xf]  ;;  %v4134_v0 = vor.u32 %v5339_v52, %v4131_v53 }
 0x133   : > { %3122 = vmatpush.bf16.msra.mxu0 %v4578_v11  ;;  %v4439_v11 = vld [vmem:[%s5727_s25 + $0x64c] sm:$0xf0] }
 0x134   : > { %3148 = vmatpush.bf16.msra.mxu2 %v5026_v16  ;;  %v3963_v16 = vld [vmem:[%s5727_s25 + $0x294] sm:$0xf0]  ;;  %v4442_v17 = vor.u32 %v5416_v10, %v4439_v11  ;;  %v3857_v11 = vld [vmem:[%s5727_s25 + $0x1a0] sm:$0xf] }
 0x135   : > { %3135 = vmatpush.bf16.msra.mxu1 %v4802_v19  ;;  %v5409_v19 = vld [vmem:[%s5727_s25 + $0x5fc] sm:$0xf]  ;;  %v3966_v28 = vor.u32 %v5297_v23, %v3963_v16  ;;  %v5195_v10 = vld [vmem:[%s5727_s25 + $0xc34] sm:$0xf0]  ;;  %v4582_v23 = vor.u32 %v5451_v3, %v4579_v4 }
 0x136   : > { %3161 = vmatpush.bf16.msra.mxu3 %v3686_v29  ;;  %v5290_v29 = vld [vmem:[%s5727_s25 + $0x244] sm:$0xf]  ;;  %v4414_v31 = vor.u32 %v5409_v19, %v4411_v25  ;;  %v6495_v52 = vld.sshfl [vmem:[#allocation1 + $0x10] sm:$0xff pattern:$0x73625140] }
 0x137   : > { %3123 = vmatpush.bf16.msra.mxu0 %v4550_v2  ;;  %v5465_v2 = vld [vmem:[%s5727_s25 + $0x7bc] sm:$0xf]  ;;  %v6437_v50 = vpop.f32.mrf.mxu0  ;;  %v3938_v43 = vor.u32 %v5290_v29, %v3935_v30  ;;  %v5598_v25 = vld [vmem:[%s5727_s25 + $0xbe4] sm:$0xf]  ;;  %v5167_v29 = vld [vmem:[%s5727_s25 + $0xbfc] sm:$0xf0] }
 0x138   : > { %3149 = vmatpush.bf16.msra.mxu2 %v4998_v34  ;;  %v5402_v34 = vld [vmem:[%s5727_s25 + $0x5c4] sm:$0xf]  ;;  %v3829_v30 = vld [vmem:[%s5727_s25 + $0x168] sm:$0xf]  ;;  %v4859_v3 = vld [vmem:[%s5727_s25 + $0x994] sm:$0xf0] }
 0x139   : > { %3136 = vmatpush.bf16.msra.mxu1 %v4774_v42  ;;  %v6442_v39 = vpop.f32.mrf.mxu1  ;;  %v5346_v42 = vld [vmem:[%s5727_s25 + $0x404] sm:$0xf]  ;;  %v4386_v47 = vor.u32 %v5402_v34, %v4383_v37  ;;  %v4915_v34 = vld [vmem:[%s5727_s25 + $0xa04] sm:$0xf0] }
 0x13a   : > { %3124 = vmatmul.bf16.vlgmr.msra.gmra.mxu0 %v6267_v8  ;;  %3162 = vmatpush.bf16.msra.mxu3 %v3658_v49  ;;  %v4162_v36 = vor.u32 %v5346_v42, %v4159_v38  ;;  %v4355_v49 = vld [vmem:[%s5727_s25 + $0x5a4] sm:$0xf0]  ;;  %v5170_v42 = vor.u32 %v5598_v25, %v5167_v29  ;;  %v5591_v38 = vld [vmem:[%s5727_s25 + $0xbac] sm:$0xf]  ;;  %v5055_v25 = vld [vmem:[%s5727_s25 + $0xb1c] sm:$0xf0] }
 0x13b   : > { %3168 = vmatpush.bf16.msrb.mxu0 %v4078_v33  ;;  %3150 = vmatmul.bf16.vlgmr.msra.gmra.mxu2 %v6183_v14  ;;  %v4470_v14 = vor.u32 %v5423_v60, %v4467_v62  ;;  %v4635_v33 = vld [vmem:[%s5727_s25 + $0x7d4] sm:$0xf0]  ;;  %v5332_v60 = vld [vmem:[%s5727_s25 + $0x394] sm:$0xf]  ;;  %v4610_v62 = vor.u32 %v5458_v12, %v4607_v35  ;;  %v4358_v63 = vor.u32 %v5395_v48, %v4355_v49  ;;  %v3801_v12 = vld [vmem:[%s5727_s25 + $0x130] sm:$0xf] }
 0x13c   : > { %3194 = vmatpush.bf16.msrb.mxu2 %v4526_v44  ;;  %3137 = vmatmul.bf16.vlgmr.msra.gmra.mxu1 %v6256_v61  ;;  %v5360_v61 = vld [vmem:[%s5727_s25 + $0x474] sm:$0xf]  ;;  %v5283_v44 = vld [vmem:[%s5727_s25 + $0x20c] sm:$0xf]  ;;  %v4887_v49 = vld [vmem:[%s5727_s25 + $0x9cc] sm:$0xf0] }
 0x13d   : > { %3181 = vmatpush.bf16.msrb.mxu1 %v4302_v46  ;;  %3163 = vmatmul.bf16.vlgmr.msra.gmra.mxu3 %v6191_v22  ;;  %v4218_v18 = vor.u32 %v5360_v61, %v4215_v21  ;;  %v4663_v22 = vld [vmem:[%s5727_s25 + $0x80c] sm:$0xf0]  ;;  %v4638_v46 = vor.u32 %v5465_v2, %v4635_v33  ;;  %v3910_v54 = vor.u32 %v5283_v44, %v3907_v45  ;;  %v5273_v61 = vld [vmem:[%s5727_s25 + $0x1b8] sm:$0xf0]  ;;  %v5535_v33 = vld [vmem:[%s5727_s25 + $0x9ec] sm:$0xf] }
 0x13e   : > { %3207 = vmatpush.bf16.msrb.mxu3 %v4750_v55  ;;  %v4666_v24 = vor.u32 %v5472_v13, %v4663_v22  ;;  %v5276_v55 = vld [vmem:[%s5727_s25 + $0x1d4] sm:$0xf]  ;;  %v3858_v26 = vor.u32 %v5273_v61, %v3857_v11  ;;  %v4053_v44 = vld [vmem:[%s5727_s25 + $0x328] sm:$0xf]  ;;  %v5322_v45 = vld [vmem:[%s5727_s25 + $0x340] sm:$0xf0]  ;;  %v4918_v35 = vor.u32 %v5535_v33, %v4915_v34 }
 0x13f   : > { %3169 = vmatpush.bf16.msrb.mxu0 %v4050_v51  ;;  %v6452_v51 = vpop.f32.mrf.mxu2  ;;  %v2919_v41 = vpop.f32.mrf.mxu0  ;;  %v5444_v13 = vld [vmem:[%s5727_s25 + $0x714] sm:$0xf]  ;;  %v4054_v53 = vor.u32 %v5322_v45, %v4053_v44  ;;  %v5245_v11 = vld [vmem:[%s5727_s25 + $0xd8] sm:$0xf0]  ;;  %v5507_v29 = vld [vmem:[%s5727_s25 + $0x90c] sm:$0xf] }
 0x140   : > { %3195 = vmatpush.bf16.msrb.mxu2 %v4498_v56  ;;  %v3879_v56 = vld [vmem:[%s5727_s25 + $0x1ec] sm:$0xf0]  ;;  %v6458_v57 = vpop.f32.mrf.mxu3  ;;  %v5528_v48 = vld [vmem:[%s5727_s25 + $0x9b4] sm:$0xf]  ;;  %v3941_v34 = vld [vmem:[%s5727_s25 + $0x248] sm:$0xf] }
 0x141   : > { %3182 = vmatpush.bf16.msrb.mxu1 %v4274_v58  ;;  %v5549_v58 = vld [vmem:[%s5727_s25 + $0xa5c] sm:$0xf]  ;;  %v3882_v9 = vor.u32 %v5276_v55, %v3879_v56  ;;  %v5584_v55 = vld [vmem:[%s5727_s25 + $0xb74] sm:$0xf] }
 0x142   : > { %3208 = vmatpush.bf16.msrb.mxu3 %v4722_v32  ;;  %v2932_v32 = vpop.f32.mrf.mxu1  ;;  %v4974_v21 = vor.u32 %v5549_v58, %v4971_v59  ;;  %v4025_v58 = vld [vmem:[%s5727_s25 + $0x2f0] sm:$0xf]  ;;  %v5315_v59 = vld [vmem:[%s5727_s25 + $0x308] sm:$0xf0]  ;;  %v5252_v41 = vld [vmem:[%s5727_s25 + $0x110] sm:$0xf0] }
 0x143   : > { %3170 = vmatpush.bf16.msrb.mxu0 %v4022_v1  ;;  %v4103_v1 = vld [vmem:[%s5727_s25 + $0x3ac] sm:$0xf0]  ;;  %v4026_v4 = vor.u32 %v5315_v59, %v4025_v58  ;;  %v5500_v45 = vld [vmem:[%s5727_s25 + $0x8d4] sm:$0xf]  ;;  %v5287_v59 = vld [vmem:[%s5727_s25 + $0x228] sm:$0xf0] }
 0x144   : > { %3196 = vmatpush.bf16.msrb.mxu2 %v4470_v14  ;;  %v5605_v14 = vld [vmem:[%s5727_s25 + $0xc1c] sm:$0xf]  ;;  %v4106_v16 = vor.u32 %v5332_v60, %v4103_v1  ;;  %v5111_v60 = vld [vmem:[%s5727_s25 + $0xb8c] sm:$0xf0] }
 0x145   : > { %3183 = vmatpush.bf16.msrb.mxu1 %v4246_v7  ;;  %v4327_v7 = vld [vmem:[%s5727_s25 + $0x56c] sm:$0xf0]  ;;  %v5198_v19 = vor.u32 %v5605_v14, %v5195_v10  ;;  %v5521_v1 = vld [vmem:[%s5727_s25 + $0x97c] sm:$0xf]  ;;  %v5114_v32 = vor.u32 %v5584_v55, %v5111_v60  ;;  %v3745_v10 = vld [vmem:[%s5727_s25 + $0xc0] sm:$0xf] }
 0x146   : > { %3209 = vmatpush.bf16.msrb.mxu3 %v4694_v40  ;;  %v4943_v40 = vld [vmem:[%s5727_s25 + $0xa3c] sm:$0xf0]  ;;  %v5577_v14 = vld [vmem:[%s5727_s25 + $0xb3c] sm:$0xf]  ;;  %v4862_v61 = vor.u32 %v5521_v1, %v4859_v3  ;;  %v3913_v58 = vld [vmem:[%s5727_s25 + $0x210] sm:$0xf] }
 0x147   : > { %3171 = vmatpush.bf16.msrb.mxu0 %v3994_v15  ;;  %v5542_v15 = vld [vmem:[%s5727_s25 + $0xa24] sm:$0xf]  ;;  %v2945_v22 = vpop.f32.mrf.mxu2  ;;  %v4999_v60 = vld [vmem:[%s5727_s25 + $0xaac] sm:$0xf0]  ;;  %v4753_v1 = vld [vmem:[%s5727_s25 + $0x8a0] sm:$0xf] }
 0x148   : > { %3197 = vmatpush.bf16.msrb.mxu2 %v4442_v17  ;;  %v4330_v17 = vor.u32 %v5388_v6, %v4327_v7  ;;  %v4946_v2 = vor.u32 %v5542_v15, %v4943_v40  ;;  %v5308_v7 = vld [vmem:[%s5727_s25 + $0x2d0] sm:$0xf0]  ;;  %v5514_v15 = vld [vmem:[%s5727_s25 + $0x944] sm:$0xf]  ;;  %v3969_v22 = vld [vmem:[%s5727_s25 + $0x280] sm:$0xf] }
 0x149   : > { %3184 = vmatpush.bf16.msrb.mxu1 %v4218_v18  ;;  %v4551_v18 = vld [vmem:[%s5727_s25 + $0x72c] sm:$0xf0]  ;;  %v5497_v3 = vld [vmem:[%s5727_s25 + $0x8b8] sm:$0xf0] }
 0x14a   : > { %3210 = vmatpush.bf16.msrb.mxu3 %v4666_v24  ;;  %v5266_v24 = vld [vmem:[%s5727_s25 + $0x180] sm:$0xf0] }
 0x14b   : > { %3172 = vmatpush.bf16.msrb.mxu0 %v3966_v28  ;;  %v5329_v28 = vld [vmem:[%s5727_s25 + $0x378] sm:$0xf0] }
 0x14c   : > { %3198 = vmatpush.bf16.msrb.mxu2 %v4414_v31  ;;  %v2958_v31 = vpop.f32.mrf.mxu3  ;;  %v4082_v37 = vor.u32 %v5329_v28, %v4081_v27  ;;  %v5238_v27 = vld [vmem:[%s5727_s25 + $0xa0] sm:$0xf0] }
 0x14d   : > { %3185 = vmatpush.bf16.msrb.mxu1 %v4190_v5  ;;  %v4554_v5 = vor.u32 %v5444_v13, %v4551_v18  ;;  %v3746_v13 = vor.u32 %v5245_v11, %v3745_v10 }
 0x14e   : > { %3211 = vmatpush.bf16.msrb.mxu3 %v4638_v46  ;;  %v5139_v46 = vld [vmem:[%s5727_s25 + $0xbc4] sm:$0xf0] }
 0x14f   : > { %3173 = vmatpush.bf16.msrb.mxu0 %v3938_v43  ;;  %v3830_v43 = vor.u32 %v5266_v24, %v3829_v30  ;;  %v4803_v30 = vld [vmem:[%s5727_s25 + $0x924] sm:$0xf0] }
 0x150   : > { %3199 = vmatpush.bf16.msrb.mxu2 %v4386_v47  ;;  %v6488_v47 = vld.sshfl [vmem:[#allocation1 + $0x8] sm:$0xff pattern:$0x73625140]  ;;  %v4806_v44 = vor.u32 %v5507_v29, %v4803_v30 }
 0x151   : > { %3186 = vmatpush.bf16.msrb.mxu1 %v4162_v36  ;;  %v5259_v36 = vld [vmem:[%s5727_s25 + $0x148] sm:$0xf0] }
 0x152   : > { %3212 = vmatpush.bf16.msrb.mxu3 %v4610_v62  ;;  %v3802_v56 = vor.u32 %v5259_v36, %v3801_v12  ;;  %v6502_v62 = vld.sshfl [vmem:[#allocation1 + $0x18] sm:$0xff pattern:$0x73625140]  ;;  %v4775_v12 = vld [vmem:[%s5727_s25 + $0x8ec] sm:$0xf0] }
 0x153   : > { %3174 = vmatpush.bf16.msrb.mxu0 %v3910_v54  ;;  %v5142_v54 = vor.u32 %v5591_v38, %v5139_v46  ;;  %v3689_v38 = vld [vmem:[%s5727_s25 + $0x50] sm:$0xf]  ;;  %v4305_v36 = vld [vmem:[%s5727_s25 + $0x520] sm:$0xf]  ;;  %v5371_v29 = vld [vmem:[%s5727_s25 + $0x4c8] sm:$0xf0] }
 0x154   : > { %3200 = vmatpush.bf16.msrb.mxu2 %v4358_v63  ;;  %v3773_v63 = vld [vmem:[%s5727_s25 + $0xf8] sm:$0xf] }
 0x155   : > { %3187 = vmatpush.bf16.msrb.mxu1 %v4134_v0  ;;  %v4890_v0 = vor.u32 %v5528_v48, %v4887_v49  ;;  %v3774_v6 = vor.u32 %v5252_v41, %v3773_v63  ;;  %v3661_v63 = vld [vmem:[%s5727_s25 + $0x18] sm:$0xf]  ;;  %v5224_v41 = vld [vmem:[%s5727_s25 + $0x30] sm:$0xf0] }
 0x156   : > { %3213 = vmatpush.bf16.msrb.mxu3 %v4582_v23  ;;  %v4831_v23 = vld [vmem:[%s5727_s25 + $0x95c] sm:$0xf0]  ;;  %v3662_v11 = vor.u32 %v5224_v41, %v3661_v63 }
 0x157   : > { %3175 = vmatpush.bf16.msrb.mxu0 %v3882_v9  ;;  %v5083_v9 = vld [vmem:[%s5727_s25 + $0xb54] sm:$0xf0]  ;;  %v4834_v28 = vor.u32 %v5514_v15, %v4831_v23  ;;  %v5280_v23 = vld [vmem:[%s5727_s25 + $0x1f0] sm:$0xf0] }
 0x158   : > { %3201 = vmatpush.bf16.msrb.mxu2 %v4330_v17  ;;  %v5086_v40 = vor.u32 %v5577_v14, %v5083_v9  ;;  %v5570_v17 = vld [vmem:[%s5727_s25 + $0xb04] sm:$0xf]  ;;  %v4529_v14 = vld [vmem:[%s5727_s25 + $0x6e0] sm:$0xf]  ;;  %v3885_v15 = vld [vmem:[%s5727_s25 + $0x1d8] sm:$0xf] }
 0x159   : > { %3188 = vmatpush.bf16.msrb.mxu1 %v4106_v16  ;;  %v6521_v18 = vpop.f32.mrf.mxu1  ;;  %v5058_v31 = vor.u32 %v5570_v17, %v5055_v25  ;;  %v5378_v9 = vld [vmem:[%s5727_s25 + $0x500] sm:$0xf0]  ;;  %v5553_v17 = vld [vmem:[%s5727_s25 + $0xa78] sm:$0xf0]  ;;  %v3886_v30 = vor.u32 %v5280_v23, %v3885_v15 }
 0x15a   : > { %3176 = vmatmul.bf16.vlgmr.msrb.gmra.mxu0 %v6488_v47  ;;  %3214 = vmatpush.bf16.msrb.mxu3 %v4554_v5  ;;  %v5350_v15 = vld [vmem:[%s5727_s25 + $0x420] sm:$0xf0] }
 0x15b   : > { %3220 = vmatpush.bf16.msra.mxu0 %v4974_v21  ;;  %3202 = vmatmul.bf16.vlgmr.msrb.gmra.mxu2 %v6502_v62  ;;  %v6516_v21 = vpop.f32.mrf.mxu0 }
 0x15c   : > { %3246 = vmatpush.bf16.msra.mxu2 %v3858_v26  ;;  %3189 = vmatmul.bf16.vlgmr.msrb.gmra.mxu1 %v6495_v52  ;;  %v3717_v26 = vld [vmem:[%s5727_s25 + $0x88] sm:$0xf] }
 0x15d   : > { %3233 = vmatpush.bf16.msra.mxu1 %v5198_v19  ;;  %3215 = vmatmul.bf16.vlgmr.msrb.gmra.mxu3 %v6267_v8  ;;  %v3997_v8 = vld [vmem:[%s5727_s25 + $0x2b8] sm:$0xf]  ;;  %v5301_v19 = vld [vmem:[%s5727_s25 + $0x298] sm:$0xf0]  ;;  %v3718_v33 = vor.u32 %v5238_v27, %v3717_v26  ;;  %v4501_v26 = vld [vmem:[%s5727_s25 + $0x6a8] sm:$0xf] }
 0x15e   : > { %3259 = vmatpush.bf16.msra.mxu3 %v4082_v37  ;;  %v3998_v16 = vor.u32 %v5308_v7, %v3997_v8  ;;  %v3970_v24 = vor.u32 %v5301_v19, %v3969_v22  ;;  %v6531_v5 = vpop.f32.mrf.mxu2  ;;  %v5294_v37 = vld [vmem:[%s5727_s25 + $0x260] sm:$0xf0]  ;;  %v4277_v7 = vld [vmem:[%s5727_s25 + $0x4e8] sm:$0xf] }
 0x15f   : > { %3221 = vmatpush.bf16.msra.mxu0 %v4946_v2  ;;  %v5563_v2 = vld [vmem:[%s5727_s25 + $0xacc] sm:$0xf]  ;;  %v3942_v48 = vor.u32 %v5294_v37, %v3941_v34  ;;  %v4725_v22 = vld [vmem:[%s5727_s25 + $0x868] sm:$0xf]  ;;  %v5490_v19 = vld [vmem:[%s5727_s25 + $0x880] sm:$0xf0]  ;;  %v4278_v25 = vor.u32 %v5378_v9, %v4277_v7 }
 0x160   : > { %3247 = vmatpush.bf16.msra.mxu2 %v3830_v43  ;;  %v5231_v43 = vld [vmem:[%s5727_s25 + $0x68] sm:$0xf0]  ;;  %v6539_v46 = vpop.f32.mrf.mxu3  ;;  %v5434_v27 = vld [vmem:[%s5727_s25 + $0x6c0] sm:$0xf0]  ;;  %v4417_v7 = vld [vmem:[%s5727_s25 + $0x600] sm:$0xf] }
 0x161   : > { %3234 = vmatpush.bf16.msra.mxu1 %v5170_v42  ;;  %v5027_v42 = vld [vmem:[%s5727_s25 + $0xae4] sm:$0xf0]  ;;  %v3690_v55 = vor.u32 %v5231_v43, %v3689_v38  ;;  %v5546_v34 = vld [vmem:[%s5727_s25 + $0xa40] sm:$0xf0]  ;;  %v4502_v37 = vor.u32 %v5434_v27, %v4501_v26  ;;  %v5483_v38 = vld [vmem:[%s5727_s25 + $0x848] sm:$0xf0] }
 0x162   : > { %3260 = vmatpush.bf16.msra.mxu3 %v4054_v53  ;;  %v5030_v53 = vor.u32 %v5563_v2, %v5027_v42  ;;  %v4726_v2 = vor.u32 %v5490_v19, %v4725_v22  ;;  %v4697_v42 = vld [vmem:[%s5727_s25 + $0x830] sm:$0xf]  ;;  %v5413_v9 = vld [vmem:[%s5727_s25 + $0x618] sm:$0xf0]  ;;  %v4389_v27 = vld [vmem:[%s5727_s25 + $0x5c8] sm:$0xf] }
 0x163   : > { %3222 = vmatpush.bf16.msra.mxu0 %v4918_v35  ;;  %v5385_v35 = vld [vmem:[%s5727_s25 + $0x538] sm:$0xf0]  ;;  %v2971_v49 = vpop.f32.mrf.mxu0  ;;  %v6573_v43 = vld.sshfl [vmem:[#allocation1 + $0x30] sm:$0xff pattern:$0x73625140]  ;;  %v4418_v19 = vor.u32 %v5413_v9, %v4417_v7 }
 0x164   : > { %3248 = vmatpush.bf16.msra.mxu2 %v3802_v56  ;;  %v2984_v56 = vpop.f32.mrf.mxu1  ;;  %v5364_v49 = vld [vmem:[%s5727_s25 + $0x490] sm:$0xf0]  ;;  %v5525_v22 = vld [vmem:[%s5727_s25 + $0x998] sm:$0xf0] }
 0x165   : > { %3235 = vmatpush.bf16.msra.mxu1 %v5142_v54  ;;  %v5556_v54 = vld [vmem:[%s5727_s25 + $0xa94] sm:$0xf]  ;;  %v4921_v56 = vld [vmem:[%s5727_s25 + $0x9f0] sm:$0xf] }
 0x166   : > { %3261 = vmatpush.bf16.msra.mxu3 %v4026_v4  ;;  %v4306_v4 = vor.u32 %v5385_v35, %v4305_v36  ;;  %v5002_v8 = vor.u32 %v5556_v54, %v4999_v60  ;;  %v2997_v10 = vpop.f32.mrf.mxu2  ;;  %v2918_v36 = vadd.f32 %v6437_v50, %v6394_v20  ;;  %v2996_v35 = vadd.f32 %v6531_v5, %v6521_v18  ;;  %v5539_v20 = vld [vmem:[%s5727_s25 + $0xa08] sm:$0xf0]  ;;  %v5476_v18 = vld [vmem:[%s5727_s25 + $0x810] sm:$0xf0] }
 0x167   : > { %3223 = vmatpush.bf16.msra.mxu0 %v4890_v0  ;;  %v4778_v0 = vor.u32 %v5500_v45, %v4775_v12  ;;  %v4473_v45 = vld [vmem:[%s5727_s25 + $0x670] sm:$0xf]  ;;  %v5427_v12 = vld [vmem:[%s5727_s25 + $0x688] sm:$0xf0]  ;;  %v5420_v60 = vld [vmem:[%s5727_s25 + $0x650] sm:$0xf0] }
 0x168   : > { %3249 = vmatpush.bf16.msra.mxu2 %v3774_v6  ;;  %v5441_v6 = vld [vmem:[%s5727_s25 + $0x6f8] sm:$0xf0]  ;;  %v4474_v50 = vor.u32 %v5427_v12, %v4473_v45  ;;  %v2931_v63 = vadd.f32 %v6442_v39, %v2918_v36  ;;  %v3009_v41 = vadd.f32 %v6539_v46, %v2996_v35  ;;  %v5455_v12 = vld [vmem:[%s5727_s25 + $0x768] sm:$0xf0] }
 0x169   : > { %3236 = vmatpush.bf16.msra.mxu1 %v5114_v32  ;;  %v3914_v32 = vor.u32 %v5287_v59, %v3913_v58  ;;  %v4669_v58 = vld [vmem:[%s5727_s25 + $0x7f8] sm:$0xf] }
 0x16a   : > { %3262 = vmatpush.bf16.msra.mxu3 %v3998_v16  ;;  %v4977_v16 = vld [vmem:[%s5727_s25 + $0xa60] sm:$0xf]  ;;  %v4445_v59 = vld [vmem:[%s5727_s25 + $0x638] sm:$0xf]  ;;  %v2944_v10 = vadd.f32 %v6452_v51, %v2931_v63  ;;  %v5462_v51 = vld [vmem:[%s5727_s25 + $0x7a0] sm:$0xf0] }
 0x16b   : > { %3224 = vmatpush.bf16.msra.mxu0 %v4862_v61  ;;  %v4754_v61 = vor.u32 %v5497_v3, %v4753_v1  ;;  %v5357_v1 = vld [vmem:[%s5727_s25 + $0x458] sm:$0xf0]  ;;  %v4922_v3 = vor.u32 %v5539_v20, %v4921_v56  ;;  %v5201_v56 = vld [vmem:[%s5727_s25 + $0xc20] sm:$0xf] }
 0x16c   : > { %3250 = vmatpush.bf16.msra.mxu2 %v3746_v13  ;;  %v4530_v13 = vor.u32 %v5441_v6, %v4529_v14  ;;  %v5532_v14 = vld [vmem:[%s5727_s25 + $0x9d0] sm:$0xf0]  ;;  %v4446_v6 = vor.u32 %v5420_v60, %v4445_v59  ;;  %v4809_v60 = vld [vmem:[%s5727_s25 + $0x910] sm:$0xf] }
 0x16d   : > { %3237 = vmatpush.bf16.msra.mxu1 %v5086_v40  ;;  %v3010_v40 = vpop.f32.mrf.mxu3 }
 0x16e   : > { %3263 = vmatpush.bf16.msra.mxu3 %v3970_v24  ;;  %v6566_v24 = vld.sshfl [vmem:[#allocation1 + $0x28] sm:$0xff pattern:$0x73625140] }
 0x16f   : > { %3225 = vmatpush.bf16.msra.mxu0 %v4834_v28  ;;  %v4249_v28 = vld [vmem:[%s5727_s25 + $0x4b0] sm:$0xf] }
 0x170   : > { %3251 = vmatpush.bf16.msra.mxu2 %v3718_v33  ;;  %v4949_v33 = vld [vmem:[%s5727_s25 + $0xa28] sm:$0xf] }
 0x171   : > { %3238 = vmatpush.bf16.msra.mxu1 %v5058_v31  ;;  %v4978_v31 = vor.u32 %v5553_v17, %v4977_v16  ;;  %v4950_v54 = vor.u32 %v5546_v34, %v4949_v33  ;;  %v4865_v17 = vld [vmem:[%s5727_s25 + $0x980] sm:$0xf] }
 0x172   : > { %3264 = vmatpush.bf16.msra.mxu3 %v3942_v48  ;;  %v4221_v48 = vld [vmem:[%s5727_s25 + $0x478] sm:$0xf]  ;;  %v4866_v34 = vor.u32 %v5525_v22, %v4865_v17  ;;  %v5650_v22 = vld.sshfl [vmem:[#allocation1 + $0x20] sm:$0xff pattern:$0x73625140] }
 0x173   : > { %3226 = vmatpush.bf16.msra.mxu0 %v4806_v44  ;;  %v4250_v44 = vor.u32 %v5371_v29, %v4249_v28  ;;  %v4222_v5 = vor.u32 %v5364_v49, %v4221_v48  ;;  %v5406_v28 = vld [vmem:[%s5727_s25 + $0x5e0] sm:$0xf0]  ;;  %v2957_v29 = vadd.f32 %v6458_v57, %v2944_v10  ;;  %v4585_v57 = vld [vmem:[%s5727_s25 + $0x750] sm:$0xf]  ;;  %v4781_v10 = vld [vmem:[%s5727_s25 + $0x8d8] sm:$0xf] }
 0x174   : > { %3252 = vmatpush.bf16.msra.mxu2 %v3690_v55  ;;  %v4698_v55 = vor.u32 %v5483_v38, %v4697_v42  ;;  %v4837_v42 = vld [vmem:[%s5727_s25 + $0x948] sm:$0xf]  ;;  %v4390_v45 = vor.u32 %v5406_v28, %v4389_v27  ;;  %v4361_v49 = vld [vmem:[%s5727_s25 + $0x590] sm:$0xf]  ;;  %v4586_v59 = vor.u32 %v5455_v12, %v4585_v57 }
 0x175   : > { %3239 = vmatpush.bf16.msra.mxu1 %v5030_v53  ;;  %v5649_v53 = vld.sshfl [vmem:[#allocation1] sm:$0xff pattern:$0x73625140]  ;;  %v2970_v20 = vadd.f32 %v6516_v21, %v2957_v29  ;;  %v5061_v28 = vld [vmem:[%s5727_s25 + $0xb08] sm:$0xf] }
 0x176   : > { %3265 = vmatpush.bf16.msra.mxu3 %v3914_v32  ;;  %v4893_v32 = vld [vmem:[%s5727_s25 + $0x9b8] sm:$0xf]  ;;  %v5574_v29 = vld [vmem:[%s5727_s25 + $0xb20] sm:$0xf0] }
 0x177   : > { %3227 = vmatpush.bf16.msra.mxu0 %v4778_v0  ;;  %v4193_v0 = vld [vmem:[%s5727_s25 + $0x440] sm:$0xf]  ;;  %v3021_v39 = vpop.f32.mrf.mxu0  ;;  %v4894_v16 = vor.u32 %v5532_v14, %v4893_v32  ;;  %v4333_v32 = vld [vmem:[%s5727_s25 + $0x558] sm:$0xf]  ;;  %v5392_v14 = vld [vmem:[%s5727_s25 + $0x570] sm:$0xf0] }
 0x178   : > { %3253 = vmatpush.bf16.msra.mxu2 %v3662_v11  ;;  %v4194_v46 = vor.u32 %v5357_v1, %v4193_v0  ;;  %v3022_v11 = vadd.f32 %v3021_v39, %v3009_v41  ;;  %v5511_v41 = vld [vmem:[%s5727_s25 + $0x928] sm:$0xf0]  ;;  %v4557_v1 = vld [vmem:[%s5727_s25 + $0x718] sm:$0xf]  ;;  %v5173_v39 = vld [vmem:[%s5727_s25 + $0xbe8] sm:$0xf] }
 0x179   : > { %3240 = vmatpush.bf16.msra.mxu1 %v5002_v8  ;;  %v4641_v8 = vld [vmem:[%s5727_s25 + $0x7c0] sm:$0xf]  ;;  %v3034_v23 = vpop.f32.mrf.mxu1  ;;  %v4810_v7 = vor.u32 %v5511_v41, %v4809_v60 }
 0x17a   : > { %3228 = vmatmul.bf16.vlgmr.msra.gmra.mxu0 %v6566_v24  ;;  %3266 = vmatpush.bf16.msra.mxu3 %v3886_v30 }
 0x17b   : > { %3272 = vmatpush.bf16.msrb.mxu0 %v4306_v4  ;;  %3254 = vmatmul.bf16.vlgmr.msra.gmra.mxu2 %v5649_v53  ;;  %v4670_v4 = vor.u32 %v5476_v18, %v4669_v58  ;;  %v5399_v53 = vld [vmem:[%s5727_s25 + $0x5a8] sm:$0xf0]  ;;  %v5609_v18 = vld [vmem:[%s5727_s25 + $0xc38] sm:$0xf0] }
 0x17c   : > { %3298 = vmatpush.bf16.msrb.mxu2 %v4754_v61  ;;  %3241 = vmatmul.bf16.vlgmr.msra.gmra.mxu1 %v6573_v43  ;;  %v4165_v61 = vld [vmem:[%s5727_s25 + $0x408] sm:$0xf]  ;;  %v4362_v0 = vor.u32 %v5399_v53, %v4361_v49 }
 0x17d   : > { %3285 = vmatpush.bf16.msrb.mxu1 %v4530_v13  ;;  %3267 = vmatmul.bf16.vlgmr.msra.gmra.mxu3 %v6488_v47  ;;  %v5469_v47 = vld [vmem:[%s5727_s25 + $0x7d8] sm:$0xf0]  ;;  %v3035_v13 = vadd.f32 %v3034_v23, %v3022_v11  ;;  %v4166_v26 = vor.u32 %v5350_v15, %v4165_v61  ;;  %v5504_v11 = vld [vmem:[%s5727_s25 + $0x8f0] sm:$0xf0]  ;;  %v4334_v61 = vor.u32 %v5392_v14, %v4333_v32 }
 0x17e   : > { %3311 = vmatpush.bf16.msrb.mxu3 %v4978_v31  ;;  %v4642_v40 = vor.u32 %v5469_v47, %v4641_v8  ;;  %v3047_v30 = vpop.f32.mrf.mxu2  ;;  %v4137_v31 = vld [vmem:[%s5727_s25 + $0x3d0] sm:$0xf]  ;;  %v5202_v8 = vor.u32 %v5609_v18, %v5201_v56  ;;  %v4782_v17 = vor.u32 %v5504_v11, %v4781_v10 }
 0x17f   : > { %3273 = vmatpush.bf16.msrb.mxu0 %v4278_v25  ;;  %v4613_v25 = vld [vmem:[%s5727_s25 + $0x788] sm:$0xf]  ;;  %v3048_v33 = vadd.f32 %v3047_v30, %v3035_v13  ;;  %v3023_v48 = vpop.f32.mrf.mxu0 }
 0x180   : > { %3299 = vmatpush.bf16.msrb.mxu2 %v4726_v2  ;;  %v5343_v2 = vld [vmem:[%s5727_s25 + $0x3e8] sm:$0xf0]  ;;  %v3060_v38 = vpop.f32.mrf.mxu3 }
 0x181   : > { %3286 = vmatpush.bf16.msrb.mxu1 %v4502_v37  ;;  %v4614_v37 = vor.u32 %v5462_v51, %v4613_v25  ;;  %v3061_v36 = vadd.f32 %v3060_v38, %v3048_v33  ;;  %v4138_v35 = vor.u32 %v5343_v2, %v4137_v31  ;;  %v3036_v63 = vpop.f32.mrf.mxu1  ;;  %v5588_v25 = vld [vmem:[%s5727_s25 + $0xb90] sm:$0xf0]  ;;  %v5062_v33 = vor.u32 %v5574_v29, %v5061_v28 }
 0x182   : > { %3312 = vmatpush.bf16.msrb.mxu3 %v4950_v54  ;;  %v4109_v54 = vld [vmem:[%s5727_s25 + $0x398] sm:$0xf] }
 0x183   : > { %3274 = vmatpush.bf16.msrb.mxu0 %v4250_v44  ;;  %v5518_v44 = vld [vmem:[%s5727_s25 + $0x960] sm:$0xf0]  ;;  %v3344_v58 = vrot.slane %v3061_v36, 4 }
 0x184   : > { %3300 = vmatpush.bf16.msrb.mxu2 %v4698_v55  ;;  %v5336_v55 = vld [vmem:[%s5727_s25 + $0x3b0] sm:$0xf0] }
 0x185   : > { %3287 = vmatpush.bf16.msrb.mxu1 %v4474_v50  ;;  %v212_v50 = vld [vmem:[#allocation2 + $0x8] sm:$0xff]  ;;  %v3348_v21 = vsel %vm3346_vm1, %v2970_v20, %v3344_v58 }
 0x186   : > { %3313 = vmatpush.bf16.msrb.mxu3 %v4922_v3  ;;  %v5448_v3 = vld [vmem:[%s5727_s25 + $0x730] sm:$0xf0]  ;;  %v3049_v47 = vpop.f32.mrf.mxu2 }
 0x187   : > { %3275 = vmatpush.bf16.msrb.mxu0 %v4222_v5  ;;  %v4838_v5 = vor.u32 %v5518_v44, %v4837_v42  ;;  %v4558_v9 = vor.u32 %v5448_v3, %v4557_v1  ;;  %v5560_v44 = vld [vmem:[%s5727_s25 + $0xab0] sm:$0xf0] }
 0x188   : > { %3301 = vmatpush.bf16.msrb.mxu2 %v4670_v4  ;;  %v4110_v4 = vor.u32 %v5336_v55, %v4109_v54  ;;  %v3062_v15 = vpop.f32.mrf.mxu3 }
 0x189   : > { %3288 = vmatpush.bf16.msrb.mxu1 %v4446_v6  ;;  %v3354_v6 = vadd.f32 %v3348_v21, %v212_v50 }
 0x18a   : > { %3314 = vmatpush.bf16.msrb.mxu3 %v4894_v16  ;;  %v5145_v16 = vld [vmem:[%s5727_s25 + $0xbb0] sm:$0xf] }
 0x18b   : > { %3276 = vmatpush.bf16.msrb.mxu0 %v4194_v46  ;;  %v5602_v46 = vld [vmem:[%s5727_s25 + $0xc00] sm:$0xf0]  ;;  %3358 = vst [vmem:[#allocation2 + $0x8] sm:$0xff] %v3354_v6 }
 0x18c   : > { %3302 = vmatpush.bf16.msrb.mxu2 %v4642_v40  ;;  %v5174_v23 = vor.u32 %v5602_v46, %v5173_v39  ;;  %v5595_v40 = vld [vmem:[%s5727_s25 + $0xbc8] sm:$0xf0] }
 0x18d   : > { %3289 = vmatpush.bf16.msrb.mxu1 %v4418_v19  ;;  %v5146_v13 = vor.u32 %v5595_v40, %v5145_v16  ;;  %v5117_v19 = vld [vmem:[%s5727_s25 + $0xb78] sm:$0xf] }
 0x18e   : > { %3315 = vmatpush.bf16.msrb.mxu3 %v4866_v34  ;;  %v5118_v51 = vor.u32 %v5588_v25, %v5117_v19  ;;  %v5033_v34 = vld [vmem:[%s5727_s25 + $0xad0] sm:$0xf] }
 0x18f   : > { %3277 = vmatpush.bf16.msrb.mxu0 %v4166_v26  ;;  %v5089_v26 = vld [vmem:[%s5727_s25 + $0xb40] sm:$0xf] }
 0x190   : > { %3303 = vmatpush.bf16.msrb.mxu2 %v4614_v37 }
 0x191   : > { %3290 = vmatpush.bf16.msrb.mxu1 %v4390_v45 }
 0x192   : > { %3316 = vmatpush.bf16.msrb.mxu3 %v4838_v5 }
 0x193   : > { %3278 = vmatpush.bf16.msrb.mxu0 %v4138_v35 }
 0x194   : > { %3304 = vmatpush.bf16.msrb.mxu2 %v4586_v59 }
 0x195   : > { %3291 = vmatpush.bf16.msrb.mxu1 %v4362_v0 }
 0x196   : > { %3317 = vmatpush.bf16.msrb.mxu3 %v4810_v7 }
 0x197   : > { %3279 = vmatpush.bf16.msrb.mxu0 %v4110_v4  ;;  %v3073_v31 = vpop.f32.mrf.mxu0 }
 0x198   : > { %3305 = vmatpush.bf16.msrb.mxu2 %v4558_v9  ;;  %v213_v9 = vld [vmem:[#allocation2 + $0x10] sm:$0xff] }
 0x199   : > { %3292 = vmatpush.bf16.msrb.mxu1 %v4334_v61  ;;  %v3086_v30 = vpop.f32.mrf.mxu1 }
 0x19a   : > { %3280 = vmatmul.bf16.vlgmr.msrb.gmra.mxu0 %v6495_v52  ;;  %3318 = vmatpush.bf16.msrb.mxu3 %v4782_v17  ;;  %v5581_v52 = vld [vmem:[%s5727_s25 + $0xb58] sm:$0xf0]  ;;  %v3087_v2 = vadd.f32 %v3086_v30, %v3073_v31 }
 0x19b   : > { %3324 = vmatpush.bf16.msra.mxu0 %v5202_v8  ;;  %3306 = vmatmul.bf16.vlgmr.msrb.gmra.mxu2 %v5650_v22  ;;  %v5090_v27 = vor.u32 %v5581_v52, %v5089_v26 }
 0x19c   : > { %3293 = vmatmul.bf16.vlgmr.msrb.gmra.mxu1 %v6502_v62  ;;  %v5567_v62 = vld [vmem:[%s5727_s25 + $0xae8] sm:$0xf0] }
 0x19d   : > { %3319 = vmatmul.bf16.vlgmr.msrb.gmra.mxu3 %v6566_v24  ;;  %v5034_v38 = vor.u32 %v5567_v62, %v5033_v34  ;;  %v5005_v24 = vld [vmem:[%s5727_s25 + $0xa98] sm:$0xf]  ;;  %v214_v34 = vld [vmem:[#allocation2 + $0x18] sm:$0xf] }
 0x19e   : > { %v3099_v37 = vpop.f32.mrf.mxu2  ;;  %v5006_v35 = vor.u32 %v5560_v44, %v5005_v24 }
 0x19f   : > { %3325 = vmatpush.bf16.msra.mxu0 %v5174_v23  ;;  %v3100_v42 = vadd.f32 %v3099_v37, %v3087_v2  ;;  %v3075_v12 = vpop.f32.mrf.mxu0 }
 0x1a0   : > { %v3112_v57 = vpop.f32.mrf.mxu3 }
 0x1a1   : > { %v3088_v45 = vpop.f32.mrf.mxu1  ;;  %v3113_v36 = vadd.f32 %v3112_v57, %v3100_v42 }
 0x1a3   : > { %3326 = vmatpush.bf16.msra.mxu0 %v5146_v13 }
 0x1a6   : > { %v3101_v48 = vpop.f32.mrf.mxu2 }
 0x1a7   : > { %3327 = vmatpush.bf16.msra.mxu0 %v5118_v51 }
 0x1a8   : > { %v3114_v49 = vpop.f32.mrf.mxu3 }
 0x1ab   : > { %3328 = vmatpush.bf16.msra.mxu0 %v5090_v27 }
 0x1af   : > { %3329 = vmatpush.bf16.msra.mxu0 %v5062_v33 }
 0x1b3   : > { %3330 = vmatpush.bf16.msra.mxu0 %v5034_v38 }
 0x1b7   : > { %3331 = vmatpush.bf16.msra.mxu0 %v5006_v35  ;;  %v3125_v53 = vpop.f32.mrf.mxu0 }
 0x1b9   : > { %v3138_v54 = vpop.f32.mrf.mxu1 }
 0x1ba   : > { %3332 = vmatmul.bf16.vlgmr.msra.gmra.mxu0 %v6573_v43  ;;  %v3126_v43 = vadd.f32 %v3125_v53, %v3113_v36 }
 0x1bc   : > { %v3139_v8 = vadd.f32 %v3138_v54, %v3126_v43 }
 0x1be   : > { %v3151_v55 = vpop.f32.mrf.mxu2 }
 0x1bf   : > { %v3127_v56 = vpop.f32.mrf.mxu0  ;;  %v3152_v7 = vadd.f32 %v3151_v55, %v3139_v8 }
 0x1c0   : > { %v3164_v50 = vpop.f32.mrf.mxu3 }
 0x1c1   : > { %v3140_v20 = vpop.f32.mrf.mxu1 }
 0x1c6   : > { %v3153_v58 = vpop.f32.mrf.mxu2 }
 0x1c8   : > { %v3166_v18 = vpop.f32.mrf.mxu3 }
 0x1d7   : > { %v3177_v5 = vpop.f32.mrf.mxu0 }
 0x1d8   : > { %v3178_v1 = vadd.f32 %v3177_v5, %v3164_v50 }
 0x1d9   : > { %v3190_v59 = vpop.f32.mrf.mxu1 }
 0x1da   : > { %v3191_v3 = vadd.f32 %v3190_v59, %v3178_v1 }
 0x1de   : > { %v3203_v41 = vpop.f32.mrf.mxu2 }
 0x1df   : > { %v3179_v60 = vpop.f32.mrf.mxu0  ;;  %v3204_v32 = vadd.f32 %v3203_v41, %v3191_v3 }
 0x1e0   : > { %v3216_v0 = vpop.f32.mrf.mxu3 }
 0x1e1   : > { %v3192_v63 = vpop.f32.mrf.mxu1  ;;  %v3217_v14 = vadd.f32 %v3216_v0, %v3204_v32 }
 0x1e6   : > { %v3205_v21 = vpop.f32.mrf.mxu2 }
 0x1e8   : > { %v3218_v4 = vpop.f32.mrf.mxu3 }
 0x1f7   : > { %v3229_v6 = vpop.f32.mrf.mxu0 }
 0x1f8   : > { %v3230_v47 = vadd.f32 %v3229_v6, %v3217_v14 }
 0x1f9   : > { %v3242_v39 = vpop.f32.mrf.mxu1 }
 0x1fa   : > { %v3243_v46 = vadd.f32 %v3242_v39, %v3230_v47 }
 0x1fc   : > { %v3345_v10 = vrot.slane %v3243_v46, 4 }
 0x1fe   : > { %v3349_v11 = vsel %vm3346_vm1, %v3152_v7, %v3345_v10  ;;  %v3255_v23 = vpop.f32.mrf.mxu2 }
 0x1ff   : > { %v3355_v61 = vadd.f32 %v3349_v11, %v213_v9  ;;  %v3231_v15 = vpop.f32.mrf.mxu0 }
 0x200   : > { %v3268_v40 = vpop.f32.mrf.mxu3 }
 0x201   : > { %3359 = vst [vmem:[#allocation2 + $0x10] sm:$0xff] %v3355_v61  ;;  %v3244_v16 = vpop.f32.mrf.mxu1  ;;  %v3269_v52 = vadd.f32 %v3268_v40, %v3255_v23 }
 0x206   : > { %v3257_v17 = vpop.f32.mrf.mxu2 }
 0x208   : > { %v3270_v13 = vpop.f32.mrf.mxu3 }
 0x217   : > { %v3281_v22 = vpop.f32.mrf.mxu0 }
 0x218   : > { %v3282_v28 = vadd.f32 %v3281_v22, %v3269_v52 }
 0x219   : > { %v3294_v19 = vpop.f32.mrf.mxu1 }
 0x21a   : > { %v3295_v30 = vadd.f32 %v3294_v19, %v3282_v28 }
 0x21e   : > { %v3307_v51 = vpop.f32.mrf.mxu2 }
 0x21f   : > { %v3283_v25 = vpop.f32.mrf.mxu0  ;;  %v3308_v2 = vadd.f32 %v3307_v51, %v3295_v30 }
 0x220   : > { %v3320_v27 = vpop.f32.mrf.mxu3 }
 0x221   : > { %v3296_v26 = vpop.f32.mrf.mxu1  ;;  %v3321_v33 = vadd.f32 %v3320_v27, %v3308_v2 }
 0x226   : > { %v3309_v29 = vpop.f32.mrf.mxu2 }
 0x228   : > { %v3322_v31 = vpop.f32.mrf.mxu3 }
 0x237   : > { %v3333_v62 = vpop.f32.mrf.mxu0 }
 0x238   : > { %v3334_v37 = vadd.f32 %v3333_v62, %v3321_v33 }
 0x23a   : > { %v3356_v42 = vadd.f32 %v3334_v37, %v214_v34 }
 0x23b   : > { %3365 = sbr.rel (%p5203_p7) target bundleno = 617 (0x269), region = 40 }
 0x23c   : > { %3361 = vst.msk [vmem:[#allocation2 + $0x18] sm:$0xf] %vm3360_vm2, %v3356_v42 }
 0x23f   : > { %v3335_v38 = vpop.f32.mrf.mxu0 }
 0x240   : > { %v3370_v24 = vld [vmem:[%s6698_s2] sm:$0x7f]  ;;  %v3366_v53 = vld [vmem:[#allocation2] sm:$0xff]  ;;  %v3367_v55 = vld [vmem:[#allocation2 + $0x8] sm:$0xff]  ;;  %v5676_v0 = vmov 0.0   ;;  %vm3448_vm7 = vcmask 1041408  }
 0x241   : > { %v3372_v44 = vperm.slane %v3370_v24, 0  ;;  %v3373_v45 = vperm.slane %v3370_v24, 1  ;;  %v3374_v57 = vperm.slane %v3370_v24, 2  ;;  %v3375_v12 = vperm.slane %v3370_v24, 3  ;;  %v3368_v20 = vld [vmem:[#allocation2 + $0x10] sm:$0xff] }
 0x242   : > { %v3376_v36 = vperm.slane %v3370_v24, 4  ;;  %v3377_v35 = vperm.slane %v3370_v24, 5  ;;  %v3378_v49 = vperm.slane %v3370_v24, 6  ;;  %vm3452_vm8 = vcmask 1045508  }
 0x243   : > { %v3369_v48 = vld [vmem:[#allocation2 + $0x18] sm:$0xf]  ;;  %v3380_v54 = vrot.slane %v3373_v45, 4  ;;  %v3381_v56 = vrot.slane %v3375_v12, 4  ;;  %vm3467_vm9 = vcmask 1040384   ;;  %vm3468_vm10 = vcmask 1042434  }
 0x244   : > { %v3382_v50 = vrot.slane %v3377_v35, 4  ;;  %v3392_v58 = vadd.f32 %v3378_v49, %v3369_v48  ;;  %vm3470_vm11 = vcmask 258052   ;;  %vm3469_vm0 = vmor %vm3468_vm10, %vm3467_vm9 }
 0x245   : > { %v3383_v18 = vsel %vm3346_vm1, %v3372_v44, %v3380_v54  ;;  %v3384_v5 = vsel %vm3346_vm1, %v3374_v57, %v3381_v56  ;;  %vm3471_vm2 = vmor %vm3470_vm11, %vm3469_vm0 }
 0x246   : > { %v3389_v59 = vadd.f32 %v3383_v18, %v3366_v53  ;;  %v3390_v60 = vadd.f32 %v3384_v5, %v3367_v55  ;;  %v3385_v63 = vsel %vm3346_vm1, %v3376_v36, %v3382_v50  ;;  %vm3400_vm3 = vcmp.ge.f32.partialorder %v3392_v58, 1.0 }
 0x247   : > { %v3391_v41 = vadd.f32 %v3385_v63, %v3368_v20  ;;  %v5207_v1 = vsel %vm3400_vm3, 1.0, %v5676_v0  ;;  %v5211_v32 = vrot.slane %v3392_v58, 10  ;;  %vm3577_vm3 = vcmask 1041409  }
 0x248   : > { %vm3397_vm4 = vcmp.ge.f32.partialorder %v3389_v59, 1.0  ;;  %vm3398_vm5 = vcmp.ge.f32.partialorder %v3390_v60, 1.0  ;;  %3419 = vst [vmem:[#allocation1 + $0x30] ss:$2 sm:$0xff] %v5207_v1  ;;  %v3476_v3 = vsub.f32 1.0, %v5207_v1  ;;  %v5208_v39 = vrot.slane %v3389_v59, 10 }
 0x249   : > { %v5204_v21 = vsel %vm3397_vm4, 1.0, %v5676_v0  ;;  %v5205_v4 = vsel %vm3398_vm5, 1.0, %v5676_v0  ;;  %vm3399_vm6 = vcmp.ge.f32.partialorder %v3391_v41, 1.0  ;;  %v5209_v10 = vrot.slane %v3390_v60, 10 }
 0x24a   : > { %3413 = vst [vmem:[#allocation1] ss:$2 sm:$0xff] %v5204_v21  ;;  %v3473_v43 = vsub.f32 1.0, %v5204_v21  ;;  %v3474_v14 = vsub.f32 1.0, %v5205_v4  ;;  %v5206_v6 = vsel %vm3399_vm6, 1.0, %v5676_v0  ;;  %v3480_v8 = vmul.f32 %v3476_v3, %v3392_v58 }
 0x24b   : > { %3415 = vst [vmem:[#allocation1 + $0x10] ss:$2 sm:$0xff] %v5205_v4  ;;  %v3475_v47 = vsub.f32 1.0, %v5206_v6  ;;  %v5210_v61 = vrot.slane %v3391_v41, 10  ;;  %vm3578_vm4 = vcmask 1043459   ;;  %vm3580_vm6 = vcmask 259077  }
 0x24c   : > { %v3477_v46 = vmul.f32 %v3473_v43, %v3389_v59  ;;  %v3478_v7 = vmul.f32 %v3474_v14, %v3390_v60  ;;  %3417 = vst [vmem:[#allocation1 + $0x20] ss:$2 sm:$0xff] %v5206_v6  ;;  %v3484_v9 = vmul.f32 0.5, %v3480_v8  ;;  %vm3579_vm5 = vmor %vm3578_vm4, %vm3577_vm3 }
 0x24d   : > { %v3479_v11 = vmul.f32 %v3475_v47, %v3391_v41  ;;  %vm3581_vm9 = vmor %vm3580_vm6, %vm3579_vm5 }
 0x24e   : > { %v3481_v15 = vmul.f32 0.5, %v3477_v46  ;;  %v3482_v23 = vmul.f32 0.5, %v3478_v7  ;;  %v3504_v16 = vadd.f32 %v5211_v32, %v3484_v9 }
 0x24f   : > { %v3483_v40 = vmul.f32 0.5, %v3479_v11  ;;  %v3426_v17 = vld.sshfl [vmem:[#allocation1 + $0x30] sm:$0xff pattern:$0x75316420] }
 0x250   : > { %v3501_v13 = vadd.f32 %v5208_v39, %v3481_v15  ;;  %v3502_v22 = vadd.f32 %v5209_v10, %v3482_v23  ;;  %v3437_v19 = vpack.c.bf16 %v3426_v17, %v3426_v17  ;;  %vm3508_vm12 = vcmp.ge.f32.partialorder %v3504_v16, 1.0 }
 0x251   : > { %v3420_v25 = vld.sshfl [vmem:[#allocation1] sm:$0xff pattern:$0x75316420]  ;;  %v3421_v51 = vld.sshfl [vmem:[#allocation1 + $0x8] sm:$0xff pattern:$0x75316420]  ;;  %v3503_v26 = vadd.f32 %v5210_v61, %v3483_v40 }
 0x252   : > { %v3434_v52 = vpack.c.bf16 %v3421_v51, %v3420_v25  ;;  %vm3505_vm13 = vcmp.ge.f32.partialorder %v3501_v13, 1.0  ;;  %v3422_v27 = vld.sshfl [vmem:[#allocation1 + $0x10] sm:$0xff pattern:$0x75316420]  ;;  %vm3506_vm14 = vcmp.ge.f32.partialorder %v3502_v22, 1.0  ;;  %v3446_v28 = vrot.slane %v3437_v19, 4 }
 0x253   : > { %v5212_v29 = vsel %vm3505_vm13, 1.0, %v5676_v0  ;;  %v3423_v30 = vld.sshfl [vmem:[#allocation1 + $0x18] sm:$0xff pattern:$0x75316420]  ;;  %v5213_v31 = vsel %vm3506_vm14, 1.0, %v5676_v0  ;;  %vm3507_vm15 = vcmp.ge.f32.partialorder %v3503_v26, 1.0 }
 0x254   : > { %3521 = vst [vmem:[#allocation1] ss:$2 sm:$0xff] %v5212_v29  ;;  %v3435_v2 = vpack.c.bf16 %v3423_v30, %v3422_v27  ;;  %v3424_v33 = vld.sshfl [vmem:[#allocation1 + $0x20] sm:$0xff pattern:$0x75316420]  ;;  %v5214_v34 = vsel %vm3507_vm15, 1.0, %v5676_v0 }
 0x255   : > { %3523 = vst [vmem:[#allocation1 + $0x10] ss:$2 sm:$0xff] %v5213_v31  ;;  %v3425_v62 = vld.sshfl [vmem:[#allocation1 + $0x28] sm:$0xff pattern:$0x75316420]  ;;  %v3447_v37 = vrot.slane %v3437_v19, 6 }
 0x256   : > { %v3436_v42 = vpack.c.bf16 %v3425_v62, %v3424_v33  ;;  %3525 = vst [vmem:[#allocation1 + $0x20] ss:$2 sm:$0xff] %v5214_v34  ;;  %v5215_v38 = vsel %vm3508_vm12, 1.0, %v5676_v0  ;;  %v3442_v24 = vrot.slane %v3434_v52, 2  ;;  %v3443_v44 = vrot.slane %v3435_v2, 4 }
 0x257   : > { %3527 = vst [vmem:[#allocation1 + $0x30] ss:$2 sm:$0xff] %v5215_v38  ;;  %v3444_v45 = vrot.slane %v3435_v2, 6  ;;  %v3462_v36 = vsel %vm3452_vm8, %v3446_v28, %v3447_v37 }
 0x258   : > { %v3451_v57 = vsel %vm3448_vm7, %v3434_v52, %v3442_v24  ;;  %v3445_v12 = vrot.slane %v3436_v42, 2 }
 0x259   : > { %v3455_v35 = vsel %vm3452_vm8, %v3443_v44, %v3444_v45 }
 0x25a   : > { %v3456_v48 = vsel %vm3346_vm1, %v3451_v57, %v3455_v35  ;;  %v3459_v49 = vsel %vm3448_vm7, %v3436_v42, %v3445_v12 }
 0x25b   : > { %3466 = vst [vmem:[%s6699_s3] sm:$0x55] %v3456_v48  ;;  %v3463_v53 = vsel %vm3346_vm1, %v3459_v49, %v3462_v36  ;;  %v3528_v54 = vld.sshfl [vmem:[#allocation1] sm:$0xff pattern:$0x75316420] }
 0x25c   : > { %3472 = vst.msk [vmem:[%s6699_s3 + $0x8] sm:$0x15] %vm3471_vm2, %v3463_v53  ;;  %v3529_v55 = vld.sshfl [vmem:[#allocation1 + $0x8] sm:$0xff pattern:$0x75316420] }
 0x25d   : > { %v3530_v56 = vld.sshfl [vmem:[#allocation1 + $0x10] sm:$0xff pattern:$0x75316420]  ;;  %v3531_v20 = vld.sshfl [vmem:[#allocation1 + $0x18] sm:$0xff pattern:$0x75316420]  ;;  %v3542_v50 = vpack.c.bf16 %v3529_v55, %v3528_v54 }
 0x25e   : > { %v3543_v58 = vpack.c.bf16 %v3531_v20, %v3530_v56  ;;  %v3532_v18 = vld.sshfl [vmem:[#allocation1 + $0x20] sm:$0xff pattern:$0x75316420]  ;;  %v3533_v5 = vld.sshfl [vmem:[#allocation1 + $0x28] sm:$0xff pattern:$0x75316420] }
 0x25f   : > { %v3550_v59 = vrot.slane %v3542_v50, 2  ;;  %v3534_v60 = vld.sshfl [vmem:[#allocation1 + $0x30] sm:$0xff pattern:$0x75316420]  ;;  %v3544_v63 = vpack.c.bf16 %v3533_v5, %v3532_v18 }
 0x260   : > { %v3551_v41 = vrot.slane %v3543_v58, 4  ;;  %v3552_v0 = vrot.slane %v3543_v58, 6  ;;  %v3545_v1 = vpack.c.bf16 %v3534_v60, %v3534_v60 }
 0x261   : > { %v3558_v3 = vsel %vm3448_vm7, %v3542_v50, %v3550_v59  ;;  %v3553_v21 = vrot.slane %v3544_v63, 2 }
 0x262   : > { %v3561_v4 = vsel %vm3452_vm8, %v3551_v41, %v3552_v0  ;;  %v3554_v32 = vrot.slane %v3545_v1, 4  ;;  %v3555_v43 = vrot.slane %v3545_v1, 6 }
 0x263   : > { %v3562_v14 = vsel %vm3346_vm1, %v3558_v3, %v3561_v4  ;;  %v3566_v6 = vsel %vm3448_vm7, %v3544_v63, %v3553_v21 }
 0x264   : > { %v3572_v8 = vrot.slane %v3562_v14, 7  ;;  %v3569_v47 = vsel %vm3452_vm8, %v3554_v32, %v3555_v43 }
 0x265   : > { %v3570_v39 = vsel %vm3346_vm1, %v3566_v6, %v3569_v47 }
 0x266   : > { %3576 = vst [vmem:[%s6699_s3] sm:$0xaa] %v3572_v8  ;;  %v3573_v46 = vrot.slane %v3570_v39, 7 }
 0x268   : > { %3582 = vst.msk [vmem:[%s6699_s3 + $0x8] sm:$0x2a] %vm3581_vm9, %v3573_v46 }
 0x269 PF: > { %s13_s14 = sadd.s32 1, %s5673_s14   ;;  %s6700_s12 = smov %s5669_s13 }
 0x26a   : > { %p10_p8 = scmp.ge.s32.totalorder %s13_s14, 9   ;;  %s6701_s13 = smov %s6703_s15 }
 0x26c   :  { %12 = sbr.rel (!%p10_p8) target bundleno = 2 (0x2), region = 76 }

</bundles_post_ra>
